<compile_context>
chip_gen: v7x
topology: tpu7x:2x2x1
jax: 0.10.0
libtpu: 0.0.40
codegen_flags: <defaults>
</compile_context>

<pallas_src>
import numpy as np
import jax
import jax.numpy as jnp
from jax.experimental import pallas as pl
from jax.experimental.pallas import tpu as pltpu

BN_EPS = 1e-5

# ---------------------------------------------------------------------------
# Fixed problem configuration (Linear(128,4) forces 32x32 inputs).
# ---------------------------------------------------------------------------
N = 2
C_IN = 3
H_IN = W_IN = 32
H1 = W1 = (H_IN - 5) // 2 + 1      # 14
H2 = W2 = (H1 - 5) // 2 + 1        # 5
H3 = W3 = (H2 - 3) // 2 + 1        # 2
M1 = N * H1 * W1                   # 392 rows after conv1
M2 = N * H2 * W2                   # 50  rows after conv2
M3 = N * H3 * W3                   # 8   rows after conv3
BLK2 = 56                          # M2 padded to a multiple of 8 -> aligned row blocks
BLK3 = 8                           # == M3 (already aligned)


# ---------------------------------------------------------------------------
# In-kernel helpers (plain traced JAX on VMEM-resident values)
# ---------------------------------------------------------------------------
def _bias_bn_relu(y, bn, m_rows):
    """conv-bias + training-mode BatchNorm (single-pass batch stats) + ReLU.

    y:  [M, C] raw conv output.  bn: [3, C] rows = (conv bias, BN gamma, BN beta).
    (The conv bias cancels mathematically under BN; kept for fidelity.)
    """
    y = y + bn[0:1, :]
    inv_m = 1.0 / m_rows
    s1 = jnp.sum(y, axis=0, keepdims=True)
    s2 = jnp.sum(y * y, axis=0, keepdims=True)
    mean = s1 * inv_m
    var = jnp.maximum(s2 * inv_m - mean * mean, 0.0)        # biased variance
    scale = bn[1:2, :] * jax.lax.rsqrt(var + BN_EPS)        # EUP rsqrt
    shift = bn[2:3, :] - mean * scale
    return jnp.maximum(y * scale + shift, 0.0)


def _gathered_conv(y_prev, g_ref, w_ref, n_off, cin, cout, blk):
    """Strided conv on a VMEM-resident [M_prev, Cin] activation.

    For each kernel offset t: patches_t = G_t @ y_prev (constant 0/1 selection,
    MXU) and out += patches_t @ W_t.  Row blocks are padded to `blk` (multiple
    of 8) so all slices are sublane-aligned.
    """
    acc = jnp.zeros((blk, cout), dtype=jnp.float32)
    for t in range(n_off):
        sel = g_ref[t * blk:(t + 1) * blk, :].astype(jnp.float32)     # 0/1, exact
        patch_t = jnp.dot(sel, y_prev, preferred_element_type=jnp.float32)   # [blk, cin]
        acc = acc + jnp.dot(patch_t, w_ref[t * cin:(t + 1) * cin, :],
                            preferred_element_type=jnp.float32)              # [blk, cout]
    return acc


# ---------------------------------------------------------------------------
# The single fused kernel
# ---------------------------------------------------------------------------
def net_kernel(p1_ref, w1_ref, bn1_ref,
               g2_ref, w2_ref, bn2_ref,
               g3_ref, w3_ref, bn3_ref,
               sh_ref, wh_ref, bh_ref, o_ref):
    # conv1 (im2col patches of the raw input) + bn1 + relu          -> [392, 16]
    y1 = jnp.dot(p1_ref[...], w1_ref[...], preferred_element_type=jnp.float32)
    y1 = _bias_bn_relu(y1, bn1_ref[...], float(M1))

    # conv2 + bn2 + relu (on-chip patch gather via selection matmuls) -> [50, 32]
    y2 = _gathered_conv(y1, g2_ref, w2_ref, n_off=25, cin=16, cout=32, blk=BLK2)
    y2 = _bias_bn_relu(y2[:M2, :], bn2_ref[...], float(M2))

    # conv3 + bn3 + relu                                             -> [8, 32]
    y3 = _gathered_conv(y2, g3_ref, w3_ref, n_off=9, cin=32, cout=32, blk=BLK3)
    y3 = _bias_bn_relu(y3, bn3_ref[...], float(M3))

    # head: PyTorch NCHW flatten (c,h,w order) is folded into the pre-permuted
    # head weights; spatial-position row selection via a tiny constant matmul.
    acc = jnp.zeros((8, 4), dtype=jnp.float32)
    for r in range(4):                                   # r = h*2 + w
        sel = jnp.dot(sh_ref[r * 8:(r + 1) * 8, :], y3,
                      preferred_element_type=jnp.float32)             # [8, 32]
        acc = acc + jnp.dot(sel, wh_ref[r * 32:(r + 1) * 32, :],
                            preferred_element_type=jnp.float32)       # [8, 4]
    o_ref[...] = acc[:N, :] + bh_ref[...]


# ---------------------------------------------------------------------------
# Host-side wrapper
# ---------------------------------------------------------------------------
def _vmem():
    return pl.BlockSpec(memory_space=pltpu.MemorySpace.VMEM)


def im2col_input(x_nhwc, k, stride):
    """Layer-1 patch extraction on the raw input (tiny XLA prologue).
    Rows ordered (n, ho, wo); columns ordered (di, dj, c)."""
    n, h, w, c = x_nhwc.shape
    ho = (h - k) // stride + 1
    wo = (w - k) // stride + 1
    cols = []
    for di in range(k):
        for dj in range(k):
            cols.append(x_nhwc[:, di:di + stride * ho:stride,
                               dj:dj + stride * wo:stride, :])
    patches = jnp.concatenate(cols, axis=-1)             # [N, Ho, Wo, k*k*C]
    return patches.reshape(n * ho * wo, k * k * c)


@jax.jit
def net_forward(x_nchw, params):
    assert x_nchw.shape == (N, C_IN, H_IN, W_IN)
    x = jnp.transpose(x_nchw, (0, 2, 3, 1))              # NCHW -> NHWC (12 KB, one-time)
    p1 = im2col_input(x, 5, 2)                           # [392, 75]
    return pl.pallas_call(
        net_kernel,
        out_shape=jax.ShapeDtypeStruct((N, 4), jnp.float32),
        in_specs=[_vmem()] * 12,
        out_specs=_vmem(),
    )(p1,
      params["w1f"], params["bn1"],
      params["g2cat"], params["w2s"], params["bn2"],
      params["g3cat"], params["w3s"], params["bn3"],
      params["shead"], params["whs"], params["bh"])


# ---------------------------------------------------------------------------
# One-time constant / weight layout (hoisted out of the forward pass)
# ---------------------------------------------------------------------------
def _build_gather(n, h_in, w_in, k, stride, blk):
    """0/1 selection matrix [k*k*blk, n*h_in*w_in]: block t=(di,dj) maps output
    row (nn,ho,wo) -> input row (nn, s*ho+di, s*wo+dj); padded rows stay zero."""
    h_out = (h_in - k) // stride + 1
    w_out = (w_in - k) // stride + 1
    g = np.zeros((k * k * blk, n * h_in * w_in), np.float32)
    for di in range(k):
        for dj in range(k):
            t = di * k + dj
            for nn in range(n):
                for ho in range(h_out):
                    for wo in range(w_out):
                        r_out = (nn * h_out + ho) * w_out + wo
                        r_in = (nn * h_in + (stride * ho + di)) * w_in + (stride * wo + dj)
                        g[t * blk + r_out, r_in] = 1.0
    return g


def pack_params(raw):
    """Re-layout PyTorch-style parameters once, at init."""
    def flat_conv_w(w):          # [Cout, Cin, kh, kw] -> [kh*kw*Cin, Cout]
        co, ci, kh, kw = w.shape
        return jnp.transpose(w, (2, 3, 1, 0)).reshape(kh * kw * ci, co)

    def bn_bundle(b, g, beta):   # rows: conv bias, BN gamma, BN beta
        return jnp.stack([b, g, beta], axis=0)

    # Head: PyTorch flattens NCHW (feature index = c*4 + h*2 + w).  Permute the
    # weight rows once so the kernel consumes y3's (spatial-pos, channel) order.
    wh = raw["wh"]                                                     # [128, 4]
    whs = wh.reshape(32, 4, 4).transpose(1, 0, 2).reshape(128, 4)      # rows = (r, c)

    shead = np.zeros((4 * 8, M3), np.float32)   # block r selects y3 rows {r, 4+r}
    for r in range(4):
        for nn in range(N):
            shead[r * 8 + nn, nn * 4 + r] = 1.0

    return {
        "w1f": flat_conv_w(raw["w1"]),
        "bn1": bn_bundle(raw["b1"], raw["g1"], raw["beta1"]),
        "w2s": flat_conv_w(raw["w2"]),
        "bn2": bn_bundle(raw["b2"], raw["g2"], raw["beta2"]),
        "w3s": flat_conv_w(raw["w3"]),
        "bn3": bn_bundle(raw["b3"], raw["g3"], raw["beta3"]),
        # 0/1 matrices are exact in bf16; halves their HBM read, upcast in-kernel.
        "g2cat": jnp.asarray(_build_gather(N, H1, W1, 5, 2, BLK2), dtype=jnp.bfloat16),
        "g3cat": jnp.asarray(_build_gather(N, H2, W2, 3, 2, BLK3), dtype=jnp.bfloat16),
        "shead": jnp.asarray(shead),
        "whs": whs,
        "bh": raw["bh"],
    }


def init_params(key):
    ks = jax.random.split(key, 14)

    def nrm(k, shape, scale=0.1):
        return scale * jax.random.normal(k, shape, dtype=jnp.float32)

    raw = {
        # PyTorch layouts: conv weight [Cout, Cin, kh, kw], Linear weight as [in, out].
        "w1": nrm(ks[0], (16, 3, 5, 5)),   "b1": nrm(ks[1], (16,)),
        "g1": 1.0 + nrm(ks[2], (16,), 0.05), "beta1": nrm(ks[3], (16,), 0.05),
        "w2": nrm(ks[4], (32, 16, 5, 5)),  "b2": nrm(ks[5], (32,)),
        "g2": 1.0 + nrm(ks[6], (32,), 0.05), "beta2": nrm(ks[7], (32,), 0.05),
        "w3": nrm(ks[8], (32, 32, 3, 3)),  "b3": nrm(ks[9], (32,)),
        "g3": 1.0 + nrm(ks[10], (32,), 0.05), "beta3": nrm(ks[11], (32,), 0.05),
        "wh": nrm(ks[12], (128, 4)),
        "bh": nrm(ks[13], (1, 4)),
    }
    return pack_params(raw)


if __name__ == "__main__":
    key = jax.random.PRNGKey(0)
    k_x, k_p = jax.random.split(key)

    # NCHW input, 32x32 spatial -> final feature map 32*2*2 = 128 = Linear in-features.
    x = jax.random.normal(k_x, (N, C_IN, H_IN, W_IN), dtype=jnp.float32)
    params = init_params(k_p)

    out = net_forward(x, params)
    out = jax.block_until_ready(out)
    assert out.shape == (N, 4), out.shape
    print("KERNEL_OK")
</pallas_src>

<mosaic_0001>
module attributes {stable_mosaic.version = 11 : i64} {
  func.func @net_kernel(%arg0: memref<392x75xf32, #tpu.memory_space<vmem>>, %arg1: memref<75x16xf32, #tpu.memory_space<vmem>>, %arg2: memref<3x16xf32, #tpu.memory_space<vmem>>, %arg3: memref<1400x392xbf16, #tpu.memory_space<vmem>>, %arg4: memref<400x32xf32, #tpu.memory_space<vmem>>, %arg5: memref<3x32xf32, #tpu.memory_space<vmem>>, %arg6: memref<72x50xbf16, #tpu.memory_space<vmem>>, %arg7: memref<288x32xf32, #tpu.memory_space<vmem>>, %arg8: memref<3x32xf32, #tpu.memory_space<vmem>>, %arg9: memref<32x8xf32, #tpu.memory_space<vmem>>, %arg10: memref<128x4xf32, #tpu.memory_space<vmem>>, %arg11: memref<1x4xf32, #tpu.memory_space<vmem>>, %arg12: memref<2x4xf32, #tpu.memory_space<vmem>>) attributes {dimension_semantics = [], scalar_prefetch = 0 : i64, scratch_operands = 0 : i64, tpu.core_type = #tpu.core_type<tc>} {
    %c0 = arith.constant 0 : index
    %c0_0 = arith.constant 0 : index
    %0 = vector.load %arg0[%c0, %c0_0] : memref<392x75xf32, #tpu.memory_space<vmem>>, vector<392x75xf32>
    %c0_1 = arith.constant 0 : index
    %c0_2 = arith.constant 0 : index
    %1 = vector.load %arg1[%c0_1, %c0_2] : memref<75x16xf32, #tpu.memory_space<vmem>>, vector<75x16xf32>
    %cst = arith.constant dense<0.000000e+00> : vector<392x16xf32>
    %2 = tpu.matmul %0, %1, %cst {dimension_numbers = #tpu.dot_dimension_numbers<[1], [0], [0], [1], [0, 0, 1, 1], [], []>} : vector<392x75xf32>, vector<75x16xf32>, vector<392x16xf32> -> vector<392x16xf32>
    %c0_3 = arith.constant 0 : index
    %c0_4 = arith.constant 0 : index
    %3 = vector.load %arg2[%c0_3, %c0_4] : memref<3x16xf32, #tpu.memory_space<vmem>>, vector<3x16xf32>
    %4 = vector.extract_strided_slice %3 {offsets = [0, 0], sizes = [1, 16], strides = [1, 1]} : vector<3x16xf32> to vector<1x16xf32>
    %5 = vector.broadcast %4 : vector<1x16xf32> to vector<392x16xf32>
    %6 = arith.addf %2, %5 : vector<392x16xf32>
    %cst_5 = arith.constant dense<0.000000e+00> : vector<16xf32>
    %7 = vector.multi_reduction <add>, %6, %cst_5 [0] : vector<392x16xf32> to vector<16xf32>
    %8 = vector.shape_cast %7 : vector<16xf32> to vector<1x16xf32>
    %9 = arith.mulf %6, %6 : vector<392x16xf32>
    %cst_6 = arith.constant dense<0.000000e+00> : vector<16xf32>
    %10 = vector.multi_reduction <add>, %9, %cst_6 [0] : vector<392x16xf32> to vector<16xf32>
    %11 = vector.shape_cast %10 : vector<16xf32> to vector<1x16xf32>
    %cst_7 = arith.constant 0.00255102036 : f32
    %12 = vector.broadcast %cst_7 : f32 to vector<1x16xf32>
    %13 = arith.mulf %8, %12 : vector<1x16xf32>
    %cst_8 = arith.constant 0.00255102036 : f32
    %14 = vector.broadcast %cst_8 : f32 to vector<1x16xf32>
    %15 = arith.mulf %11, %14 : vector<1x16xf32>
    %16 = arith.mulf %13, %13 : vector<1x16xf32>
    %17 = arith.subf %15, %16 : vector<1x16xf32>
    %cst_9 = arith.constant 0.000000e+00 : f32
    %18 = vector.broadcast %cst_9 : f32 to vector<1x16xf32>
    %19 = arith.maximumf %17, %18 : vector<1x16xf32>
    %20 = vector.extract_strided_slice %3 {offsets = [1, 0], sizes = [1, 16], strides = [1, 1]} : vector<3x16xf32> to vector<1x16xf32>
    %cst_10 = arith.constant 9.99999974E-6 : f32
    %21 = vector.broadcast %cst_10 : f32 to vector<1x16xf32>
    %22 = arith.addf %19, %21 : vector<1x16xf32>
    %23 = math.rsqrt %22 : vector<1x16xf32>
    %24 = arith.mulf %20, %23 : vector<1x16xf32>
    %25 = vector.extract_strided_slice %3 {offsets = [2, 0], sizes = [1, 16], strides = [1, 1]} : vector<3x16xf32> to vector<1x16xf32>
    %26 = arith.mulf %13, %24 : vector<1x16xf32>
    %27 = arith.subf %25, %26 : vector<1x16xf32>
    %28 = vector.broadcast %24 : vector<1x16xf32> to vector<392x16xf32>
    %29 = arith.mulf %6, %28 : vector<392x16xf32>
    %30 = vector.broadcast %27 : vector<1x16xf32> to vector<392x16xf32>
    %31 = arith.addf %29, %30 : vector<392x16xf32>
    %cst_11 = arith.constant 0.000000e+00 : f32
    %32 = vector.broadcast %cst_11 : f32 to vector<392x16xf32>
    %33 = arith.maximumf %31, %32 : vector<392x16xf32>
    %cst_12 = arith.constant 0.000000e+00 : f32
    %34 = vector.broadcast %cst_12 : f32 to vector<56x32xf32>
    %c0_13 = arith.constant 0 : index
    %c0_14 = arith.constant 0 : index
    %35 = vector.load %arg3[%c0_13, %c0_14] : memref<1400x392xbf16, #tpu.memory_space<vmem>>, vector<56x392xbf16>
    %36 = arith.extf %35 : vector<56x392xbf16> to vector<56x392xf32>
    %cst_15 = arith.constant dense<0.000000e+00> : vector<56x16xf32>
    %37 = tpu.matmul %36, %33, %cst_15 {dimension_numbers = #tpu.dot_dimension_numbers<[1], [0], [0], [1], [0, 0, 1, 1], [], []>} : vector<56x392xf32>, vector<392x16xf32>, vector<56x16xf32> -> vector<56x16xf32>
    %c0_16 = arith.constant 0 : index
    %c0_17 = arith.constant 0 : index
    %38 = vector.load %arg4[%c0_16, %c0_17] : memref<400x32xf32, #tpu.memory_space<vmem>>, vector<16x32xf32>
    %cst_18 = arith.constant dense<0.000000e+00> : vector<56x32xf32>
    %39 = tpu.matmul %37, %38, %cst_18 {dimension_numbers = #tpu.dot_dimension_numbers<[1], [0], [0], [1], [0, 0, 1, 1], [], []>} : vector<56x16xf32>, vector<16x32xf32>, vector<56x32xf32> -> vector<56x32xf32>
    %40 = arith.addf %34, %39 : vector<56x32xf32>
    %c56 = arith.constant 56 : index
    %c0_19 = arith.constant 0 : index
    %41 = vector.load %arg3[%c56, %c0_19] : memref<1400x392xbf16, #tpu.memory_space<vmem>>, vector<56x392xbf16>
    %42 = arith.extf %41 : vector<56x392xbf16> to vector<56x392xf32>
    %cst_20 = arith.constant dense<0.000000e+00> : vector<56x16xf32>
    %43 = tpu.matmul %42, %33, %cst_20 {dimension_numbers = #tpu.dot_dimension_numbers<[1], [0], [0], [1], [0, 0, 1, 1], [], []>} : vector<56x392xf32>, vector<392x16xf32>, vector<56x16xf32> -> vector<56x16xf32>
    %c16 = arith.constant 16 : index
    %c0_21 = arith.constant 0 : index
    %44 = vector.load %arg4[%c16, %c0_21] : memref<400x32xf32, #tpu.memory_space<vmem>>, vector<16x32xf32>
    %cst_22 = arith.constant dense<0.000000e+00> : vector<56x32xf32>
    %45 = tpu.matmul %43, %44, %cst_22 {dimension_numbers = #tpu.dot_dimension_numbers<[1], [0], [0], [1], [0, 0, 1, 1], [], []>} : vector<56x16xf32>, vector<16x32xf32>, vector<56x32xf32> -> vector<56x32xf32>
    %46 = arith.addf %40, %45 : vector<56x32xf32>
    %c112 = arith.constant 112 : index
    %c0_23 = arith.constant 0 : index
    %47 = vector.load %arg3[%c112, %c0_23] : memref<1400x392xbf16, #tpu.memory_space<vmem>>, vector<56x392xbf16>
    %48 = arith.extf %47 : vector<56x392xbf16> to vector<56x392xf32>
    %cst_24 = arith.constant dense<0.000000e+00> : vector<56x16xf32>
    %49 = tpu.matmul %48, %33, %cst_24 {dimension_numbers = #tpu.dot_dimension_numbers<[1], [0], [0], [1], [0, 0, 1, 1], [], []>} : vector<56x392xf32>, vector<392x16xf32>, vector<56x16xf32> -> vector<56x16xf32>
    %c32 = arith.constant 32 : index
    %c0_25 = arith.constant 0 : index
    %50 = vector.load %arg4[%c32, %c0_25] : memref<400x32xf32, #tpu.memory_space<vmem>>, vector<16x32xf32>
    %cst_26 = arith.constant dense<0.000000e+00> : vector<56x32xf32>
    %51 = tpu.matmul %49, %50, %cst_26 {dimension_numbers = #tpu.dot_dimension_numbers<[1], [0], [0], [1], [0, 0, 1, 1], [], []>} : vector<56x16xf32>, vector<16x32xf32>, vector<56x32xf32> -> vector<56x32xf32>
    %52 = arith.addf %46, %51 : vector<56x32xf32>
    %c168 = arith.constant 168 : index
    %c0_27 = arith.constant 0 : index
    %53 = vector.load %arg3[%c168, %c0_27] : memref<1400x392xbf16, #tpu.memory_space<vmem>>, vector<56x392xbf16>
    %54 = arith.extf %53 : vector<56x392xbf16> to vector<56x392xf32>
    %cst_28 = arith.constant dense<0.000000e+00> : vector<56x16xf32>
    %55 = tpu.matmul %54, %33, %cst_28 {dimension_numbers = #tpu.dot_dimension_numbers<[1], [0], [0], [1], [0, 0, 1, 1], [], []>} : vector<56x392xf32>, vector<392x16xf32>, vector<56x16xf32> -> vector<56x16xf32>
    %c48 = arith.constant 48 : index
    %c0_29 = arith.constant 0 : index
    %56 = vector.load %arg4[%c48, %c0_29] : memref<400x32xf32, #tpu.memory_space<vmem>>, vector<16x32xf32>
    %cst_30 = arith.constant dense<0.000000e+00> : vector<56x32xf32>
    %57 = tpu.matmul %55, %56, %cst_30 {dimension_numbers = #tpu.dot_dimension_numbers<[1], [0], [0], [1], [0, 0, 1, 1], [], []>} : vector<56x16xf32>, vector<16x32xf32>, vector<56x32xf32> -> vector<56x32xf32>
    %58 = arith.addf %52, %57 : vector<56x32xf32>
    %c224 = arith.constant 224 : index
    %c0_31 = arith.constant 0 : index
    %59 = vector.load %arg3[%c224, %c0_31] : memref<1400x392xbf16, #tpu.memory_space<vmem>>, vector<56x392xbf16>
    %60 = arith.extf %59 : vector<56x392xbf16> to vector<56x392xf32>
    %cst_32 = arith.constant dense<0.000000e+00> : vector<56x16xf32>
    %61 = tpu.matmul %60, %33, %cst_32 {dimension_numbers = #tpu.dot_dimension_numbers<[1], [0], [0], [1], [0, 0, 1, 1], [], []>} : vector<56x392xf32>, vector<392x16xf32>, vector<56x16xf32> -> vector<56x16xf32>
    %c64 = arith.constant 64 : index
    %c0_33 = arith.constant 0 : index
    %62 = vector.load %arg4[%c64, %c0_33] : memref<400x32xf32, #tpu.memory_space<vmem>>, vector<16x32xf32>
    %cst_34 = arith.constant dense<0.000000e+00> : vector<56x32xf32>
    %63 = tpu.matmul %61, %62, %cst_34 {dimension_numbers = #tpu.dot_dimension_numbers<[1], [0], [0], [1], [0, 0, 1, 1], [], []>} : vector<56x16xf32>, vector<16x32xf32>, vector<56x32xf32> -> vector<56x32xf32>
    %64 = arith.addf %58, %63 : vector<56x32xf32>
    %c280 = arith.constant 280 : index
    %c0_35 = arith.constant 0 : index
    %65 = vector.load %arg3[%c280, %c0_35] : memref<1400x392xbf16, #tpu.memory_space<vmem>>, vector<56x392xbf16>
    %66 = arith.extf %65 : vector<56x392xbf16> to vector<56x392xf32>
    %cst_36 = arith.constant dense<0.000000e+00> : vector<56x16xf32>
    %67 = tpu.matmul %66, %33, %cst_36 {dimension_numbers = #tpu.dot_dimension_numbers<[1], [0], [0], [1], [0, 0, 1, 1], [], []>} : vector<56x392xf32>, vector<392x16xf32>, vector<56x16xf32> -> vector<56x16xf32>
    %c80 = arith.constant 80 : index
    %c0_37 = arith.constant 0 : index
    %68 = vector.load %arg4[%c80, %c0_37] : memref<400x32xf32, #tpu.memory_space<vmem>>, vector<16x32xf32>
    %cst_38 = arith.constant dense<0.000000e+00> : vector<56x32xf32>
    %69 = tpu.matmul %67, %68, %cst_38 {dimension_numbers = #tpu.dot_dimension_numbers<[1], [0], [0], [1], [0, 0, 1, 1], [], []>} : vector<56x16xf32>, vector<16x32xf32>, vector<56x32xf32> -> vector<56x32xf32>
    %70 = arith.addf %64, %69 : vector<56x32xf32>
    %c336 = arith.constant 336 : index
    %c0_39 = arith.constant 0 : index
    %71 = vector.load %arg3[%c336, %c0_39] : memref<1400x392xbf16, #tpu.memory_space<vmem>>, vector<56x392xbf16>
    %72 = arith.extf %71 : vector<56x392xbf16> to vector<56x392xf32>
    %cst_40 = arith.constant dense<0.000000e+00> : vector<56x16xf32>
    %73 = tpu.matmul %72, %33, %cst_40 {dimension_numbers = #tpu.dot_dimension_numbers<[1], [0], [0], [1], [0, 0, 1, 1], [], []>} : vector<56x392xf32>, vector<392x16xf32>, vector<56x16xf32> -> vector<56x16xf32>
    %c96 = arith.constant 96 : index
    %c0_41 = arith.constant 0 : index
    %74 = vector.load %arg4[%c96, %c0_41] : memref<400x32xf32, #tpu.memory_space<vmem>>, vector<16x32xf32>
    %cst_42 = arith.constant dense<0.000000e+00> : vector<56x32xf32>
    %75 = tpu.matmul %73, %74, %cst_42 {dimension_numbers = #tpu.dot_dimension_numbers<[1], [0], [0], [1], [0, 0, 1, 1], [], []>} : vector<56x16xf32>, vector<16x32xf32>, vector<56x32xf32> -> vector<56x32xf32>
    %76 = arith.addf %70, %75 : vector<56x32xf32>
    %c392 = arith.constant 392 : index
    %c0_43 = arith.constant 0 : index
    %77 = vector.load %arg3[%c392, %c0_43] : memref<1400x392xbf16, #tpu.memory_space<vmem>>, vector<56x392xbf16>
    %78 = arith.extf %77 : vector<56x392xbf16> to vector<56x392xf32>
    %cst_44 = arith.constant dense<0.000000e+00> : vector<56x16xf32>
    %79 = tpu.matmul %78, %33, %cst_44 {dimension_numbers = #tpu.dot_dimension_numbers<[1], [0], [0], [1], [0, 0, 1, 1], [], []>} : vector<56x392xf32>, vector<392x16xf32>, vector<56x16xf32> -> vector<56x16xf32>
    %c112_45 = arith.constant 112 : index
    %c0_46 = arith.constant 0 : index
    %80 = vector.load %arg4[%c112_45, %c0_46] : memref<400x32xf32, #tpu.memory_space<vmem>>, vector<16x32xf32>
    %cst_47 = arith.constant dense<0.000000e+00> : vector<56x32xf32>
    %81 = tpu.matmul %79, %80, %cst_47 {dimension_numbers = #tpu.dot_dimension_numbers<[1], [0], [0], [1], [0, 0, 1, 1], [], []>} : vector<56x16xf32>, vector<16x32xf32>, vector<56x32xf32> -> vector<56x32xf32>
    %82 = arith.addf %76, %81 : vector<56x32xf32>
    %c448 = arith.constant 448 : index
    %c0_48 = arith.constant 0 : index
    %83 = vector.load %arg3[%c448, %c0_48] : memref<1400x392xbf16, #tpu.memory_space<vmem>>, vector<56x392xbf16>
    %84 = arith.extf %83 : vector<56x392xbf16> to vector<56x392xf32>
    %cst_49 = arith.constant dense<0.000000e+00> : vector<56x16xf32>
    %85 = tpu.matmul %84, %33, %cst_49 {dimension_numbers = #tpu.dot_dimension_numbers<[1], [0], [0], [1], [0, 0, 1, 1], [], []>} : vector<56x392xf32>, vector<392x16xf32>, vector<56x16xf32> -> vector<56x16xf32>
    %c128 = arith.constant 128 : index
    %c0_50 = arith.constant 0 : index
    %86 = vector.load %arg4[%c128, %c0_50] : memref<400x32xf32, #tpu.memory_space<vmem>>, vector<16x32xf32>
    %cst_51 = arith.constant dense<0.000000e+00> : vector<56x32xf32>
    %87 = tpu.matmul %85, %86, %cst_51 {dimension_numbers = #tpu.dot_dimension_numbers<[1], [0], [0], [1], [0, 0, 1, 1], [], []>} : vector<56x16xf32>, vector<16x32xf32>, vector<56x32xf32> -> vector<56x32xf32>
    %88 = arith.addf %82, %87 : vector<56x32xf32>
    %c504 = arith.constant 504 : index
    %c0_52 = arith.constant 0 : index
    %89 = vector.load %arg3[%c504, %c0_52] : memref<1400x392xbf16, #tpu.memory_space<vmem>>, vector<56x392xbf16>
    %90 = arith.extf %89 : vector<56x392xbf16> to vector<56x392xf32>
    %cst_53 = arith.constant dense<0.000000e+00> : vector<56x16xf32>
    %91 = tpu.matmul %90, %33, %cst_53 {dimension_numbers = #tpu.dot_dimension_numbers<[1], [0], [0], [1], [0, 0, 1, 1], [], []>} : vector<56x392xf32>, vector<392x16xf32>, vector<56x16xf32> -> vector<56x16xf32>
    %c144 = arith.constant 144 : index
    %c0_54 = arith.constant 0 : index
    %92 = vector.load %arg4[%c144, %c0_54] : memref<400x32xf32, #tpu.memory_space<vmem>>, vector<16x32xf32>
    %cst_55 = arith.constant dense<0.000000e+00> : vector<56x32xf32>
    %93 = tpu.matmul %91, %92, %cst_55 {dimension_numbers = #tpu.dot_dimension_numbers<[1], [0], [0], [1], [0, 0, 1, 1], [], []>} : vector<56x16xf32>, vector<16x32xf32>, vector<56x32xf32> -> vector<56x32xf32>
    %94 = arith.addf %88, %93 : vector<56x32xf32>
    %c560 = arith.constant 560 : index
    %c0_56 = arith.constant 0 : index
    %95 = vector.load %arg3[%c560, %c0_56] : memref<1400x392xbf16, #tpu.memory_space<vmem>>, vector<56x392xbf16>
    %96 = arith.extf %95 : vector<56x392xbf16> to vector<56x392xf32>
    %cst_57 = arith.constant dense<0.000000e+00> : vector<56x16xf32>
    %97 = tpu.matmul %96, %33, %cst_57 {dimension_numbers = #tpu.dot_dimension_numbers<[1], [0], [0], [1], [0, 0, 1, 1], [], []>} : vector<56x392xf32>, vector<392x16xf32>, vector<56x16xf32> -> vector<56x16xf32>
    %c160 = arith.constant 160 : index
    %c0_58 = arith.constant 0 : index
    %98 = vector.load %arg4[%c160, %c0_58] : memref<400x32xf32, #tpu.memory_space<vmem>>, vector<16x32xf32>
    %cst_59 = arith.constant dense<0.000000e+00> : vector<56x32xf32>
    %99 = tpu.matmul %97, %98, %cst_59 {dimension_numbers = #tpu.dot_dimension_numbers<[1], [0], [0], [1], [0, 0, 1, 1], [], []>} : vector<56x16xf32>, vector<16x32xf32>, vector<56x32xf32> -> vector<56x32xf32>
    %100 = arith.addf %94, %99 : vector<56x32xf32>
    %c616 = arith.constant 616 : index
    %c0_60 = arith.constant 0 : index
    %101 = vector.load %arg3[%c616, %c0_60] : memref<1400x392xbf16, #tpu.memory_space<vmem>>, vector<56x392xbf16>
    %102 = arith.extf %101 : vector<56x392xbf16> to vector<56x392xf32>
    %cst_61 = arith.constant dense<0.000000e+00> : vector<56x16xf32>
    %103 = tpu.matmul %102, %33, %cst_61 {dimension_numbers = #tpu.dot_dimension_numbers<[1], [0], [0], [1], [0, 0, 1, 1], [], []>} : vector<56x392xf32>, vector<392x16xf32>, vector<56x16xf32> -> vector<56x16xf32>
    %c176 = arith.constant 176 : index
    %c0_62 = arith.constant 0 : index
    %104 = vector.load %arg4[%c176, %c0_62] : memref<400x32xf32, #tpu.memory_space<vmem>>, vector<16x32xf32>
    %cst_63 = arith.constant dense<0.000000e+00> : vector<56x32xf32>
    %105 = tpu.matmul %103, %104, %cst_63 {dimension_numbers = #tpu.dot_dimension_numbers<[1], [0], [0], [1], [0, 0, 1, 1], [], []>} : vector<56x16xf32>, vector<16x32xf32>, vector<56x32xf32> -> vector<56x32xf32>
    %106 = arith.addf %100, %105 : vector<56x32xf32>
    %c672 = arith.constant 672 : index
    %c0_64 = arith.constant 0 : index
    %107 = vector.load %arg3[%c672, %c0_64] : memref<1400x392xbf16, #tpu.memory_space<vmem>>, vector<56x392xbf16>
    %108 = arith.extf %107 : vector<56x392xbf16> to vector<56x392xf32>
    %cst_65 = arith.constant dense<0.000000e+00> : vector<56x16xf32>
    %109 = tpu.matmul %108, %33, %cst_65 {dimension_numbers = #tpu.dot_dimension_numbers<[1], [0], [0], [1], [0, 0, 1, 1], [], []>} : vector<56x392xf32>, vector<392x16xf32>, vector<56x16xf32> -> vector<56x16xf32>
    %c192 = arith.constant 192 : index
    %c0_66 = arith.constant 0 : index
    %110 = vector.load %arg4[%c192, %c0_66] : memref<400x32xf32, #tpu.memory_space<vmem>>, vector<16x32xf32>
    %cst_67 = arith.constant dense<0.000000e+00> : vector<56x32xf32>
    %111 = tpu.matmul %109, %110, %cst_67 {dimension_numbers = #tpu.dot_dimension_numbers<[1], [0], [0], [1], [0, 0, 1, 1], [], []>} : vector<56x16xf32>, vector<16x32xf32>, vector<56x32xf32> -> vector<56x32xf32>
    %112 = arith.addf %106, %111 : vector<56x32xf32>
    %c728 = arith.constant 728 : index
    %c0_68 = arith.constant 0 : index
    %113 = vector.load %arg3[%c728, %c0_68] : memref<1400x392xbf16, #tpu.memory_space<vmem>>, vector<56x392xbf16>
    %114 = arith.extf %113 : vector<56x392xbf16> to vector<56x392xf32>
    %cst_69 = arith.constant dense<0.000000e+00> : vector<56x16xf32>
    %115 = tpu.matmul %114, %33, %cst_69 {dimension_numbers = #tpu.dot_dimension_numbers<[1], [0], [0], [1], [0, 0, 1, 1], [], []>} : vector<56x392xf32>, vector<392x16xf32>, vector<56x16xf32> -> vector<56x16xf32>
    %c208 = arith.constant 208 : index
    %c0_70 = arith.constant 0 : index
    %116 = vector.load %arg4[%c208, %c0_70] : memref<400x32xf32, #tpu.memory_space<vmem>>, vector<16x32xf32>
    %cst_71 = arith.constant dense<0.000000e+00> : vector<56x32xf32>
    %117 = tpu.matmul %115, %116, %cst_71 {dimension_numbers = #tpu.dot_dimension_numbers<[1], [0], [0], [1], [0, 0, 1, 1], [], []>} : vector<56x16xf32>, vector<16x32xf32>, vector<56x32xf32> -> vector<56x32xf32>
    %118 = arith.addf %112, %117 : vector<56x32xf32>
    %c784 = arith.constant 784 : index
    %c0_72 = arith.constant 0 : index
    %119 = vector.load %arg3[%c784, %c0_72] : memref<1400x392xbf16, #tpu.memory_space<vmem>>, vector<56x392xbf16>
    %120 = arith.extf %119 : vector<56x392xbf16> to vector<56x392xf32>
    %cst_73 = arith.constant dense<0.000000e+00> : vector<56x16xf32>
    %121 = tpu.matmul %120, %33, %cst_73 {dimension_numbers = #tpu.dot_dimension_numbers<[1], [0], [0], [1], [0, 0, 1, 1], [], []>} : vector<56x392xf32>, vector<392x16xf32>, vector<56x16xf32> -> vector<56x16xf32>
    %c224_74 = arith.constant 224 : index
    %c0_75 = arith.constant 0 : index
    %122 = vector.load %arg4[%c224_74, %c0_75] : memref<400x32xf32, #tpu.memory_space<vmem>>, vector<16x32xf32>
    %cst_76 = arith.constant dense<0.000000e+00> : vector<56x32xf32>
    %123 = tpu.matmul %121, %122, %cst_76 {dimension_numbers = #tpu.dot_dimension_numbers<[1], [0], [0], [1], [0, 0, 1, 1], [], []>} : vector<56x16xf32>, vector<16x32xf32>, vector<56x32xf32> -> vector<56x32xf32>
    %124 = arith.addf %118, %123 : vector<56x32xf32>
    %c840 = arith.constant 840 : index
    %c0_77 = arith.constant 0 : index
    %125 = vector.load %arg3[%c840, %c0_77] : memref<1400x392xbf16, #tpu.memory_space<vmem>>, vector<56x392xbf16>
    %126 = arith.extf %125 : vector<56x392xbf16> to vector<56x392xf32>
    %cst_78 = arith.constant dense<0.000000e+00> : vector<56x16xf32>
    %127 = tpu.matmul %126, %33, %cst_78 {dimension_numbers = #tpu.dot_dimension_numbers<[1], [0], [0], [1], [0, 0, 1, 1], [], []>} : vector<56x392xf32>, vector<392x16xf32>, vector<56x16xf32> -> vector<56x16xf32>
    %c240 = arith.constant 240 : index
    %c0_79 = arith.constant 0 : index
    %128 = vector.load %arg4[%c240, %c0_79] : memref<400x32xf32, #tpu.memory_space<vmem>>, vector<16x32xf32>
    %cst_80 = arith.constant dense<0.000000e+00> : vector<56x32xf32>
    %129 = tpu.matmul %127, %128, %cst_80 {dimension_numbers = #tpu.dot_dimension_numbers<[1], [0], [0], [1], [0, 0, 1, 1], [], []>} : vector<56x16xf32>, vector<16x32xf32>, vector<56x32xf32> -> vector<56x32xf32>
    %130 = arith.addf %124, %129 : vector<56x32xf32>
    %c896 = arith.constant 896 : index
    %c0_81 = arith.constant 0 : index
    %131 = vector.load %arg3[%c896, %c0_81] : memref<1400x392xbf16, #tpu.memory_space<vmem>>, vector<56x392xbf16>
    %132 = arith.extf %131 : vector<56x392xbf16> to vector<56x392xf32>
    %cst_82 = arith.constant dense<0.000000e+00> : vector<56x16xf32>
    %133 = tpu.matmul %132, %33, %cst_82 {dimension_numbers = #tpu.dot_dimension_numbers<[1], [0], [0], [1], [0, 0, 1, 1], [], []>} : vector<56x392xf32>, vector<392x16xf32>, vector<56x16xf32> -> vector<56x16xf32>
    %c256 = arith.constant 256 : index
    %c0_83 = arith.constant 0 : index
    %134 = vector.load %arg4[%c256, %c0_83] : memref<400x32xf32, #tpu.memory_space<vmem>>, vector<16x32xf32>
    %cst_84 = arith.constant dense<0.000000e+00> : vector<56x32xf32>
    %135 = tpu.matmul %133, %134, %cst_84 {dimension_numbers = #tpu.dot_dimension_numbers<[1], [0], [0], [1], [0, 0, 1, 1], [], []>} : vector<56x16xf32>, vector<16x32xf32>, vector<56x32xf32> -> vector<56x32xf32>
    %136 = arith.addf %130, %135 : vector<56x32xf32>
    %c952 = arith.constant 952 : index
    %c0_85 = arith.constant 0 : index
    %137 = vector.load %arg3[%c952, %c0_85] : memref<1400x392xbf16, #tpu.memory_space<vmem>>, vector<56x392xbf16>
    %138 = arith.extf %137 : vector<56x392xbf16> to vector<56x392xf32>
    %cst_86 = arith.constant dense<0.000000e+00> : vector<56x16xf32>
    %139 = tpu.matmul %138, %33, %cst_86 {dimension_numbers = #tpu.dot_dimension_numbers<[1], [0], [0], [1], [0, 0, 1, 1], [], []>} : vector<56x392xf32>, vector<392x16xf32>, vector<56x16xf32> -> vector<56x16xf32>
    %c272 = arith.constant 272 : index
    %c0_87 = arith.constant 0 : index
    %140 = vector.load %arg4[%c272, %c0_87] : memref<400x32xf32, #tpu.memory_space<vmem>>, vector<16x32xf32>
    %cst_88 = arith.constant dense<0.000000e+00> : vector<56x32xf32>
    %141 = tpu.matmul %139, %140, %cst_88 {dimension_numbers = #tpu.dot_dimension_numbers<[1], [0], [0], [1], [0, 0, 1, 1], [], []>} : vector<56x16xf32>, vector<16x32xf32>, vector<56x32xf32> -> vector<56x32xf32>
    %142 = arith.addf %136, %141 : vector<56x32xf32>
    %c1008 = arith.constant 1008 : index
    %c0_89 = arith.constant 0 : index
    %143 = vector.load %arg3[%c1008, %c0_89] : memref<1400x392xbf16, #tpu.memory_space<vmem>>, vector<56x392xbf16>
    %144 = arith.extf %143 : vector<56x392xbf16> to vector<56x392xf32>
    %cst_90 = arith.constant dense<0.000000e+00> : vector<56x16xf32>
    %145 = tpu.matmul %144, %33, %cst_90 {dimension_numbers = #tpu.dot_dimension_numbers<[1], [0], [0], [1], [0, 0, 1, 1], [], []>} : vector<56x392xf32>, vector<392x16xf32>, vector<56x16xf32> -> vector<56x16xf32>
    %c288 = arith.constant 288 : index
    %c0_91 = arith.constant 0 : index
    %146 = vector.load %arg4[%c288, %c0_91] : memref<400x32xf32, #tpu.memory_space<vmem>>, vector<16x32xf32>
    %cst_92 = arith.constant dense<0.000000e+00> : vector<56x32xf32>
    %147 = tpu.matmul %145, %146, %cst_92 {dimension_numbers = #tpu.dot_dimension_numbers<[1], [0], [0], [1], [0, 0, 1, 1], [], []>} : vector<56x16xf32>, vector<16x32xf32>, vector<56x32xf32> -> vector<56x32xf32>
    %148 = arith.addf %142, %147 : vector<56x32xf32>
    %c1064 = arith.constant 1064 : index
    %c0_93 = arith.constant 0 : index
    %149 = vector.load %arg3[%c1064, %c0_93] : memref<1400x392xbf16, #tpu.memory_space<vmem>>, vector<56x392xbf16>
    %150 = arith.extf %149 : vector<56x392xbf16> to vector<56x392xf32>
    %cst_94 = arith.constant dense<0.000000e+00> : vector<56x16xf32>
    %151 = tpu.matmul %150, %33, %cst_94 {dimension_numbers = #tpu.dot_dimension_numbers<[1], [0], [0], [1], [0, 0, 1, 1], [], []>} : vector<56x392xf32>, vector<392x16xf32>, vector<56x16xf32> -> vector<56x16xf32>
    %c304 = arith.constant 304 : index
    %c0_95 = arith.constant 0 : index
    %152 = vector.load %arg4[%c304, %c0_95] : memref<400x32xf32, #tpu.memory_space<vmem>>, vector<16x32xf32>
    %cst_96 = arith.constant dense<0.000000e+00> : vector<56x32xf32>
    %153 = tpu.matmul %151, %152, %cst_96 {dimension_numbers = #tpu.dot_dimension_numbers<[1], [0], [0], [1], [0, 0, 1, 1], [], []>} : vector<56x16xf32>, vector<16x32xf32>, vector<56x32xf32> -> vector<56x32xf32>
    %154 = arith.addf %148, %153 : vector<56x32xf32>
    %c1120 = arith.constant 1120 : index
    %c0_97 = arith.constant 0 : index
    %155 = vector.load %arg3[%c1120, %c0_97] : memref<1400x392xbf16, #tpu.memory_space<vmem>>, vector<56x392xbf16>
    %156 = arith.extf %155 : vector<56x392xbf16> to vector<56x392xf32>
    %cst_98 = arith.constant dense<0.000000e+00> : vector<56x16xf32>
    %157 = tpu.matmul %156, %33, %cst_98 {dimension_numbers = #tpu.dot_dimension_numbers<[1], [0], [0], [1], [0, 0, 1, 1], [], []>} : vector<56x392xf32>, vector<392x16xf32>, vector<56x16xf32> -> vector<56x16xf32>
    %c320 = arith.constant 320 : index
    %c0_99 = arith.constant 0 : index
    %158 = vector.load %arg4[%c320, %c0_99] : memref<400x32xf32, #tpu.memory_space<vmem>>, vector<16x32xf32>
    %cst_100 = arith.constant dense<0.000000e+00> : vector<56x32xf32>
    %159 = tpu.matmul %157, %158, %cst_100 {dimension_numbers = #tpu.dot_dimension_numbers<[1], [0], [0], [1], [0, 0, 1, 1], [], []>} : vector<56x16xf32>, vector<16x32xf32>, vector<56x32xf32> -> vector<56x32xf32>
    %160 = arith.addf %154, %159 : vector<56x32xf32>
    %c1176 = arith.constant 1176 : index
    %c0_101 = arith.constant 0 : index
    %161 = vector.load %arg3[%c1176, %c0_101] : memref<1400x392xbf16, #tpu.memory_space<vmem>>, vector<56x392xbf16>
    %162 = arith.extf %161 : vector<56x392xbf16> to vector<56x392xf32>
    %cst_102 = arith.constant dense<0.000000e+00> : vector<56x16xf32>
    %163 = tpu.matmul %162, %33, %cst_102 {dimension_numbers = #tpu.dot_dimension_numbers<[1], [0], [0], [1], [0, 0, 1, 1], [], []>} : vector<56x392xf32>, vector<392x16xf32>, vector<56x16xf32> -> vector<56x16xf32>
    %c336_103 = arith.constant 336 : index
    %c0_104 = arith.constant 0 : index
    %164 = vector.load %arg4[%c336_103, %c0_104] : memref<400x32xf32, #tpu.memory_space<vmem>>, vector<16x32xf32>
    %cst_105 = arith.constant dense<0.000000e+00> : vector<56x32xf32>
    %165 = tpu.matmul %163, %164, %cst_105 {dimension_numbers = #tpu.dot_dimension_numbers<[1], [0], [0], [1], [0, 0, 1, 1], [], []>} : vector<56x16xf32>, vector<16x32xf32>, vector<56x32xf32> -> vector<56x32xf32>
    %166 = arith.addf %160, %165 : vector<56x32xf32>
    %c1232 = arith.constant 1232 : index
    %c0_106 = arith.constant 0 : index
    %167 = vector.load %arg3[%c1232, %c0_106] : memref<1400x392xbf16, #tpu.memory_space<vmem>>, vector<56x392xbf16>
    %168 = arith.extf %167 : vector<56x392xbf16> to vector<56x392xf32>
    %cst_107 = arith.constant dense<0.000000e+00> : vector<56x16xf32>
    %169 = tpu.matmul %168, %33, %cst_107 {dimension_numbers = #tpu.dot_dimension_numbers<[1], [0], [0], [1], [0, 0, 1, 1], [], []>} : vector<56x392xf32>, vector<392x16xf32>, vector<56x16xf32> -> vector<56x16xf32>
    %c352 = arith.constant 352 : index
    %c0_108 = arith.constant 0 : index
    %170 = vector.load %arg4[%c352, %c0_108] : memref<400x32xf32, #tpu.memory_space<vmem>>, vector<16x32xf32>
    %cst_109 = arith.constant dense<0.000000e+00> : vector<56x32xf32>
    %171 = tpu.matmul %169, %170, %cst_109 {dimension_numbers = #tpu.dot_dimension_numbers<[1], [0], [0], [1], [0, 0, 1, 1], [], []>} : vector<56x16xf32>, vector<16x32xf32>, vector<56x32xf32> -> vector<56x32xf32>
    %172 = arith.addf %166, %171 : vector<56x32xf32>
    %c1288 = arith.constant 1288 : index
    %c0_110 = arith.constant 0 : index
    %173 = vector.load %arg3[%c1288, %c0_110] : memref<1400x392xbf16, #tpu.memory_space<vmem>>, vector<56x392xbf16>
    %174 = arith.extf %173 : vector<56x392xbf16> to vector<56x392xf32>
    %cst_111 = arith.constant dense<0.000000e+00> : vector<56x16xf32>
    %175 = tpu.matmul %174, %33, %cst_111 {dimension_numbers = #tpu.dot_dimension_numbers<[1], [0], [0], [1], [0, 0, 1, 1], [], []>} : vector<56x392xf32>, vector<392x16xf32>, vector<56x16xf32> -> vector<56x16xf32>
    %c368 = arith.constant 368 : index
    %c0_112 = arith.constant 0 : index
    %176 = vector.load %arg4[%c368, %c0_112] : memref<400x32xf32, #tpu.memory_space<vmem>>, vector<16x32xf32>
    %cst_113 = arith.constant dense<0.000000e+00> : vector<56x32xf32>
    %177 = tpu.matmul %175, %176, %cst_113 {dimension_numbers = #tpu.dot_dimension_numbers<[1], [0], [0], [1], [0, 0, 1, 1], [], []>} : vector<56x16xf32>, vector<16x32xf32>, vector<56x32xf32> -> vector<56x32xf32>
    %178 = arith.addf %172, %177 : vector<56x32xf32>
    %c1344 = arith.constant 1344 : index
    %c0_114 = arith.constant 0 : index
    %179 = vector.load %arg3[%c1344, %c0_114] : memref<1400x392xbf16, #tpu.memory_space<vmem>>, vector<56x392xbf16>
    %180 = arith.extf %179 : vector<56x392xbf16> to vector<56x392xf32>
    %cst_115 = arith.constant dense<0.000000e+00> : vector<56x16xf32>
    %181 = tpu.matmul %180, %33, %cst_115 {dimension_numbers = #tpu.dot_dimension_numbers<[1], [0], [0], [1], [0, 0, 1, 1], [], []>} : vector<56x392xf32>, vector<392x16xf32>, vector<56x16xf32> -> vector<56x16xf32>
    %c384 = arith.constant 384 : index
    %c0_116 = arith.constant 0 : index
    %182 = vector.load %arg4[%c384, %c0_116] : memref<400x32xf32, #tpu.memory_space<vmem>>, vector<16x32xf32>
    %cst_117 = arith.constant dense<0.000000e+00> : vector<56x32xf32>
    %183 = tpu.matmul %181, %182, %cst_117 {dimension_numbers = #tpu.dot_dimension_numbers<[1], [0], [0], [1], [0, 0, 1, 1], [], []>} : vector<56x16xf32>, vector<16x32xf32>, vector<56x32xf32> -> vector<56x32xf32>
    %184 = arith.addf %178, %183 : vector<56x32xf32>
    %185 = vector.extract_strided_slice %184 {offsets = [0, 0], sizes = [50, 32], strides = [1, 1]} : vector<56x32xf32> to vector<50x32xf32>
    %c0_118 = arith.constant 0 : index
    %c0_119 = arith.constant 0 : index
    %186 = vector.load %arg5[%c0_118, %c0_119] : memref<3x32xf32, #tpu.memory_space<vmem>>, vector<3x32xf32>
    %187 = vector.extract_strided_slice %186 {offsets = [0, 0], sizes = [1, 32], strides = [1, 1]} : vector<3x32xf32> to vector<1x32xf32>
    %188 = vector.broadcast %187 : vector<1x32xf32> to vector<50x32xf32>
    %189 = arith.addf %185, %188 : vector<50x32xf32>
    %cst_120 = arith.constant dense<0.000000e+00> : vector<32xf32>
    %190 = vector.multi_reduction <add>, %189, %cst_120 [0] : vector<50x32xf32> to vector<32xf32>
    %191 = vector.shape_cast %190 : vector<32xf32> to vector<1x32xf32>
    %192 = arith.mulf %189, %189 : vector<50x32xf32>
    %cst_121 = arith.constant dense<0.000000e+00> : vector<32xf32>
    %193 = vector.multi_reduction <add>, %192, %cst_121 [0] : vector<50x32xf32> to vector<32xf32>
    %194 = vector.shape_cast %193 : vector<32xf32> to vector<1x32xf32>
    %cst_122 = arith.constant 2.000000e-02 : f32
    %195 = vector.broadcast %cst_122 : f32 to vector<1x32xf32>
    %196 = arith.mulf %191, %195 : vector<1x32xf32>
    %cst_123 = arith.constant 2.000000e-02 : f32
    %197 = vector.broadcast %cst_123 : f32 to vector<1x32xf32>
    %198 = arith.mulf %194, %197 : vector<1x32xf32>
    %199 = arith.mulf %196, %196 : vector<1x32xf32>
    %200 = arith.subf %198, %199 : vector<1x32xf32>
    %cst_124 = arith.constant 0.000000e+00 : f32
    %201 = vector.broadcast %cst_124 : f32 to vector<1x32xf32>
    %202 = arith.maximumf %200, %201 : vector<1x32xf32>
    %203 = vector.extract_strided_slice %186 {offsets = [1, 0], sizes = [1, 32], strides = [1, 1]} : vector<3x32xf32> to vector<1x32xf32>
    %cst_125 = arith.constant 9.99999974E-6 : f32
    %204 = vector.broadcast %cst_125 : f32 to vector<1x32xf32>
    %205 = arith.addf %202, %204 : vector<1x32xf32>
    %206 = math.rsqrt %205 : vector<1x32xf32>
    %207 = arith.mulf %203, %206 : vector<1x32xf32>
    %208 = vector.extract_strided_slice %186 {offsets = [2, 0], sizes = [1, 32], strides = [1, 1]} : vector<3x32xf32> to vector<1x32xf32>
    %209 = arith.mulf %196, %207 : vector<1x32xf32>
    %210 = arith.subf %208, %209 : vector<1x32xf32>
    %211 = vector.broadcast %207 : vector<1x32xf32> to vector<50x32xf32>
    %212 = arith.mulf %189, %211 : vector<50x32xf32>
    %213 = vector.broadcast %210 : vector<1x32xf32> to vector<50x32xf32>
    %214 = arith.addf %212, %213 : vector<50x32xf32>
    %cst_126 = arith.constant 0.000000e+00 : f32
    %215 = vector.broadcast %cst_126 : f32 to vector<50x32xf32>
    %216 = arith.maximumf %214, %215 : vector<50x32xf32>
    %cst_127 = arith.constant 0.000000e+00 : f32
    %217 = vector.broadcast %cst_127 : f32 to vector<8x32xf32>
    %c0_128 = arith.constant 0 : index
    %c0_129 = arith.constant 0 : index
    %218 = vector.load %arg6[%c0_128, %c0_129] : memref<72x50xbf16, #tpu.memory_space<vmem>>, vector<8x50xbf16>
    %219 = arith.extf %218 : vector<8x50xbf16> to vector<8x50xf32>
    %cst_130 = arith.constant dense<0.000000e+00> : vector<8x32xf32>
    %220 = tpu.matmul %219, %216, %cst_130 {dimension_numbers = #tpu.dot_dimension_numbers<[1], [0], [0], [1], [0, 0, 1, 1], [], []>} : vector<8x50xf32>, vector<50x32xf32>, vector<8x32xf32> -> vector<8x32xf32>
    %c0_131 = arith.constant 0 : index
    %c0_132 = arith.constant 0 : index
    %221 = vector.load %arg7[%c0_131, %c0_132] : memref<288x32xf32, #tpu.memory_space<vmem>>, vector<32x32xf32>
    %cst_133 = arith.constant dense<0.000000e+00> : vector<8x32xf32>
    %222 = tpu.matmul %220, %221, %cst_133 {dimension_numbers = #tpu.dot_dimension_numbers<[1], [0], [0], [1], [0, 0, 1, 1], [], []>} : vector<8x32xf32>, vector<32x32xf32>, vector<8x32xf32> -> vector<8x32xf32>
    %223 = arith.addf %217, %222 : vector<8x32xf32>
    %c8 = arith.constant 8 : index
    %c0_134 = arith.constant 0 : index
    %224 = vector.load %arg6[%c8, %c0_134] : memref<72x50xbf16, #tpu.memory_space<vmem>>, vector<8x50xbf16>
    %225 = arith.extf %224 : vector<8x50xbf16> to vector<8x50xf32>
    %cst_135 = arith.constant dense<0.000000e+00> : vector<8x32xf32>
    %226 = tpu.matmul %225, %216, %cst_135 {dimension_numbers = #tpu.dot_dimension_numbers<[1], [0], [0], [1], [0, 0, 1, 1], [], []>} : vector<8x50xf32>, vector<50x32xf32>, vector<8x32xf32> -> vector<8x32xf32>
    %c32_136 = arith.constant 32 : index
    %c0_137 = arith.constant 0 : index
    %227 = vector.load %arg7[%c32_136, %c0_137] : memref<288x32xf32, #tpu.memory_space<vmem>>, vector<32x32xf32>
    %cst_138 = arith.constant dense<0.000000e+00> : vector<8x32xf32>
    %228 = tpu.matmul %226, %227, %cst_138 {dimension_numbers = #tpu.dot_dimension_numbers<[1], [0], [0], [1], [0, 0, 1, 1], [], []>} : vector<8x32xf32>, vector<32x32xf32>, vector<8x32xf32> -> vector<8x32xf32>
    %229 = arith.addf %223, %228 : vector<8x32xf32>
    %c16_139 = arith.constant 16 : index
    %c0_140 = arith.constant 0 : index
    %230 = vector.load %arg6[%c16_139, %c0_140] : memref<72x50xbf16, #tpu.memory_space<vmem>>, vector<8x50xbf16>
    %231 = arith.extf %230 : vector<8x50xbf16> to vector<8x50xf32>
    %cst_141 = arith.constant dense<0.000000e+00> : vector<8x32xf32>
    %232 = tpu.matmul %231, %216, %cst_141 {dimension_numbers = #tpu.dot_dimension_numbers<[1], [0], [0], [1], [0, 0, 1, 1], [], []>} : vector<8x50xf32>, vector<50x32xf32>, vector<8x32xf32> -> vector<8x32xf32>
    %c64_142 = arith.constant 64 : index
    %c0_143 = arith.constant 0 : index
    %233 = vector.load %arg7[%c64_142, %c0_143] : memref<288x32xf32, #tpu.memory_space<vmem>>, vector<32x32xf32>
    %cst_144 = arith.constant dense<0.000000e+00> : vector<8x32xf32>
    %234 = tpu.matmul %232, %233, %cst_144 {dimension_numbers = #tpu.dot_dimension_numbers<[1], [0], [0], [1], [0, 0, 1, 1], [], []>} : vector<8x32xf32>, vector<32x32xf32>, vector<8x32xf32> -> vector<8x32xf32>
    %235 = arith.addf %229, %234 : vector<8x32xf32>
    %c24 = arith.constant 24 : index
    %c0_145 = arith.constant 0 : index
    %236 = vector.load %arg6[%c24, %c0_145] : memref<72x50xbf16, #tpu.memory_space<vmem>>, vector<8x50xbf16>
    %237 = arith.extf %236 : vector<8x50xbf16> to vector<8x50xf32>
    %cst_146 = arith.constant dense<0.000000e+00> : vector<8x32xf32>
    %238 = tpu.matmul %237, %216, %cst_146 {dimension_numbers = #tpu.dot_dimension_numbers<[1], [0], [0], [1], [0, 0, 1, 1], [], []>} : vector<8x50xf32>, vector<50x32xf32>, vector<8x32xf32> -> vector<8x32xf32>
    %c96_147 = arith.constant 96 : index
    %c0_148 = arith.constant 0 : index
    %239 = vector.load %arg7[%c96_147, %c0_148] : memref<288x32xf32, #tpu.memory_space<vmem>>, vector<32x32xf32>
    %cst_149 = arith.constant dense<0.000000e+00> : vector<8x32xf32>
    %240 = tpu.matmul %238, %239, %cst_149 {dimension_numbers = #tpu.dot_dimension_numbers<[1], [0], [0], [1], [0, 0, 1, 1], [], []>} : vector<8x32xf32>, vector<32x32xf32>, vector<8x32xf32> -> vector<8x32xf32>
    %241 = arith.addf %235, %240 : vector<8x32xf32>
    %c32_150 = arith.constant 32 : index
    %c0_151 = arith.constant 0 : index
    %242 = vector.load %arg6[%c32_150, %c0_151] : memref<72x50xbf16, #tpu.memory_space<vmem>>, vector<8x50xbf16>
    %243 = arith.extf %242 : vector<8x50xbf16> to vector<8x50xf32>
    %cst_152 = arith.constant dense<0.000000e+00> : vector<8x32xf32>
    %244 = tpu.matmul %243, %216, %cst_152 {dimension_numbers = #tpu.dot_dimension_numbers<[1], [0], [0], [1], [0, 0, 1, 1], [], []>} : vector<8x50xf32>, vector<50x32xf32>, vector<8x32xf32> -> vector<8x32xf32>
    %c128_153 = arith.constant 128 : index
    %c0_154 = arith.constant 0 : index
    %245 = vector.load %arg7[%c128_153, %c0_154] : memref<288x32xf32, #tpu.memory_space<vmem>>, vector<32x32xf32>
    %cst_155 = arith.constant dense<0.000000e+00> : vector<8x32xf32>
    %246 = tpu.matmul %244, %245, %cst_155 {dimension_numbers = #tpu.dot_dimension_numbers<[1], [0], [0], [1], [0, 0, 1, 1], [], []>} : vector<8x32xf32>, vector<32x32xf32>, vector<8x32xf32> -> vector<8x32xf32>
    %247 = arith.addf %241, %246 : vector<8x32xf32>
    %c40 = arith.constant 40 : index
    %c0_156 = arith.constant 0 : index
    %248 = vector.load %arg6[%c40, %c0_156] : memref<72x50xbf16, #tpu.memory_space<vmem>>, vector<8x50xbf16>
    %249 = arith.extf %248 : vector<8x50xbf16> to vector<8x50xf32>
    %cst_157 = arith.constant dense<0.000000e+00> : vector<8x32xf32>
    %250 = tpu.matmul %249, %216, %cst_157 {dimension_numbers = #tpu.dot_dimension_numbers<[1], [0], [0], [1], [0, 0, 1, 1], [], []>} : vector<8x50xf32>, vector<50x32xf32>, vector<8x32xf32> -> vector<8x32xf32>
    %c160_158 = arith.constant 160 : index
    %c0_159 = arith.constant 0 : index
    %251 = vector.load %arg7[%c160_158, %c0_159] : memref<288x32xf32, #tpu.memory_space<vmem>>, vector<32x32xf32>
    %cst_160 = arith.constant dense<0.000000e+00> : vector<8x32xf32>
    %252 = tpu.matmul %250, %251, %cst_160 {dimension_numbers = #tpu.dot_dimension_numbers<[1], [0], [0], [1], [0, 0, 1, 1], [], []>} : vector<8x32xf32>, vector<32x32xf32>, vector<8x32xf32> -> vector<8x32xf32>
    %253 = arith.addf %247, %252 : vector<8x32xf32>
    %c48_161 = arith.constant 48 : index
    %c0_162 = arith.constant 0 : index
    %254 = vector.load %arg6[%c48_161, %c0_162] : memref<72x50xbf16, #tpu.memory_space<vmem>>, vector<8x50xbf16>
    %255 = arith.extf %254 : vector<8x50xbf16> to vector<8x50xf32>
    %cst_163 = arith.constant dense<0.000000e+00> : vector<8x32xf32>
    %256 = tpu.matmul %255, %216, %cst_163 {dimension_numbers = #tpu.dot_dimension_numbers<[1], [0], [0], [1], [0, 0, 1, 1], [], []>} : vector<8x50xf32>, vector<50x32xf32>, vector<8x32xf32> -> vector<8x32xf32>
    %c192_164 = arith.constant 192 : index
    %c0_165 = arith.constant 0 : index
    %257 = vector.load %arg7[%c192_164, %c0_165] : memref<288x32xf32, #tpu.memory_space<vmem>>, vector<32x32xf32>
    %cst_166 = arith.constant dense<0.000000e+00> : vector<8x32xf32>
    %258 = tpu.matmul %256, %257, %cst_166 {dimension_numbers = #tpu.dot_dimension_numbers<[1], [0], [0], [1], [0, 0, 1, 1], [], []>} : vector<8x32xf32>, vector<32x32xf32>, vector<8x32xf32> -> vector<8x32xf32>
    %259 = arith.addf %253, %258 : vector<8x32xf32>
    %c56_167 = arith.constant 56 : index
    %c0_168 = arith.constant 0 : index
    %260 = vector.load %arg6[%c56_167, %c0_168] : memref<72x50xbf16, #tpu.memory_space<vmem>>, vector<8x50xbf16>
    %261 = arith.extf %260 : vector<8x50xbf16> to vector<8x50xf32>
    %cst_169 = arith.constant dense<0.000000e+00> : vector<8x32xf32>
    %262 = tpu.matmul %261, %216, %cst_169 {dimension_numbers = #tpu.dot_dimension_numbers<[1], [0], [0], [1], [0, 0, 1, 1], [], []>} : vector<8x50xf32>, vector<50x32xf32>, vector<8x32xf32> -> vector<8x32xf32>
    %c224_170 = arith.constant 224 : index
    %c0_171 = arith.constant 0 : index
    %263 = vector.load %arg7[%c224_170, %c0_171] : memref<288x32xf32, #tpu.memory_space<vmem>>, vector<32x32xf32>
    %cst_172 = arith.constant dense<0.000000e+00> : vector<8x32xf32>
    %264 = tpu.matmul %262, %263, %cst_172 {dimension_numbers = #tpu.dot_dimension_numbers<[1], [0], [0], [1], [0, 0, 1, 1], [], []>} : vector<8x32xf32>, vector<32x32xf32>, vector<8x32xf32> -> vector<8x32xf32>
    %265 = arith.addf %259, %264 : vector<8x32xf32>
    %c64_173 = arith.constant 64 : index
    %c0_174 = arith.constant 0 : index
    %266 = vector.load %arg6[%c64_173, %c0_174] : memref<72x50xbf16, #tpu.memory_space<vmem>>, vector<8x50xbf16>
    %267 = arith.extf %266 : vector<8x50xbf16> to vector<8x50xf32>
    %cst_175 = arith.constant dense<0.000000e+00> : vector<8x32xf32>
    %268 = tpu.matmul %267, %216, %cst_175 {dimension_numbers = #tpu.dot_dimension_numbers<[1], [0], [0], [1], [0, 0, 1, 1], [], []>} : vector<8x50xf32>, vector<50x32xf32>, vector<8x32xf32> -> vector<8x32xf32>
    %c256_176 = arith.constant 256 : index
    %c0_177 = arith.constant 0 : index
    %269 = vector.load %arg7[%c256_176, %c0_177] : memref<288x32xf32, #tpu.memory_space<vmem>>, vector<32x32xf32>
    %cst_178 = arith.constant dense<0.000000e+00> : vector<8x32xf32>
    %270 = tpu.matmul %268, %269, %cst_178 {dimension_numbers = #tpu.dot_dimension_numbers<[1], [0], [0], [1], [0, 0, 1, 1], [], []>} : vector<8x32xf32>, vector<32x32xf32>, vector<8x32xf32> -> vector<8x32xf32>
    %271 = arith.addf %265, %270 : vector<8x32xf32>
    %c0_179 = arith.constant 0 : index
    %c0_180 = arith.constant 0 : index
    %272 = vector.load %arg8[%c0_179, %c0_180] : memref<3x32xf32, #tpu.memory_space<vmem>>, vector<3x32xf32>
    %273 = vector.extract_strided_slice %272 {offsets = [0, 0], sizes = [1, 32], strides = [1, 1]} : vector<3x32xf32> to vector<1x32xf32>
    %274 = vector.broadcast %273 : vector<1x32xf32> to vector<8x32xf32>
    %275 = arith.addf %271, %274 : vector<8x32xf32>
    %cst_181 = arith.constant dense<0.000000e+00> : vector<32xf32>
    %276 = vector.multi_reduction <add>, %275, %cst_181 [0] : vector<8x32xf32> to vector<32xf32>
    %277 = vector.shape_cast %276 : vector<32xf32> to vector<1x32xf32>
    %278 = arith.mulf %275, %275 : vector<8x32xf32>
    %cst_182 = arith.constant dense<0.000000e+00> : vector<32xf32>
    %279 = vector.multi_reduction <add>, %278, %cst_182 [0] : vector<8x32xf32> to vector<32xf32>
    %280 = vector.shape_cast %279 : vector<32xf32> to vector<1x32xf32>
    %cst_183 = arith.constant 1.250000e-01 : f32
    %281 = vector.broadcast %cst_183 : f32 to vector<1x32xf32>
    %282 = arith.mulf %277, %281 : vector<1x32xf32>
    %cst_184 = arith.constant 1.250000e-01 : f32
    %283 = vector.broadcast %cst_184 : f32 to vector<1x32xf32>
    %284 = arith.mulf %280, %283 : vector<1x32xf32>
    %285 = arith.mulf %282, %282 : vector<1x32xf32>
    %286 = arith.subf %284, %285 : vector<1x32xf32>
    %cst_185 = arith.constant 0.000000e+00 : f32
    %287 = vector.broadcast %cst_185 : f32 to vector<1x32xf32>
    %288 = arith.maximumf %286, %287 : vector<1x32xf32>
    %289 = vector.extract_strided_slice %272 {offsets = [1, 0], sizes = [1, 32], strides = [1, 1]} : vector<3x32xf32> to vector<1x32xf32>
    %cst_186 = arith.constant 9.99999974E-6 : f32
    %290 = vector.broadcast %cst_186 : f32 to vector<1x32xf32>
    %291 = arith.addf %288, %290 : vector<1x32xf32>
    %292 = math.rsqrt %291 : vector<1x32xf32>
    %293 = arith.mulf %289, %292 : vector<1x32xf32>
    %294 = vector.extract_strided_slice %272 {offsets = [2, 0], sizes = [1, 32], strides = [1, 1]} : vector<3x32xf32> to vector<1x32xf32>
    %295 = arith.mulf %282, %293 : vector<1x32xf32>
    %296 = arith.subf %294, %295 : vector<1x32xf32>
    %297 = vector.broadcast %293 : vector<1x32xf32> to vector<8x32xf32>
    %298 = arith.mulf %275, %297 : vector<8x32xf32>
    %299 = vector.broadcast %296 : vector<1x32xf32> to vector<8x32xf32>
    %300 = arith.addf %298, %299 : vector<8x32xf32>
    %cst_187 = arith.constant 0.000000e+00 : f32
    %301 = vector.broadcast %cst_187 : f32 to vector<8x32xf32>
    %302 = arith.maximumf %300, %301 : vector<8x32xf32>
    %cst_188 = arith.constant 0.000000e+00 : f32
    %303 = vector.broadcast %cst_188 : f32 to vector<8x4xf32>
    %c0_189 = arith.constant 0 : index
    %c0_190 = arith.constant 0 : index
    %304 = vector.load %arg9[%c0_189, %c0_190] : memref<32x8xf32, #tpu.memory_space<vmem>>, vector<8x8xf32>
    %cst_191 = arith.constant dense<0.000000e+00> : vector<8x32xf32>
    %305 = tpu.matmul %304, %302, %cst_191 {dimension_numbers = #tpu.dot_dimension_numbers<[1], [0], [0], [1], [0, 0, 1, 1], [], []>} : vector<8x8xf32>, vector<8x32xf32>, vector<8x32xf32> -> vector<8x32xf32>
    %c0_192 = arith.constant 0 : index
    %c0_193 = arith.constant 0 : index
    %306 = vector.load %arg10[%c0_192, %c0_193] : memref<128x4xf32, #tpu.memory_space<vmem>>, vector<32x4xf32>
    %cst_194 = arith.constant dense<0.000000e+00> : vector<8x4xf32>
    %307 = tpu.matmul %305, %306, %cst_194 {dimension_numbers = #tpu.dot_dimension_numbers<[1], [0], [0], [1], [0, 0, 1, 1], [], []>} : vector<8x32xf32>, vector<32x4xf32>, vector<8x4xf32> -> vector<8x4xf32>
    %308 = arith.addf %303, %307 : vector<8x4xf32>
    %c8_195 = arith.constant 8 : index
    %c0_196 = arith.constant 0 : index
    %309 = vector.load %arg9[%c8_195, %c0_196] : memref<32x8xf32, #tpu.memory_space<vmem>>, vector<8x8xf32>
    %cst_197 = arith.constant dense<0.000000e+00> : vector<8x32xf32>
    %310 = tpu.matmul %309, %302, %cst_197 {dimension_numbers = #tpu.dot_dimension_numbers<[1], [0], [0], [1], [0, 0, 1, 1], [], []>} : vector<8x8xf32>, vector<8x32xf32>, vector<8x32xf32> -> vector<8x32xf32>
    %c32_198 = arith.constant 32 : index
    %c0_199 = arith.constant 0 : index
    %311 = vector.load %arg10[%c32_198, %c0_199] : memref<128x4xf32, #tpu.memory_space<vmem>>, vector<32x4xf32>
    %cst_200 = arith.constant dense<0.000000e+00> : vector<8x4xf32>
    %312 = tpu.matmul %310, %311, %cst_200 {dimension_numbers = #tpu.dot_dimension_numbers<[1], [0], [0], [1], [0, 0, 1, 1], [], []>} : vector<8x32xf32>, vector<32x4xf32>, vector<8x4xf32> -> vector<8x4xf32>
    %313 = arith.addf %308, %312 : vector<8x4xf32>
    %c16_201 = arith.constant 16 : index
    %c0_202 = arith.constant 0 : index
    %314 = vector.load %arg9[%c16_201, %c0_202] : memref<32x8xf32, #tpu.memory_space<vmem>>, vector<8x8xf32>
    %cst_203 = arith.constant dense<0.000000e+00> : vector<8x32xf32>
    %315 = tpu.matmul %314, %302, %cst_203 {dimension_numbers = #tpu.dot_dimension_numbers<[1], [0], [0], [1], [0, 0, 1, 1], [], []>} : vector<8x8xf32>, vector<8x32xf32>, vector<8x32xf32> -> vector<8x32xf32>
    %c64_204 = arith.constant 64 : index
    %c0_205 = arith.constant 0 : index
    %316 = vector.load %arg10[%c64_204, %c0_205] : memref<128x4xf32, #tpu.memory_space<vmem>>, vector<32x4xf32>
    %cst_206 = arith.constant dense<0.000000e+00> : vector<8x4xf32>
    %317 = tpu.matmul %315, %316, %cst_206 {dimension_numbers = #tpu.dot_dimension_numbers<[1], [0], [0], [1], [0, 0, 1, 1], [], []>} : vector<8x32xf32>, vector<32x4xf32>, vector<8x4xf32> -> vector<8x4xf32>
    %318 = arith.addf %313, %317 : vector<8x4xf32>
    %c24_207 = arith.constant 24 : index
    %c0_208 = arith.constant 0 : index
    %319 = vector.load %arg9[%c24_207, %c0_208] : memref<32x8xf32, #tpu.memory_space<vmem>>, vector<8x8xf32>
    %cst_209 = arith.constant dense<0.000000e+00> : vector<8x32xf32>
    %320 = tpu.matmul %319, %302, %cst_209 {dimension_numbers = #tpu.dot_dimension_numbers<[1], [0], [0], [1], [0, 0, 1, 1], [], []>} : vector<8x8xf32>, vector<8x32xf32>, vector<8x32xf32> -> vector<8x32xf32>
    %c96_210 = arith.constant 96 : index
    %c0_211 = arith.constant 0 : index
    %321 = vector.load %arg10[%c96_210, %c0_211] : memref<128x4xf32, #tpu.memory_space<vmem>>, vector<32x4xf32>
    %cst_212 = arith.constant dense<0.000000e+00> : vector<8x4xf32>
    %322 = tpu.matmul %320, %321, %cst_212 {dimension_numbers = #tpu.dot_dimension_numbers<[1], [0], [0], [1], [0, 0, 1, 1], [], []>} : vector<8x32xf32>, vector<32x4xf32>, vector<8x4xf32> -> vector<8x4xf32>
    %323 = arith.addf %318, %322 : vector<8x4xf32>
    %324 = vector.extract_strided_slice %323 {offsets = [0, 0], sizes = [2, 4], strides = [1, 1]} : vector<8x4xf32> to vector<2x4xf32>
    %c0_213 = arith.constant 0 : index
    %c0_214 = arith.constant 0 : index
    %325 = vector.load %arg11[%c0_213, %c0_214] : memref<1x4xf32, #tpu.memory_space<vmem>>, vector<1x4xf32>
    %326 = vector.broadcast %325 : vector<1x4xf32> to vector<2x4xf32>
    %327 = arith.addf %324, %326 : vector<2x4xf32>
    %c0_215 = arith.constant 0 : index
    %c0_216 = arith.constant 0 : index
    %328 = vector.load %arg12[%c0_215, %c0_216] : memref<2x4xf32, #tpu.memory_space<vmem>>, vector<2x4xf32>
    tpu.vector_store %arg12[%c0_215, %c0_216], %327 {strides = array<i32>} : memref<2x4xf32, #tpu.memory_space<vmem>>, vector<2x4xf32>,
    return
  }
}

</mosaic_0001>

<bundles_post_ra>
// kernel: net_forward.1
= control target key start
LH: loop header
LB: loop body
LE: loop exit
PB: predicated region body
PF: predicated region fallthrough
CT: control target
= control target key end

     0   :  { %v23346_v3 = vmov 0.0|0.0   ;;  %vm17944_vm0 = vmmov 0   ;;  %v23344_v6 = vmov 0.0   ;;  %vm254_vm1 = vcmask 1042432   ;;  %s23331_s0 = inlined_call_operand.vmem [shape: f32[392,75], index: 0, kind: input, shape index: {}]   ;;  %s23332_s1 = inlined_call_operand.vmem [shape: f32[75,16], index: 1, kind: input, shape index: {}]   ;;  %s23333_s2 = inlined_call_operand.vmem [shape: f32[3,16], index: 2, kind: input, shape index: {}]   ;;  %s23334_s3 = inlined_call_operand.vmem [shape: bf16[1400,392], index: 3, kind: input, shape index: {}]   ;;  %s23335_s4 = inlined_call_operand.vmem [shape: f32[400,32], index: 4, kind: input, shape index: {}]   ;;  %s23336_s5 = inlined_call_operand.vmem [shape: f32[3,32], index: 5, kind: input, shape index: {}]   ;;  %s23337_s6 = inlined_call_operand.vmem [shape: bf16[72,50], index: 6, kind: input, shape index: {}]   ;;  %s23338_s7 = inlined_call_operand.vmem [shape: f32[288,32], index: 7, kind: input, shape index: {}]   ;;  %s23339_s8 = inlined_call_operand.vmem [shape: f32[3,32], index: 8, kind: input, shape index: {}]   ;;  %s23340_s9 = inlined_call_operand.vmem [shape: f32[32,8], index: 9, kind: input, shape index: {}]   ;;  %s23341_s10 = inlined_call_operand.vmem [shape: f32[128,4], index: 10, kind: input, shape index: {}]   ;;  %s23342_s11 = inlined_call_operand.vmem [shape: f32[1,4], index: 11, kind: input, shape index: {}]   ;;  %s23343_s12 = inlined_call_operand.hbm [shape: f32[2,4], index: 12, kind: output, shape index: {}]  }
   0x1   :  { %v91_v0 = vld [vmem:[%s23332_s1] sm:$0xff]  ;;  %v92_v1 = vld [vmem:[%s23332_s1 + $0x8] sm:$0xff]  ;;  %v93_v2 = vld [vmem:[%s23332_s1 + $0x10] sm:$0xff]  ;;  %16258 = vmatprep.subr.bf16.mxu0 %v23346_v3  ;;  %15170 = vmatprep.mubr.msk.f32.mxu0 %vm17944_vm0, %v23344_v6 }
   0x2   :  { %v16259_v4 = vpack.c.bf16 %v92_v1, %v91_v0  ;;  %v94_v5 = vld [vmem:[%s23332_s1 + $0x18] sm:$0xff]  ;;  %v95_v8 = vld [vmem:[%s23332_s1 + $0x20] sm:$0xff]  ;;  %v96_v9 = vld [vmem:[%s23332_s1 + $0x28] sm:$0xff] }
   0x3   :  { %v16262_v7 = vpack.c.bf16 %v94_v5, %v93_v2  ;;  %v16265_v10 = vpack.c.bf16 %v96_v9, %v95_v8  ;;  %v97_v11 = vld [vmem:[%s23332_s1 + $0x30] sm:$0xff]  ;;  %v98_v12 = vld [vmem:[%s23332_s1 + $0x38] sm:$0xff]  ;;  %v99_v14 = vld [vmem:[%s23332_s1 + $0x40] sm:$0xff] }
   0x4   :  { %16260 = vmatpush3.bf16.msra.mxu0 %v16259_v4  ;;  %v16268_v13 = vpack.c.bf16 %v98_v12, %v97_v11  ;;  %v100_v15 = vld [vmem:[%s23332_s1 + $0x48] sm:$0x7] }
   0x5   :  { %16261 = vmatprep.subr.bf16.mxu0 %v23346_v3 }
   0x8   :  { %16263 = vmatpush3.bf16.msra.mxu0 %v16262_v7 }
   0x9   :  { %16264 = vmatprep.subr.bf16.mxu0 %v23346_v3 }
   0xc   :  { %16266 = vmatpush3.bf16.msra.mxu0 %v16265_v10 }
   0xd   :  { %16267 = vmatprep.subr.bf16.mxu0 %v23346_v3 }
   0xe   :  { %17 = vsyncpa [#allocation3], 0  ;;  %v16271_v16 = vpack.c.bf16 %v100_v15, %v99_v14  ;;  %vm17946_vm2 = vmmov 1   ;;  %v42_v17 = vld [vmem:[%s23331_s0] sm:$0xff]  ;;  %vm106_vm4 = vcmask 613376   ;;  %v43_v18 = vld [vmem:[%s23331_s0 + $0x8] sm:$0xff] }
   0xf   :  { %vm16272_vm3 = vmpackc.low %vm254_vm1, %vm17946_vm2  ;;  %v44_v19 = vld [vmem:[%s23331_s0 + $0x10] sm:$0xff]  ;;  %v45_v20 = vld [vmem:[%s23331_s0 + $0x18] sm:$0xff]  ;;  %vm568_vm5 = vcmask 130048   ;;  %vm1034_vm6 = vcmask 64512   ;;  %vm10816_vm7 = vcmask 261120   ;;  %vm10828_vm8 = vcmask 254976  }
  0x10   :  { %16269 = vmatpush3.bf16.msra.mxu0 %v16268_v13  ;;  %v46_v21 = vld [vmem:[%s23331_s0 + $0x20] sm:$0xff]  ;;  %v47_v22 = vld [vmem:[%s23331_s0 + $0x28] sm:$0xff]  ;;  %v48_v23 = vld [vmem:[%s23331_s0 + $0x30] sm:$0xff]  ;;  %vm10911_vm9 = vcmask 1041408   ;;  %vm10907_vm10 = vcmask 408576   ;;  %vm12944_vm11 = vcmask 25600  }
  0x11   :  { %16270 = vmatprep.subr.bf16.mxu0 %v23346_v3  ;;  %v49_v24 = vld [vmem:[%s23331_s0 + $0x38] sm:$0xff]  ;;  %v50_v25 = vld [vmem:[%s23331_s0 + $0x40] sm:$0xff]  ;;  %v51_v26 = vld [vmem:[%s23331_s0 + $0x48] sm:$0xff] }
  0x12   :  { %v52_v27 = vld [vmem:[%s23331_s0 + $0x50] sm:$0xff]  ;;  %v53_v28 = vld [vmem:[%s23331_s0 + $0x58] sm:$0xff]  ;;  %v54_v29 = vld [vmem:[%s23331_s0 + $0x60] sm:$0xff] }
  0x13   :  { %v55_v30 = vld [vmem:[%s23331_s0 + $0x68] sm:$0xff]  ;;  %v56_v31 = vld [vmem:[%s23331_s0 + $0x70] sm:$0xff]  ;;  %v57_v32 = vld [vmem:[%s23331_s0 + $0x78] sm:$0xff] }
  0x14   :  { %16273 = vmatpush3.bf16.msk.msra.mxu0 %vm16272_vm3, %v16271_v16  ;;  %v58_v33 = vld [vmem:[%s23331_s0 + $0x80] sm:$0xff]  ;;  %v59_v34 = vld [vmem:[%s23331_s0 + $0x88] sm:$0xff]  ;;  %v60_v35 = vld [vmem:[%s23331_s0 + $0x90] sm:$0xff] }
  0x15   :  { %v61_v36 = vld [vmem:[%s23331_s0 + $0x98] sm:$0xff]  ;;  %v62_v37 = vld [vmem:[%s23331_s0 + $0xa0] sm:$0xff]  ;;  %v63_v38 = vld [vmem:[%s23331_s0 + $0xa8] sm:$0xff] }
  0x16   :  { %v64_v39 = vld [vmem:[%s23331_s0 + $0xb0] sm:$0xff]  ;;  %v65_v40 = vld [vmem:[%s23331_s0 + $0xb8] sm:$0xff]  ;;  %v66_v41 = vld [vmem:[%s23331_s0 + $0xc0] sm:$0xff] }
  0x17   :  { %15171 = vmatmul.mubr.msk.f32.vlgmr.msra.gmra.mrb[0].mxu0 %vm106_vm4, %v42_v17  ;;  %v67_v42 = vld [vmem:[%s23331_s0 + $0xc8] sm:$0xff]  ;;  %v68_v43 = vld [vmem:[%s23331_s0 + $0xd0] sm:$0xff]  ;;  %v69_v44 = vld [vmem:[%s23331_s0 + $0xd8] sm:$0xff] }
  0x18   :  { %15173 = vmatprep.mubr.msk.f32.mxu0 %vm17944_vm0, %v23344_v6  ;;  %v70_v45 = vld [vmem:[%s23331_s0 + $0xe0] sm:$0xff]  ;;  %v71_v46 = vld [vmem:[%s23331_s0 + $0xe8] sm:$0xff]  ;;  %v72_v47 = vld [vmem:[%s23331_s0 + $0xf0] sm:$0xff] }
  0x19   :  { %v73_v48 = vld [vmem:[%s23331_s0 + $0xf8] sm:$0xff]  ;;  %v74_v49 = vld [vmem:[%s23331_s0 + $0x100] sm:$0xff]  ;;  %v75_v50 = vld [vmem:[%s23331_s0 + $0x108] sm:$0xff] }
  0x1a   :  { %v76_v51 = vld [vmem:[%s23331_s0 + $0x110] sm:$0xff]  ;;  %v77_v52 = vld [vmem:[%s23331_s0 + $0x118] sm:$0xff]  ;;  %v78_v53 = vld [vmem:[%s23331_s0 + $0x120] sm:$0xff] }
  0x1b   :  { %15174 = vmatmul.mubr.msk.f32.gmra.mrb[2].mxu0 %vm106_vm4, %v43_v18  ;;  %v79_v54 = vld [vmem:[%s23331_s0 + $0x128] sm:$0xff]  ;;  %v80_v55 = vld [vmem:[%s23331_s0 + $0x130] sm:$0xff]  ;;  %v81_v56 = vld [vmem:[%s23331_s0 + $0x138] sm:$0xff] }
  0x1c   :  { %15176 = vmatprep.mubr.msk.f32.mxu0 %vm17944_vm0, %v23344_v6  ;;  %v82_v57 = vld [vmem:[%s23331_s0 + $0x140] sm:$0xff]  ;;  %v83_v58 = vld [vmem:[%s23331_s0 + $0x148] sm:$0xff]  ;;  %v84_v59 = vld [vmem:[%s23331_s0 + $0x150] sm:$0xff] }
  0x1d   :  { %v85_v60 = vld [vmem:[%s23331_s0 + $0x158] sm:$0xff]  ;;  %v86_v61 = vld [vmem:[%s23331_s0 + $0x160] sm:$0xff]  ;;  %v87_v62 = vld [vmem:[%s23331_s0 + $0x168] sm:$0xff] }
  0x1e   :  { %v88_v63 = vld [vmem:[%s23331_s0 + $0x170] sm:$0xff]  ;;  %v89_v0 = vld [vmem:[%s23331_s0 + $0x178] sm:$0xff]  ;;  %v90_v1 = vld [vmem:[%s23331_s0 + $0x180] sm:$0xff] }
  0x1f   :  { %15177 = vmatmul.mubr.msk.f32.gmra.mrb[4].mxu0 %vm106_vm4, %v44_v19 }
  0x20   :  { %15179 = vmatprep.mubr.msk.f32.mxu0 %vm17944_vm0, %v23344_v6 }
  0x23   :  { %15180 = vmatmul.mubr.msk.f32.gmra.mrb[6].mxu0 %vm106_vm4, %v45_v20 }
  0x24   :  { %15182 = vmatprep.mubr.msk.f32.mxu0 %vm17944_vm0, %v23344_v6 }
  0x27   :  { %15183 = vmatmul.mubr.msk.f32.gmra.mrb[8].mxu0 %vm106_vm4, %v46_v21 }
  0x28   :  { %15185 = vmatprep.mubr.msk.f32.mxu0 %vm17944_vm0, %v23344_v6 }
  0x2b   :  { %15186 = vmatmul.mubr.msk.f32.gmra.mrb[10].mxu0 %vm106_vm4, %v47_v22 }
  0x2c   :  { %15188 = vmatprep.mubr.msk.f32.mxu0 %vm17944_vm0, %v23344_v6 }
  0x2f   :  { %15189 = vmatmul.mubr.msk.f32.gmra.mrb[12].mxu0 %vm106_vm4, %v48_v23 }
  0x30   :  { %15191 = vmatprep.mubr.msk.f32.mxu0 %vm17944_vm0, %v23344_v6 }
  0x33   :  { %15192 = vmatmul.mubr.msk.f32.gmra.mrb[14].mxu0 %vm106_vm4, %v49_v24 }
  0x34   :  { %15194 = vmatprep.mubr.msk.f32.mxu0 %vm17944_vm0, %v23344_v6 }
  0x37   :  { %15195 = vmatmul.mubr.msk.f32.gmra.mrb[16].mxu0 %vm106_vm4, %v50_v25 }
  0x38   :  { %15197 = vmatprep.mubr.msk.f32.mxu0 %vm17944_vm0, %v23344_v6 }
  0x3b   :  { %15198 = vmatmul.mubr.msk.f32.gmra.mrb[18].mxu0 %vm106_vm4, %v51_v26 }
  0x3c   :  { %15200 = vmatprep.mubr.msk.f32.mxu0 %vm17944_vm0, %v23344_v6 }
  0x3f   :  { %15201 = vmatmul.mubr.msk.f32.gmra.mrb[20].mxu0 %vm106_vm4, %v52_v27 }
  0x40   :  { %15203 = vmatprep.mubr.msk.f32.mxu0 %vm17944_vm0, %v23344_v6 }
  0x43   :  { %15204 = vmatmul.mubr.msk.f32.gmra.mrb[22].mxu0 %vm106_vm4, %v53_v28 }
  0x44   :  { %15206 = vmatprep.mubr.msk.f32.mxu0 %vm17944_vm0, %v23344_v6 }
  0x47   :  { %15207 = vmatmul.mubr.msk.f32.gmra.mrb[24].mxu0 %vm106_vm4, %v54_v29 }
  0x48   :  { %15209 = vmatprep.mubr.msk.f32.mxu0 %vm17944_vm0, %v23344_v6 }
  0x4b   :  { %15210 = vmatmul.mubr.msk.f32.gmra.mrb[26].mxu0 %vm106_vm4, %v55_v30 }
  0x4c   :  { %15212 = vmatprep.mubr.msk.f32.mxu0 %vm17944_vm0, %v23344_v6 }
  0x4f   :  { %15213 = vmatmul.mubr.msk.f32.gmra.mrb[28].mxu0 %vm106_vm4, %v56_v31 }
  0x50   :  { %15215 = vmatprep.mubr.msk.f32.mxu0 %vm17944_vm0, %v23344_v6 }
  0x53   :  { %15216 = vmatmul.mubr.msk.f32.gmra.mrb[30].mxu0 %vm106_vm4, %v57_v32 }
  0x54   :  { %15218 = vmatprep.mubr.msk.f32.mxu0 %vm17944_vm0, %v23344_v6 }
  0x57   :  { %15219 = vmatmul.mubr.msk.f32.gmra.mrb[32].mxu0 %vm106_vm4, %v58_v33 }
  0x58   :  { %15221 = vmatprep.mubr.msk.f32.mxu0 %vm17944_vm0, %v23344_v6 }
  0x5b   :  { %15222 = vmatmul.mubr.msk.f32.gmra.mrb[34].mxu0 %vm106_vm4, %v59_v34 }
  0x5c   :  { %15224 = vmatprep.mubr.msk.f32.mxu0 %vm17944_vm0, %v23344_v6 }
  0x5f   :  { %15225 = vmatmul.mubr.msk.f32.gmra.mrb[36].mxu0 %vm106_vm4, %v60_v35 }
  0x60   :  { %15227 = vmatprep.mubr.msk.f32.mxu0 %vm17944_vm0, %v23344_v6 }
  0x63   :  { %15228 = vmatmul.mubr.msk.f32.gmra.mrb[38].mxu0 %vm106_vm4, %v61_v36 }
  0x64   :  { %15230 = vmatprep.mubr.msk.f32.mxu0 %vm17944_vm0, %v23344_v6 }
  0x67   :  { %15231 = vmatmul.mubr.msk.f32.gmra.mrb[40].mxu0 %vm106_vm4, %v62_v37 }
  0x68   :  { %15233 = vmatprep.mubr.msk.f32.mxu0 %vm17944_vm0, %v23344_v6 }
  0x6b   :  { %15234 = vmatmul.mubr.msk.f32.gmra.mrb[42].mxu0 %vm106_vm4, %v63_v38 }
  0x6c   :  { %15236 = vmatprep.mubr.msk.f32.mxu0 %vm17944_vm0, %v23344_v6 }
  0x6f   :  { %15237 = vmatmul.mubr.msk.f32.gmra.mrb[44].mxu0 %vm106_vm4, %v64_v39 }
  0x70   :  { %15239 = vmatprep.mubr.msk.f32.mxu0 %vm17944_vm0, %v23344_v6 }
  0x73   :  { %15240 = vmatmul.mubr.msk.f32.gmra.mrb[46].mxu0 %vm106_vm4, %v65_v40 }
  0x74   :  { %15242 = vmatprep.mubr.msk.f32.mxu0 %vm17944_vm0, %v23344_v6 }
  0x77   :  { %15243 = vmatmul.mubr.msk.f32.gmra.mrb[48].mxu0 %vm106_vm4, %v66_v41 }
  0x78   :  { %15245 = vmatprep.mubr.msk.f32.mxu0 %vm17944_vm0, %v23344_v6 }
  0x7b   :  { %15246 = vmatmul.mubr.msk.f32.gmra.mrb[50].mxu0 %vm106_vm4, %v67_v42  ;;  %v102_v42 = vlaneseq }
  0x7c   :  { %15248 = vmatprep.mubr.msk.f32.mxu0 %vm17944_vm0, %v23344_v6 }
  0x7f   :  { %15249 = vmatmul.mubr.msk.f32.gmra.mrb[52].mxu0 %vm106_vm4, %v68_v43 }
  0x80   :  { %15251 = vmatprep.mubr.msk.f32.mxu0 %vm17944_vm0, %v23344_v6 }
  0x83   :  { %15252 = vmatmul.mubr.msk.f32.gmra.mrb[54].mxu0 %vm106_vm4, %v69_v44 }
  0x84   :  { %15254 = vmatprep.mubr.msk.f32.mxu0 %vm17944_vm0, %v23344_v6 }
  0x87   :  { %15255 = vmatmul.mubr.msk.f32.gmra.mrb[56].mxu0 %vm106_vm4, %v70_v45  ;;  %v18370_v45 = vshrl.u32 %v102_v42, 7 }
  0x88   :  { %15257 = vmatprep.mubr.msk.f32.mxu0 %vm17944_vm0, %v23344_v6 }
  0x8b   :  { %15258 = vmatmul.mubr.msk.f32.gmra.mrb[58].mxu0 %vm106_vm4, %v71_v46 }
  0x8c   :  { %15260 = vmatprep.mubr.msk.f32.mxu0 %vm17944_vm0, %v23344_v6 }
  0x8f   :  { %15261 = vmatmul.mubr.msk.f32.gmra.mrb[60].mxu0 %vm106_vm4, %v72_v47 }
  0x90   :  { %15263 = vmatprep.mubr.msk.f32.mxu0 %vm17944_vm0, %v23344_v6 }
  0x93   :  { %15264 = vmatmul.mubr.msk.f32.gmra.mrb[62].mxu0 %vm106_vm4, %v73_v48  ;;  %v18375_v48 = vsub.s32 0, %v18370_v45 }
  0x94   :  { %15266 = vmatprep.mubr.msk.f32.mxu0 %vm17944_vm0, %v23344_v6 }
  0x95   :  { %23361 = vst [vmem:[#allocation5_spill] sm:$0xff] %v18375_v48 }
  0x97   :  { %15267 = vmatmul.mubr.msk.f32.gmra.mrb[64].mxu0 %vm106_vm4, %v74_v49  ;;  %v18380_v49 = vld [vmem:[%s23333_s2] sm:$0x7] }
  0x98   :  { %15269 = vmatprep.mubr.msk.f32.mxu0 %vm17944_vm0, %v23344_v6 }
  0x9b   :  { %15270 = vmatmul.mubr.msk.f32.gmra.mrb[66].mxu0 %vm106_vm4, %v75_v50 }
  0x9c   :  { %15272 = vmatprep.mubr.msk.f32.mxu0 %vm17944_vm0, %v23344_v6 }
  0x9f   :  { %15273 = vmatmul.mubr.msk.f32.gmra.mrb[68].mxu0 %vm106_vm4, %v76_v51 }
  0xa0   :  { %15275 = vmatprep.mubr.msk.f32.mxu0 %vm17944_vm0, %v23344_v6 }
  0xa3   :  { %15276 = vmatmul.mubr.msk.f32.gmra.mrb[70].mxu0 %vm106_vm4, %v77_v52  ;;  %v18386_v52 = vrot.slane %v18380_v49, %v18375_v48 }
  0xa4   :  { %15278 = vmatprep.mubr.msk.f32.mxu0 %vm17944_vm0, %v23344_v6 }
  0xa7   :  { %15279 = vmatmul.mubr.msk.f32.gmra.mrb[72].mxu0 %vm106_vm4, %v78_v53 }
  0xa8   :  { %15281 = vmatprep.mubr.msk.f32.mxu0 %vm17944_vm0, %v23344_v6 }
  0xab   :  { %15282 = vmatmul.mubr.msk.f32.gmra.mrb[74].mxu0 %vm106_vm4, %v79_v54 }
  0xac   :  { %15284 = vmatprep.mubr.msk.f32.mxu0 %vm17944_vm0, %v23344_v6 }
  0xaf   :  { %15285 = vmatmul.mubr.msk.f32.gmra.mrb[76].mxu0 %vm106_vm4, %v80_v55 }
  0xb0   :  { %15287 = vmatprep.mubr.msk.f32.mxu0 %vm17944_vm0, %v23344_v6 }
  0xb3   :  { %15288 = vmatmul.mubr.msk.f32.gmra.mrb[78].mxu0 %vm106_vm4, %v81_v56 }
  0xb4   :  { %15290 = vmatprep.mubr.msk.f32.mxu0 %vm17944_vm0, %v23344_v6 }
  0xb7   :  { %15291 = vmatmul.mubr.msk.f32.gmra.mrb[80].mxu0 %vm106_vm4, %v82_v57 }
  0xb8   :  { %15293 = vmatprep.mubr.msk.f32.mxu0 %vm17944_vm0, %v23344_v6 }
  0xbb   :  { %15294 = vmatmul.mubr.msk.f32.gmra.mrb[82].mxu0 %vm106_vm4, %v83_v58 }
  0xbc   :  { %15296 = vmatprep.mubr.msk.f32.mxu0 %vm17944_vm0, %v23344_v6 }
  0xbf   :  { %15297 = vmatmul.mubr.msk.f32.gmra.mrb[84].mxu0 %vm106_vm4, %v84_v59 }
  0xc0   :  { %15299 = vmatprep.mubr.msk.f32.mxu0 %vm17944_vm0, %v23344_v6 }
  0xc3   :  { %15300 = vmatmul.mubr.msk.f32.gmra.mrb[86].mxu0 %vm106_vm4, %v85_v60 }
  0xc4   :  { %15302 = vmatprep.mubr.msk.f32.mxu0 %vm17944_vm0, %v23344_v6 }
  0xc7   :  { %15303 = vmatmul.mubr.msk.f32.gmra.mrb[88].mxu0 %vm106_vm4, %v86_v61 }
  0xc8   :  { %15305 = vmatprep.mubr.msk.f32.mxu0 %vm17944_vm0, %v23344_v6 }
  0xcb   :  { %15306 = vmatmul.mubr.msk.f32.gmra.mrb[90].mxu0 %vm106_vm4, %v87_v62 }
  0xcc   :  { %15308 = vmatprep.mubr.msk.f32.mxu0 %vm17944_vm0, %v23344_v6 }
  0xcf   :  { %15309 = vmatmul.mubr.msk.f32.gmra.mrb[92].mxu0 %vm106_vm4, %v88_v63 }
  0xd0   :  { %15311 = vmatprep.mubr.msk.f32.mxu0 %vm17944_vm0, %v23344_v6 }
  0xd3   :  { %15312 = vmatmul.mubr.msk.f32.gmra.mrb[94].mxu0 %vm106_vm4, %v89_v0 }
  0xd4   :  { %15314 = vmatprep.mubr.msk.f32.mxu0 %vm17944_vm0, %v23344_v6 }
  0xd7   :  { %15315 = vmatmul.mubr.msk.f32.gmra.mrb[96].mxu0 %vm106_vm4, %v90_v1 }
  0xea   :  { %v324_v2 = vpop.f32.mrb[0].mxu0 }
  0xeb   :  { %v15172_v4 = vpop.f32.mrb[1].mxu0  ;;  %v18394_v56 = vadd.f32 %v324_v2, %v18386_v52 }
  0xed   :  { %v672_v62 = vmul.f32 %v18394_v56, %v18394_v56  ;;  %v569_v2 = vsel %vm568_vm5, %v18394_v56, 0.0 }
  0xee   :  { %v329_v5 = vpop.f32.mrb[2].mxu0 }
  0xef   :  { %v15175_v7 = vpop.f32.mrb[3].mxu0  ;;  %v18391_v54 = vadd.f32 %v329_v5, %v18386_v52 }
  0xf1   :  { %v673_v59 = vmul.f32 %v18391_v54, %v18391_v54  ;;  %v570_v63 = vsel %vm568_vm5, %v18391_v54, 0.0 }
  0xf2   :  { %v334_v8 = vpop.f32.mrb[4].mxu0 }
  0xf3   :  { %v15178_v9 = vpop.f32.mrb[5].mxu0  ;;  %v18397_v57 = vadd.f32 %v334_v8, %v18386_v52  ;;  %v722_v5 = vsel %vm568_vm5, %v673_v59, 0.0 }
  0xf5   :  { %v674_v0 = vmul.f32 %v18397_v57, %v18397_v57  ;;  %v572_v7 = vsel %vm568_vm5, %v18397_v57, 0.0 }
  0xf6   :  { %v339_v10 = vpop.f32.mrb[6].mxu0 }
  0xf7   :  { %v15181_v11 = vpop.f32.mrb[7].mxu0  ;;  %v18404_v60 = vadd.f32 %v339_v10, %v18386_v52 }
  0xf8   :  { %v721_v11 = vsel %vm568_vm5, %v672_v62, 0.0 }
  0xf9   :  { %v675_v8 = vmul.f32 %v18404_v60, %v18404_v60 }
  0xfa   :  { %v344_v12 = vpop.f32.mrb[8].mxu0 }
  0xfb   :  { %v15184_v13 = vpop.f32.mrb[9].mxu0  ;;  %v18413_v1 = vadd.f32 %v344_v12, %v18386_v52  ;;  %v571_v12 = vadd.f32 %v570_v63, %v569_v2 }
  0xfc   :  { %v724_v13 = vsel %vm568_vm5, %v674_v0, 0.0 }
  0xfe   :  { %v349_v14 = vpop.f32.mrb[10].mxu0 }
  0xff   :  { %v15187_v15 = vpop.f32.mrb[11].mxu0  ;;  %v18425_v9 = vadd.f32 %v349_v14, %v18386_v52 }
 0x100   :  { %v574_v15 = vsel %vm568_vm5, %v18404_v60, 0.0 }
 0x102   :  { %v18342_v16 = vpop.f32.mrb[12].mxu0 }
 0x103   :  { %v15190_v17 = vpop.f32.mrb[13].mxu0 }
 0x104   :  { %v676_v17 = vmul.f32 %v18413_v1, %v18413_v1 }
 0x106   :  { %v18344_v18 = vpop.f32.mrb[14].mxu0 }
 0x107   :  { %v15193_v19 = vpop.f32.mrb[15].mxu0 }
 0x108   :  { %v18435_v19 = vadd.f32 %v18342_v16, %v18386_v52 }
 0x10a   :  { %v18346_v20 = vpop.f32.mrb[16].mxu0 }
 0x10b   :  { %v15196_v21 = vpop.f32.mrb[17].mxu0  ;;  %v18455_v42 = vadd.f32 %v18346_v20, %v18386_v52 }
 0x10c   :  { %v723_v21 = vadd.f32 %v722_v5, %v721_v11 }
 0x10d   :  { %v680_v5 = vmul.f32 %v18455_v42, %v18455_v42 }
 0x10e   :  { %v18348_v22 = vpop.f32.mrb[18].mxu0 }
 0x10f   :  { %v15199_v23 = vpop.f32.mrb[19].mxu0 }
 0x110   :  { %v573_v23 = vadd.f32 %v572_v7, %v571_v12  ;;  %v584_v12 = vsel %vm568_vm5, %v18455_v42, 0.0 }
 0x112   :  { %v18350_v24 = vpop.f32.mrb[20].mxu0  ;;  %v575_v16 = vadd.f32 %v574_v15, %v573_v23  ;;  %v736_v23 = vsel %vm568_vm5, %v680_v5, 0.0 }
 0x113   :  { %v15202_v25 = vpop.f32.mrb[21].mxu0  ;;  %v18475_v7 = vadd.f32 %v18350_v24, %v18386_v52 }
 0x114   :  { %v726_v25 = vsel %vm568_vm5, %v675_v8, 0.0 }
 0x116   :  { %v18352_v26 = vpop.f32.mrb[22].mxu0 }
 0x117   :  { %v15205_v27 = vpop.f32.mrb[23].mxu0  ;;  %v18486_v15 = vadd.f32 %v18352_v26, %v18386_v52 }
 0x118   :  { %v576_v27 = vsel %vm568_vm5, %v18413_v1, 0.0 }
 0x11a   :  { %v18354_v28 = vpop.f32.mrb[24].mxu0 }
 0x11b   :  { %v15208_v29 = vpop.f32.mrb[25].mxu0 }
 0x11c   :  { %v677_v29 = vmul.f32 %v18425_v9, %v18425_v9 }
 0x11e   :  { %v18356_v30 = vpop.f32.mrb[26].mxu0 }
 0x11f   :  { %v15211_v31 = vpop.f32.mrb[27].mxu0 }
 0x120   :  { %v18446_v31 = vadd.f32 %v18344_v18, %v18386_v52  ;;  %v730_v18 = vsel %vm568_vm5, %v677_v29, 0.0  ;;  %v18495_v29 = vadd.f32 %v18354_v28, %v18386_v52 }
 0x122   :  { %v18358_v32 = vpop.f32.mrb[28].mxu0  ;;  %v679_v59 = vmul.f32 %v18446_v31, %v18446_v31  ;;  %v582_v2 = vsel %vm568_vm5, %v18446_v31, 0.0 }
 0x123   :  { %v15214_v33 = vpop.f32.mrb[29].mxu0 }
 0x126   :  { %v18360_v34 = vpop.f32.mrb[30].mxu0 }
 0x127   :  { %v15217_v35 = vpop.f32.mrb[31].mxu0 }
 0x128   :  { %v725_v35 = vadd.f32 %v724_v13, %v723_v21 }
 0x12a   :  { %v18362_v36 = vpop.f32.mrb[32].mxu0 }
 0x12b   :  { %v15220_v37 = vpop.f32.mrb[33].mxu0 }
 0x12c   :  { %v728_v37 = vsel %vm568_vm5, %v676_v17, 0.0 }
 0x12e   :  { %v18364_v38 = vpop.f32.mrb[34].mxu0 }
 0x12f   :  { %v15223_v39 = vpop.f32.mrb[35].mxu0 }
 0x130   :  { %v578_v39 = vsel %vm568_vm5, %v18425_v9, 0.0 }
 0x132   :  { %v18366_v40 = vpop.f32.mrb[36].mxu0 }
 0x133   :  { %v15226_v41 = vpop.f32.mrb[37].mxu0 }
 0x134   :  { %v678_v41 = vmul.f32 %v18435_v19, %v18435_v19 }
 0x136   :  { %v18368_v43 = vpop.f32.mrb[38].mxu0  ;;  %v732_v0 = vsel %vm568_vm5, %v678_v41, 0.0  ;;  %v18506_v41 = vadd.f32 %v18356_v30, %v18386_v52 }
 0x137   :  { %v15229_v44 = vpop.f32.mrb[39].mxu0 }
 0x138   :  { %v727_v44 = vadd.f32 %v726_v25, %v725_v35  ;;  %v685_v5 = vmul.f32 %v18506_v41, %v18506_v41 }
 0x13a   :  { %v18372_v46 = vpop.f32.mrb[40].mxu0  ;;  %v729_v63 = vadd.f32 %v728_v37, %v727_v44  ;;  %v588_v37 = vsel %vm568_vm5, %v18475_v7, 0.0 }
 0x13b   :  { %v15232_v47 = vpop.f32.mrb[41].mxu0 }
 0x13c   :  { %v577_v47 = vadd.f32 %v576_v27, %v575_v16  ;;  %v731_v8 = vadd.f32 %v730_v18, %v729_v63  ;;  %v682_v27 = vmul.f32 %v18475_v7, %v18475_v7 }
 0x13e   :  { %v18382_v50 = vpop.f32.mrb[42].mxu0  ;;  %v579_v20 = vadd.f32 %v578_v39, %v577_v47  ;;  %v733_v21 = vadd.f32 %v732_v0, %v731_v8  ;;  %v683_v39 = vmul.f32 %v18486_v15, %v18486_v15  ;;  %v740_v18 = vsel %vm568_vm5, %v682_v27, 0.0 }
 0x13f   :  { %v15235_v51 = vpop.f32.mrb[43].mxu0  ;;  %v18526_v8 = vadd.f32 %v18360_v34, %v18386_v52  ;;  %v746_v34 = vsel %vm568_vm5, %v685_v5, 0.0 }
 0x140   :  { %v742_v30 = vsel %vm568_vm5, %v683_v39, 0.0 }
 0x142   :  { %v18388_v53 = vpop.f32.mrb[44].mxu0 }
 0x143   :  { %v15238_v55 = vpop.f32.mrb[45].mxu0 }
 0x144   :  { %v580_v55 = vsel %vm568_vm5, %v18435_v19, 0.0 }
 0x146   :  { %v18399_v58 = vpop.f32.mrb[46].mxu0 }
 0x147   :  { %v15241_v61 = vpop.f32.mrb[47].mxu0 }
 0x148   :  { %v18466_v61 = vadd.f32 %v18348_v22, %v18386_v52  ;;  %v734_v22 = vsel %vm568_vm5, %v679_v59, 0.0  ;;  %v684_v59 = vmul.f32 %v18495_v29, %v18495_v29 }
 0x14a   :  { %v18417_v4 = vpop.f32.mrb[48].mxu0  ;;  %v681_v13 = vmul.f32 %v18466_v61, %v18466_v61  ;;  %v586_v25 = vsel %vm568_vm5, %v18466_v61, 0.0 }
 0x14b   :  { %v15244_v10 = vpop.f32.mrb[49].mxu0 }
 0x14c   :  { %v581_v10 = vadd.f32 %v580_v55, %v579_v20  ;;  %v738_v26 = vsel %vm568_vm5, %v681_v13, 0.0  ;;  %v590_v55 = vsel %vm568_vm5, %v18486_v15, 0.0  ;;  %v594_v13 = vsel %vm568_vm5, %v18506_v41, 0.0 }
 0x14e   :  { %v18437_v14 = vpop.f32.mrb[50].mxu0  ;;  %v583_v24 = vadd.f32 %v582_v2, %v581_v10  ;;  %v592_v2 = vsel %vm568_vm5, %v18495_v29, 0.0 }
 0x14f   :  { %v15247_v33 = vpop.f32.mrb[51].mxu0 }
 0x150   :  { %v735_v33 = vadd.f32 %v734_v22, %v733_v21  ;;  %v585_v35 = vadd.f32 %v584_v12, %v583_v24  ;;  %v744_v12 = vsel %vm568_vm5, %v684_v59, 0.0  ;;  %v18535_v21 = vadd.f32 %v18362_v36, %v18386_v52 }
 0x152   :  { %v18457_v51 = vpop.f32.mrb[52].mxu0  ;;  %v737_v47 = vadd.f32 %v736_v23, %v735_v33  ;;  %v587_v28 = vadd.f32 %v586_v25, %v585_v35  ;;  %v687_v33 = vmul.f32 %v18526_v8, %v18526_v8  ;;  %v18546_v35 = vadd.f32 %v18364_v38, %v18386_v52 }
 0x153   :  { %v15250_v62 = vpop.f32.mrb[53].mxu0 }
 0x154   :  { %v18515_v62 = vadd.f32 %v18358_v32, %v18386_v52  ;;  %v739_v63 = vadd.f32 %v738_v26, %v737_v47  ;;  %v589_v20 = vadd.f32 %v588_v37, %v587_v28  ;;  %v688_v47 = vmul.f32 %v18535_v21, %v18535_v21 }
 0x155   :  { %v18555_v28 = vadd.f32 %v18366_v40, %v18386_v52  ;;  %v750_v38 = vsel %vm568_vm5, %v687_v33, 0.0 }
 0x156   :  { %v18477_v11 = vpop.f32.mrb[54].mxu0  ;;  %v741_v22 = vadd.f32 %v740_v18, %v739_v63  ;;  %v591_v32 = vadd.f32 %v590_v55, %v589_v20  ;;  %v596_v27 = vsel %vm568_vm5, %v18515_v62, 0.0  ;;  %v600_v63 = vsel %vm568_vm5, %v18535_v21, 0.0 }
 0x157   :  { %v15253_v17 = vpop.f32.mrb[55].mxu0  ;;  %v689_v20 = vmul.f32 %v18546_v35, %v18546_v35 }
 0x158   :  { %v686_v17 = vmul.f32 %v18515_v62, %v18515_v62  ;;  %v743_v24 = vadd.f32 %v742_v30, %v741_v22  ;;  %v593_v23 = vadd.f32 %v592_v2, %v591_v32  ;;  %v18566_v30 = vadd.f32 %v18368_v43, %v18386_v52 }
 0x159   :  { %v602_v22 = vsel %vm568_vm5, %v18546_v35, 0.0  ;;  %v690_v32 = vmul.f32 %v18555_v28, %v18555_v28  ;;  %v754_v43 = vsel %vm568_vm5, %v689_v20, 0.0  ;;  %v18606_v20 = vadd.f32 %v18399_v58, %v18386_v52 }
 0x15a   :  { %v18497_v16 = vpop.f32.mrb[56].mxu0  ;;  %v745_v37 = vadd.f32 %v744_v12, %v743_v24  ;;  %v595_v36 = vadd.f32 %v594_v13, %v593_v23  ;;  %v748_v39 = vsel %vm568_vm5, %v686_v17, 0.0  ;;  %v18575_v12 = vadd.f32 %v18372_v46, %v18386_v52 }
 0x15b   :  { %v15256_v44 = vpop.f32.mrb[57].mxu0  ;;  %v604_v23 = vsel %vm568_vm5, %v18555_v28, 0.0 }
 0x15c   :  { %v598_v44 = vsel %vm568_vm5, %v18526_v8, 0.0  ;;  %v747_v18 = vadd.f32 %v746_v34, %v745_v37  ;;  %v597_v55 = vadd.f32 %v596_v27, %v595_v36  ;;  %v691_v34 = vmul.f32 %v18566_v30, %v18566_v30 }
 0x15d   :  { %v18586_v27 = vadd.f32 %v18382_v50, %v18386_v52  ;;  %v756_v37 = vsel %vm568_vm5, %v690_v32, 0.0  ;;  %v606_v36 = vsel %vm568_vm5, %v18566_v30, 0.0  ;;  %v18615_v32 = vadd.f32 %v18417_v4, %v18386_v52 }
 0x15e   :  { %v18517_v0 = vpop.f32.mrb[58].mxu0  ;;  %v749_v5 = vadd.f32 %v748_v39, %v747_v18  ;;  %v599_v40 = vadd.f32 %v598_v44, %v597_v55  ;;  %v692_v39 = vmul.f32 %v18575_v12, %v18575_v12  ;;  %v18595_v44 = vadd.f32 %v18388_v53, %v18386_v52 }
 0x15f   :  { %v15259_v10 = vpop.f32.mrb[59].mxu0  ;;  %v758_v50 = vsel %vm568_vm5, %v691_v34, 0.0  ;;  %v695_v34 = vmul.f32 %v18606_v20, %v18606_v20 }
 0x160   :  { %v752_v10 = vsel %vm568_vm5, %v688_v47, 0.0  ;;  %v751_v13 = vadd.f32 %v750_v38, %v749_v5  ;;  %v601_v17 = vadd.f32 %v600_v63, %v599_v40  ;;  %v608_v38 = vsel %vm568_vm5, %v18575_v12, 0.0 }
 0x161   :  { %v693_v63 = vmul.f32 %v18586_v27, %v18586_v27  ;;  %v760_v40 = vsel %vm568_vm5, %v692_v39, 0.0  ;;  %v696_v39 = vmul.f32 %v18615_v32, %v18615_v32 }
 0x162   :  { %v18537_v25 = vpop.f32.mrb[60].mxu0  ;;  %v603_v46 = vadd.f32 %v602_v22, %v601_v17  ;;  %v694_v22 = vmul.f32 %v18595_v44, %v18595_v44 }
 0x163   :  { %v15262_v26 = vpop.f32.mrb[61].mxu0  ;;  %v762_v58 = vsel %vm568_vm5, %v693_v63, 0.0  ;;  %v616_v63 = vsel %vm568_vm5, %v18615_v32, 0.0 }
 0x164   :  { %v753_v26 = vadd.f32 %v752_v10, %v751_v13  ;;  %v605_v18 = vadd.f32 %v604_v23, %v603_v46  ;;  %v610_v10 = vsel %vm568_vm5, %v18586_v27, 0.0  ;;  %v612_v23 = vsel %vm568_vm5, %v18595_v44, 0.0 }
 0x166   :  { %v18557_v59 = vpop.f32.mrb[62].mxu0  ;;  %v755_v47 = vadd.f32 %v754_v43, %v753_v26  ;;  %v607_v53 = vadd.f32 %v606_v36, %v605_v18  ;;  %v614_v36 = vsel %vm568_vm5, %v18606_v20, 0.0 }
 0x167   :  { %v15265_v2 = vpop.f32.mrb[63].mxu0 }
 0x168   :  { %v757_v5 = vadd.f32 %v756_v37, %v755_v47  ;;  %v609_v17 = vadd.f32 %v608_v38, %v607_v53  ;;  %v764_v37 = vsel %vm568_vm5, %v694_v22, 0.0  ;;  %v18635_v47 = vadd.f32 %v18457_v51, %v18386_v52 }
 0x169   :  { %v768_v51 = vsel %vm568_vm5, %v696_v39, 0.0 }
 0x16a   :  { %v18577_v24 = vpop.f32.mrb[64].mxu0  ;;  %v759_v13 = vadd.f32 %v758_v50, %v757_v5  ;;  %v611_v4 = vadd.f32 %v610_v10, %v609_v17  ;;  %v18644_v5 = vadd.f32 %v18477_v11, %v18386_v52  ;;  %v18653_v17 = vadd.f32 %v18497_v16, %v18386_v52 }
 0x16b   :  { %v15268_v33 = vpop.f32.mrb[65].mxu0 }
 0x16c   :  { %v18626_v33 = vadd.f32 %v18437_v14, %v18386_v52  ;;  %v761_v46 = vadd.f32 %v760_v40, %v759_v13  ;;  %v613_v50 = vadd.f32 %v612_v23, %v611_v4  ;;  %v766_v14 = vsel %vm568_vm5, %v695_v34, 0.0 }
 0x16d   :  { %v698_v13 = vmul.f32 %v18635_v47, %v18635_v47  ;;  %v18662_v4 = vadd.f32 %v18517_v0, %v18386_v52 }
 0x16e   :  { %v18597_v55 = vpop.f32.mrb[66].mxu0  ;;  %v763_v18 = vadd.f32 %v762_v58, %v761_v46  ;;  %v615_v10 = vadd.f32 %v614_v36, %v613_v50  ;;  %v618_v22 = vsel %vm568_vm5, %v18626_v33, 0.0  ;;  %v699_v46 = vmul.f32 %v18644_v5, %v18644_v5 }
 0x16f   :  { %v15271_v2 = vpop.f32.mrb[67].mxu0  ;;  %v772_v16 = vsel %vm568_vm5, %v698_v13, 0.0  ;;  %v700_v50 = vmul.f32 %v18653_v17, %v18653_v17 }
 0x170   :  { %v697_v2 = vmul.f32 %v18626_v33, %v18626_v33  ;;  %v765_v40 = vadd.f32 %v764_v37, %v763_v18  ;;  %v617_v23 = vadd.f32 %v616_v63, %v615_v10  ;;  %v622_v18 = vsel %vm568_vm5, %v18644_v5, 0.0 }
 0x171   :  { %v774_v0 = vsel %vm568_vm5, %v699_v46, 0.0  ;;  %v701_v10 = vmul.f32 %v18662_v4, %v18662_v4 }
 0x172   :  { %v18617_v43 = vpop.f32.mrb[68].mxu0  ;;  %v767_v58 = vadd.f32 %v766_v14, %v765_v40  ;;  %v770_v11 = vsel %vm568_vm5, %v697_v2, 0.0  ;;  %v619_v39 = vadd.f32 %v618_v22, %v617_v23  ;;  %v18671_v14 = vadd.f32 %v18537_v25, %v18386_v52 }
 0x173   :  { %v15274_v26 = vpop.f32.mrb[69].mxu0  ;;  %v624_v40 = vsel %vm568_vm5, %v18653_v17, 0.0  ;;  %v776_v25 = vsel %vm568_vm5, %v700_v50, 0.0  ;;  %v626_v23 = vsel %vm568_vm5, %v18662_v4, 0.0 }
 0x174   :  { %v620_v26 = vsel %vm568_vm5, %v18635_v47, 0.0  ;;  %v769_v36 = vadd.f32 %v768_v51, %v767_v58  ;;  %v18680_v51 = vadd.f32 %v18557_v59, %v18386_v52  ;;  %v778_v59 = vsel %vm568_vm5, %v701_v10, 0.0 }
 0x175   :  { %v621_v2 = vadd.f32 %v620_v26, %v619_v39  ;;  %v18689_v26 = vadd.f32 %v18577_v24, %v18386_v52  ;;  %v628_v39 = vsel %vm568_vm5, %v18671_v14, 0.0  ;;  %v18707_v10 = vadd.f32 %v18617_v43, %v18386_v52 }
 0x176   :  { %v499_v38 = vpop.f32.mrb[70].mxu0  ;;  %v771_v63 = vadd.f32 %v770_v11, %v769_v36  ;;  %v702_v11 = vmul.f32 %v18671_v14, %v18671_v14 }
 0x177   :  { %v15277_v53 = vpop.f32.mrb[71].mxu0  ;;  %v623_v58 = vadd.f32 %v622_v18, %v621_v2  ;;  %v18698_v18 = vadd.f32 %v18597_v55, %v18386_v52 }
 0x178   :  { %v773_v13 = vadd.f32 %v772_v16, %v771_v63  ;;  %v703_v16 = vmul.f32 %v18680_v51, %v18680_v51  ;;  %v780_v24 = vsel %vm568_vm5, %v702_v11, 0.0  ;;  %v18715_v11 = vadd.f32 %v499_v38, %v18386_v52 }
 0x17a   :  { %v504_v34 = vpop.f32.mrb[72].mxu0  ;;  %v775_v46 = vadd.f32 %v774_v0, %v773_v13  ;;  %v630_v0 = vsel %vm568_vm5, %v18680_v51, 0.0  ;;  %v782_v55 = vsel %vm568_vm5, %v703_v16, 0.0 }
 0x17b   :  { %v15280_v37 = vpop.f32.mrb[73].mxu0  ;;  %v18723_v16 = vadd.f32 %v504_v34, %v18386_v52 }
 0x17c   :  { %v625_v37 = vadd.f32 %v624_v40, %v623_v58  ;;  %v777_v63 = vadd.f32 %v776_v25, %v775_v46  ;;  %v704_v40 = vmul.f32 %v18689_v26, %v18689_v26  ;;  %v632_v25 = vsel %vm568_vm5, %v18689_v26, 0.0 }
 0x17e   :  { %v509_v53 = vpop.f32.mrb[74].mxu0  ;;  %v627_v2 = vadd.f32 %v626_v23, %v625_v37  ;;  %v705_v23 = vmul.f32 %v18698_v18, %v18698_v18  ;;  %v784_v43 = vsel %vm568_vm5, %v704_v40, 0.0 }
 0x17f   :  { %v15283_v22 = vpop.f32.mrb[75].mxu0  ;;  %v18731_v40 = vadd.f32 %v509_v53, %v18386_v52 }
 0x180   :  { %v779_v22 = vadd.f32 %v778_v59, %v777_v63  ;;  %v629_v13 = vadd.f32 %v628_v39, %v627_v2  ;;  %v634_v59 = vsel %vm568_vm5, %v18698_v18, 0.0  ;;  %v706_v39 = vmul.f32 %v18707_v10, %v18707_v10 }
 0x181   :  { %v786_v38 = vsel %vm568_vm5, %v705_v23, 0.0 }
 0x182   :  { %v514_v36 = vpop.f32.mrb[76].mxu0  ;;  %v781_v37 = vadd.f32 %v780_v24, %v779_v22  ;;  %v636_v24 = vsel %vm568_vm5, %v18707_v10, 0.0  ;;  %v788_v34 = vsel %vm568_vm5, %v706_v39, 0.0 }
 0x183   :  { %v15286_v50 = vpop.f32.mrb[77].mxu0  ;;  %v18739_v23 = vadd.f32 %v514_v36, %v18386_v52 }
 0x184   :  { %v631_v50 = vadd.f32 %v630_v0, %v629_v13  ;;  %v783_v63 = vadd.f32 %v782_v55, %v781_v37  ;;  %v707_v0 = vmul.f32 %v18715_v11, %v18715_v11  ;;  %v638_v55 = vsel %vm568_vm5, %v18715_v11, 0.0 }
 0x185   :  { %23362 = vst [vmem:[#allocation6_spill] sm:$0xff] %v18739_v23 }
 0x186   :  { %v519_v58 = vpop.f32.mrb[78].mxu0  ;;  %v633_v2 = vadd.f32 %v632_v25, %v631_v50  ;;  %v785_v13 = vadd.f32 %v784_v43, %v783_v63  ;;  %v708_v25 = vmul.f32 %v18723_v16, %v18723_v16  ;;  %v790_v53 = vsel %vm568_vm5, %v707_v0, 0.0 }
 0x187   :  { %v15289_v46 = vpop.f32.mrb[79].mxu0  ;;  %v640_v43 = vsel %vm568_vm5, %v18723_v16, 0.0  ;;  %v18747_v39 = vadd.f32 %v519_v58, %v18386_v52 }
 0x188   :  { %v635_v46 = vadd.f32 %v634_v59, %v633_v2  ;;  %v787_v37 = vadd.f32 %v786_v38, %v785_v13  ;;  %v709_v59 = vmul.f32 %v18731_v40, %v18731_v40  ;;  %v792_v36 = vsel %vm568_vm5, %v708_v25, 0.0 }
 0x189   :  { %23363 = vst [vmem:[#allocation7_spill] sm:$0xff] %v18747_v39  ;;  %v642_v38 = vsel %vm568_vm5, %v18731_v40, 0.0 }
 0x18a   :  { %v524_v6 = vpop.f32.mrb[80].mxu0  ;;  %v637_v50 = vadd.f32 %v636_v24, %v635_v46  ;;  %v789_v2 = vadd.f32 %v788_v34, %v787_v37  ;;  %v710_v24 = vmul.f32 %v18739_v23, %v18739_v23  ;;  %v794_v58 = vsel %vm568_vm5, %v709_v59, 0.0 }
 0x18b   :  { %v15292_v22 = vpop.f32.mrb[81].mxu0  ;;  %v18755_v0 = vadd.f32 %v524_v6, %v18386_v52  ;;  %v644_v34 = vsel %vm568_vm5, %v18739_v23, 0.0 }
 0x18c   :  { %v639_v22 = vadd.f32 %v638_v55, %v637_v50  ;;  %v791_v13 = vadd.f32 %v790_v53, %v789_v2  ;;  %v711_v55 = vmul.f32 %v18747_v39, %v18747_v39  ;;  %v796_v6 = vsel %vm568_vm5, %v710_v24, 0.0 }
 0x18d   :  { %23364 = vst [vmem:[#allocation8_spill] sm:$0xff] %v18755_v0  ;;  %v646_v53 = vsel %vm568_vm5, %v18747_v39, 0.0 }
 0x18e   :  { %v529_v3 = vpop.f32.mrb[82].mxu0  ;;  %v641_v46 = vadd.f32 %v640_v43, %v639_v22  ;;  %v793_v50 = vadd.f32 %v792_v36, %v791_v13  ;;  %v712_v43 = vmul.f32 %v18755_v0, %v18755_v0  ;;  %v648_v36 = vsel %vm568_vm5, %v18755_v0, 0.0 }
 0x18f   :  { %v15295_v63 = vpop.f32.mrb[83].mxu0  ;;  %v18763_v25 = vadd.f32 %v529_v3, %v18386_v52  ;;  %v798_v3 = vsel %vm568_vm5, %v711_v55, 0.0 }
 0x190   :  { %v643_v63 = vadd.f32 %v642_v38, %v641_v46  ;;  %v795_v2 = vadd.f32 %v794_v58, %v793_v50 }
 0x191   :  { %23365 = vst [vmem:[#allocation9_spill] sm:$0xff] %v18763_v25  ;;  %v713_v38 = vmul.f32 %v18763_v25, %v18763_v25  ;;  %v650_v58 = vsel %vm568_vm5, %v18763_v25, 0.0 }
 0x192   :  { %v534_v48 = vpop.f32.mrb[84].mxu0  ;;  %v645_v22 = vadd.f32 %v644_v34, %v643_v63  ;;  %v797_v46 = vadd.f32 %v796_v6, %v795_v2  ;;  %v18797_v2 = vld [vmem:[%s23334_s3] sm:$0xff] }
 0x193   :  { %v15298_v37 = vpop.f32.mrb[85].mxu0  ;;  %v18771_v59 = vadd.f32 %v534_v48, %v18386_v52  ;;  %v800_v48 = vsel %vm568_vm5, %v712_v43, 0.0  ;;  %v802_v0 = vsel %vm568_vm5, %v713_v38, 0.0  ;;  %23369 = vst [vmem:[#allocation13_spill] sm:$0xff] %v18797_v2 }
 0x194   :  { %v647_v37 = vadd.f32 %v646_v53, %v645_v22  ;;  %v799_v55 = vadd.f32 %v798_v3, %v797_v46 }
 0x195   :  { %23366 = vst [vmem:[#allocation10_spill] sm:$0xff] %v18771_v59  ;;  %v714_v34 = vmul.f32 %v18771_v59, %v18771_v59 }
 0x196   :  { %v539_v23 = vpop.f32.mrb[86].mxu0  ;;  %v649_v50 = vadd.f32 %v648_v36, %v647_v37  ;;  %v801_v22 = vadd.f32 %v800_v48, %v799_v55  ;;  %v1007_v36 = vunpack.c.h.bf16 %v18797_v2 }
 0x197   :  { %v18779_v24 = vadd.f32 %v539_v23, %v18386_v52  ;;  %v15301_v13 = vpop.f32.mrb[87].mxu0  ;;  %v652_v23 = vsel %vm568_vm5, %v18771_v59, 0.0  ;;  %v804_v38 = vsel %vm568_vm5, %v714_v34, 0.0 }
 0x198   :  { %v651_v3 = vadd.f32 %v650_v58, %v649_v50  ;;  %v803_v37 = vadd.f32 %v802_v0, %v801_v22  ;;  %1120 = vmatprep.mubr.f32.mxu1 %v1007_v36 }
 0x199   :  { %23367 = vst [vmem:[#allocation11_spill] sm:$0xff] %v18779_v24  ;;  %v715_v6 = vmul.f32 %v18779_v24, %v18779_v24  ;;  %v654_v13 = vsel %vm568_vm5, %v18779_v24, 0.0 }
 0x19a   :  { %v544_v63 = vpop.f32.mrb[88].mxu0  ;;  %v805_v34 = vadd.f32 %v804_v38, %v803_v37 }
 0x19b   :  { %v18792_v53 = vadd.f32 %v544_v63, %v18386_v52  ;;  %v15304_v43 = vpop.f32.mrb[89].mxu0  ;;  %v653_v63 = vadd.f32 %v652_v23, %v651_v3  ;;  %v806_v59 = vsel %vm568_vm5, %v715_v6, 0.0 }
 0x19c   :  { %v807_v23 = vadd.f32 %v806_v59, %v805_v34 }
 0x19d   :  { %23368 = vst [vmem:[#allocation12_spill] sm:$0xff] %v18792_v53  ;;  %v716_v46 = vmul.f32 %v18792_v53, %v18792_v53  ;;  %v656_v48 = vsel %vm568_vm5, %v18792_v53, 0.0  ;;  %v655_v50 = vadd.f32 %v654_v13, %v653_v63 }
 0x19e   :  { %v549_v43 = vpop.f32.mrb[90].mxu0 }
 0x19f   :  { %v18809_v58 = vadd.f32 %v549_v43, %v18386_v52  ;;  %v15307_v55 = vpop.f32.mrb[91].mxu0  ;;  %v808_v2 = vsel %vm568_vm5, %v716_v46, 0.0  ;;  %v657_v22 = vadd.f32 %v656_v48, %v655_v50 }
 0x1a0   :  { %v809_v55 = vadd.f32 %v808_v2, %v807_v23 }
 0x1a1   :  { %23370 = vst [vmem:[#allocation14_spill] sm:$0xff] %v18809_v58  ;;  %v658_v24 = vsel %vm568_vm5, %v18809_v58, 0.0  ;;  %v717_v0 = vmul.f32 %v18809_v58, %v18809_v58 }
 0x1a2   :  { %v554_v6 = vpop.f32.mrb[92].mxu0  ;;  %v659_v38 = vadd.f32 %v658_v24, %v657_v22 }
 0x1a3   :  { %v810_v3 = vsel %vm568_vm5, %v717_v0, 0.0  ;;  %v18818_v36 = vadd.f32 %v554_v6, %v18386_v52  ;;  %v15310_v43 = vpop.f32.mrb[93].mxu0 }
 0x1a4   :  { %v811_v37 = vadd.f32 %v810_v3, %v809_v55 }
 0x1a5   :  { %23371 = vst [vmem:[#allocation15_spill] sm:$0xff] %v18818_v36  ;;  %v660_v13 = vsel %vm568_vm5, %v18818_v36, 0.0  ;;  %v718_v46 = vmul.f32 %v18818_v36, %v18818_v36 }
 0x1a6   :  { %v661_v63 = vadd.f32 %v660_v13, %v659_v38  ;;  %v559_v58 = vpop.f32.mrb[94].mxu0 }
 0x1a7   :  { %v812_v59 = vsel %vm568_vm5, %v718_v46, 0.0  ;;  %v18826_v48 = vadd.f32 %v559_v58, %v18386_v52  ;;  %v15313_v34 = vpop.f32.mrb[95].mxu0 }
 0x1a8   :  { %v813_v50 = vadd.f32 %v812_v59, %v811_v37 }
 0x1a9   :  { %23372 = vst [vmem:[#allocation16_spill] sm:$0xff] %v18826_v48  ;;  %v662_v2 = vsel %vm568_vm5, %v18826_v48, 0.0  ;;  %v719_v24 = vmul.f32 %v18826_v48, %v18826_v48 }
 0x1aa   :  { %v663_v0 = vadd.f32 %v662_v2, %v661_v63  ;;  %v564_v23 = vpop.f32.mrb[96].mxu0 }
 0x1ab   :  { %v814_v22 = vsel %vm568_vm5, %v719_v24, 0.0  ;;  %v565_v6 = vadd.f32 %v564_v23, %v18386_v52  ;;  %v15316_v3 = vpop.f32.mrb[97].mxu0 }
 0x1ac   :  { %v815_v43 = vadd.f32 %v814_v22, %v813_v50 }
 0x1ad   :  { %v664_v55 = vsel %vm568_vm5, %v565_v6, 0.0  ;;  %v720_v58 = vmul.f32 %v565_v6, %v565_v6 }
 0x1ae   :  { %v665_v38 = vadd.f32 %v664_v55, %v663_v0 }
 0x1af   :  { %v816_v13 = vsel %vm568_vm5, %v720_v58, 0.0 }
 0x1b0   :  { %v666_v46 = vrot.slane %v665_v38, 4  ;;  %v817_v37 = vadd.f32 %v816_v13, %v815_v43  ;;  %v18837_v43 = vsub.s32 1, %v18370_v45 }
 0x1b2   :  { %v667_v59 = vadd.f32 %v666_v46, %v665_v38  ;;  %v818_v34 = vrot.slane %v817_v37, 4  ;;  %v18842_v46 = vsub.s32 2, %v18370_v45 }
 0x1b4   :  { %v668_v36 = vrot.slane %v667_v59, 2  ;;  %v819_v48 = vadd.f32 %v818_v34, %v817_v37 }
 0x1b6   :  { %v669_v63 = vadd.f32 %v668_v36, %v667_v59  ;;  %v820_v2 = vrot.slane %v819_v48, 2 }
 0x1b8   :  { %v670_v53 = vrot.slane %v669_v63, 1  ;;  %v821_v24 = vadd.f32 %v820_v2, %v819_v48 }
 0x1ba   :  { %v671_v25 = vadd.f32 %v670_v53, %v669_v63  ;;  %v822_v52 = vrot.slane %v821_v24, 1 }
 0x1bc   :  { %v823_v23 = vadd.f32 %v822_v52, %v821_v24  ;;  %v824_v50 = vmul.f32 0.0025510204, %v671_v25 }
 0x1be   :  { %v825_v22 = vmul.f32 0.0025510204, %v823_v23  ;;  %v826_v3 = vmul.f32 %v824_v50, %v824_v50 }
 0x1c0   :  { %v827_v39 = vsub.f32 %v825_v22, %v826_v3  ;;  %v23374_v22 = vld [vmem:[#allocation7_spill] sm:$0xff]  ;;  %v23375_v3 = vld [vmem:[#allocation8_spill] sm:$0xff] }
 0x1c2   :  { %v828_v0 = vmax.f32 %v827_v39, 0.0 }
 0x1c4   :  { %v829_v55 = vadd.f32 1e-05, %v828_v0  ;;  %v23376_v0 = vld [vmem:[#allocation9_spill] sm:$0xff] }
 0x1c6   :  { %17913 = vrsqrt.f32 %v829_v55  ;;  %v23377_v55 = vld [vmem:[#allocation10_spill] sm:$0xff] }
 0x1d0   :  { %v17914_v58 = vpop.eup %17913 }
 0x1d1   :  { %v831_v38 = vmul.f32 %v17914_v58, %v18380_v49  ;;  %v23378_v58 = vld [vmem:[#allocation11_spill] sm:$0xff] }
 0x1d3   :  { %v832_v36 = vmul.f32 %v831_v38, %v824_v50  ;;  %v840_v13 = vrot.slane %v831_v38, %v18837_v43  ;;  %v23373_v50 = vld [vmem:[#allocation6_spill] sm:$0xff]  ;;  %v23379_v38 = vld [vmem:[#allocation12_spill] sm:$0xff] }
 0x1d5   :  { %v834_v48 = vrot.slane %v832_v36, 7  ;;  %v889_v53 = vmul.f32 %v840_v13, %v565_v6  ;;  %v841_v25 = vmul.f32 %v840_v13, %v18394_v56  ;;  %v842_v39 = vmul.f32 %v840_v13, %v18391_v54  ;;  %v23380_v36 = vld [vmem:[#allocation14_spill] sm:$0xff] }
 0x1d6   :  { %v843_v37 = vmul.f32 %v840_v13, %v18397_v57  ;;  %v844_v59 = vmul.f32 %v840_v13, %v18404_v60  ;;  %v845_v34 = vmul.f32 %v840_v13, %v18413_v1  ;;  %v846_v2 = vmul.f32 %v840_v13, %v18425_v9 }
 0x1d7   :  { %v836_v63 = vsub.f32 %v18380_v49, %v834_v48  ;;  %v847_v24 = vmul.f32 %v840_v13, %v18435_v19  ;;  %v848_v6 = vmul.f32 %v840_v13, %v18446_v31  ;;  %v849_v45 = vmul.f32 %v840_v13, %v18455_v42  ;;  %v23381_v48 = vld [vmem:[#allocation15_spill] sm:$0xff] }
 0x1d8   :  { %v850_v56 = vmul.f32 %v840_v13, %v18466_v61  ;;  %v851_v54 = vmul.f32 %v840_v13, %v18475_v7  ;;  %v852_v57 = vmul.f32 %v840_v13, %v18486_v15  ;;  %v853_v1 = vmul.f32 %v840_v13, %v18495_v29 }
 0x1d9   :  { %v18858_v60 = vrot.slane %v836_v63, %v18842_v46  ;;  %v854_v49 = vmul.f32 %v840_v13, %v18506_v41  ;;  %v855_v9 = vmul.f32 %v840_v13, %v18515_v62  ;;  %v856_v19 = vmul.f32 %v840_v13, %v18526_v8 }
 0x1da   :  { %v857_v31 = vmul.f32 %v840_v13, %v18535_v21  ;;  %v858_v42 = vmul.f32 %v840_v13, %v18546_v35  ;;  %v859_v61 = vmul.f32 %v840_v13, %v18555_v28  ;;  %v860_v15 = vmul.f32 %v840_v13, %v18566_v30 }
 0x1db   :  { %v18868_v7 = vadd.f32 %v18858_v60, %v889_v53  ;;  %v861_v52 = vmul.f32 %v840_v13, %v18575_v12  ;;  %v862_v29 = vmul.f32 %v840_v13, %v18586_v27  ;;  %v863_v41 = vmul.f32 %v840_v13, %v18595_v44  ;;  %v23382_v53 = vld [vmem:[#allocation16_spill] sm:$0xff] }
 0x1dc   :  { %v864_v62 = vmul.f32 %v840_v13, %v18606_v20  ;;  %v865_v8 = vmul.f32 %v840_v13, %v18615_v32  ;;  %v866_v21 = vmul.f32 %v840_v13, %v18626_v33  ;;  %v867_v35 = vmul.f32 %v840_v13, %v18635_v47 }
 0x1dd   :  { %v868_v28 = vmul.f32 %v840_v13, %v18644_v5  ;;  %v869_v23 = vmul.f32 %v840_v13, %v18653_v17  ;;  %v870_v30 = vmul.f32 %v840_v13, %v18662_v4  ;;  %v871_v12 = vmul.f32 %v840_v13, %v18671_v14 }
 0x1de   :  { %v872_v27 = vmul.f32 %v840_v13, %v18680_v51  ;;  %v873_v44 = vmul.f32 %v840_v13, %v18689_v26  ;;  %v874_v20 = vmul.f32 %v840_v13, %v18698_v18  ;;  %v875_v32 = vmul.f32 %v840_v13, %v18707_v10 }
 0x1df   :  { %v876_v33 = vmul.f32 %v840_v13, %v18715_v11  ;;  %v877_v47 = vmul.f32 %v840_v13, %v18723_v16  ;;  %v878_v5 = vmul.f32 %v840_v13, %v18731_v40  ;;  %v879_v17 = vmul.f32 %v840_v13, %v23373_v50 }
 0x1e0   :  { %v880_v4 = vmul.f32 %v840_v13, %v23374_v22  ;;  %v881_v14 = vmul.f32 %v840_v13, %v23375_v3  ;;  %v882_v51 = vmul.f32 %v840_v13, %v23376_v0  ;;  %v883_v26 = vmul.f32 %v840_v13, %v23377_v55 }
 0x1e1   :  { %v884_v18 = vmul.f32 %v840_v13, %v23378_v58  ;;  %v885_v10 = vmul.f32 %v840_v13, %v23379_v38  ;;  %v886_v11 = vmul.f32 %v840_v13, %v23380_v36  ;;  %v887_v16 = vmul.f32 %v840_v13, %v23381_v48 }
 0x1e2   :  { %v888_v40 = vmul.f32 %v840_v13, %v23382_v53  ;;  %v18900_v63 = vadd.f32 %v18858_v60, %v841_v25  ;;  %v18903_v50 = vadd.f32 %v18858_v60, %v842_v39  ;;  %v18906_v22 = vadd.f32 %v18858_v60, %v843_v37 }
 0x1e3   :  { %v18909_v3 = vadd.f32 %v18858_v60, %v844_v59  ;;  %v18912_v0 = vadd.f32 %v18858_v60, %v845_v34  ;;  %v18915_v55 = vadd.f32 %v18858_v60, %v846_v2  ;;  %v18918_v13 = vadd.f32 %v18858_v60, %v847_v24 }
 0x1e4   :  { %v18921_v25 = vadd.f32 %v18858_v60, %v848_v6  ;;  %v18924_v39 = vadd.f32 %v18858_v60, %v849_v45  ;;  %v18927_v37 = vadd.f32 %v18858_v60, %v850_v56  ;;  %v18930_v59 = vadd.f32 %v18858_v60, %v851_v54 }
 0x1e5   :  { %v18933_v34 = vadd.f32 %v18858_v60, %v852_v57  ;;  %v18936_v2 = vadd.f32 %v18858_v60, %v853_v1  ;;  %v18939_v24 = vadd.f32 %v18858_v60, %v854_v49  ;;  %v18942_v6 = vadd.f32 %v18858_v60, %v855_v9 }
 0x1e6   :  { %v18945_v45 = vadd.f32 %v18858_v60, %v856_v19  ;;  %v18948_v56 = vadd.f32 %v18858_v60, %v857_v31  ;;  %v18951_v54 = vadd.f32 %v18858_v60, %v858_v42  ;;  %v18954_v57 = vadd.f32 %v18858_v60, %v859_v61 }
 0x1e7   :  { %v18957_v1 = vadd.f32 %v18858_v60, %v860_v15  ;;  %v18960_v49 = vadd.f32 %v18858_v60, %v861_v52  ;;  %v18963_v9 = vadd.f32 %v18858_v60, %v862_v29  ;;  %v18966_v19 = vadd.f32 %v18858_v60, %v863_v41 }
 0x1e8   :  { %v18969_v31 = vadd.f32 %v18858_v60, %v864_v62  ;;  %v18972_v42 = vadd.f32 %v18858_v60, %v865_v8  ;;  %v18975_v61 = vadd.f32 %v18858_v60, %v866_v21  ;;  %v18978_v15 = vadd.f32 %v18858_v60, %v867_v35 }
 0x1e9   :  { %v18981_v52 = vadd.f32 %v18858_v60, %v868_v28  ;;  %v18984_v29 = vadd.f32 %v18858_v60, %v869_v23  ;;  %v18987_v41 = vadd.f32 %v18858_v60, %v870_v30  ;;  %v18990_v62 = vadd.f32 %v18858_v60, %v871_v12 }
 0x1ea   :  { %v18993_v8 = vadd.f32 %v18858_v60, %v872_v27  ;;  %v18996_v21 = vadd.f32 %v18858_v60, %v873_v44  ;;  %v18999_v35 = vadd.f32 %v18858_v60, %v874_v20  ;;  %v19002_v28 = vadd.f32 %v18858_v60, %v875_v32 }
 0x1eb   :  { %v19005_v23 = vadd.f32 %v18858_v60, %v876_v33  ;;  %v19008_v30 = vadd.f32 %v18858_v60, %v877_v47  ;;  %v19011_v12 = vadd.f32 %v18858_v60, %v878_v5  ;;  %v19014_v27 = vadd.f32 %v18858_v60, %v879_v17 }
 0x1ec   :  { %v19017_v44 = vadd.f32 %v18858_v60, %v880_v4  ;;  %v19020_v20 = vadd.f32 %v18858_v60, %v881_v14  ;;  %v19023_v32 = vadd.f32 %v18858_v60, %v882_v51  ;;  %v19026_v33 = vadd.f32 %v18858_v60, %v883_v26 }
 0x1ed   :  { %v19029_v47 = vadd.f32 %v18858_v60, %v884_v18  ;;  %v19032_v5 = vadd.f32 %v18858_v60, %v885_v10  ;;  %v19035_v17 = vadd.f32 %v18858_v60, %v886_v11  ;;  %v19038_v4 = vadd.f32 %v18858_v60, %v887_v16 }
 0x1ee   :  { %v19041_v14 = vadd.f32 %v18858_v60, %v888_v40  ;;  %v943_v51 = vmax.f32 %v18900_v63, 0.0  ;;  %v944_v26 = vmax.f32 %v18903_v50, 0.0  ;;  %v945_v58 = vmax.f32 %v18906_v22, 0.0 }
 0x1ef   :  { %v946_v18 = vmax.f32 %v18909_v3, 0.0  ;;  %v947_v38 = vmax.f32 %v18912_v0, 0.0  ;;  %v948_v10 = vmax.f32 %v18915_v55, 0.0  ;;  %v949_v36 = vmax.f32 %v18918_v13, 0.0 }
 0x1f0   :  { %v950_v11 = vmax.f32 %v18921_v25, 0.0  ;;  %v951_v48 = vmax.f32 %v18924_v39, 0.0  ;;  %v952_v60 = vmax.f32 %v18927_v37, 0.0  ;;  %v953_v16 = vmax.f32 %v18930_v59, 0.0 }
 0x1f1   :  { %v954_v53 = vmax.f32 %v18933_v34, 0.0  ;;  %v955_v40 = vmax.f32 %v18936_v2, 0.0  ;;  %v956_v63 = vmax.f32 %v18939_v24, 0.0  ;;  %v957_v50 = vmax.f32 %v18942_v6, 0.0 }
 0x1f2   :  { %v958_v22 = vmax.f32 %v18945_v45, 0.0  ;;  %v959_v3 = vmax.f32 %v18948_v56, 0.0  ;;  %v960_v0 = vmax.f32 %v18951_v54, 0.0  ;;  %v961_v55 = vmax.f32 %v18954_v57, 0.0 }
 0x1f3   :  { %v962_v13 = vmax.f32 %v18957_v1, 0.0  ;;  %v963_v25 = vmax.f32 %v18960_v49, 0.0  ;;  %v964_v39 = vmax.f32 %v18963_v9, 0.0  ;;  %v965_v37 = vmax.f32 %v18966_v19, 0.0 }
 0x1f4   :  { %v966_v59 = vmax.f32 %v18969_v31, 0.0  ;;  %v967_v34 = vmax.f32 %v18972_v42, 0.0  ;;  %v968_v2 = vmax.f32 %v18975_v61, 0.0  ;;  %v969_v24 = vmax.f32 %v18978_v15, 0.0 }
 0x1f5   :  { %v970_v6 = vmax.f32 %v18981_v52, 0.0  ;;  %v971_v45 = vmax.f32 %v18984_v29, 0.0  ;;  %v972_v56 = vmax.f32 %v18987_v41, 0.0  ;;  %v973_v54 = vmax.f32 %v18990_v62, 0.0 }
 0x1f6   :  { %v974_v57 = vmax.f32 %v18993_v8, 0.0  ;;  %v975_v1 = vmax.f32 %v18996_v21, 0.0  ;;  %v976_v49 = vmax.f32 %v18999_v35, 0.0  ;;  %v977_v9 = vmax.f32 %v19002_v28, 0.0 }
 0x1f7   :  { %v978_v19 = vmax.f32 %v19005_v23, 0.0  ;;  %v979_v31 = vmax.f32 %v19008_v30, 0.0  ;;  %v980_v42 = vmax.f32 %v19011_v12, 0.0  ;;  %v981_v61 = vmax.f32 %v19014_v27, 0.0 }
 0x1f8   :  { %v982_v15 = vmax.f32 %v19017_v44, 0.0  ;;  %v983_v52 = vmax.f32 %v19020_v20, 0.0  ;;  %v984_v29 = vmax.f32 %v19023_v32, 0.0  ;;  %v985_v41 = vmax.f32 %v19026_v33, 0.0 }
 0x1f9   :  { %v986_v62 = vmax.f32 %v19029_v47, 0.0  ;;  %v987_v8 = vmax.f32 %v19032_v5, 0.0  ;;  %v988_v21 = vmax.f32 %v19035_v17, 0.0  ;;  %v989_v35 = vmax.f32 %v19038_v4, 0.0 }
 0x1fa   :  { %v990_v28 = vmax.f32 %v19041_v14, 0.0  ;;  %v19091_v23 = vpack.c.bf16 %v960_v0, %v959_v3  ;;  %v19093_v30 = vpack.c.bf16 %v944_v26, %v943_v51  ;;  %v19095_v12 = vpack.c.bf16 %v962_v13, %v961_v55  ;;  %v996_v3 = vld [vmem:[%s23334_s3 + $0x20] sm:$0xff]  ;;  %v998_v13 = vld [vmem:[%s23334_s3 + $0x30] sm:$0xff] }
 0x1fb   :  { %v19097_v27 = vpack.c.bf16 %v946_v18, %v945_v58  ;;  %v19099_v44 = vpack.c.bf16 %v964_v39, %v963_v25  ;;  %v19101_v20 = vpack.c.bf16 %v948_v10, %v947_v38  ;;  %v19104_v32 = vpack.c.bf16 %v966_v59, %v965_v37  ;;  %v1000_v37 = vld [vmem:[%s23334_s3 + $0x40] sm:$0xff] }
 0x1fc   :  { %16275 = vmatprep.subr.bf16.mxu1 %v19091_v23  ;;  %v19106_v33 = vpack.c.bf16 %v950_v11, %v949_v36  ;;  %v19108_v47 = vpack.c.bf16 %v968_v2, %v967_v34  ;;  %v19110_v5 = vpack.c.bf16 %v952_v60, %v951_v48  ;;  %v19112_v17 = vpack.c.bf16 %v970_v6, %v969_v24  ;;  %v1002_v2 = vld [vmem:[%s23334_s3 + $0x50] sm:$0xff] }
 0x1fd   :  { %v19114_v4 = vpack.c.bf16 %v954_v53, %v953_v16  ;;  %v19116_v14 = vpack.c.bf16 %v972_v56, %v971_v45  ;;  %v19118_v51 = vpack.c.bf16 %v956_v63, %v955_v40  ;;  %16393 = vmatprep.subr.bf16.mxu0 %v19091_v23  ;;  %v19121_v26 = vpack.c.bf16 %v974_v57, %v973_v54  ;;  %v994_v53 = vld [vmem:[%s23334_s3 + $0x10] sm:$0xff]  ;;  %v23383_v40 = vld [vmem:[#allocation13_spill] sm:$0xff] }
 0x1fe   :  { %v19123_v58 = vpack.c.bf16 %v958_v22, %v957_v50  ;;  %v19125_v18 = vpack.c.bf16 %v976_v49, %v975_v1  ;;  %v19127_v38 = vpack.c.bf16 %v978_v19, %v977_v9  ;;  %16277 = vmatpush3.bf16.msra.mxu1 %v19093_v30  ;;  %v19130_v10 = vpack.c.bf16 %v980_v42, %v979_v31  ;;  %v1004_v45 = vld [vmem:[%s23334_s3 + $0x60] sm:$0xff]  ;;  %v993_v57 = vld [vmem:[%s23334_s3 + $0x8] sm:$0xff]  ;;  %v995_v9 = vld [vmem:[%s23334_s3 + $0x18] sm:$0xff] }
 0x1ff   :  { %v19132_v36 = vpack.c.bf16 %v982_v15, %v981_v61  ;;  %v19134_v11 = vpack.c.bf16 %v984_v29, %v983_v52  ;;  %v19136_v48 = vpack.c.bf16 %v986_v62, %v985_v41  ;;  %16395 = vmatpush3.bf16.msra.mxu0 %v19093_v30  ;;  %v19139_v60 = vpack.c.bf16 %v988_v21, %v987_v8  ;;  %v997_v15 = vld [vmem:[%s23334_s3 + $0x28] sm:$0xff] }
 0x200   :  { %v19141_v16 = vpack.c.bf16 %v990_v28, %v989_v35  ;;  %16279 = vmatprep.subr.bf16.mxu1 %v19095_v12  ;;  %16397 = vmatprep.subr.bf16.mxu0 %v19095_v12  ;;  %v1006_v63 = vunpack.c.l.bf16 %v23383_v40  ;;  %v1011_v50 = vunpack.c.h.bf16 %v994_v53  ;;  %v23384_v22 = vmov 0.0|0.0   ;;  %v1001_v8 = vld [vmem:[%s23334_s3 + $0x48] sm:$0xff]  ;;  %v1003_v28 = vld [vmem:[%s23334_s3 + $0x58] sm:$0xff] }
 0x201   :  { %v1010_v0 = vunpack.c.l.bf16 %v994_v53  ;;  %v1015_v55 = vunpack.c.h.bf16 %v996_v3  ;;  %v1014_v25 = vunpack.c.l.bf16 %v996_v3  ;;  %v1019_v39 = vunpack.c.h.bf16 %v998_v13 }
 0x202   :  { %16281 = vmatpush3.bf16.msra.mxu1 %v19097_v27  ;;  %v1018_v59 = vunpack.c.l.bf16 %v998_v13  ;;  %v1023_v34 = vunpack.c.h.bf16 %v1000_v37  ;;  %v1022_v24 = vunpack.c.l.bf16 %v1000_v37  ;;  %v1027_v6 = vunpack.c.h.bf16 %v1002_v2 }
 0x203   :  { %16399 = vmatpush3.bf16.msra.mxu0 %v19097_v27  ;;  %16283 = vmatprep.subr.bf16.mxu1 %v19099_v44  ;;  %v1026_v56 = vunpack.c.l.bf16 %v1002_v2  ;;  %v1031_v54 = vunpack.c.h.bf16 %v1004_v45  ;;  %v1030_v1 = vunpack.c.l.bf16 %v1004_v45  ;;  %v1009_v49 = vunpack.c.h.bf16 %v993_v57 }
 0x204   :  { %16401 = vmatprep.subr.bf16.mxu0 %v19099_v44  ;;  %v23385_v19 = vmov 0.0   ;;  %v1008_v31 = vunpack.c.l.bf16 %v993_v57  ;;  %v19216_v42 = vmax.f32 %v18868_v7, 0.0  ;;  %v1013_v61 = vunpack.c.h.bf16 %v995_v9  ;;  %v999_v7 = vld [vmem:[%s23334_s3 + $0x38] sm:$0xff] }
 0x205   :  { %v1012_v52 = vunpack.c.l.bf16 %v995_v9  ;;  %v1017_v29 = vunpack.c.h.bf16 %v997_v15  ;;  %v1016_v41 = vunpack.c.l.bf16 %v997_v15  ;;  %v1021_v62 = vunpack.c.h.bf16 %v999_v7 }
 0x206   :  { %16285 = vmatpush3.bf16.msra.mxu1 %v19101_v20  ;;  %v1020_v21 = vunpack.c.l.bf16 %v999_v7  ;;  %v1025_v35 = vunpack.c.h.bf16 %v1001_v8  ;;  %v1024_v53 = vunpack.c.l.bf16 %v1001_v8  ;;  %v1029_v40 = vunpack.c.h.bf16 %v1003_v28 }
 0x207   :  { %16403 = vmatpush3.bf16.msra.mxu0 %v19101_v20  ;;  %16287 = vmatprep.subr.bf16.mxu1 %v19104_v32 }
 0x208   :  { %16405 = vmatprep.subr.bf16.mxu0 %v19104_v32 }
 0x20a   :  { %16289 = vmatpush3.bf16.msra.mxu1 %v19106_v33 }
 0x20b   :  { %16407 = vmatpush3.bf16.msra.mxu0 %v19106_v33  ;;  %16291 = vmatprep.subr.bf16.mxu1 %v19108_v47 }
 0x20c   :  { %16409 = vmatprep.subr.bf16.mxu0 %v19108_v47 }
 0x20e   :  { %16293 = vmatpush3.bf16.msra.mxu1 %v19110_v5 }
 0x20f   :  { %16411 = vmatpush3.bf16.msra.mxu0 %v19110_v5  ;;  %16295 = vmatprep.subr.bf16.mxu1 %v19112_v17 }
 0x210   :  { %16413 = vmatprep.subr.bf16.mxu0 %v19112_v17 }
 0x212   :  { %16297 = vmatpush3.bf16.msra.mxu1 %v19114_v4 }
 0x213   :  { %16415 = vmatpush3.bf16.msra.mxu0 %v19114_v4  ;;  %16299 = vmatprep.subr.bf16.mxu1 %v19116_v14 }
 0x214   :  { %16417 = vmatprep.subr.bf16.mxu0 %v19116_v14 }
 0x216   :  { %16301 = vmatpush3.bf16.msra.mxu1 %v19118_v51 }
 0x217   :  { %16419 = vmatpush3.bf16.msra.mxu0 %v19118_v51  ;;  %16303 = vmatprep.subr.bf16.mxu1 %v19121_v26 }
 0x218   :  { %16421 = vmatprep.subr.bf16.mxu0 %v19121_v26 }
 0x21a   :  { %16305 = vmatpush3.bf16.msra.mxu1 %v19123_v58 }
 0x21b   :  { %16423 = vmatpush3.bf16.msra.mxu0 %v19123_v58  ;;  %16306 = vmatprep.subr.bf16.mxu1 %v23384_v22 }
 0x21c   :  { %16448 = vmatprep.subr.bf16.mxu0 %v23384_v22 }
 0x21d   :  { %1121 = vmatmul.mubr.f32.vlgmr.msra.gmra.mrb[0].mxu1 %v1006_v63  ;;  %v1005_v63 = vld [vmem:[%s23334_s3 + $0x68] sm:$0xff] }
 0x21e   :  { %16308 = vmatpush1.bf16.msra.mxu1 %v19125_v18  ;;  %1125 = vmatprep.mubr.f32.mxu1 %v1011_v50  ;;  %v1028_v50 = vunpack.c.l.bf16 %v1003_v28  ;;  %v1033_v3 = vunpack.c.h.bf16 %v1005_v63 }
 0x21f   :  { %16309 = vmatprep.subr.bf16.mxu1 %v23384_v22 }
 0x221   :  { %1126 = vmatmul.mubr.f32.gmra.mrb[2].mxu1 %v1010_v0  ;;  %v1258_v0 = vld [vmem:[%s23334_s3 + $0x70] sm:$0xff] }
 0x222   :  { %16311 = vmatpush1.bf16.msra.mxu1 %v19127_v38  ;;  %1130 = vmatprep.mubr.f32.mxu1 %v1015_v55  ;;  %v1032_v55 = vunpack.c.l.bf16 %v1005_v63  ;;  %v1273_v13 = vunpack.c.h.bf16 %v1258_v0 }
 0x223   :  { %16312 = vmatprep.subr.bf16.mxu1 %v23384_v22 }
 0x225   :  { %1131 = vmatmul.mubr.f32.gmra.mrb[4].mxu1 %v1014_v25  ;;  %v1260_v25 = vld [vmem:[%s23334_s3 + $0x80] sm:$0xff] }
 0x226   :  { %16314 = vmatpush1.bf16.msra.mxu1 %v19130_v10  ;;  %1135 = vmatprep.mubr.f32.mxu1 %v1019_v39  ;;  %v1272_v39 = vunpack.c.l.bf16 %v1258_v0  ;;  %v1277_v37 = vunpack.c.h.bf16 %v1260_v25 }
 0x227   :  { %16315 = vmatprep.subr.bf16.mxu1 %v23384_v22 }
 0x229   :  { %1136 = vmatmul.mubr.f32.gmra.mrb[6].mxu1 %v1018_v59  ;;  %v1262_v59 = vld [vmem:[%s23334_s3 + $0x90] sm:$0xff] }
 0x22a   :  { %16317 = vmatpush1.bf16.msra.mxu1 %v19132_v36  ;;  %1140 = vmatprep.mubr.f32.mxu1 %v1023_v34  ;;  %v1276_v34 = vunpack.c.l.bf16 %v1260_v25  ;;  %v1281_v2 = vunpack.c.h.bf16 %v1262_v59 }
 0x22b   :  { %16318 = vmatprep.subr.bf16.mxu1 %v23384_v22 }
 0x22d   :  { %1141 = vmatmul.mubr.f32.gmra.mrb[8].mxu1 %v1022_v24  ;;  %v1264_v24 = vld [vmem:[%s23334_s3 + $0xa0] sm:$0xff] }
 0x22e   :  { %16320 = vmatpush1.bf16.msra.mxu1 %v19134_v11  ;;  %1145 = vmatprep.mubr.f32.mxu1 %v1027_v6  ;;  %v1280_v6 = vunpack.c.l.bf16 %v1262_v59  ;;  %v1285_v45 = vunpack.c.h.bf16 %v1264_v24 }
 0x22f   :  { %16321 = vmatprep.subr.bf16.mxu1 %v23384_v22 }
 0x231   :  { %1146 = vmatmul.mubr.f32.gmra.mrb[10].mxu1 %v1026_v56  ;;  %v1266_v56 = vld [vmem:[%s23334_s3 + $0xb0] sm:$0xff] }
 0x232   :  { %16323 = vmatpush1.bf16.msra.mxu1 %v19136_v48  ;;  %1150 = vmatprep.mubr.f32.mxu1 %v1031_v54  ;;  %v1284_v54 = vunpack.c.l.bf16 %v1264_v24  ;;  %v1289_v57 = vunpack.c.h.bf16 %v1266_v56  ;;  %v1522_v24 = vld [vmem:[%s23335_s4 + $0x18] sm:$0xff] }
 0x233   :  { %16324 = vmatprep.subr.bf16.mxu1 %v23384_v22 }
 0x235   :  { %1151 = vmatmul.mubr.f32.gmra.mrb[12].mxu1 %v1030_v1  ;;  %v1268_v1 = vld [vmem:[%s23334_s3 + $0xc0] sm:$0xff] }
 0x236   :  { %16326 = vmatpush1.bf16.msra.mxu1 %v19139_v60  ;;  %13010 = vmatprep.mubr.msk.f32.mxu1 %vm1034_vm6, %v1009_v49  ;;  %v1288_v49 = vunpack.c.l.bf16 %v1266_v56  ;;  %v1293_v9 = vunpack.c.h.bf16 %v1268_v1 }
 0x237   :  { %16327 = vmatprep.subr.bf16.mxu1 %v23384_v22 }
 0x23a   :  { %16329 = vmatpush1.bf16.msra.mxu1 %v19141_v16 }
 0x23b   :  { %1188 = vmatprep.subr.mxu1 %v23385_v19 }
 0x23e   :  { %1189 = vmatpush1.msra.mxu1 %v19216_v42 }
 0x23f   :  { %1221 = vmatmul.mubr.f32.vlgmr.msra.gmra.mrb[14].mxu1 %v1008_v31  ;;  %16331 = vmatprep.subr.bf16.mxu1 %v19091_v23  ;;  %v1270_v31 = vld [vmem:[%s23334_s3 + $0xd0] sm:$0xff] }
 0x240   :  { %16333 = vmatpush3.bf16.msra.mxu1 %v19093_v30  ;;  %13011 = vmatprep.mubr.msk.f32.mxu1 %vm1034_vm6, %v1013_v61  ;;  %v1292_v61 = vunpack.c.l.bf16 %v1268_v1  ;;  %v1297_v15 = vunpack.c.h.bf16 %v1270_v31 }
 0x241   :  { %16335 = vmatprep.subr.bf16.mxu1 %v19095_v12 }
 0x243   :  { %1226 = vmatmul.mubr.f32.gmra.mrb[16].mxu1 %v1012_v52  ;;  %v1259_v52 = vld [vmem:[%s23334_s3 + $0x78] sm:$0xff] }
 0x244   :  { %16337 = vmatpush3.bf16.msra.mxu1 %v19097_v27  ;;  %13012 = vmatprep.mubr.msk.f32.mxu1 %vm1034_vm6, %v1017_v29  ;;  %v1296_v29 = vunpack.c.l.bf16 %v1270_v31  ;;  %v1275_v7 = vunpack.c.h.bf16 %v1259_v52 }
 0x245   :  { %16339 = vmatprep.subr.bf16.mxu1 %v19099_v44 }
 0x247   :  { %1231 = vmatmul.mubr.f32.gmra.mrb[18].mxu1 %v1016_v41  ;;  %v1261_v41 = vld [vmem:[%s23334_s3 + $0x88] sm:$0xff] }
 0x248   :  { %16341 = vmatpush3.bf16.msra.mxu1 %v19101_v20  ;;  %13013 = vmatprep.mubr.msk.f32.mxu1 %vm1034_vm6, %v1021_v62  ;;  %v1274_v62 = vunpack.c.l.bf16 %v1259_v52  ;;  %v1279_v8 = vunpack.c.h.bf16 %v1261_v41 }
 0x249   :  { %16343 = vmatprep.subr.bf16.mxu1 %v19104_v32 }
 0x24b   :  { %1236 = vmatmul.mubr.f32.gmra.mrb[20].mxu1 %v1020_v21  ;;  %v1263_v21 = vld [vmem:[%s23334_s3 + $0x98] sm:$0xff] }
 0x24c   :  { %16345 = vmatpush3.bf16.msra.mxu1 %v19106_v33  ;;  %13014 = vmatprep.mubr.msk.f32.mxu1 %vm1034_vm6, %v1025_v35  ;;  %v1278_v35 = vunpack.c.l.bf16 %v1261_v41  ;;  %v1283_v28 = vunpack.c.h.bf16 %v1263_v21 }
 0x24d   :  { %16347 = vmatprep.subr.bf16.mxu1 %v19108_v47 }
 0x24f   :  { %1241 = vmatmul.mubr.f32.gmra.mrb[22].mxu1 %v1024_v53  ;;  %v1265_v53 = vld [vmem:[%s23334_s3 + $0xa8] sm:$0xff] }
 0x250   :  { %16349 = vmatpush3.bf16.msra.mxu1 %v19110_v5  ;;  %13015 = vmatprep.mubr.msk.f32.mxu1 %vm1034_vm6, %v1029_v40  ;;  %v1282_v40 = vunpack.c.l.bf16 %v1263_v21  ;;  %v1287_v63 = vunpack.c.h.bf16 %v1265_v53 }
 0x251   :  { %16351 = vmatprep.subr.bf16.mxu1 %v19112_v17 }
 0x253   :  { %1246 = vmatmul.mubr.f32.gmra.mrb[24].mxu1 %v1028_v50  ;;  %v1267_v50 = vld [vmem:[%s23334_s3 + $0xb8] sm:$0xff] }
 0x254   :  { %16353 = vmatpush3.bf16.msra.mxu1 %v19114_v4  ;;  %13016 = vmatprep.mubr.msk.f32.mxu1 %vm1034_vm6, %v1033_v3  ;;  %v1286_v3 = vunpack.c.l.bf16 %v1265_v53  ;;  %v1291_v0 = vunpack.c.h.bf16 %v1267_v50 }
 0x255   :  { %16355 = vmatprep.subr.bf16.mxu1 %v19116_v14 }
 0x257   :  { %1251 = vmatmul.mubr.f32.gmra.mrb[26].mxu1 %v1032_v55  ;;  %v1269_v55 = vld [vmem:[%s23334_s3 + $0xc8] sm:$0xff] }
 0x258   :  { %16357 = vmatpush3.bf16.msra.mxu1 %v19118_v51  ;;  %1385 = vmatprep.mubr.f32.mxu1 %v1273_v13  ;;  %v1290_v13 = vunpack.c.l.bf16 %v1267_v50  ;;  %v1295_v25 = vunpack.c.h.bf16 %v1269_v55 }
 0x259   :  { %16359 = vmatprep.subr.bf16.mxu1 %v19121_v26 }
 0x25c   :  { %16361 = vmatpush3.bf16.msra.mxu1 %v19123_v58 }
 0x25d   :  { %16362 = vmatprep.subr.bf16.mxu1 %v23384_v22 }
 0x25f   :  { %1386 = vmatmul.mubr.f32.vlgmr.msra.gmra.mrb[28].mxu1 %v1272_v39  ;;  %v1271_v39 = vld [vmem:[%s23334_s3 + $0xd8] sm:$0xff] }
 0x260   :  { %16364 = vmatpush1.bf16.msra.mxu1 %v19125_v18  ;;  %1390 = vmatprep.mubr.f32.mxu1 %v1277_v37  ;;  %v1294_v37 = vunpack.c.l.bf16 %v1269_v55  ;;  %v1299_v59 = vunpack.c.h.bf16 %v1271_v39 }
 0x261   :  { %16365 = vmatprep.subr.bf16.mxu1 %v23384_v22 }
 0x263   :  { %1391 = vmatmul.mubr.f32.gmra.mrb[30].mxu1 %v1276_v34  ;;  %v1298_v34 = vunpack.c.l.bf16 %v1271_v39 }
 0x264   :  { %16367 = vmatpush1.bf16.msra.mxu1 %v19127_v38  ;;  %1395 = vmatprep.mubr.f32.mxu1 %v1281_v2  ;;  %v1521_v2 = vld [vmem:[%s23335_s4 + $0x10] sm:$0xff] }
 0x265   :  { %16368 = vmatprep.subr.bf16.mxu1 %v23384_v22 }
 0x267   :  { %1396 = vmatmul.mubr.f32.gmra.mrb[32].mxu1 %v1280_v6  ;;  %v16387_v6 = vpack.c.bf16 %v1522_v24, %v1521_v2  ;;  %v1769_v24 = vld [vmem:[%s23334_s3 + $0x100] sm:$0xff] }
 0x268   :  { %16370 = vmatpush1.bf16.msra.mxu1 %v19130_v10  ;;  %1400 = vmatprep.mubr.f32.mxu1 %v1285_v45 }
 0x269   :  { %16371 = vmatprep.subr.bf16.mxu1 %v23384_v22 }
 0x26b   :  { %1401 = vmatmul.mubr.f32.gmra.mrb[34].mxu1 %v1284_v54 }
 0x26c   :  { %16373 = vmatpush1.bf16.msra.mxu1 %v19132_v36  ;;  %1405 = vmatprep.mubr.f32.mxu1 %v1289_v57 }
 0x26d   :  { %16374 = vmatprep.subr.bf16.mxu1 %v23384_v22 }
 0x26f   :  { %1406 = vmatmul.mubr.f32.gmra.mrb[36].mxu1 %v1288_v49 }
 0x270   :  { %16376 = vmatpush1.bf16.msra.mxu1 %v19134_v11  ;;  %1410 = vmatprep.mubr.f32.mxu1 %v1293_v9 }
 0x271   :  { %16377 = vmatprep.subr.bf16.mxu1 %v23384_v22 }
 0x273   :  { %1411 = vmatmul.mubr.f32.gmra.mrb[38].mxu1 %v1292_v61 }
 0x274   :  { %16379 = vmatpush1.bf16.msra.mxu1 %v19136_v48  ;;  %1415 = vmatprep.mubr.f32.mxu1 %v1297_v15 }
 0x275   :  { %16380 = vmatprep.subr.bf16.mxu1 %v23384_v22 }
 0x277   :  { %1416 = vmatmul.mubr.f32.gmra.mrb[40].mxu1 %v1296_v29 }
 0x278   :  { %16382 = vmatpush1.bf16.msra.mxu1 %v19139_v60  ;;  %13017 = vmatprep.mubr.msk.f32.mxu1 %vm1034_vm6, %v1275_v7 }
 0x279   :  { %16383 = vmatprep.subr.bf16.mxu1 %v23384_v22 }
 0x27c   :  { %16385 = vmatpush1.bf16.msra.mxu1 %v19141_v16 }
 0x27d   :  { %1453 = vmatprep.subr.mxu1 %v23385_v19 }
 0x280   :  { %1454 = vmatpush1.msra.mxu1 %v19216_v42 }
 0x281   :  { %1486 = vmatmul.mubr.f32.vlgmr.msra.gmra.mrb[42].mxu1 %v1274_v62  ;;  %16386 = vmatprep.subr.bf16.mxu1 %v23384_v22 }
 0x282   :  { %13018 = vmatprep.mubr.msk.f32.mxu1 %vm1034_vm6, %v1279_v8  ;;  %16388 = vmatpush3.bf16.msra.mxu1 %v16387_v6  ;;  %v1788_v6 = vunpack.c.h.bf16 %v1769_v24 }
 0x283   :  { %16389 = vmatprep.subr.bf16.mxu1 %v23384_v22 }
 0x285   :  { %1491 = vmatmul.mubr.f32.gmra.mrb[44].mxu1 %v1278_v35 }
 0x286   :  { %13019 = vmatprep.mubr.msk.f32.mxu1 %vm1034_vm6, %v1283_v28 }
 0x289   :  { %1496 = vmatmul.mubr.f32.gmra.mrb[46].mxu1 %v1282_v40 }
 0x28a   :  { %13020 = vmatprep.mubr.msk.f32.mxu1 %vm1034_vm6, %v1287_v63  ;;  %v1765_v63 = vld [vmem:[%s23334_s3 + $0xe0] sm:$0xff] }
 0x28b   :  { %v1779_v50 = vunpack.c.l.bf16 %v1765_v63 }
 0x28d   :  { %1501 = vmatmul.mubr.f32.gmra.mrb[48].mxu1 %v1286_v3  ;;  %v1780_v3 = vunpack.c.h.bf16 %v1765_v63 }
 0x28e   :  { %13021 = vmatprep.mubr.msk.f32.mxu1 %vm1034_vm6, %v1291_v0 }
 0x28f   :  { %1892 = vmatprep.mubr.f32.mxu0 %v1780_v3 }
 0x290   :  { %1893 = vmatmul.mubr.f32.vlgmr.msra.gmra.mrb[98].mxu0 %v1779_v50 }
 0x291   :  { %1506 = vmatmul.mubr.f32.gmra.mrb[50].mxu1 %v1290_v13 }
 0x292   :  { %13022 = vmatprep.mubr.msk.f32.mxu1 %vm1034_vm6, %v1295_v25  ;;  %v1767_v25 = vld [vmem:[%s23334_s3 + $0xf0] sm:$0xff] }
 0x293   :  { %v1784_v39 = vunpack.c.h.bf16 %v1767_v25 }
 0x295   :  { %1511 = vmatmul.mubr.f32.gmra.mrb[52].mxu1 %v1294_v37  ;;  %v1783_v37 = vunpack.c.l.bf16 %v1767_v25  ;;  %1897 = vmatprep.mubr.f32.mxu0 %v1784_v39 }
 0x296   :  { %13023 = vmatprep.mubr.msk.f32.mxu1 %vm1034_vm6, %v1299_v59 }
 0x297   :  { %1898 = vmatmul.mubr.f32.gmra.mrb[100].mxu0 %v1783_v37 }
 0x298   :  { %1902 = vmatprep.mubr.f32.mxu0 %v1788_v6 }
 0x299   :  { %1516 = vmatmul.mubr.f32.gmra.mrb[54].mxu1 %v1298_v34 }
 0x29a   :  { %15321 = vmatprep.mubr.msk.f32.mxu1 %vm17944_vm0, %v23385_v19 }
 0x2f0   :  { %v13487_v45 = vpop.f32.mrb[0].mxu1 }
 0x2f1   :  { %v13488_v56 = vpop.f32.mrb[1].mxu1 }
 0x2f2   :  { %v13489_v54 = vadd.f32 %v13488_v56, %v13487_v45  ;;  %v1787_v45 = vunpack.c.l.bf16 %v1769_v24 }
 0x2f4   :  { %v13490_v57 = vpop.f32.mrb[2].mxu1  ;;  %1903 = vmatmul.mubr.f32.gmra.mrb[102].mxu0 %v1787_v45 }
 0x2f5   :  { %v13491_v1 = vpop.f32.mrb[3].mxu1 }
 0x2f6   :  { %v13492_v49 = vadd.f32 %v13491_v1, %v13490_v57  ;;  %v1771_v1 = vld [vmem:[%s23334_s3 + $0x110] sm:$0xff] }
 0x2f8   :  { %v13493_v9 = vpop.f32.mrb[4].mxu1 }
 0x2f9   :  { %v13494_v31 = vpop.f32.mrb[5].mxu1 }
 0x2fa   :  { %v13495_v61 = vadd.f32 %v13494_v31, %v13493_v9  ;;  %v1791_v9 = vunpack.c.l.bf16 %v1771_v1 }
 0x2fc   :  { %v13496_v15 = vpop.f32.mrb[6].mxu1 }
 0x2fd   :  { %v13497_v52 = vpop.f32.mrb[7].mxu1 }
 0x2fe   :  { %v13498_v29 = vadd.f32 %v13497_v52, %v13496_v15 }
 0x300   :  { %v13499_v7 = vpop.f32.mrb[8].mxu1 }
 0x301   :  { %v13500_v41 = vpop.f32.mrb[9].mxu1 }
 0x302   :  { %v13501_v62 = vadd.f32 %v13500_v41, %v13499_v7  ;;  %v1773_v7 = vld [vmem:[%s23334_s3 + $0x120] sm:$0xff] }
 0x303   :  { %v1795_v41 = vunpack.c.l.bf16 %v1773_v7 }
 0x304   :  { %v13502_v8 = vpop.f32.mrb[10].mxu1 }
 0x305   :  { %v13503_v21 = vpop.f32.mrb[11].mxu1 }
 0x306   :  { %v13504_v35 = vadd.f32 %v13503_v21, %v13502_v8 }
 0x308   :  { %v13505_v28 = vpop.f32.mrb[12].mxu1 }
 0x309   :  { %v13506_v53 = vpop.f32.mrb[13].mxu1 }
 0x30a   :  { %v13507_v40 = vadd.f32 %v13506_v53, %v13505_v28  ;;  %v1775_v53 = vld [vmem:[%s23334_s3 + $0x130] sm:$0xff] }
 0x30b   :  { %v1799_v63 = vunpack.c.l.bf16 %v1775_v53 }
 0x312   :  { %v1222_v0 = vpop.f32.mrb[14].mxu1 }
 0x313   :  { %v19336_v55 = vadd.f32 %v13489_v54, %v1222_v0  ;;  %v1224_v13 = vpop.f32.mrb[15].mxu1 }
 0x314   :  { %v1777_v13 = vld [vmem:[%s23334_s3 + $0x140] sm:$0xff] }
 0x315   :  { %v1803_v25 = vunpack.c.l.bf16 %v1777_v13 }
 0x316   :  { %v1227_v59 = vpop.f32.mrb[16].mxu1 }
 0x317   :  { %v19341_v34 = vadd.f32 %v13492_v49, %v1227_v59  ;;  %v1229_v2 = vpop.f32.mrb[17].mxu1  ;;  %v1792_v49 = vunpack.c.h.bf16 %v1771_v1 }
 0x319   :  { %1907 = vmatprep.mubr.f32.mxu0 %v1792_v49 }
 0x31a   :  { %v1232_v56 = vpop.f32.mrb[18].mxu1  ;;  %1908 = vmatmul.mubr.f32.gmra.mrb[104].mxu0 %v1791_v9 }
 0x31b   :  { %v19346_v54 = vadd.f32 %v13495_v61, %v1232_v56  ;;  %v1234_v57 = vpop.f32.mrb[19].mxu1  ;;  %v1796_v61 = vunpack.c.h.bf16 %v1773_v7 }
 0x31d   :  { %1912 = vmatprep.mubr.f32.mxu0 %v1796_v61 }
 0x31e   :  { %v1237_v31 = vpop.f32.mrb[20].mxu1  ;;  %1913 = vmatmul.mubr.f32.gmra.mrb[106].mxu0 %v1795_v41 }
 0x31f   :  { %v19351_v15 = vadd.f32 %v13498_v29, %v1237_v31  ;;  %v1239_v52 = vpop.f32.mrb[21].mxu1  ;;  %v1800_v29 = vunpack.c.h.bf16 %v1775_v53 }
 0x321   :  { %1917 = vmatprep.mubr.f32.mxu0 %v1800_v29 }
 0x322   :  { %v1242_v8 = vpop.f32.mrb[22].mxu1  ;;  %1918 = vmatmul.mubr.f32.gmra.mrb[108].mxu0 %v1799_v63 }
 0x323   :  { %v19356_v21 = vadd.f32 %v13501_v62, %v1242_v8  ;;  %v1244_v28 = vpop.f32.mrb[23].mxu1  ;;  %v1804_v62 = vunpack.c.h.bf16 %v1777_v13 }
 0x325   :  { %1922 = vmatprep.mubr.f32.mxu0 %v1804_v62 }
 0x326   :  { %v1247_v50 = vpop.f32.mrb[24].mxu1  ;;  %1923 = vmatmul.mubr.f32.gmra.mrb[110].mxu0 %v1803_v25 }
 0x327   :  { %v19361_v3 = vadd.f32 %v13504_v35, %v1247_v50  ;;  %v1249_v0 = vpop.f32.mrb[25].mxu1  ;;  %15371 = vmatprep.mubr.msk.f32.mxu0 %vm17944_vm0, %v23385_v19  ;;  %v1256_v50 = vld [vmem:[%s23335_s4] sm:$0xff] }
 0x328   :  { %v1257_v0 = vld [vmem:[%s23335_s4 + $0x8] sm:$0xff] }
 0x329   :  { %v16390_v62 = vpack.c.bf16 %v1257_v0, %v1256_v50  ;;  %v1774_v50 = vld [vmem:[%s23334_s3 + $0x128] sm:$0xff] }
 0x32a   :  { %v1252_v39 = vpop.f32.mrb[26].mxu1 }
 0x32b   :  { %v19366_v37 = vadd.f32 %v13507_v40, %v1252_v39  ;;  %v1254_v59 = vpop.f32.mrb[27].mxu1 }
 0x332   :  { %v13540_v2 = vpop.f32.mrb[28].mxu1 }
 0x333   :  { %v13541_v35 = vpop.f32.mrb[29].mxu1 }
 0x334   :  { %v13542_v24 = vadd.f32 %v13541_v35, %v13540_v2 }
 0x336   :  { %v13543_v6 = vpop.f32.mrb[30].mxu1 }
 0x337   :  { %v13544_v45 = vpop.f32.mrb[31].mxu1 }
 0x338   :  { %v13545_v56 = vadd.f32 %v13544_v45, %v13543_v6 }
 0x33a   :  { %v13546_v57 = vpop.f32.mrb[32].mxu1 }
 0x33b   :  { %v13547_v1 = vpop.f32.mrb[33].mxu1 }
 0x33c   :  { %v13548_v49 = vadd.f32 %v13547_v1, %v13546_v57 }
 0x33e   :  { %v13549_v9 = vpop.f32.mrb[34].mxu1 }
 0x33f   :  { %v13550_v31 = vpop.f32.mrb[35].mxu1 }
 0x340   :  { %v13551_v52 = vadd.f32 %v13550_v31, %v13549_v9 }
 0x342   :  { %v13552_v7 = vpop.f32.mrb[36].mxu1 }
 0x343   :  { %v13553_v40 = vpop.f32.mrb[37].mxu1 }
 0x344   :  { %v13554_v61 = vadd.f32 %v13553_v40, %v13552_v7 }
 0x346   :  { %v13555_v41 = vpop.f32.mrb[38].mxu1 }
 0x347   :  { %v13556_v8 = vpop.f32.mrb[39].mxu1 }
 0x348   :  { %v13557_v28 = vadd.f32 %v13556_v8, %v13555_v41 }
 0x34a   :  { %v13558_v53 = vpop.f32.mrb[40].mxu1 }
 0x34b   :  { %v13559_v29 = vpop.f32.mrb[41].mxu1 }
 0x34c   :  { %v13560_v63 = vadd.f32 %v13559_v29, %v13558_v53 }
 0x354   :  { %v1487_v13 = vpop.f32.mrb[42].mxu1 }
 0x355   :  { %v1488_v25 = vadd.f32 %v13542_v24, %v1487_v13  ;;  %v1489_v39 = vpop.f32.mrb[43].mxu1  ;;  %v1798_v13 = vunpack.c.h.bf16 %v1774_v50 }
 0x357   :  { %15322 = vmatmul.mubr.msk.f32.vlgmr.msra.gmra.mrb[56].mxu1 %vm568_vm5, %v1488_v25  ;;  %v1797_v25 = vunpack.c.l.bf16 %v1774_v50 }
 0x358   :  { %v1492_v59 = vpop.f32.mrb[44].mxu1  ;;  %15324 = vmatprep.mubr.msk.f32.mxu1 %vm17944_vm0, %v23385_v19  ;;  %16391 = vmatpush3.bf16.msra.mxu1 %v16390_v62  ;;  %v1776_v62 = vld [vmem:[%s23334_s3 + $0x138] sm:$0xff] }
 0x359   :  { %v1493_v2 = vadd.f32 %v13545_v56, %v1492_v59  ;;  %v1494_v35 = vpop.f32.mrb[45].mxu1  ;;  %16424 = vmatprep.subr.bf16.mxu1 %v23384_v22  ;;  %v1802_v39 = vunpack.c.h.bf16 %v1776_v62  ;;  %v1778_v59 = vld [vmem:[%s23334_s3 + $0x148] sm:$0xff] }
 0x35a   :  { %v1806_v35 = vunpack.c.h.bf16 %v1778_v59 }
 0x35b   :  { %15325 = vmatmul.mubr.msk.f32.gmra.mrb[58].mxu1 %vm568_vm5, %v1493_v2  ;;  %v1801_v2 = vunpack.c.l.bf16 %v1776_v62 }
 0x35c   :  { %v1497_v6 = vpop.f32.mrb[46].mxu1  ;;  %15327 = vmatprep.mubr.msk.f32.mxu1 %vm17944_vm0, %v23385_v19 }
 0x35d   :  { %v1498_v45 = vadd.f32 %v13548_v49, %v1497_v6  ;;  %v1499_v24 = vpop.f32.mrb[47].mxu1  ;;  %v1805_v6 = vunpack.c.l.bf16 %v1778_v59 }
 0x35e   :  { %v2029_v24 = vld [vmem:[%s23335_s4 + $0x28] sm:$0xff] }
 0x35f   :  { %15328 = vmatmul.mubr.msk.f32.gmra.mrb[60].mxu1 %vm568_vm5, %v1498_v45  ;;  %v2028_v45 = vld [vmem:[%s23335_s4 + $0x20] sm:$0xff] }
 0x360   :  { %v1502_v57 = vpop.f32.mrb[48].mxu1  ;;  %15330 = vmatprep.mubr.msk.f32.mxu1 %vm17944_vm0, %v23385_v19 }
 0x361   :  { %v1503_v1 = vadd.f32 %v13551_v52, %v1502_v57  ;;  %v1504_v9 = vpop.f32.mrb[49].mxu1  ;;  %v16449_v57 = vpack.c.bf16 %v2029_v24, %v2028_v45  ;;  %v2166_v24 = vld [vmem:[%s23334_s3 + $0x190] sm:$0xff] }
 0x363   :  { %15331 = vmatmul.mubr.msk.f32.gmra.mrb[62].mxu1 %vm568_vm5, %v1503_v1  ;;  %16450 = vmatpush3.bf16.msra.mxu0 %v16449_v57  ;;  %v13611_v1 = vpop.f32.mrb[98].mxu0  ;;  %v2189_v57 = vunpack.c.h.bf16 %v2166_v24 }
 0x364   :  { %v1507_v56 = vpop.f32.mrb[50].mxu1  ;;  %15333 = vmatprep.mubr.msk.f32.mxu1 %vm17944_vm0, %v23385_v19  ;;  %16483 = vmatprep.subr.bf16.mxu0 %v23384_v22  ;;  %v13612_v9 = vpop.f32.mrb[99].mxu0 }
 0x365   :  { %v1508_v31 = vadd.f32 %v13554_v61, %v1507_v56  ;;  %v1509_v7 = vpop.f32.mrb[51].mxu1  ;;  %v19493_v56 = vadd.f32 %v13612_v9, %v13611_v1  ;;  %v2188_v1 = vunpack.c.l.bf16 %v2166_v24  ;;  %v2168_v9 = vld [vmem:[%s23334_s3 + $0x1a0] sm:$0xff] }
 0x367   :  { %15334 = vmatmul.mubr.msk.f32.gmra.mrb[64].mxu1 %vm568_vm5, %v1508_v31 }
 0x368   :  { %v1512_v49 = vpop.f32.mrb[52].mxu1  ;;  %15336 = vmatprep.mubr.msk.f32.mxu1 %vm17944_vm0, %v23385_v19 }
 0x369   :  { %v1513_v40 = vadd.f32 %v13557_v28, %v1512_v49  ;;  %v1514_v41 = vpop.f32.mrb[53].mxu1  ;;  %v1772_v28 = vld [vmem:[%s23334_s3 + $0x118] sm:$0xff] }
 0x36a   :  { %v1793_v0 = vunpack.c.l.bf16 %v1772_v28  ;;  %v13614_v31 = vpop.f32.mrb[100].mxu0 }
 0x36b   :  { %15337 = vmatmul.mubr.msk.f32.gmra.mrb[66].mxu1 %vm568_vm5, %v1513_v40  ;;  %v13615_v7 = vpop.f32.mrb[101].mxu0 }
 0x36c   :  { %v1517_v52 = vpop.f32.mrb[54].mxu1  ;;  %15339 = vmatprep.mubr.msk.f32.mxu1 %vm17944_vm0, %v23385_v19  ;;  %v19495_v49 = vadd.f32 %v13615_v7, %v13614_v31  ;;  %v2193_v31 = vunpack.c.h.bf16 %v2168_v9  ;;  %v2192_v7 = vunpack.c.l.bf16 %v2168_v9 }
 0x36d   :  { %v1518_v8 = vadd.f32 %v13560_v63, %v1517_v52  ;;  %v1519_v53 = vpop.f32.mrb[55].mxu1  ;;  %v1794_v63 = vunpack.c.h.bf16 %v1772_v28 }
 0x36f   :  { %15340 = vmatmul.mubr.msk.f32.gmra.mrb[68].mxu1 %vm568_vm5, %v1518_v8 }
 0x370   :  { %15346 = vmatprep.mubr.msk.f32.mxu1 %vm17944_vm0, %v23385_v19 }
 0x373   :  { %15347 = vmatmul.mubr.msk.f32.vlgmr.msra.gmra.mrb[70].mxu1 %vm568_vm5, %v19336_v55  ;;  %v1766_v55 = vld [vmem:[%s23334_s3 + $0xe8] sm:$0xff] }
 0x374   :  { %16426 = vmatpush1.bf16.msra.mxu1 %v19125_v18  ;;  %15349 = vmatprep.mubr.msk.f32.mxu1 %vm17944_vm0, %v23385_v19 }
 0x375   :  { %16427 = vmatprep.subr.bf16.mxu1 %v23384_v22 }
 0x377   :  { %15350 = vmatmul.mubr.msk.f32.gmra.mrb[72].mxu1 %vm568_vm5, %v19341_v34  ;;  %v1782_v34 = vunpack.c.h.bf16 %v1766_v55 }
 0x378   :  { %16429 = vmatpush1.bf16.msra.mxu1 %v19127_v38  ;;  %15352 = vmatprep.mubr.msk.f32.mxu1 %vm17944_vm0, %v23385_v19 }
 0x379   :  { %16430 = vmatprep.subr.bf16.mxu1 %v23384_v22 }
 0x37b   :  { %15353 = vmatmul.mubr.msk.f32.gmra.mrb[74].mxu1 %vm568_vm5, %v19346_v54  ;;  %v1768_v54 = vld [vmem:[%s23334_s3 + $0xf8] sm:$0xff] }
 0x37c   :  { %16432 = vmatpush1.bf16.msra.mxu1 %v19130_v10  ;;  %15355 = vmatprep.mubr.msk.f32.mxu1 %vm17944_vm0, %v23385_v19 }
 0x37d   :  { %16433 = vmatprep.subr.bf16.mxu1 %v23384_v22 }
 0x37f   :  { %15356 = vmatmul.mubr.msk.f32.gmra.mrb[76].mxu1 %vm568_vm5, %v19351_v15  ;;  %v1781_v15 = vunpack.c.l.bf16 %v1766_v55 }
 0x380   :  { %16435 = vmatpush1.bf16.msra.mxu1 %v19132_v36  ;;  %15358 = vmatprep.mubr.msk.f32.mxu1 %vm17944_vm0, %v23385_v19 }
 0x381   :  { %16436 = vmatprep.subr.bf16.mxu1 %v23384_v22 }
 0x383   :  { %15359 = vmatmul.mubr.msk.f32.gmra.mrb[78].mxu1 %vm568_vm5, %v19356_v21  ;;  %v1786_v21 = vunpack.c.h.bf16 %v1768_v54 }
 0x384   :  { %16438 = vmatpush1.bf16.msra.mxu1 %v19134_v11  ;;  %15361 = vmatprep.mubr.msk.f32.mxu1 %vm17944_vm0, %v23385_v19 }
 0x385   :  { %16439 = vmatprep.subr.bf16.mxu1 %v23384_v22 }
 0x387   :  { %15362 = vmatmul.mubr.msk.f32.gmra.mrb[80].mxu1 %vm568_vm5, %v19361_v3  ;;  %v1770_v3 = vld [vmem:[%s23334_s3 + $0x108] sm:$0xff] }
 0x388   :  { %16441 = vmatpush1.bf16.msra.mxu1 %v19136_v48  ;;  %15364 = vmatprep.mubr.msk.f32.mxu1 %vm17944_vm0, %v23385_v19  ;;  %v1790_v61 = vunpack.c.h.bf16 %v1770_v3  ;;  %v1789_v29 = vunpack.c.l.bf16 %v1770_v3 }
 0x389   :  { %16442 = vmatprep.subr.bf16.mxu1 %v23384_v22 }
 0x38b   :  { %15365 = vmatmul.mubr.msk.f32.gmra.mrb[82].mxu1 %vm568_vm5, %v19366_v37  ;;  %v1785_v37 = vunpack.c.l.bf16 %v1768_v54 }
 0x38c   :  { %16444 = vmatpush1.bf16.msra.mxu1 %v19139_v60  ;;  %13038 = vmatprep.mubr.msk.f32.mxu1 %vm1034_vm6, %v1782_v34 }
 0x38d   :  { %16445 = vmatprep.subr.bf16.mxu1 %v23384_v22 }
 0x390   :  { %16447 = vmatpush1.bf16.msra.mxu1 %v19141_v16 }
 0x391   :  { %1960 = vmatprep.subr.mxu1 %v23385_v19 }
 0x394   :  { %1961 = vmatpush1.msra.mxu1 %v19216_v42 }
 0x395   :  { %1993 = vmatmul.mubr.f32.vlgmr.msra.gmra.mrb[84].mxu1 %v1781_v15  ;;  %16452 = vmatprep.subr.bf16.mxu1 %v19091_v23 }
 0x396   :  { %16454 = vmatpush3.bf16.msra.mxu1 %v19093_v30  ;;  %13039 = vmatprep.mubr.msk.f32.mxu1 %vm1034_vm6, %v1786_v21 }
 0x397   :  { %16456 = vmatprep.subr.bf16.mxu1 %v19095_v12 }
 0x399   :  { %1998 = vmatmul.mubr.f32.gmra.mrb[86].mxu1 %v1785_v37 }
 0x39a   :  { %16458 = vmatpush3.bf16.msra.mxu1 %v19097_v27  ;;  %13040 = vmatprep.mubr.msk.f32.mxu1 %vm1034_vm6, %v1790_v61 }
 0x39b   :  { %16460 = vmatprep.subr.bf16.mxu1 %v19099_v44 }
 0x39d   :  { %2003 = vmatmul.mubr.f32.gmra.mrb[88].mxu1 %v1789_v29 }
 0x39e   :  { %16462 = vmatpush3.bf16.msra.mxu1 %v19101_v20  ;;  %13041 = vmatprep.mubr.msk.f32.mxu1 %vm1034_vm6, %v1794_v63  ;;  %v2158_v63 = vld [vmem:[%s23334_s3 + $0x150] sm:$0xff] }
 0x39f   :  { %16464 = vmatprep.subr.bf16.mxu1 %v19104_v32  ;;  %v2172_v50 = vunpack.c.l.bf16 %v2158_v63 }
 0x3a1   :  { %2008 = vmatmul.mubr.f32.gmra.mrb[90].mxu1 %v1793_v0  ;;  %v2173_v0 = vunpack.c.h.bf16 %v2158_v63 }
 0x3a2   :  { %16466 = vmatpush3.bf16.msra.mxu1 %v19106_v33  ;;  %13042 = vmatprep.mubr.msk.f32.mxu1 %vm1034_vm6, %v1798_v13  ;;  %v2160_v13 = vld [vmem:[%s23334_s3 + $0x160] sm:$0xff] }
 0x3a3   :  { %16468 = vmatprep.subr.bf16.mxu1 %v19108_v47  ;;  %v2177_v62 = vunpack.c.h.bf16 %v2160_v13 }
 0x3a5   :  { %2013 = vmatmul.mubr.f32.gmra.mrb[92].mxu1 %v1797_v25  ;;  %v2176_v25 = vunpack.c.l.bf16 %v2160_v13 }
 0x3a6   :  { %16470 = vmatpush3.bf16.msra.mxu1 %v19110_v5  ;;  %13043 = vmatprep.mubr.msk.f32.mxu1 %vm1034_vm6, %v1802_v39  ;;  %v2162_v39 = vld [vmem:[%s23334_s3 + $0x170] sm:$0xff] }
 0x3a7   :  { %16472 = vmatprep.subr.bf16.mxu1 %v19112_v17  ;;  %v2181_v59 = vunpack.c.h.bf16 %v2162_v39 }
 0x3a9   :  { %2018 = vmatmul.mubr.f32.gmra.mrb[94].mxu1 %v1801_v2  ;;  %v2180_v2 = vunpack.c.l.bf16 %v2162_v39 }
 0x3aa   :  { %16474 = vmatpush3.bf16.msra.mxu1 %v19114_v4  ;;  %13044 = vmatprep.mubr.msk.f32.mxu1 %vm1034_vm6, %v1806_v35  ;;  %v2164_v35 = vld [vmem:[%s23334_s3 + $0x180] sm:$0xff] }
 0x3ab   :  { %16476 = vmatprep.subr.bf16.mxu1 %v19116_v14  ;;  %v2184_v45 = vunpack.c.l.bf16 %v2164_v35 }
 0x3ad   :  { %2023 = vmatmul.mubr.f32.gmra.mrb[96].mxu1 %v1805_v6  ;;  %v2185_v6 = vunpack.c.h.bf16 %v2164_v35 }
 0x3ae   :  { %16478 = vmatpush3.bf16.msra.mxu1 %v19118_v51  ;;  %2285 = vmatprep.mubr.f32.mxu1 %v2173_v0 }
 0x3af   :  { %16480 = vmatprep.subr.bf16.mxu1 %v19121_v26 }
 0x3b2   :  { %16482 = vmatpush3.bf16.msra.mxu1 %v19123_v58 }
 0x3b3   :  { %16507 = vmatprep.subr.bf16.mxu1 %v23384_v22 }
 0x3b5   :  { %2286 = vmatmul.mubr.f32.vlgmr.msra.gmra.mrb[98].mxu1 %v2172_v50 }
 0x3b6   :  { %2290 = vmatprep.mubr.f32.mxu1 %v2177_v62 }
 0x3b9   :  { %2291 = vmatmul.mubr.f32.gmra.mrb[100].mxu1 %v2176_v25 }
 0x3ba   :  { %2295 = vmatprep.mubr.f32.mxu1 %v2181_v59 }
 0x3bd   :  { %2296 = vmatmul.mubr.f32.gmra.mrb[102].mxu1 %v2180_v2 }
 0x3be   :  { %2300 = vmatprep.mubr.f32.mxu1 %v2185_v6 }
 0x3c1   :  { %2301 = vmatmul.mubr.f32.gmra.mrb[104].mxu1 %v2184_v45 }
 0x3c2   :  { %2305 = vmatprep.mubr.f32.mxu1 %v2189_v57 }
 0x3c5   :  { %2306 = vmatmul.mubr.f32.gmra.mrb[106].mxu1 %v2188_v1 }
 0x3c6   :  { %2310 = vmatprep.mubr.f32.mxu1 %v2193_v31 }
 0x3c7   :  { %v13617_v40 = vpop.f32.mrb[102].mxu0 }
 0x3c8   :  { %v13618_v41 = vpop.f32.mrb[103].mxu0 }
 0x3c9   :  { %v19497_v52 = vadd.f32 %v13618_v41, %v13617_v40  ;;  %v2170_v40 = vld [vmem:[%s23334_s3 + $0x1b0] sm:$0xff]  ;;  %2311 = vmatmul.mubr.f32.gmra.mrb[108].mxu1 %v2192_v7 }
 0x3ca   :  { %v2197_v41 = vunpack.c.h.bf16 %v2170_v40 }
 0x3cc   :  { %2315 = vmatprep.mubr.f32.mxu1 %v2197_v41 }
 0x3ed   :  { %v13620_v8 = vpop.f32.mrb[104].mxu0 }
 0x3ee   :  { %v13621_v53 = vpop.f32.mrb[105].mxu0 }
 0x3ef   :  { %v19499_v55 = vadd.f32 %v13621_v53, %v13620_v8  ;;  %v2196_v8 = vunpack.c.l.bf16 %v2170_v40 }
 0x3f1   :  { %v13623_v34 = vpop.f32.mrb[106].mxu0  ;;  %2316 = vmatmul.mubr.f32.gmra.mrb[110].mxu1 %v2196_v8 }
 0x3f2   :  { %v13624_v54 = vpop.f32.mrb[107].mxu0  ;;  %15396 = vmatprep.mubr.msk.f32.mxu1 %vm17944_vm0, %v23385_v19 }
 0x3f3   :  { %v19501_v15 = vadd.f32 %v13624_v54, %v13623_v34 }
 0x3f5   :  { %v13626_v21 = vpop.f32.mrb[108].mxu0 }
 0x3f6   :  { %v13627_v3 = vpop.f32.mrb[109].mxu0 }
 0x3f7   :  { %v19503_v37 = vadd.f32 %v13627_v3, %v13626_v21 }
 0x3f9   :  { %v13629_v61 = vpop.f32.mrb[110].mxu0 }
 0x3fa   :  { %v13630_v28 = vpop.f32.mrb[111].mxu0 }
 0x3fb   :  { %v19505_v29 = vadd.f32 %v13630_v28, %v13629_v61 }
 0x42a   :  { %v1610_v53 = vpop.f32.mrb[56].mxu1 }
 0x42b   :  { %v15323_v34 = vpop.f32.mrb[57].mxu1 }
 0x42e   :  { %v1615_v54 = vpop.f32.mrb[58].mxu1 }
 0x42f   :  { %v15326_v21 = vpop.f32.mrb[59].mxu1 }
 0x432   :  { %v1620_v3 = vpop.f32.mrb[60].mxu1 }
 0x433   :  { %v15329_v61 = vpop.f32.mrb[61].mxu1 }
 0x436   :  { %v1625_v28 = vpop.f32.mrb[62].mxu1 }
 0x437   :  { %v15332_v63 = vpop.f32.mrb[63].mxu1 }
 0x43a   :  { %v1630_v50 = vpop.f32.mrb[64].mxu1 }
 0x43b   :  { %v15335_v0 = vpop.f32.mrb[65].mxu1 }
 0x43e   :  { %v1635_v13 = vpop.f32.mrb[66].mxu1 }
 0x43f   :  { %v15338_v62 = vpop.f32.mrb[67].mxu1 }
 0x442   :  { %v1640_v25 = vpop.f32.mrb[68].mxu1 }
 0x443   :  { %v15341_v39 = vpop.f32.mrb[69].mxu1 }
 0x446   :  { %v1731_v59 = vpop.f32.mrb[70].mxu1 }
 0x447   :  { %v19530_v2 = vadd.f32 %v1731_v59, %v1610_v53  ;;  %v15348_v35 = vpop.f32.mrb[71].mxu1 }
 0x44a   :  { %v1736_v6 = vpop.f32.mrb[72].mxu1 }
 0x44b   :  { %v19532_v45 = vadd.f32 %v1736_v6, %v1615_v54  ;;  %v15351_v24 = vpop.f32.mrb[73].mxu1 }
 0x44e   :  { %v1741_v57 = vpop.f32.mrb[74].mxu1 }
 0x44f   :  { %v19534_v1 = vadd.f32 %v1741_v57, %v1620_v3  ;;  %v15354_v9 = vpop.f32.mrb[75].mxu1 }
 0x452   :  { %v1746_v31 = vpop.f32.mrb[76].mxu1 }
 0x453   :  { %v19536_v7 = vadd.f32 %v1746_v31, %v1625_v28  ;;  %v15357_v40 = vpop.f32.mrb[77].mxu1 }
 0x456   :  { %v1751_v41 = vpop.f32.mrb[78].mxu1 }
 0x457   :  { %v19538_v8 = vadd.f32 %v1751_v41, %v1630_v50  ;;  %v15360_v34 = vpop.f32.mrb[79].mxu1 }
 0x45a   :  { %v1756_v21 = vpop.f32.mrb[80].mxu1 }
 0x45b   :  { %v19540_v53 = vadd.f32 %v1756_v21, %v1635_v13  ;;  %v15363_v61 = vpop.f32.mrb[81].mxu1  ;;  %v2161_v21 = vld [vmem:[%s23334_s3 + $0x168] sm:$0xff] }
 0x45c   :  { %v2179_v61 = vunpack.c.h.bf16 %v2161_v21 }
 0x45e   :  { %v1761_v63 = vpop.f32.mrb[82].mxu1 }
 0x45f   :  { %v19542_v54 = vadd.f32 %v1761_v63, %v1640_v25  ;;  %v15366_v0 = vpop.f32.mrb[83].mxu1  ;;  %v2163_v63 = vld [vmem:[%s23334_s3 + $0x178] sm:$0xff] }
 0x460   :  { %v2178_v0 = vunpack.c.l.bf16 %v2161_v21 }
 0x468   :  { %v1994_v62 = vpop.f32.mrb[84].mxu1 }
 0x469   :  { %v1995_v3 = vadd.f32 %v19493_v56, %v1994_v62  ;;  %v1996_v39 = vpop.f32.mrb[85].mxu1  ;;  %v2183_v62 = vunpack.c.h.bf16 %v2163_v63 }
 0x46a   :  { %v2182_v39 = vunpack.c.l.bf16 %v2163_v63 }
 0x46b   :  { %15372 = vmatmul.mubr.msk.f32.vlgmr.msra.gmra.mrb[112].mxu0 %vm568_vm5, %v1995_v3  ;;  %v2165_v3 = vld [vmem:[%s23334_s3 + $0x188] sm:$0xff] }
 0x46c   :  { %16485 = vmatpush1.bf16.msra.mxu0 %v19125_v18  ;;  %v1999_v28 = vpop.f32.mrb[86].mxu1  ;;  %15374 = vmatprep.mubr.msk.f32.mxu0 %vm17944_vm0, %v23385_v19 }
 0x46d   :  { %v2000_v50 = vadd.f32 %v19495_v49, %v1999_v28  ;;  %16486 = vmatprep.subr.bf16.mxu0 %v23384_v22  ;;  %v2001_v13 = vpop.f32.mrb[87].mxu1  ;;  %v2187_v28 = vunpack.c.h.bf16 %v2165_v3 }
 0x46e   :  { %v2186_v13 = vunpack.c.l.bf16 %v2165_v3 }
 0x46f   :  { %15375 = vmatmul.mubr.msk.f32.gmra.mrb[114].mxu0 %vm568_vm5, %v2000_v50  ;;  %v2167_v50 = vld [vmem:[%s23334_s3 + $0x198] sm:$0xff] }
 0x470   :  { %16488 = vmatpush1.bf16.msra.mxu0 %v19127_v38  ;;  %v2004_v25 = vpop.f32.mrb[88].mxu1  ;;  %15377 = vmatprep.mubr.msk.f32.mxu0 %vm17944_vm0, %v23385_v19 }
 0x471   :  { %v2005_v56 = vadd.f32 %v19497_v52, %v2004_v25  ;;  %16489 = vmatprep.subr.bf16.mxu0 %v23384_v22  ;;  %v2006_v59 = vpop.f32.mrb[89].mxu1  ;;  %v2191_v25 = vunpack.c.h.bf16 %v2167_v50 }
 0x472   :  { %v2190_v59 = vunpack.c.l.bf16 %v2167_v50 }
 0x473   :  { %15378 = vmatmul.mubr.msk.f32.gmra.mrb[116].mxu0 %vm568_vm5, %v2005_v56  ;;  %v2169_v56 = vld [vmem:[%s23334_s3 + $0x1a8] sm:$0xff] }
 0x474   :  { %16491 = vmatpush1.bf16.msra.mxu0 %v19130_v10  ;;  %v2009_v49 = vpop.f32.mrb[90].mxu1  ;;  %15380 = vmatprep.mubr.msk.f32.mxu0 %vm17944_vm0, %v23385_v19 }
 0x475   :  { %v2010_v35 = vadd.f32 %v19499_v55, %v2009_v49  ;;  %16492 = vmatprep.subr.bf16.mxu0 %v23384_v22  ;;  %v2011_v6 = vpop.f32.mrb[91].mxu1  ;;  %v2195_v49 = vunpack.c.h.bf16 %v2169_v56 }
 0x476   :  { %v2194_v6 = vunpack.c.l.bf16 %v2169_v56 }
 0x477   :  { %15381 = vmatmul.mubr.msk.f32.gmra.mrb[118].mxu0 %vm568_vm5, %v2010_v35  ;;  %v2171_v35 = vld [vmem:[%s23334_s3 + $0x1b8] sm:$0xff] }
 0x478   :  { %16494 = vmatpush1.bf16.msra.mxu0 %v19132_v36  ;;  %v2014_v52 = vpop.f32.mrb[92].mxu1  ;;  %15383 = vmatprep.mubr.msk.f32.mxu0 %vm17944_vm0, %v23385_v19 }
 0x479   :  { %v2015_v24 = vadd.f32 %v19501_v15, %v2014_v52  ;;  %16495 = vmatprep.subr.bf16.mxu0 %v23384_v22  ;;  %v2016_v57 = vpop.f32.mrb[93].mxu1  ;;  %v2159_v15 = vld [vmem:[%s23334_s3 + $0x158] sm:$0xff]  ;;  %v2199_v52 = vunpack.c.h.bf16 %v2171_v35 }
 0x47a   :  { %v2175_v41 = vunpack.c.h.bf16 %v2159_v15  ;;  %v2421_v57 = vld [vmem:[%s23335_s4 + $0x30] sm:$0xff] }
 0x47b   :  { %15384 = vmatmul.mubr.msk.f32.gmra.mrb[120].mxu0 %vm568_vm5, %v2015_v24  ;;  %v2198_v24 = vunpack.c.l.bf16 %v2171_v35  ;;  %v2551_v35 = vld [vmem:[%s23334_s3 + $0x1c0] sm:$0xff] }
 0x47c   :  { %16497 = vmatpush1.bf16.msra.mxu0 %v19134_v11  ;;  %v2019_v55 = vpop.f32.mrb[94].mxu1  ;;  %15386 = vmatprep.mubr.msk.f32.mxu0 %vm17944_vm0, %v23385_v19 }
 0x47d   :  { %v2020_v9 = vadd.f32 %v19503_v37, %v2019_v55  ;;  %16498 = vmatprep.subr.bf16.mxu0 %v23384_v22  ;;  %v2021_v31 = vpop.f32.mrb[95].mxu1  ;;  %v2422_v55 = vld [vmem:[%s23335_s4 + $0x38] sm:$0xff] }
 0x47f   :  { %15387 = vmatmul.mubr.msk.f32.gmra.mrb[122].mxu0 %vm568_vm5, %v2020_v9  ;;  %v16508_v9 = vpack.c.bf16 %v2422_v55, %v2421_v57 }
 0x480   :  { %16500 = vmatpush1.bf16.msra.mxu0 %v19136_v48  ;;  %v2024_v40 = vpop.f32.mrb[96].mxu1  ;;  %15389 = vmatprep.mubr.msk.f32.mxu0 %vm17944_vm0, %v23385_v19 }
 0x481   :  { %v2025_v34 = vadd.f32 %v19505_v29, %v2024_v40  ;;  %16501 = vmatprep.subr.bf16.mxu0 %v23384_v22  ;;  %v2026_v37 = vpop.f32.mrb[97].mxu1  ;;  %v2174_v29 = vunpack.c.l.bf16 %v2159_v15  ;;  %16509 = vmatpush3.bf16.msra.mxu1 %v16508_v9  ;;  %v2555_v9 = vld [vmem:[%s23334_s3 + $0x1e0] sm:$0xff] }
 0x482   :  { %16542 = vmatprep.subr.bf16.mxu1 %v23384_v22 }
 0x483   :  { %15390 = vmatmul.mubr.msk.f32.gmra.mrb[124].mxu0 %vm568_vm5, %v2025_v34 }
 0x484   :  { %16503 = vmatpush1.bf16.msra.mxu0 %v19139_v60  ;;  %13052 = vmatprep.mubr.msk.f32.mxu0 %vm1034_vm6, %v2175_v41 }
 0x485   :  { %16504 = vmatprep.subr.bf16.mxu0 %v23384_v22 }
 0x488   :  { %16506 = vmatpush1.bf16.msra.mxu0 %v19141_v16  ;;  %v13673_v31 = vpop.f32.mrb[98].mxu1 }
 0x489   :  { %2353 = vmatprep.subr.mxu0 %v23385_v19  ;;  %v13674_v15 = vpop.f32.mrb[99].mxu1 }
 0x48a   :  { %v19639_v40 = vadd.f32 %v13674_v15, %v13673_v31  ;;  %v2574_v31 = vunpack.c.h.bf16 %v2555_v9  ;;  %v2573_v15 = vunpack.c.l.bf16 %v2555_v9 }
 0x48c   :  { %2354 = vmatpush1.msra.mxu0 %v19216_v42  ;;  %v13676_v41 = vpop.f32.mrb[100].mxu1 }
 0x48d   :  { %2386 = vmatmul.mubr.f32.vlgmr.msra.gmra.mrb[126].mxu0 %v2174_v29  ;;  %16511 = vmatprep.subr.bf16.mxu0 %v19091_v23  ;;  %v13677_v34 = vpop.f32.mrb[101].mxu1 }
 0x48e   :  { %16513 = vmatpush3.bf16.msra.mxu0 %v19093_v30  ;;  %13053 = vmatprep.mubr.msk.f32.mxu0 %vm1034_vm6, %v2179_v61  ;;  %v19641_v37 = vadd.f32 %v13677_v34, %v13676_v41  ;;  %v2557_v41 = vld [vmem:[%s23334_s3 + $0x1f0] sm:$0xff] }
 0x48f   :  { %16515 = vmatprep.subr.bf16.mxu0 %v19095_v12  ;;  %v2578_v34 = vunpack.c.h.bf16 %v2557_v41 }
 0x490   :  { %v13679_v21 = vpop.f32.mrb[102].mxu1 }
 0x491   :  { %2391 = vmatmul.mubr.f32.gmra.mrb[128].mxu0 %v2178_v0  ;;  %v13680_v29 = vpop.f32.mrb[103].mxu1 }
 0x492   :  { %16517 = vmatpush3.bf16.msra.mxu0 %v19097_v27  ;;  %13054 = vmatprep.mubr.msk.f32.mxu0 %vm1034_vm6, %v2183_v62  ;;  %v19643_v61 = vadd.f32 %v13680_v29, %v13679_v21  ;;  %v2577_v21 = vunpack.c.l.bf16 %v2557_v41  ;;  %v2559_v29 = vld [vmem:[%s23334_s3 + $0x200] sm:$0xff] }
 0x493   :  { %16519 = vmatprep.subr.bf16.mxu0 %v19099_v44 }
 0x494   :  { %v13682_v63 = vpop.f32.mrb[104].mxu1 }
 0x495   :  { %2396 = vmatmul.mubr.f32.gmra.mrb[130].mxu0 %v2182_v39  ;;  %v13683_v0 = vpop.f32.mrb[105].mxu1 }
 0x496   :  { %16521 = vmatpush3.bf16.msra.mxu0 %v19101_v20  ;;  %13055 = vmatprep.mubr.msk.f32.mxu0 %vm1034_vm6, %v2187_v28  ;;  %v19645_v62 = vadd.f32 %v13683_v0, %v13682_v63  ;;  %v2582_v63 = vunpack.c.h.bf16 %v2559_v29  ;;  %v2581_v0 = vunpack.c.l.bf16 %v2559_v29 }
 0x497   :  { %16523 = vmatprep.subr.bf16.mxu0 %v19104_v32 }
 0x498   :  { %v13685_v3 = vpop.f32.mrb[106].mxu1 }
 0x499   :  { %2401 = vmatmul.mubr.f32.gmra.mrb[132].mxu0 %v2186_v13  ;;  %v13686_v39 = vpop.f32.mrb[107].mxu1 }
 0x49a   :  { %16525 = vmatpush3.bf16.msra.mxu0 %v19106_v33  ;;  %13056 = vmatprep.mubr.msk.f32.mxu0 %vm1034_vm6, %v2191_v25  ;;  %v19647_v28 = vadd.f32 %v13686_v39, %v13685_v3  ;;  %v2561_v3 = vld [vmem:[%s23334_s3 + $0x210] sm:$0xff] }
 0x49b   :  { %16527 = vmatprep.subr.bf16.mxu0 %v19108_v47  ;;  %v2586_v39 = vunpack.c.h.bf16 %v2561_v3 }
 0x49c   :  { %v13688_v50 = vpop.f32.mrb[108].mxu1 }
 0x49d   :  { %2406 = vmatmul.mubr.f32.gmra.mrb[134].mxu0 %v2190_v59  ;;  %v13689_v13 = vpop.f32.mrb[109].mxu1 }
 0x49e   :  { %16529 = vmatpush3.bf16.msra.mxu0 %v19110_v5  ;;  %13057 = vmatprep.mubr.msk.f32.mxu0 %vm1034_vm6, %v2195_v49  ;;  %v19649_v25 = vadd.f32 %v13689_v13, %v13688_v50  ;;  %v2585_v50 = vunpack.c.l.bf16 %v2561_v3  ;;  %v2563_v13 = vld [vmem:[%s23334_s3 + $0x220] sm:$0xff] }
 0x49f   :  { %16531 = vmatprep.subr.bf16.mxu0 %v19112_v17 }
 0x4a1   :  { %2411 = vmatmul.mubr.f32.gmra.mrb[136].mxu0 %v2194_v6  ;;  %v2565_v6 = vunpack.c.l.bf16 %v2551_v35 }
 0x4a2   :  { %16533 = vmatpush3.bf16.msra.mxu0 %v19114_v4  ;;  %13058 = vmatprep.mubr.msk.f32.mxu0 %vm1034_vm6, %v2199_v52  ;;  %v2566_v52 = vunpack.c.h.bf16 %v2551_v35 }
 0x4a3   :  { %16535 = vmatprep.subr.bf16.mxu0 %v19116_v14 }
 0x4a5   :  { %2416 = vmatmul.mubr.f32.gmra.mrb[138].mxu0 %v2198_v24  ;;  %v2553_v24 = vld [vmem:[%s23334_s3 + $0x1d0] sm:$0xff] }
 0x4a6   :  { %16537 = vmatpush3.bf16.msra.mxu0 %v19118_v51  ;;  %2678 = vmatprep.mubr.f32.mxu0 %v2566_v52  ;;  %v2570_v57 = vunpack.c.h.bf16 %v2553_v24  ;;  %v2569_v55 = vunpack.c.l.bf16 %v2553_v24 }
 0x4a7   :  { %16539 = vmatprep.subr.bf16.mxu0 %v19121_v26 }
 0x4aa   :  { %16541 = vmatpush3.bf16.msra.mxu0 %v19123_v58 }
 0x4ab   :  { %16566 = vmatprep.subr.bf16.mxu0 %v23384_v22 }
 0x4ad   :  { %2679 = vmatmul.mubr.f32.vlgmr.msra.gmra.mrb[140].mxu0 %v2565_v6 }
 0x4ae   :  { %2683 = vmatprep.mubr.f32.mxu0 %v2570_v57 }
 0x4b1   :  { %2684 = vmatmul.mubr.f32.gmra.mrb[142].mxu0 %v2569_v55 }
 0x4b2   :  { %2688 = vmatprep.mubr.f32.mxu0 %v2574_v31 }
 0x4b5   :  { %2689 = vmatmul.mubr.f32.gmra.mrb[144].mxu0 %v2573_v15 }
 0x4b6   :  { %2693 = vmatprep.mubr.f32.mxu0 %v2578_v34 }
 0x4b9   :  { %2694 = vmatmul.mubr.f32.gmra.mrb[146].mxu0 %v2577_v21 }
 0x4ba   :  { %2698 = vmatprep.mubr.f32.mxu0 %v2582_v63 }
 0x4bd   :  { %2699 = vmatmul.mubr.f32.gmra.mrb[148].mxu0 %v2581_v0 }
 0x4be   :  { %2703 = vmatprep.mubr.f32.mxu0 %v2586_v39 }
 0x4c1   :  { %2704 = vmatmul.mubr.f32.gmra.mrb[150].mxu0 %v2585_v50 }
 0x4c4   :  { %v13691_v56 = vpop.f32.mrb[110].mxu1 }
 0x4c5   :  { %v13692_v59 = vpop.f32.mrb[111].mxu1 }
 0x4c6   :  { %v19651_v49 = vadd.f32 %v13692_v59, %v13691_v56  ;;  %v2590_v56 = vunpack.c.h.bf16 %v2563_v13  ;;  %v2589_v59 = vunpack.c.l.bf16 %v2563_v13 }
 0x4c8   :  { %2708 = vmatprep.mubr.f32.mxu0 %v2590_v56 }
 0x4c9   :  { %2709 = vmatmul.mubr.f32.gmra.mrb[152].mxu0 %v2589_v59 }
 0x4ca   :  { %15421 = vmatprep.mubr.msk.f32.mxu0 %vm17944_vm0, %v23385_v19 }
 0x53e   :  { %v2117_v35 = vpop.f32.mrb[112].mxu0 }
 0x53f   :  { %v19677_v6 = vadd.f32 %v2117_v35, %v19530_v2  ;;  %v15373_v52 = vpop.f32.mrb[113].mxu0 }
 0x542   :  { %v2122_v24 = vpop.f32.mrb[114].mxu0 }
 0x543   :  { %v19680_v57 = vadd.f32 %v2122_v24, %v19532_v45  ;;  %v15376_v55 = vpop.f32.mrb[115].mxu0 }
 0x546   :  { %v2127_v9 = vpop.f32.mrb[116].mxu0 }
 0x547   :  { %v19683_v31 = vadd.f32 %v2127_v9, %v19534_v1  ;;  %v15379_v15 = vpop.f32.mrb[117].mxu0 }
 0x54a   :  { %v2132_v41 = vpop.f32.mrb[118].mxu0 }
 0x54b   :  { %v19686_v34 = vadd.f32 %v2132_v41, %v19536_v7  ;;  %v15382_v21 = vpop.f32.mrb[119].mxu0 }
 0x54e   :  { %v2137_v29 = vpop.f32.mrb[120].mxu0 }
 0x54f   :  { %v19689_v2 = vadd.f32 %v2137_v29, %v19538_v8  ;;  %v15385_v63 = vpop.f32.mrb[121].mxu0 }
 0x552   :  { %v2142_v0 = vpop.f32.mrb[122].mxu0 }
 0x553   :  { %v19692_v45 = vadd.f32 %v2142_v0, %v19540_v53  ;;  %v15388_v3 = vpop.f32.mrb[123].mxu0  ;;  %v2554_v0 = vld [vmem:[%s23334_s3 + $0x1d8] sm:$0xff] }
 0x554   :  { %v2572_v3 = vunpack.c.h.bf16 %v2554_v0 }
 0x556   :  { %v2147_v39 = vpop.f32.mrb[124].mxu0 }
 0x557   :  { %v19695_v1 = vadd.f32 %v2147_v39, %v19542_v54  ;;  %v15391_v50 = vpop.f32.mrb[125].mxu0  ;;  %v2556_v39 = vld [vmem:[%s23334_s3 + $0x1e8] sm:$0xff] }
 0x558   :  { %v2571_v50 = vunpack.c.l.bf16 %v2554_v0 }
 0x560   :  { %v2387_v13 = vpop.f32.mrb[126].mxu0 }
 0x561   :  { %v2388_v7 = vadd.f32 %v19639_v40, %v2387_v13  ;;  %v2389_v56 = vpop.f32.mrb[127].mxu0  ;;  %v2576_v13 = vunpack.c.h.bf16 %v2556_v39 }
 0x562   :  { %v2575_v56 = vunpack.c.l.bf16 %v2556_v39 }
 0x563   :  { %15397 = vmatmul.mubr.msk.f32.vlgmr.msra.gmra.mrb[112].mxu1 %vm568_vm5, %v2388_v7  ;;  %v2558_v7 = vld [vmem:[%s23334_s3 + $0x1f8] sm:$0xff] }
 0x564   :  { %16544 = vmatpush1.bf16.msra.mxu1 %v19125_v18  ;;  %v2392_v8 = vpop.f32.mrb[128].mxu0  ;;  %15399 = vmatprep.mubr.msk.f32.mxu1 %vm17944_vm0, %v23385_v19 }
 0x565   :  { %v2393_v53 = vadd.f32 %v19641_v37, %v2392_v8  ;;  %16545 = vmatprep.subr.bf16.mxu1 %v23384_v22  ;;  %v2394_v59 = vpop.f32.mrb[129].mxu0  ;;  %v2580_v8 = vunpack.c.h.bf16 %v2558_v7 }
 0x566   :  { %v2579_v59 = vunpack.c.l.bf16 %v2558_v7 }
 0x567   :  { %15400 = vmatmul.mubr.msk.f32.gmra.mrb[114].mxu1 %vm568_vm5, %v2393_v53  ;;  %v2560_v53 = vld [vmem:[%s23334_s3 + $0x208] sm:$0xff] }
 0x568   :  { %16547 = vmatpush1.bf16.msra.mxu1 %v19127_v38  ;;  %v2397_v54 = vpop.f32.mrb[130].mxu0  ;;  %15402 = vmatprep.mubr.msk.f32.mxu1 %vm17944_vm0, %v23385_v19 }
 0x569   :  { %v2398_v40 = vadd.f32 %v19643_v61, %v2397_v54  ;;  %16548 = vmatprep.subr.bf16.mxu1 %v23384_v22  ;;  %v2399_v35 = vpop.f32.mrb[131].mxu0  ;;  %v2584_v54 = vunpack.c.h.bf16 %v2560_v53 }
 0x56a   :  { %v2583_v35 = vunpack.c.l.bf16 %v2560_v53 }
 0x56b   :  { %15403 = vmatmul.mubr.msk.f32.gmra.mrb[116].mxu1 %vm568_vm5, %v2398_v40  ;;  %v2562_v40 = vld [vmem:[%s23334_s3 + $0x218] sm:$0xff] }
 0x56c   :  { %16550 = vmatpush1.bf16.msra.mxu1 %v19130_v10  ;;  %v2402_v37 = vpop.f32.mrb[132].mxu0  ;;  %15405 = vmatprep.mubr.msk.f32.mxu1 %vm17944_vm0, %v23385_v19 }
 0x56d   :  { %v2403_v52 = vadd.f32 %v19645_v62, %v2402_v37  ;;  %16551 = vmatprep.subr.bf16.mxu1 %v23384_v22  ;;  %v2404_v24 = vpop.f32.mrb[133].mxu0  ;;  %v2588_v37 = vunpack.c.h.bf16 %v2562_v40 }
 0x56e   :  { %v2587_v24 = vunpack.c.l.bf16 %v2562_v40 }
 0x56f   :  { %15406 = vmatmul.mubr.msk.f32.gmra.mrb[118].mxu1 %vm568_vm5, %v2403_v52  ;;  %v2564_v52 = vld [vmem:[%s23334_s3 + $0x228] sm:$0xff] }
 0x570   :  { %16553 = vmatpush1.bf16.msra.mxu1 %v19132_v36  ;;  %v2407_v61 = vpop.f32.mrb[134].mxu0  ;;  %15408 = vmatprep.mubr.msk.f32.mxu1 %vm17944_vm0, %v23385_v19 }
 0x571   :  { %v2408_v55 = vadd.f32 %v19647_v28, %v2407_v61  ;;  %16554 = vmatprep.subr.bf16.mxu1 %v23384_v22  ;;  %v2409_v9 = vpop.f32.mrb[135].mxu0  ;;  %v2552_v28 = vld [vmem:[%s23334_s3 + $0x1c8] sm:$0xff]  ;;  %v2592_v61 = vunpack.c.h.bf16 %v2564_v52 }
 0x572   :  { %v2568_v29 = vunpack.c.h.bf16 %v2552_v28  ;;  %v2814_v9 = vld [vmem:[%s23335_s4 + $0x40] sm:$0xff] }
 0x573   :  { %15409 = vmatmul.mubr.msk.f32.gmra.mrb[120].mxu1 %vm568_vm5, %v2408_v55  ;;  %v2591_v55 = vunpack.c.l.bf16 %v2564_v52  ;;  %v2944_v52 = vld [vmem:[%s23334_s3 + $0x230] sm:$0xff] }
 0x574   :  { %16556 = vmatpush1.bf16.msra.mxu1 %v19134_v11  ;;  %v2412_v62 = vpop.f32.mrb[136].mxu0  ;;  %15411 = vmatprep.mubr.msk.f32.mxu1 %vm17944_vm0, %v23385_v19 }
 0x575   :  { %v2413_v15 = vadd.f32 %v19649_v25, %v2412_v62  ;;  %16557 = vmatprep.subr.bf16.mxu1 %v23384_v22  ;;  %v2414_v41 = vpop.f32.mrb[137].mxu0  ;;  %v2815_v62 = vld [vmem:[%s23335_s4 + $0x48] sm:$0xff] }
 0x577   :  { %15412 = vmatmul.mubr.msk.f32.gmra.mrb[122].mxu1 %vm568_vm5, %v2413_v15  ;;  %v16567_v15 = vpack.c.bf16 %v2815_v62, %v2814_v9 }
 0x578   :  { %16559 = vmatpush1.bf16.msra.mxu1 %v19136_v48  ;;  %v2417_v21 = vpop.f32.mrb[138].mxu0  ;;  %15414 = vmatprep.mubr.msk.f32.mxu1 %vm17944_vm0, %v23385_v19 }
 0x579   :  { %v2418_v63 = vadd.f32 %v19651_v49, %v2417_v21  ;;  %16560 = vmatprep.subr.bf16.mxu1 %v23384_v22  ;;  %v2419_v25 = vpop.f32.mrb[139].mxu0  ;;  %v2567_v49 = vunpack.c.l.bf16 %v2552_v28  ;;  %16568 = vmatpush3.bf16.msra.mxu0 %v16567_v15  ;;  %v2948_v15 = vld [vmem:[%s23334_s3 + $0x250] sm:$0xff] }
 0x57a   :  { %16601 = vmatprep.subr.bf16.mxu0 %v23384_v22 }
 0x57b   :  { %15415 = vmatmul.mubr.msk.f32.gmra.mrb[124].mxu1 %vm568_vm5, %v2418_v63 }
 0x57c   :  { %16562 = vmatpush1.bf16.msra.mxu1 %v19139_v60  ;;  %13066 = vmatprep.mubr.msk.f32.mxu1 %vm1034_vm6, %v2568_v29 }
 0x57d   :  { %16563 = vmatprep.subr.bf16.mxu1 %v23384_v22 }
 0x580   :  { %16565 = vmatpush1.bf16.msra.mxu1 %v19141_v16  ;;  %v13735_v41 = vpop.f32.mrb[140].mxu0 }
 0x581   :  { %2746 = vmatprep.subr.mxu1 %v23385_v19  ;;  %v13736_v28 = vpop.f32.mrb[141].mxu0 }
 0x582   :  { %v19792_v21 = vadd.f32 %v13736_v28, %v13735_v41  ;;  %v2967_v41 = vunpack.c.h.bf16 %v2948_v15  ;;  %v2966_v28 = vunpack.c.l.bf16 %v2948_v15 }
 0x584   :  { %2747 = vmatpush1.msra.mxu1 %v19216_v42  ;;  %v13738_v29 = vpop.f32.mrb[142].mxu0 }
 0x585   :  { %2779 = vmatmul.mubr.f32.vlgmr.msra.gmra.mrb[126].mxu1 %v2567_v49  ;;  %16570 = vmatprep.subr.bf16.mxu1 %v19091_v23  ;;  %v13739_v63 = vpop.f32.mrb[143].mxu0 }
 0x586   :  { %16572 = vmatpush3.bf16.msra.mxu1 %v19093_v30  ;;  %13067 = vmatprep.mubr.msk.f32.mxu1 %vm1034_vm6, %v2572_v3  ;;  %v19794_v25 = vadd.f32 %v13739_v63, %v13738_v29  ;;  %v2950_v29 = vld [vmem:[%s23334_s3 + $0x260] sm:$0xff] }
 0x587   :  { %16574 = vmatprep.subr.bf16.mxu1 %v19095_v12  ;;  %v2971_v63 = vunpack.c.h.bf16 %v2950_v29 }
 0x588   :  { %v13741_v0 = vpop.f32.mrb[144].mxu0 }
 0x589   :  { %2784 = vmatmul.mubr.f32.gmra.mrb[128].mxu1 %v2571_v50  ;;  %v13742_v49 = vpop.f32.mrb[145].mxu0 }
 0x58a   :  { %16576 = vmatpush3.bf16.msra.mxu1 %v19097_v27  ;;  %13068 = vmatprep.mubr.msk.f32.mxu1 %vm1034_vm6, %v2576_v13  ;;  %v19796_v3 = vadd.f32 %v13742_v49, %v13741_v0  ;;  %v2970_v0 = vunpack.c.l.bf16 %v2950_v29  ;;  %v2952_v49 = vld [vmem:[%s23334_s3 + $0x270] sm:$0xff] }
 0x58b   :  { %16578 = vmatprep.subr.bf16.mxu1 %v19099_v44 }
 0x58c   :  { %v13744_v39 = vpop.f32.mrb[146].mxu0 }
 0x58d   :  { %2789 = vmatmul.mubr.f32.gmra.mrb[130].mxu1 %v2575_v56  ;;  %v13745_v50 = vpop.f32.mrb[147].mxu0 }
 0x58e   :  { %16580 = vmatpush3.bf16.msra.mxu1 %v19101_v20  ;;  %13069 = vmatprep.mubr.msk.f32.mxu1 %vm1034_vm6, %v2580_v8  ;;  %v19798_v13 = vadd.f32 %v13745_v50, %v13744_v39  ;;  %v2975_v39 = vunpack.c.h.bf16 %v2952_v49  ;;  %v2974_v50 = vunpack.c.l.bf16 %v2952_v49 }
 0x58f   :  { %16582 = vmatprep.subr.bf16.mxu1 %v19104_v32 }
 0x590   :  { %v13747_v7 = vpop.f32.mrb[148].mxu0 }
 0x591   :  { %2794 = vmatmul.mubr.f32.gmra.mrb[132].mxu1 %v2579_v59  ;;  %v13748_v56 = vpop.f32.mrb[149].mxu0 }
 0x592   :  { %16584 = vmatpush3.bf16.msra.mxu1 %v19106_v33  ;;  %13070 = vmatprep.mubr.msk.f32.mxu1 %vm1034_vm6, %v2584_v54  ;;  %v19800_v8 = vadd.f32 %v13748_v56, %v13747_v7  ;;  %v2954_v7 = vld [vmem:[%s23334_s3 + $0x280] sm:$0xff] }
 0x593   :  { %16586 = vmatprep.subr.bf16.mxu1 %v19108_v47  ;;  %v2979_v56 = vunpack.c.h.bf16 %v2954_v7 }
 0x594   :  { %v13750_v53 = vpop.f32.mrb[150].mxu0 }
 0x595   :  { %2799 = vmatmul.mubr.f32.gmra.mrb[134].mxu1 %v2583_v35  ;;  %v13751_v59 = vpop.f32.mrb[151].mxu0 }
 0x596   :  { %16588 = vmatpush3.bf16.msra.mxu1 %v19110_v5  ;;  %13071 = vmatprep.mubr.msk.f32.mxu1 %vm1034_vm6, %v2588_v37  ;;  %v19802_v54 = vadd.f32 %v13751_v59, %v13750_v53  ;;  %v2978_v53 = vunpack.c.l.bf16 %v2954_v7  ;;  %v2956_v59 = vld [vmem:[%s23334_s3 + $0x290] sm:$0xff] }
 0x597   :  { %16590 = vmatprep.subr.bf16.mxu1 %v19112_v17 }
 0x599   :  { %2804 = vmatmul.mubr.f32.gmra.mrb[136].mxu1 %v2587_v24  ;;  %v2958_v24 = vunpack.c.l.bf16 %v2944_v52 }
 0x59a   :  { %16592 = vmatpush3.bf16.msra.mxu1 %v19114_v4  ;;  %13072 = vmatprep.mubr.msk.f32.mxu1 %vm1034_vm6, %v2592_v61  ;;  %v2959_v61 = vunpack.c.h.bf16 %v2944_v52 }
 0x59b   :  { %16594 = vmatprep.subr.bf16.mxu1 %v19116_v14 }
 0x59c   :  { %v13753_v40 = vpop.f32.mrb[152].mxu0 }
 0x59d   :  { %2809 = vmatmul.mubr.f32.gmra.mrb[138].mxu1 %v2591_v55  ;;  %v13754_v35 = vpop.f32.mrb[153].mxu0  ;;  %v2946_v55 = vld [vmem:[%s23334_s3 + $0x240] sm:$0xff] }
 0x59e   :  { %16596 = vmatpush3.bf16.msra.mxu1 %v19118_v51  ;;  %v19804_v37 = vadd.f32 %v13754_v35, %v13753_v40  ;;  %3071 = vmatprep.mubr.f32.mxu1 %v2959_v61  ;;  %v2963_v9 = vunpack.c.h.bf16 %v2946_v55  ;;  %v2962_v62 = vunpack.c.l.bf16 %v2946_v55  ;;  %v2983_v40 = vunpack.c.h.bf16 %v2956_v59 }
 0x59f   :  { %16598 = vmatprep.subr.bf16.mxu1 %v19121_v26  ;;  %v2982_v35 = vunpack.c.l.bf16 %v2956_v59 }
 0x5a2   :  { %16600 = vmatpush3.bf16.msra.mxu1 %v19123_v58 }
 0x5a3   :  { %16625 = vmatprep.subr.bf16.mxu1 %v23384_v22 }
 0x5a5   :  { %3072 = vmatmul.mubr.f32.vlgmr.msra.gmra.mrb[140].mxu1 %v2958_v24 }
 0x5a6   :  { %3076 = vmatprep.mubr.f32.mxu1 %v2963_v9 }
 0x5a9   :  { %3077 = vmatmul.mubr.f32.gmra.mrb[142].mxu1 %v2962_v62 }
 0x5aa   :  { %3081 = vmatprep.mubr.f32.mxu1 %v2967_v41 }
 0x5ad   :  { %3082 = vmatmul.mubr.f32.gmra.mrb[144].mxu1 %v2966_v28 }
 0x5ae   :  { %3086 = vmatprep.mubr.f32.mxu1 %v2971_v63 }
 0x5b1   :  { %3087 = vmatmul.mubr.f32.gmra.mrb[146].mxu1 %v2970_v0 }
 0x5b2   :  { %3091 = vmatprep.mubr.f32.mxu1 %v2975_v39 }
 0x5b5   :  { %3092 = vmatmul.mubr.f32.gmra.mrb[148].mxu1 %v2974_v50 }
 0x5b6   :  { %3096 = vmatprep.mubr.f32.mxu1 %v2979_v56 }
 0x5b9   :  { %3097 = vmatmul.mubr.f32.gmra.mrb[150].mxu1 %v2978_v53 }
 0x5ba   :  { %3101 = vmatprep.mubr.f32.mxu1 %v2983_v40 }
 0x5bd   :  { %3102 = vmatmul.mubr.f32.gmra.mrb[152].mxu1 %v2982_v35 }
 0x5be   :  { %15446 = vmatprep.mubr.msk.f32.mxu1 %vm17944_vm0, %v23385_v19 }
 0x636   :  { %v2510_v52 = vpop.f32.mrb[112].mxu1 }
 0x637   :  { %v19830_v24 = vadd.f32 %v2510_v52, %v19677_v6  ;;  %v15398_v61 = vpop.f32.mrb[113].mxu1 }
 0x63a   :  { %v2515_v55 = vpop.f32.mrb[114].mxu1 }
 0x63b   :  { %v19833_v9 = vadd.f32 %v2515_v55, %v19680_v57  ;;  %v15401_v62 = vpop.f32.mrb[115].mxu1 }
 0x63e   :  { %v2520_v15 = vpop.f32.mrb[116].mxu1 }
 0x63f   :  { %v19836_v41 = vadd.f32 %v2520_v15, %v19683_v31  ;;  %v15404_v28 = vpop.f32.mrb[117].mxu1 }
 0x642   :  { %v2525_v29 = vpop.f32.mrb[118].mxu1 }
 0x643   :  { %v19839_v63 = vadd.f32 %v2525_v29, %v19686_v34  ;;  %v15407_v0 = vpop.f32.mrb[119].mxu1 }
 0x646   :  { %v2530_v49 = vpop.f32.mrb[120].mxu1 }
 0x647   :  { %v19842_v6 = vadd.f32 %v2530_v49, %v19689_v2  ;;  %v15410_v39 = vpop.f32.mrb[121].mxu1 }
 0x64a   :  { %v2535_v50 = vpop.f32.mrb[122].mxu1 }
 0x64b   :  { %v19845_v57 = vadd.f32 %v2535_v50, %v19692_v45  ;;  %v15413_v7 = vpop.f32.mrb[123].mxu1  ;;  %v2947_v50 = vld [vmem:[%s23334_s3 + $0x248] sm:$0xff] }
 0x64c   :  { %v2965_v7 = vunpack.c.h.bf16 %v2947_v50 }
 0x64e   :  { %v2540_v56 = vpop.f32.mrb[124].mxu1 }
 0x64f   :  { %v19848_v31 = vadd.f32 %v2540_v56, %v19695_v1  ;;  %v15416_v53 = vpop.f32.mrb[125].mxu1  ;;  %v2949_v56 = vld [vmem:[%s23334_s3 + $0x258] sm:$0xff] }
 0x650   :  { %v2964_v53 = vunpack.c.l.bf16 %v2947_v50 }
 0x658   :  { %v2780_v59 = vpop.f32.mrb[126].mxu1 }
 0x659   :  { %v2781_v34 = vadd.f32 %v19792_v21, %v2780_v59  ;;  %v2782_v40 = vpop.f32.mrb[127].mxu1  ;;  %v2969_v59 = vunpack.c.h.bf16 %v2949_v56 }
 0x65a   :  { %v2968_v40 = vunpack.c.l.bf16 %v2949_v56 }
 0x65b   :  { %15422 = vmatmul.mubr.msk.f32.vlgmr.msra.gmra.mrb[154].mxu0 %vm568_vm5, %v2781_v34  ;;  %v2951_v34 = vld [vmem:[%s23334_s3 + $0x268] sm:$0xff] }
 0x65c   :  { %16603 = vmatpush1.bf16.msra.mxu0 %v19125_v18  ;;  %v2785_v2 = vpop.f32.mrb[128].mxu1  ;;  %15424 = vmatprep.mubr.msk.f32.mxu0 %vm17944_vm0, %v23385_v19 }
 0x65d   :  { %v2786_v45 = vadd.f32 %v19794_v25, %v2785_v2  ;;  %16604 = vmatprep.subr.bf16.mxu0 %v23384_v22  ;;  %v2787_v35 = vpop.f32.mrb[129].mxu1  ;;  %v2973_v2 = vunpack.c.h.bf16 %v2951_v34 }
 0x65e   :  { %v2972_v35 = vunpack.c.l.bf16 %v2951_v34 }
 0x65f   :  { %15425 = vmatmul.mubr.msk.f32.gmra.mrb[156].mxu0 %vm568_vm5, %v2786_v45  ;;  %v2953_v45 = vld [vmem:[%s23334_s3 + $0x278] sm:$0xff] }
 0x660   :  { %16606 = vmatpush1.bf16.msra.mxu0 %v19127_v38  ;;  %v2790_v1 = vpop.f32.mrb[130].mxu1  ;;  %15427 = vmatprep.mubr.msk.f32.mxu0 %vm17944_vm0, %v23385_v19 }
 0x661   :  { %v2791_v21 = vadd.f32 %v19796_v3, %v2790_v1  ;;  %16607 = vmatprep.subr.bf16.mxu0 %v23384_v22  ;;  %v2792_v52 = vpop.f32.mrb[131].mxu1  ;;  %v2977_v1 = vunpack.c.h.bf16 %v2953_v45 }
 0x662   :  { %v2976_v52 = vunpack.c.l.bf16 %v2953_v45 }
 0x663   :  { %15428 = vmatmul.mubr.msk.f32.gmra.mrb[158].mxu0 %vm568_vm5, %v2791_v21  ;;  %v2955_v21 = vld [vmem:[%s23334_s3 + $0x288] sm:$0xff] }
 0x664   :  { %16609 = vmatpush1.bf16.msra.mxu0 %v19130_v10  ;;  %v2795_v25 = vpop.f32.mrb[132].mxu1  ;;  %15430 = vmatprep.mubr.msk.f32.mxu0 %vm17944_vm0, %v23385_v19 }
 0x665   :  { %v2796_v61 = vadd.f32 %v19798_v13, %v2795_v25  ;;  %16610 = vmatprep.subr.bf16.mxu0 %v23384_v22  ;;  %v2797_v55 = vpop.f32.mrb[133].mxu1  ;;  %v2981_v25 = vunpack.c.h.bf16 %v2955_v21 }
 0x666   :  { %v2980_v55 = vunpack.c.l.bf16 %v2955_v21 }
 0x667   :  { %15431 = vmatmul.mubr.msk.f32.gmra.mrb[160].mxu0 %vm568_vm5, %v2796_v61  ;;  %v2957_v61 = vld [vmem:[%s23334_s3 + $0x298] sm:$0xff] }
 0x668   :  { %16612 = vmatpush1.bf16.msra.mxu0 %v19132_v36  ;;  %v2800_v3 = vpop.f32.mrb[134].mxu1  ;;  %15433 = vmatprep.mubr.msk.f32.mxu0 %vm17944_vm0, %v23385_v19 }
 0x669   :  { %v2801_v62 = vadd.f32 %v19800_v8, %v2800_v3  ;;  %16613 = vmatprep.subr.bf16.mxu0 %v23384_v22  ;;  %v2802_v15 = vpop.f32.mrb[135].mxu1  ;;  %v2945_v8 = vld [vmem:[%s23334_s3 + $0x238] sm:$0xff]  ;;  %v2985_v3 = vunpack.c.h.bf16 %v2957_v61 }
 0x66a   :  { %v2961_v49 = vunpack.c.h.bf16 %v2945_v8  ;;  %v3207_v15 = vld [vmem:[%s23335_s4 + $0x50] sm:$0xff] }
 0x66b   :  { %15434 = vmatmul.mubr.msk.f32.gmra.mrb[162].mxu0 %vm568_vm5, %v2801_v62  ;;  %v2984_v62 = vunpack.c.l.bf16 %v2957_v61  ;;  %v3337_v61 = vld [vmem:[%s23334_s3 + $0x2a0] sm:$0xff] }
 0x66c   :  { %16615 = vmatpush1.bf16.msra.mxu0 %v19134_v11  ;;  %v2805_v13 = vpop.f32.mrb[136].mxu1  ;;  %15436 = vmatprep.mubr.msk.f32.mxu0 %vm17944_vm0, %v23385_v19 }
 0x66d   :  { %v2806_v28 = vadd.f32 %v19802_v54, %v2805_v13  ;;  %16616 = vmatprep.subr.bf16.mxu0 %v23384_v22  ;;  %v2807_v29 = vpop.f32.mrb[137].mxu1  ;;  %v3208_v13 = vld [vmem:[%s23335_s4 + $0x58] sm:$0xff] }
 0x66f   :  { %15437 = vmatmul.mubr.msk.f32.gmra.mrb[164].mxu0 %vm568_vm5, %v2806_v28  ;;  %v16626_v28 = vpack.c.bf16 %v3208_v13, %v3207_v15 }
 0x670   :  { %16618 = vmatpush1.bf16.msra.mxu0 %v19136_v48  ;;  %v2810_v0 = vpop.f32.mrb[138].mxu1  ;;  %15439 = vmatprep.mubr.msk.f32.mxu0 %vm17944_vm0, %v23385_v19 }
 0x671   :  { %v2811_v39 = vadd.f32 %v19804_v37, %v2810_v0  ;;  %16619 = vmatprep.subr.bf16.mxu0 %v23384_v22  ;;  %v2812_v54 = vpop.f32.mrb[139].mxu1  ;;  %v2960_v37 = vunpack.c.l.bf16 %v2945_v8  ;;  %16627 = vmatpush3.bf16.msra.mxu1 %v16626_v28  ;;  %v3341_v28 = vld [vmem:[%s23334_s3 + $0x2c0] sm:$0xff] }
 0x672   :  { %16660 = vmatprep.subr.bf16.mxu1 %v23384_v22 }
 0x673   :  { %15440 = vmatmul.mubr.msk.f32.gmra.mrb[166].mxu0 %vm568_vm5, %v2811_v39 }
 0x674   :  { %16621 = vmatpush1.bf16.msra.mxu0 %v19139_v60  ;;  %13080 = vmatprep.mubr.msk.f32.mxu0 %vm1034_vm6, %v2961_v49 }
 0x675   :  { %16622 = vmatprep.subr.bf16.mxu0 %v23384_v22 }
 0x678   :  { %16624 = vmatpush1.bf16.msra.mxu0 %v19141_v16  ;;  %v13797_v29 = vpop.f32.mrb[140].mxu1 }
 0x679   :  { %3139 = vmatprep.subr.mxu0 %v23385_v19  ;;  %v13798_v8 = vpop.f32.mrb[141].mxu1 }
 0x67a   :  { %v19945_v0 = vadd.f32 %v13798_v8, %v13797_v29  ;;  %v3360_v29 = vunpack.c.h.bf16 %v3341_v28  ;;  %v3359_v8 = vunpack.c.l.bf16 %v3341_v28 }
 0x67c   :  { %3140 = vmatpush1.msra.mxu0 %v19216_v42  ;;  %v13800_v49 = vpop.f32.mrb[142].mxu1 }
 0x67d   :  { %3172 = vmatmul.mubr.f32.vlgmr.msra.gmra.mrb[168].mxu0 %v2960_v37  ;;  %16629 = vmatprep.subr.bf16.mxu0 %v19091_v23  ;;  %v13801_v39 = vpop.f32.mrb[143].mxu1 }
 0x67e   :  { %16631 = vmatpush3.bf16.msra.mxu0 %v19093_v30  ;;  %13081 = vmatprep.mubr.msk.f32.mxu0 %vm1034_vm6, %v2965_v7  ;;  %v19947_v54 = vadd.f32 %v13801_v39, %v13800_v49  ;;  %v3343_v49 = vld [vmem:[%s23334_s3 + $0x2d0] sm:$0xff] }
 0x67f   :  { %16633 = vmatprep.subr.bf16.mxu0 %v19095_v12  ;;  %v3364_v39 = vunpack.c.h.bf16 %v3343_v49 }
 0x680   :  { %v13803_v50 = vpop.f32.mrb[144].mxu1 }
 0x681   :  { %3177 = vmatmul.mubr.f32.gmra.mrb[170].mxu0 %v2964_v53  ;;  %v13804_v37 = vpop.f32.mrb[145].mxu1 }
 0x682   :  { %16635 = vmatpush3.bf16.msra.mxu0 %v19097_v27  ;;  %13082 = vmatprep.mubr.msk.f32.mxu0 %vm1034_vm6, %v2969_v59  ;;  %v19949_v7 = vadd.f32 %v13804_v37, %v13803_v50  ;;  %v3363_v50 = vunpack.c.l.bf16 %v3343_v49  ;;  %v3345_v37 = vld [vmem:[%s23334_s3 + $0x2e0] sm:$0xff] }
 0x683   :  { %16637 = vmatprep.subr.bf16.mxu0 %v19099_v44 }
 0x684   :  { %v13806_v56 = vpop.f32.mrb[146].mxu1 }
 0x685   :  { %3182 = vmatmul.mubr.f32.gmra.mrb[172].mxu0 %v2968_v40  ;;  %v13807_v53 = vpop.f32.mrb[147].mxu1 }
 0x686   :  { %16639 = vmatpush3.bf16.msra.mxu0 %v19101_v20  ;;  %13083 = vmatprep.mubr.msk.f32.mxu0 %vm1034_vm6, %v2973_v2  ;;  %v19951_v59 = vadd.f32 %v13807_v53, %v13806_v56  ;;  %v3368_v56 = vunpack.c.h.bf16 %v3345_v37  ;;  %v3367_v53 = vunpack.c.l.bf16 %v3345_v37 }
 0x687   :  { %16641 = vmatprep.subr.bf16.mxu0 %v19104_v32 }
 0x688   :  { %v13809_v34 = vpop.f32.mrb[148].mxu1 }
 0x689   :  { %3187 = vmatmul.mubr.f32.gmra.mrb[174].mxu0 %v2972_v35  ;;  %v13810_v40 = vpop.f32.mrb[149].mxu1 }
 0x68a   :  { %16643 = vmatpush3.bf16.msra.mxu0 %v19106_v33  ;;  %13084 = vmatprep.mubr.msk.f32.mxu0 %vm1034_vm6, %v2977_v1  ;;  %v19953_v2 = vadd.f32 %v13810_v40, %v13809_v34  ;;  %v3347_v34 = vld [vmem:[%s23334_s3 + $0x2f0] sm:$0xff] }
 0x68b   :  { %16645 = vmatprep.subr.bf16.mxu0 %v19108_v47  ;;  %v3372_v40 = vunpack.c.h.bf16 %v3347_v34 }
 0x68c   :  { %v13812_v45 = vpop.f32.mrb[150].mxu1 }
 0x68d   :  { %3192 = vmatmul.mubr.f32.gmra.mrb[176].mxu0 %v2976_v52  ;;  %v13813_v35 = vpop.f32.mrb[151].mxu1 }
 0x68e   :  { %16647 = vmatpush3.bf16.msra.mxu0 %v19110_v5  ;;  %13085 = vmatprep.mubr.msk.f32.mxu0 %vm1034_vm6, %v2981_v25  ;;  %v19955_v1 = vadd.f32 %v13813_v35, %v13812_v45  ;;  %v3371_v45 = vunpack.c.l.bf16 %v3347_v34  ;;  %v3349_v35 = vld [vmem:[%s23334_s3 + $0x300] sm:$0xff] }
 0x68f   :  { %16649 = vmatprep.subr.bf16.mxu0 %v19112_v17 }
 0x690   :  { %v13815_v21 = vpop.f32.mrb[152].mxu1 }
 0x691   :  { %3197 = vmatmul.mubr.f32.gmra.mrb[178].mxu0 %v2980_v55  ;;  %v13816_v52 = vpop.f32.mrb[153].mxu1  ;;  %v3351_v55 = vunpack.c.l.bf16 %v3337_v61 }
 0x692   :  { %16651 = vmatpush3.bf16.msra.mxu0 %v19114_v4  ;;  %13086 = vmatprep.mubr.msk.f32.mxu0 %vm1034_vm6, %v2985_v3  ;;  %v19957_v25 = vadd.f32 %v13816_v52, %v13815_v21  ;;  %v3352_v3 = vunpack.c.h.bf16 %v3337_v61  ;;  %v3376_v21 = vunpack.c.h.bf16 %v3349_v35  ;;  %v3375_v52 = vunpack.c.l.bf16 %v3349_v35 }
 0x693   :  { %16653 = vmatprep.subr.bf16.mxu0 %v19116_v14 }
 0x695   :  { %3202 = vmatmul.mubr.f32.gmra.mrb[180].mxu0 %v2984_v62  ;;  %v3339_v62 = vld [vmem:[%s23334_s3 + $0x2b0] sm:$0xff] }
 0x696   :  { %16655 = vmatpush3.bf16.msra.mxu0 %v19118_v51  ;;  %3464 = vmatprep.mubr.f32.mxu0 %v3352_v3  ;;  %v3356_v15 = vunpack.c.h.bf16 %v3339_v62  ;;  %v3355_v13 = vunpack.c.l.bf16 %v3339_v62 }
 0x697   :  { %16657 = vmatprep.subr.bf16.mxu0 %v19121_v26 }
 0x69a   :  { %16659 = vmatpush3.bf16.msra.mxu0 %v19123_v58 }
 0x69b   :  { %16684 = vmatprep.subr.bf16.mxu0 %v23384_v22 }
 0x69d   :  { %3465 = vmatmul.mubr.f32.vlgmr.msra.gmra.mrb[182].mxu0 %v3351_v55 }
 0x69e   :  { %3469 = vmatprep.mubr.f32.mxu0 %v3356_v15 }
 0x6a1   :  { %3470 = vmatmul.mubr.f32.gmra.mrb[184].mxu0 %v3355_v13 }
 0x6a2   :  { %3474 = vmatprep.mubr.f32.mxu0 %v3360_v29 }
 0x6a5   :  { %3475 = vmatmul.mubr.f32.gmra.mrb[186].mxu0 %v3359_v8 }
 0x6a6   :  { %3479 = vmatprep.mubr.f32.mxu0 %v3364_v39 }
 0x6a9   :  { %3480 = vmatmul.mubr.f32.gmra.mrb[188].mxu0 %v3363_v50 }
 0x6aa   :  { %3484 = vmatprep.mubr.f32.mxu0 %v3368_v56 }
 0x6ad   :  { %3485 = vmatmul.mubr.f32.gmra.mrb[190].mxu0 %v3367_v53 }
 0x6ae   :  { %3489 = vmatprep.mubr.f32.mxu0 %v3372_v40 }
 0x6b1   :  { %3490 = vmatmul.mubr.f32.gmra.mrb[192].mxu0 %v3371_v45 }
 0x6b2   :  { %3494 = vmatprep.mubr.f32.mxu0 %v3376_v21 }
 0x6b5   :  { %3495 = vmatmul.mubr.f32.gmra.mrb[194].mxu0 %v3375_v52 }
 0x6b6   :  { %15471 = vmatprep.mubr.msk.f32.mxu0 %vm17944_vm0, %v23385_v19 }
 0x72e   :  { %v2903_v61 = vpop.f32.mrb[154].mxu0 }
 0x72f   :  { %v19983_v55 = vadd.f32 %v2903_v61, %v19830_v24  ;;  %v15423_v3 = vpop.f32.mrb[155].mxu0 }
 0x732   :  { %v2908_v62 = vpop.f32.mrb[156].mxu0 }
 0x733   :  { %v19986_v15 = vadd.f32 %v2908_v62, %v19833_v9  ;;  %v15426_v13 = vpop.f32.mrb[157].mxu0 }
 0x736   :  { %v2913_v28 = vpop.f32.mrb[158].mxu0 }
 0x737   :  { %v19989_v29 = vadd.f32 %v2913_v28, %v19836_v41  ;;  %v15429_v8 = vpop.f32.mrb[159].mxu0 }
 0x73a   :  { %v2918_v49 = vpop.f32.mrb[160].mxu0 }
 0x73b   :  { %v19992_v39 = vadd.f32 %v2918_v49, %v19839_v63  ;;  %v15432_v50 = vpop.f32.mrb[161].mxu0 }
 0x73e   :  { %v2923_v37 = vpop.f32.mrb[162].mxu0 }
 0x73f   :  { %v19995_v24 = vadd.f32 %v2923_v37, %v19842_v6  ;;  %v15435_v56 = vpop.f32.mrb[163].mxu0 }
 0x742   :  { %v2928_v53 = vpop.f32.mrb[164].mxu0 }
 0x743   :  { %v19998_v9 = vadd.f32 %v2928_v53, %v19845_v57  ;;  %v15438_v34 = vpop.f32.mrb[165].mxu0  ;;  %v3340_v53 = vld [vmem:[%s23334_s3 + $0x2b8] sm:$0xff] }
 0x744   :  { %v3358_v34 = vunpack.c.h.bf16 %v3340_v53 }
 0x746   :  { %v2933_v40 = vpop.f32.mrb[166].mxu0 }
 0x747   :  { %v20001_v41 = vadd.f32 %v2933_v40, %v19848_v31  ;;  %v15441_v45 = vpop.f32.mrb[167].mxu0  ;;  %v3342_v40 = vld [vmem:[%s23334_s3 + $0x2c8] sm:$0xff] }
 0x748   :  { %v3357_v45 = vunpack.c.l.bf16 %v3340_v53 }
 0x750   :  { %v3173_v35 = vpop.f32.mrb[168].mxu0 }
 0x751   :  { %v3174_v63 = vadd.f32 %v19945_v0, %v3173_v35  ;;  %v3175_v21 = vpop.f32.mrb[169].mxu0  ;;  %v3362_v35 = vunpack.c.h.bf16 %v3342_v40 }
 0x752   :  { %v3361_v21 = vunpack.c.l.bf16 %v3342_v40 }
 0x753   :  { %15447 = vmatmul.mubr.msk.f32.vlgmr.msra.gmra.mrb[154].mxu1 %vm568_vm5, %v3174_v63  ;;  %v3344_v63 = vld [vmem:[%s23334_s3 + $0x2d8] sm:$0xff] }
 0x754   :  { %16662 = vmatpush1.bf16.msra.mxu1 %v19125_v18  ;;  %v3178_v6 = vpop.f32.mrb[170].mxu0  ;;  %15449 = vmatprep.mubr.msk.f32.mxu1 %vm17944_vm0, %v23385_v19 }
 0x755   :  { %v3179_v57 = vadd.f32 %v19947_v54, %v3178_v6  ;;  %16663 = vmatprep.subr.bf16.mxu1 %v23384_v22  ;;  %v3180_v52 = vpop.f32.mrb[171].mxu0  ;;  %v3366_v6 = vunpack.c.h.bf16 %v3344_v63 }
 0x756   :  { %v3365_v52 = vunpack.c.l.bf16 %v3344_v63 }
 0x757   :  { %15450 = vmatmul.mubr.msk.f32.gmra.mrb[156].mxu1 %vm568_vm5, %v3179_v57  ;;  %v3346_v57 = vld [vmem:[%s23334_s3 + $0x2e8] sm:$0xff] }
 0x758   :  { %16665 = vmatpush1.bf16.msra.mxu1 %v19127_v38  ;;  %v3183_v31 = vpop.f32.mrb[172].mxu0  ;;  %15452 = vmatprep.mubr.msk.f32.mxu1 %vm17944_vm0, %v23385_v19 }
 0x759   :  { %v3184_v0 = vadd.f32 %v19949_v7, %v3183_v31  ;;  %16666 = vmatprep.subr.bf16.mxu1 %v23384_v22  ;;  %v3185_v61 = vpop.f32.mrb[173].mxu0  ;;  %v3370_v31 = vunpack.c.h.bf16 %v3346_v57 }
 0x75a   :  { %v3369_v61 = vunpack.c.l.bf16 %v3346_v57 }
 0x75b   :  { %15453 = vmatmul.mubr.msk.f32.gmra.mrb[158].mxu1 %vm568_vm5, %v3184_v0  ;;  %v3348_v0 = vld [vmem:[%s23334_s3 + $0x2f8] sm:$0xff] }
 0x75c   :  { %16668 = vmatpush1.bf16.msra.mxu1 %v19130_v10  ;;  %v3188_v54 = vpop.f32.mrb[174].mxu0  ;;  %15455 = vmatprep.mubr.msk.f32.mxu1 %vm17944_vm0, %v23385_v19 }
 0x75d   :  { %v3189_v3 = vadd.f32 %v19951_v59, %v3188_v54  ;;  %16669 = vmatprep.subr.bf16.mxu1 %v23384_v22  ;;  %v3190_v62 = vpop.f32.mrb[175].mxu0  ;;  %v3374_v54 = vunpack.c.h.bf16 %v3348_v0 }
 0x75e   :  { %v3373_v62 = vunpack.c.l.bf16 %v3348_v0 }
 0x75f   :  { %15456 = vmatmul.mubr.msk.f32.gmra.mrb[160].mxu1 %vm568_vm5, %v3189_v3  ;;  %v3350_v3 = vld [vmem:[%s23334_s3 + $0x308] sm:$0xff] }
 0x760   :  { %16671 = vmatpush1.bf16.msra.mxu1 %v19132_v36  ;;  %v3193_v7 = vpop.f32.mrb[176].mxu0  ;;  %15458 = vmatprep.mubr.msk.f32.mxu1 %vm17944_vm0, %v23385_v19 }
 0x761   :  { %v3194_v13 = vadd.f32 %v19953_v2, %v3193_v7  ;;  %16672 = vmatprep.subr.bf16.mxu1 %v23384_v22  ;;  %v3195_v28 = vpop.f32.mrb[177].mxu0  ;;  %v3338_v2 = vld [vmem:[%s23334_s3 + $0x2a8] sm:$0xff]  ;;  %v3378_v7 = vunpack.c.h.bf16 %v3350_v3 }
 0x762   :  { %v3354_v37 = vunpack.c.h.bf16 %v3338_v2  ;;  %v3600_v28 = vld [vmem:[%s23335_s4 + $0x60] sm:$0xff] }
 0x763   :  { %15459 = vmatmul.mubr.msk.f32.gmra.mrb[162].mxu1 %vm568_vm5, %v3194_v13  ;;  %v3377_v13 = vunpack.c.l.bf16 %v3350_v3  ;;  %v3730_v3 = vld [vmem:[%s23334_s3 + $0x310] sm:$0xff] }
 0x764   :  { %16674 = vmatpush1.bf16.msra.mxu1 %v19134_v11  ;;  %v3198_v59 = vpop.f32.mrb[178].mxu0  ;;  %15461 = vmatprep.mubr.msk.f32.mxu1 %vm17944_vm0, %v23385_v19 }
 0x765   :  { %v3199_v8 = vadd.f32 %v19955_v1, %v3198_v59  ;;  %16675 = vmatprep.subr.bf16.mxu1 %v23384_v22  ;;  %v3200_v49 = vpop.f32.mrb[179].mxu0  ;;  %v3601_v59 = vld [vmem:[%s23335_s4 + $0x68] sm:$0xff] }
 0x767   :  { %15462 = vmatmul.mubr.msk.f32.gmra.mrb[164].mxu1 %vm568_vm5, %v3199_v8  ;;  %v16685_v8 = vpack.c.bf16 %v3601_v59, %v3600_v28 }
 0x768   :  { %16677 = vmatpush1.bf16.msra.mxu1 %v19136_v48  ;;  %v3203_v50 = vpop.f32.mrb[180].mxu0  ;;  %15464 = vmatprep.mubr.msk.f32.mxu1 %vm17944_vm0, %v23385_v19 }
 0x769   :  { %v3204_v56 = vadd.f32 %v19957_v25, %v3203_v50  ;;  %16678 = vmatprep.subr.bf16.mxu1 %v23384_v22  ;;  %v3205_v1 = vpop.f32.mrb[181].mxu0  ;;  %v3353_v25 = vunpack.c.l.bf16 %v3338_v2  ;;  %16686 = vmatpush3.bf16.msra.mxu0 %v16685_v8  ;;  %v3734_v8 = vld [vmem:[%s23334_s3 + $0x330] sm:$0xff] }
 0x76a   :  { %16719 = vmatprep.subr.bf16.mxu0 %v23384_v22 }
 0x76b   :  { %15465 = vmatmul.mubr.msk.f32.gmra.mrb[166].mxu1 %vm568_vm5, %v3204_v56 }
 0x76c   :  { %16680 = vmatpush1.bf16.msra.mxu1 %v19139_v60  ;;  %13094 = vmatprep.mubr.msk.f32.mxu1 %vm1034_vm6, %v3354_v37 }
 0x76d   :  { %16681 = vmatprep.subr.bf16.mxu1 %v23384_v22 }
 0x770   :  { %16683 = vmatpush1.bf16.msra.mxu1 %v19141_v16  ;;  %v13859_v49 = vpop.f32.mrb[182].mxu0 }
 0x771   :  { %3532 = vmatprep.subr.mxu1 %v23385_v19  ;;  %v13860_v2 = vpop.f32.mrb[183].mxu0 }
 0x772   :  { %v20098_v50 = vadd.f32 %v13860_v2, %v13859_v49  ;;  %v3753_v49 = vunpack.c.h.bf16 %v3734_v8  ;;  %v3752_v2 = vunpack.c.l.bf16 %v3734_v8 }
 0x774   :  { %3533 = vmatpush1.msra.mxu1 %v19216_v42  ;;  %v13862_v37 = vpop.f32.mrb[184].mxu0 }
 0x775   :  { %3565 = vmatmul.mubr.f32.vlgmr.msra.gmra.mrb[168].mxu1 %v3353_v25  ;;  %16688 = vmatprep.subr.bf16.mxu1 %v19091_v23  ;;  %v13863_v56 = vpop.f32.mrb[185].mxu0 }
 0x776   :  { %16690 = vmatpush3.bf16.msra.mxu1 %v19093_v30  ;;  %13095 = vmatprep.mubr.msk.f32.mxu1 %vm1034_vm6, %v3358_v34  ;;  %v20100_v1 = vadd.f32 %v13863_v56, %v13862_v37  ;;  %v3736_v37 = vld [vmem:[%s23334_s3 + $0x340] sm:$0xff] }
 0x777   :  { %16692 = vmatprep.subr.bf16.mxu1 %v19095_v12  ;;  %v3757_v56 = vunpack.c.h.bf16 %v3736_v37 }
 0x778   :  { %v13865_v53 = vpop.f32.mrb[186].mxu0 }
 0x779   :  { %3570 = vmatmul.mubr.f32.gmra.mrb[170].mxu1 %v3357_v45  ;;  %v13866_v25 = vpop.f32.mrb[187].mxu0 }
 0x77a   :  { %16694 = vmatpush3.bf16.msra.mxu1 %v19097_v27  ;;  %13096 = vmatprep.mubr.msk.f32.mxu1 %vm1034_vm6, %v3362_v35  ;;  %v20102_v34 = vadd.f32 %v13866_v25, %v13865_v53  ;;  %v3756_v53 = vunpack.c.l.bf16 %v3736_v37  ;;  %v3738_v25 = vld [vmem:[%s23334_s3 + $0x350] sm:$0xff] }
 0x77b   :  { %16696 = vmatprep.subr.bf16.mxu1 %v19099_v44 }
 0x77c   :  { %v13868_v40 = vpop.f32.mrb[188].mxu0 }
 0x77d   :  { %3575 = vmatmul.mubr.f32.gmra.mrb[172].mxu1 %v3361_v21  ;;  %v13869_v45 = vpop.f32.mrb[189].mxu0 }
 0x77e   :  { %16698 = vmatpush3.bf16.msra.mxu1 %v19101_v20  ;;  %13097 = vmatprep.mubr.msk.f32.mxu1 %vm1034_vm6, %v3366_v6  ;;  %v20104_v35 = vadd.f32 %v13869_v45, %v13868_v40  ;;  %v3761_v40 = vunpack.c.h.bf16 %v3738_v25  ;;  %v3760_v45 = vunpack.c.l.bf16 %v3738_v25 }
 0x77f   :  { %16700 = vmatprep.subr.bf16.mxu1 %v19104_v32 }
 0x780   :  { %v13871_v63 = vpop.f32.mrb[190].mxu0 }
 0x781   :  { %3580 = vmatmul.mubr.f32.gmra.mrb[174].mxu1 %v3365_v52  ;;  %v13872_v21 = vpop.f32.mrb[191].mxu0 }
 0x782   :  { %16702 = vmatpush3.bf16.msra.mxu1 %v19106_v33  ;;  %13098 = vmatprep.mubr.msk.f32.mxu1 %vm1034_vm6, %v3370_v31  ;;  %v20106_v6 = vadd.f32 %v13872_v21, %v13871_v63  ;;  %v3740_v63 = vld [vmem:[%s23334_s3 + $0x360] sm:$0xff] }
 0x783   :  { %16704 = vmatprep.subr.bf16.mxu1 %v19108_v47  ;;  %v3765_v21 = vunpack.c.h.bf16 %v3740_v63 }
 0x784   :  { %v13874_v57 = vpop.f32.mrb[192].mxu0 }
 0x785   :  { %3585 = vmatmul.mubr.f32.gmra.mrb[176].mxu1 %v3369_v61  ;;  %v13875_v52 = vpop.f32.mrb[193].mxu0 }
 0x786   :  { %16706 = vmatpush3.bf16.msra.mxu1 %v19110_v5  ;;  %13099 = vmatprep.mubr.msk.f32.mxu1 %vm1034_vm6, %v3374_v54  ;;  %v20108_v31 = vadd.f32 %v13875_v52, %v13874_v57  ;;  %v3764_v57 = vunpack.c.l.bf16 %v3740_v63  ;;  %v3742_v52 = vld [vmem:[%s23334_s3 + $0x370] sm:$0xff] }
 0x787   :  { %16708 = vmatprep.subr.bf16.mxu1 %v19112_v17 }
 0x788   :  { %v13877_v0 = vpop.f32.mrb[194].mxu0 }
 0x789   :  { %3590 = vmatmul.mubr.f32.gmra.mrb[178].mxu1 %v3373_v62  ;;  %v13878_v61 = vpop.f32.mrb[195].mxu0  ;;  %v3744_v62 = vunpack.c.l.bf16 %v3730_v3 }
 0x78a   :  { %16710 = vmatpush3.bf16.msra.mxu1 %v19114_v4  ;;  %13100 = vmatprep.mubr.msk.f32.mxu1 %vm1034_vm6, %v3378_v7  ;;  %v20110_v54 = vadd.f32 %v13878_v61, %v13877_v0  ;;  %v3745_v7 = vunpack.c.h.bf16 %v3730_v3  ;;  %v3769_v0 = vunpack.c.h.bf16 %v3742_v52  ;;  %v3768_v61 = vunpack.c.l.bf16 %v3742_v52 }
 0x78b   :  { %16712 = vmatprep.subr.bf16.mxu1 %v19116_v14 }
 0x78d   :  { %3595 = vmatmul.mubr.f32.gmra.mrb[180].mxu1 %v3377_v13  ;;  %v3732_v13 = vld [vmem:[%s23334_s3 + $0x320] sm:$0xff] }
 0x78e   :  { %16714 = vmatpush3.bf16.msra.mxu1 %v19118_v51  ;;  %3857 = vmatprep.mubr.f32.mxu1 %v3745_v7  ;;  %v3749_v28 = vunpack.c.h.bf16 %v3732_v13  ;;  %v3748_v59 = vunpack.c.l.bf16 %v3732_v13 }
 0x78f   :  { %16716 = vmatprep.subr.bf16.mxu1 %v19121_v26 }
 0x792   :  { %16718 = vmatpush3.bf16.msra.mxu1 %v19123_v58 }
 0x793   :  { %16743 = vmatprep.subr.bf16.mxu1 %v23384_v22 }
 0x795   :  { %3858 = vmatmul.mubr.f32.vlgmr.msra.gmra.mrb[182].mxu1 %v3744_v62 }
 0x796   :  { %3862 = vmatprep.mubr.f32.mxu1 %v3749_v28 }
 0x799   :  { %3863 = vmatmul.mubr.f32.gmra.mrb[184].mxu1 %v3748_v59 }
 0x79a   :  { %3867 = vmatprep.mubr.f32.mxu1 %v3753_v49 }
 0x79d   :  { %3868 = vmatmul.mubr.f32.gmra.mrb[186].mxu1 %v3752_v2 }
 0x79e   :  { %3872 = vmatprep.mubr.f32.mxu1 %v3757_v56 }
 0x7a1   :  { %3873 = vmatmul.mubr.f32.gmra.mrb[188].mxu1 %v3756_v53 }
 0x7a2   :  { %3877 = vmatprep.mubr.f32.mxu1 %v3761_v40 }
 0x7a5   :  { %3878 = vmatmul.mubr.f32.gmra.mrb[190].mxu1 %v3760_v45 }
 0x7a6   :  { %3882 = vmatprep.mubr.f32.mxu1 %v3765_v21 }
 0x7a9   :  { %3883 = vmatmul.mubr.f32.gmra.mrb[192].mxu1 %v3764_v57 }
 0x7aa   :  { %3887 = vmatprep.mubr.f32.mxu1 %v3769_v0 }
 0x7ad   :  { %3888 = vmatmul.mubr.f32.gmra.mrb[194].mxu1 %v3768_v61 }
 0x7ae   :  { %15496 = vmatprep.mubr.msk.f32.mxu1 %vm17944_vm0, %v23385_v19 }
 0x826   :  { %v3296_v3 = vpop.f32.mrb[154].mxu1 }
 0x827   :  { %v20136_v62 = vadd.f32 %v3296_v3, %v19983_v55  ;;  %v15448_v7 = vpop.f32.mrb[155].mxu1 }
 0x82a   :  { %v3301_v13 = vpop.f32.mrb[156].mxu1 }
 0x82b   :  { %v20139_v28 = vadd.f32 %v3301_v13, %v19986_v15  ;;  %v15451_v59 = vpop.f32.mrb[157].mxu1 }
 0x82e   :  { %v3306_v8 = vpop.f32.mrb[158].mxu1 }
 0x82f   :  { %v20142_v49 = vadd.f32 %v3306_v8, %v19989_v29  ;;  %v15454_v2 = vpop.f32.mrb[159].mxu1 }
 0x832   :  { %v3311_v37 = vpop.f32.mrb[160].mxu1 }
 0x833   :  { %v20145_v56 = vadd.f32 %v3311_v37, %v19992_v39  ;;  %v15457_v53 = vpop.f32.mrb[161].mxu1 }
 0x836   :  { %v3316_v25 = vpop.f32.mrb[162].mxu1 }
 0x837   :  { %v20148_v55 = vadd.f32 %v3316_v25, %v19995_v24  ;;  %v15460_v40 = vpop.f32.mrb[163].mxu1 }
 0x83a   :  { %v3321_v45 = vpop.f32.mrb[164].mxu1 }
 0x83b   :  { %v20151_v15 = vadd.f32 %v3321_v45, %v19998_v9  ;;  %v15463_v63 = vpop.f32.mrb[165].mxu1  ;;  %v3733_v45 = vld [vmem:[%s23334_s3 + $0x328] sm:$0xff] }
 0x83c   :  { %v3751_v63 = vunpack.c.h.bf16 %v3733_v45 }
 0x83e   :  { %v3326_v21 = vpop.f32.mrb[166].mxu1 }
 0x83f   :  { %v20154_v29 = vadd.f32 %v3326_v21, %v20001_v41  ;;  %v15466_v57 = vpop.f32.mrb[167].mxu1  ;;  %v3735_v21 = vld [vmem:[%s23334_s3 + $0x338] sm:$0xff] }
 0x840   :  { %v3750_v57 = vunpack.c.l.bf16 %v3733_v45 }
 0x848   :  { %v3566_v52 = vpop.f32.mrb[168].mxu1 }
 0x849   :  { %v3567_v39 = vadd.f32 %v20098_v50, %v3566_v52  ;;  %v3568_v0 = vpop.f32.mrb[169].mxu1  ;;  %v3755_v52 = vunpack.c.h.bf16 %v3735_v21 }
 0x84a   :  { %v3754_v0 = vunpack.c.l.bf16 %v3735_v21 }
 0x84b   :  { %15472 = vmatmul.mubr.msk.f32.vlgmr.msra.gmra.mrb[196].mxu0 %vm568_vm5, %v3567_v39  ;;  %v3737_v39 = vld [vmem:[%s23334_s3 + $0x348] sm:$0xff] }
 0x84c   :  { %16721 = vmatpush1.bf16.msra.mxu0 %v19125_v18  ;;  %v3571_v24 = vpop.f32.mrb[170].mxu1  ;;  %15474 = vmatprep.mubr.msk.f32.mxu0 %vm17944_vm0, %v23385_v19 }
 0x84d   :  { %v3572_v9 = vadd.f32 %v20100_v1, %v3571_v24  ;;  %16722 = vmatprep.subr.bf16.mxu0 %v23384_v22  ;;  %v3573_v61 = vpop.f32.mrb[171].mxu1  ;;  %v3759_v24 = vunpack.c.h.bf16 %v3737_v39 }
 0x84e   :  { %v3758_v61 = vunpack.c.l.bf16 %v3737_v39 }
 0x84f   :  { %15475 = vmatmul.mubr.msk.f32.gmra.mrb[198].mxu0 %vm568_vm5, %v3572_v9  ;;  %v3739_v9 = vld [vmem:[%s23334_s3 + $0x358] sm:$0xff] }
 0x850   :  { %16724 = vmatpush1.bf16.msra.mxu0 %v19127_v38  ;;  %v3576_v41 = vpop.f32.mrb[172].mxu1  ;;  %15477 = vmatprep.mubr.msk.f32.mxu0 %vm17944_vm0, %v23385_v19 }
 0x851   :  { %v3577_v50 = vadd.f32 %v20102_v34, %v3576_v41  ;;  %16725 = vmatprep.subr.bf16.mxu0 %v23384_v22  ;;  %v3578_v3 = vpop.f32.mrb[173].mxu1  ;;  %v3763_v41 = vunpack.c.h.bf16 %v3739_v9 }
 0x852   :  { %v3762_v3 = vunpack.c.l.bf16 %v3739_v9 }
 0x853   :  { %15478 = vmatmul.mubr.msk.f32.gmra.mrb[200].mxu0 %vm568_vm5, %v3577_v50  ;;  %v3741_v50 = vld [vmem:[%s23334_s3 + $0x368] sm:$0xff] }
 0x854   :  { %16727 = vmatpush1.bf16.msra.mxu0 %v19130_v10  ;;  %v3581_v1 = vpop.f32.mrb[174].mxu1  ;;  %15480 = vmatprep.mubr.msk.f32.mxu0 %vm17944_vm0, %v23385_v19 }
 0x855   :  { %v3582_v7 = vadd.f32 %v20104_v35, %v3581_v1  ;;  %16728 = vmatprep.subr.bf16.mxu0 %v23384_v22  ;;  %v3583_v13 = vpop.f32.mrb[175].mxu1  ;;  %v3767_v1 = vunpack.c.h.bf16 %v3741_v50 }
 0x856   :  { %v3766_v13 = vunpack.c.l.bf16 %v3741_v50 }
 0x857   :  { %15481 = vmatmul.mubr.msk.f32.gmra.mrb[202].mxu0 %vm568_vm5, %v3582_v7  ;;  %v3743_v7 = vld [vmem:[%s23334_s3 + $0x378] sm:$0xff] }
 0x858   :  { %16730 = vmatpush1.bf16.msra.mxu0 %v19132_v36  ;;  %v3586_v34 = vpop.f32.mrb[176].mxu1  ;;  %15483 = vmatprep.mubr.msk.f32.mxu0 %vm17944_vm0, %v23385_v19 }
 0x859   :  { %v3587_v59 = vadd.f32 %v20106_v6, %v3586_v34  ;;  %16731 = vmatprep.subr.bf16.mxu0 %v23384_v22  ;;  %v3588_v8 = vpop.f32.mrb[177].mxu1  ;;  %v3731_v6 = vld [vmem:[%s23334_s3 + $0x318] sm:$0xff]  ;;  %v3771_v34 = vunpack.c.h.bf16 %v3743_v7 }
 0x85a   :  { %v3747_v25 = vunpack.c.h.bf16 %v3731_v6  ;;  %v3993_v8 = vld [vmem:[%s23335_s4 + $0x70] sm:$0xff] }
 0x85b   :  { %15484 = vmatmul.mubr.msk.f32.gmra.mrb[204].mxu0 %vm568_vm5, %v3587_v59  ;;  %v3770_v59 = vunpack.c.l.bf16 %v3743_v7  ;;  %v4123_v7 = vld [vmem:[%s23334_s3 + $0x380] sm:$0xff] }
 0x85c   :  { %16733 = vmatpush1.bf16.msra.mxu0 %v19134_v11  ;;  %v3591_v35 = vpop.f32.mrb[178].mxu1  ;;  %15486 = vmatprep.mubr.msk.f32.mxu0 %vm17944_vm0, %v23385_v19 }
 0x85d   :  { %v3592_v2 = vadd.f32 %v20108_v31, %v3591_v35  ;;  %16734 = vmatprep.subr.bf16.mxu0 %v23384_v22  ;;  %v3593_v37 = vpop.f32.mrb[179].mxu1  ;;  %v3994_v35 = vld [vmem:[%s23335_s4 + $0x78] sm:$0xff] }
 0x85f   :  { %15487 = vmatmul.mubr.msk.f32.gmra.mrb[206].mxu0 %vm568_vm5, %v3592_v2  ;;  %v16744_v2 = vpack.c.bf16 %v3994_v35, %v3993_v8 }
 0x860   :  { %16736 = vmatpush1.bf16.msra.mxu0 %v19136_v48  ;;  %v3596_v53 = vpop.f32.mrb[180].mxu1  ;;  %15489 = vmatprep.mubr.msk.f32.mxu0 %vm17944_vm0, %v23385_v19 }
 0x861   :  { %v3597_v40 = vadd.f32 %v20110_v54, %v3596_v53  ;;  %16737 = vmatprep.subr.bf16.mxu0 %v23384_v22  ;;  %v3598_v31 = vpop.f32.mrb[181].mxu1  ;;  %v3746_v54 = vunpack.c.l.bf16 %v3731_v6  ;;  %16745 = vmatpush3.bf16.msra.mxu1 %v16744_v2  ;;  %v4127_v2 = vld [vmem:[%s23334_s3 + $0x3a0] sm:$0xff] }
 0x862   :  { %16778 = vmatprep.subr.bf16.mxu1 %v23384_v22 }
 0x863   :  { %15490 = vmatmul.mubr.msk.f32.gmra.mrb[208].mxu0 %vm568_vm5, %v3597_v40 }
 0x864   :  { %16739 = vmatpush1.bf16.msra.mxu0 %v19139_v60  ;;  %13108 = vmatprep.mubr.msk.f32.mxu0 %vm1034_vm6, %v3747_v25 }
 0x865   :  { %16740 = vmatprep.subr.bf16.mxu0 %v23384_v22 }
 0x868   :  { %16742 = vmatpush1.bf16.msra.mxu0 %v19141_v16  ;;  %v13921_v37 = vpop.f32.mrb[182].mxu1 }
 0x869   :  { %3925 = vmatprep.subr.mxu0 %v23385_v19  ;;  %v13922_v6 = vpop.f32.mrb[183].mxu1 }
 0x86a   :  { %v20251_v53 = vadd.f32 %v13922_v6, %v13921_v37  ;;  %v4146_v37 = vunpack.c.h.bf16 %v4127_v2  ;;  %v4145_v6 = vunpack.c.l.bf16 %v4127_v2 }
 0x86c   :  { %3926 = vmatpush1.msra.mxu0 %v19216_v42  ;;  %v13924_v25 = vpop.f32.mrb[184].mxu1 }
 0x86d   :  { %3958 = vmatmul.mubr.f32.vlgmr.msra.gmra.mrb[210].mxu0 %v3746_v54  ;;  %16747 = vmatprep.subr.bf16.mxu0 %v19091_v23  ;;  %v13925_v40 = vpop.f32.mrb[185].mxu1 }
 0x86e   :  { %16749 = vmatpush3.bf16.msra.mxu0 %v19093_v30  ;;  %13109 = vmatprep.mubr.msk.f32.mxu0 %vm1034_vm6, %v3751_v63  ;;  %v20253_v31 = vadd.f32 %v13925_v40, %v13924_v25  ;;  %v4129_v25 = vld [vmem:[%s23334_s3 + $0x3b0] sm:$0xff] }
 0x86f   :  { %16751 = vmatprep.subr.bf16.mxu0 %v19095_v12  ;;  %v4150_v40 = vunpack.c.h.bf16 %v4129_v25 }
 0x870   :  { %v13927_v45 = vpop.f32.mrb[186].mxu1 }
 0x871   :  { %3963 = vmatmul.mubr.f32.gmra.mrb[212].mxu0 %v3750_v57  ;;  %v13928_v54 = vpop.f32.mrb[187].mxu1 }
 0x872   :  { %16753 = vmatpush3.bf16.msra.mxu0 %v19097_v27  ;;  %13110 = vmatprep.mubr.msk.f32.mxu0 %vm1034_vm6, %v3755_v52  ;;  %v20255_v63 = vadd.f32 %v13928_v54, %v13927_v45  ;;  %v4149_v45 = vunpack.c.l.bf16 %v4129_v25  ;;  %v4131_v54 = vld [vmem:[%s23334_s3 + $0x3c0] sm:$0xff] }
 0x873   :  { %16755 = vmatprep.subr.bf16.mxu0 %v19099_v44 }
 0x874   :  { %v13930_v21 = vpop.f32.mrb[188].mxu1 }
 0x875   :  { %3968 = vmatmul.mubr.f32.gmra.mrb[214].mxu0 %v3754_v0  ;;  %v13931_v57 = vpop.f32.mrb[189].mxu1 }
 0x876   :  { %16757 = vmatpush3.bf16.msra.mxu0 %v19101_v20  ;;  %13111 = vmatprep.mubr.msk.f32.mxu0 %vm1034_vm6, %v3759_v24  ;;  %v20257_v52 = vadd.f32 %v13931_v57, %v13930_v21  ;;  %v4154_v21 = vunpack.c.h.bf16 %v4131_v54  ;;  %v4153_v57 = vunpack.c.l.bf16 %v4131_v54 }
 0x877   :  { %16759 = vmatprep.subr.bf16.mxu0 %v19104_v32 }
 0x878   :  { %v13933_v39 = vpop.f32.mrb[190].mxu1 }
 0x879   :  { %3973 = vmatmul.mubr.f32.gmra.mrb[216].mxu0 %v3758_v61  ;;  %v13934_v0 = vpop.f32.mrb[191].mxu1 }
 0x87a   :  { %16761 = vmatpush3.bf16.msra.mxu0 %v19106_v33  ;;  %13112 = vmatprep.mubr.msk.f32.mxu0 %vm1034_vm6, %v3763_v41  ;;  %v20259_v24 = vadd.f32 %v13934_v0, %v13933_v39  ;;  %v4133_v39 = vld [vmem:[%s23334_s3 + $0x3d0] sm:$0xff] }
 0x87b   :  { %16763 = vmatprep.subr.bf16.mxu0 %v19108_v47  ;;  %v4158_v0 = vunpack.c.h.bf16 %v4133_v39 }
 0x87c   :  { %v13936_v9 = vpop.f32.mrb[192].mxu1 }
 0x87d   :  { %3978 = vmatmul.mubr.f32.gmra.mrb[218].mxu0 %v3762_v3  ;;  %v13937_v61 = vpop.f32.mrb[193].mxu1 }
 0x87e   :  { %16765 = vmatpush3.bf16.msra.mxu0 %v19110_v5  ;;  %13113 = vmatprep.mubr.msk.f32.mxu0 %vm1034_vm6, %v3767_v1  ;;  %v20261_v41 = vadd.f32 %v13937_v61, %v13936_v9  ;;  %v4157_v9 = vunpack.c.l.bf16 %v4133_v39  ;;  %v4135_v61 = vld [vmem:[%s23334_s3 + $0x3e0] sm:$0xff] }
 0x87f   :  { %16767 = vmatprep.subr.bf16.mxu0 %v19112_v17 }
 0x880   :  { %v13939_v50 = vpop.f32.mrb[194].mxu1 }
 0x881   :  { %3983 = vmatmul.mubr.f32.gmra.mrb[220].mxu0 %v3766_v13  ;;  %v13940_v3 = vpop.f32.mrb[195].mxu1  ;;  %v4137_v13 = vunpack.c.l.bf16 %v4123_v7 }
 0x882   :  { %16769 = vmatpush3.bf16.msra.mxu0 %v19114_v4  ;;  %13114 = vmatprep.mubr.msk.f32.mxu0 %vm1034_vm6, %v3771_v34  ;;  %v20263_v1 = vadd.f32 %v13940_v3, %v13939_v50  ;;  %v4138_v34 = vunpack.c.h.bf16 %v4123_v7  ;;  %v4162_v50 = vunpack.c.h.bf16 %v4135_v61  ;;  %v4161_v3 = vunpack.c.l.bf16 %v4135_v61 }
 0x883   :  { %16771 = vmatprep.subr.bf16.mxu0 %v19116_v14 }
 0x885   :  { %3988 = vmatmul.mubr.f32.gmra.mrb[222].mxu0 %v3770_v59  ;;  %v4125_v59 = vld [vmem:[%s23334_s3 + $0x390] sm:$0xff] }
 0x886   :  { %16773 = vmatpush3.bf16.msra.mxu0 %v19118_v51  ;;  %4250 = vmatprep.mubr.f32.mxu0 %v4138_v34  ;;  %v4142_v8 = vunpack.c.h.bf16 %v4125_v59  ;;  %v4141_v35 = vunpack.c.l.bf16 %v4125_v59 }
 0x887   :  { %16775 = vmatprep.subr.bf16.mxu0 %v19121_v26 }
 0x88a   :  { %16777 = vmatpush3.bf16.msra.mxu0 %v19123_v58 }
 0x88b   :  { %16802 = vmatprep.subr.bf16.mxu0 %v23384_v22 }
 0x88d   :  { %4251 = vmatmul.mubr.f32.vlgmr.msra.gmra.mrb[224].mxu0 %v4137_v13 }
 0x88e   :  { %4255 = vmatprep.mubr.f32.mxu0 %v4142_v8 }
 0x891   :  { %4256 = vmatmul.mubr.f32.gmra.mrb[226].mxu0 %v4141_v35 }
 0x892   :  { %4260 = vmatprep.mubr.f32.mxu0 %v4146_v37 }
 0x895   :  { %4261 = vmatmul.mubr.f32.gmra.mrb[228].mxu0 %v4145_v6 }
 0x896   :  { %4265 = vmatprep.mubr.f32.mxu0 %v4150_v40 }
 0x899   :  { %4266 = vmatmul.mubr.f32.gmra.mrb[230].mxu0 %v4149_v45 }
 0x89a   :  { %4270 = vmatprep.mubr.f32.mxu0 %v4154_v21 }
 0x89d   :  { %4271 = vmatmul.mubr.f32.gmra.mrb[232].mxu0 %v4153_v57 }
 0x89e   :  { %4275 = vmatprep.mubr.f32.mxu0 %v4158_v0 }
 0x8a1   :  { %4276 = vmatmul.mubr.f32.gmra.mrb[234].mxu0 %v4157_v9 }
 0x8a2   :  { %4280 = vmatprep.mubr.f32.mxu0 %v4162_v50 }
 0x8a5   :  { %4281 = vmatmul.mubr.f32.gmra.mrb[236].mxu0 %v4161_v3 }
 0x8a6   :  { %15521 = vmatprep.mubr.msk.f32.mxu0 %vm17944_vm0, %v23385_v19 }
 0x91e   :  { %v3689_v7 = vpop.f32.mrb[196].mxu0 }
 0x91f   :  { %v20289_v13 = vadd.f32 %v3689_v7, %v20136_v62  ;;  %v15473_v34 = vpop.f32.mrb[197].mxu0 }
 0x922   :  { %v3694_v59 = vpop.f32.mrb[198].mxu0 }
 0x923   :  { %v20292_v8 = vadd.f32 %v3694_v59, %v20139_v28  ;;  %v15476_v35 = vpop.f32.mrb[199].mxu0 }
 0x926   :  { %v3699_v2 = vpop.f32.mrb[200].mxu0 }
 0x927   :  { %v20295_v37 = vadd.f32 %v3699_v2, %v20142_v49  ;;  %v15479_v6 = vpop.f32.mrb[201].mxu0 }
 0x92a   :  { %v3704_v25 = vpop.f32.mrb[202].mxu0 }
 0x92b   :  { %v20298_v40 = vadd.f32 %v3704_v25, %v20145_v56  ;;  %v15482_v45 = vpop.f32.mrb[203].mxu0 }
 0x92e   :  { %v3709_v54 = vpop.f32.mrb[204].mxu0 }
 0x92f   :  { %v20301_v62 = vadd.f32 %v3709_v54, %v20148_v55  ;;  %v15485_v21 = vpop.f32.mrb[205].mxu0 }
 0x932   :  { %v3714_v57 = vpop.f32.mrb[206].mxu0 }
 0x933   :  { %v20304_v28 = vadd.f32 %v3714_v57, %v20151_v15  ;;  %v15488_v39 = vpop.f32.mrb[207].mxu0  ;;  %v4126_v57 = vld [vmem:[%s23334_s3 + $0x398] sm:$0xff] }
 0x934   :  { %v4144_v39 = vunpack.c.h.bf16 %v4126_v57 }
 0x936   :  { %v3719_v0 = vpop.f32.mrb[208].mxu0 }
 0x937   :  { %v20307_v49 = vadd.f32 %v3719_v0, %v20154_v29  ;;  %v15491_v9 = vpop.f32.mrb[209].mxu0  ;;  %v4128_v0 = vld [vmem:[%s23334_s3 + $0x3a8] sm:$0xff] }
 0x938   :  { %v4143_v9 = vunpack.c.l.bf16 %v4126_v57 }
 0x940   :  { %v3959_v61 = vpop.f32.mrb[210].mxu0 }
 0x941   :  { %v3960_v56 = vadd.f32 %v20251_v53, %v3959_v61  ;;  %v3961_v50 = vpop.f32.mrb[211].mxu0  ;;  %v4148_v61 = vunpack.c.h.bf16 %v4128_v0 }
 0x942   :  { %v4147_v50 = vunpack.c.l.bf16 %v4128_v0 }
 0x943   :  { %15497 = vmatmul.mubr.msk.f32.vlgmr.msra.gmra.mrb[196].mxu1 %vm568_vm5, %v3960_v56  ;;  %v4130_v56 = vld [vmem:[%s23334_s3 + $0x3b8] sm:$0xff] }
 0x944   :  { %16780 = vmatpush1.bf16.msra.mxu1 %v19125_v18  ;;  %v3964_v55 = vpop.f32.mrb[212].mxu0  ;;  %15499 = vmatprep.mubr.msk.f32.mxu1 %vm17944_vm0, %v23385_v19 }
 0x945   :  { %v3965_v15 = vadd.f32 %v20253_v31, %v3964_v55  ;;  %16781 = vmatprep.subr.bf16.mxu1 %v23384_v22  ;;  %v3966_v3 = vpop.f32.mrb[213].mxu0  ;;  %v4152_v55 = vunpack.c.h.bf16 %v4130_v56 }
 0x946   :  { %v4151_v3 = vunpack.c.l.bf16 %v4130_v56 }
 0x947   :  { %15500 = vmatmul.mubr.msk.f32.gmra.mrb[198].mxu1 %vm568_vm5, %v3965_v15  ;;  %v4132_v15 = vld [vmem:[%s23334_s3 + $0x3c8] sm:$0xff] }
 0x948   :  { %16783 = vmatpush1.bf16.msra.mxu1 %v19127_v38  ;;  %v3969_v29 = vpop.f32.mrb[214].mxu0  ;;  %15502 = vmatprep.mubr.msk.f32.mxu1 %vm17944_vm0, %v23385_v19 }
 0x949   :  { %v3970_v53 = vadd.f32 %v20255_v63, %v3969_v29  ;;  %16784 = vmatprep.subr.bf16.mxu1 %v23384_v22  ;;  %v3971_v7 = vpop.f32.mrb[215].mxu0  ;;  %v4156_v29 = vunpack.c.h.bf16 %v4132_v15 }
 0x94a   :  { %v4155_v7 = vunpack.c.l.bf16 %v4132_v15 }
 0x94b   :  { %15503 = vmatmul.mubr.msk.f32.gmra.mrb[200].mxu1 %vm568_vm5, %v3970_v53  ;;  %v4134_v53 = vld [vmem:[%s23334_s3 + $0x3d8] sm:$0xff] }
 0x94c   :  { %16786 = vmatpush1.bf16.msra.mxu1 %v19130_v10  ;;  %v3974_v31 = vpop.f32.mrb[216].mxu0  ;;  %15505 = vmatprep.mubr.msk.f32.mxu1 %vm17944_vm0, %v23385_v19 }
 0x94d   :  { %v3975_v34 = vadd.f32 %v20257_v52, %v3974_v31  ;;  %16787 = vmatprep.subr.bf16.mxu1 %v23384_v22  ;;  %v3976_v59 = vpop.f32.mrb[217].mxu0  ;;  %v4160_v31 = vunpack.c.h.bf16 %v4134_v53 }
 0x94e   :  { %v4159_v59 = vunpack.c.l.bf16 %v4134_v53 }
 0x94f   :  { %15506 = vmatmul.mubr.msk.f32.gmra.mrb[202].mxu1 %vm568_vm5, %v3975_v34  ;;  %v4136_v34 = vld [vmem:[%s23334_s3 + $0x3e8] sm:$0xff] }
 0x950   :  { %16789 = vmatpush1.bf16.msra.mxu1 %v19132_v36  ;;  %v3979_v63 = vpop.f32.mrb[218].mxu0  ;;  %15508 = vmatprep.mubr.msk.f32.mxu1 %vm17944_vm0, %v23385_v19 }
 0x951   :  { %v3980_v35 = vadd.f32 %v20259_v24, %v3979_v63  ;;  %16790 = vmatprep.subr.bf16.mxu1 %v23384_v22  ;;  %v3981_v2 = vpop.f32.mrb[219].mxu0  ;;  %v4124_v24 = vld [vmem:[%s23334_s3 + $0x388] sm:$0xff]  ;;  %v4164_v63 = vunpack.c.h.bf16 %v4136_v34 }
 0x952   :  { %v4140_v54 = vunpack.c.h.bf16 %v4124_v24  ;;  %v4386_v2 = vld [vmem:[%s23335_s4 + $0x80] sm:$0xff] }
 0x953   :  { %15509 = vmatmul.mubr.msk.f32.gmra.mrb[204].mxu1 %vm568_vm5, %v3980_v35  ;;  %v4163_v35 = vunpack.c.l.bf16 %v4136_v34  ;;  %v4516_v34 = vld [vmem:[%s23334_s3 + $0x3f0] sm:$0xff] }
 0x954   :  { %16792 = vmatpush1.bf16.msra.mxu1 %v19134_v11  ;;  %v3984_v52 = vpop.f32.mrb[220].mxu0  ;;  %15511 = vmatprep.mubr.msk.f32.mxu1 %vm17944_vm0, %v23385_v19 }
 0x955   :  { %v3985_v6 = vadd.f32 %v20261_v41, %v3984_v52  ;;  %16793 = vmatprep.subr.bf16.mxu1 %v23384_v22  ;;  %v3986_v25 = vpop.f32.mrb[221].mxu0  ;;  %v4387_v52 = vld [vmem:[%s23335_s4 + $0x88] sm:$0xff] }
 0x957   :  { %15512 = vmatmul.mubr.msk.f32.gmra.mrb[206].mxu1 %vm568_vm5, %v3985_v6  ;;  %v16803_v6 = vpack.c.bf16 %v4387_v52, %v4386_v2 }
 0x958   :  { %16795 = vmatpush1.bf16.msra.mxu1 %v19136_v48  ;;  %v3989_v45 = vpop.f32.mrb[222].mxu0  ;;  %15514 = vmatprep.mubr.msk.f32.mxu1 %vm17944_vm0, %v23385_v19 }
 0x959   :  { %v3990_v21 = vadd.f32 %v20263_v1, %v3989_v45  ;;  %16796 = vmatprep.subr.bf16.mxu1 %v23384_v22  ;;  %v3991_v41 = vpop.f32.mrb[223].mxu0  ;;  %v4139_v1 = vunpack.c.l.bf16 %v4124_v24  ;;  %16804 = vmatpush3.bf16.msra.mxu0 %v16803_v6  ;;  %v4520_v6 = vld [vmem:[%s23334_s3 + $0x410] sm:$0xff] }
 0x95a   :  { %16837 = vmatprep.subr.bf16.mxu0 %v23384_v22 }
 0x95b   :  { %15515 = vmatmul.mubr.msk.f32.gmra.mrb[208].mxu1 %vm568_vm5, %v3990_v21 }
 0x95c   :  { %16798 = vmatpush1.bf16.msra.mxu1 %v19139_v60  ;;  %13122 = vmatprep.mubr.msk.f32.mxu1 %vm1034_vm6, %v4140_v54 }
 0x95d   :  { %16799 = vmatprep.subr.bf16.mxu1 %v23384_v22 }
 0x960   :  { %16801 = vmatpush1.bf16.msra.mxu1 %v19141_v16  ;;  %v13983_v25 = vpop.f32.mrb[224].mxu0 }
 0x961   :  { %4318 = vmatprep.subr.mxu1 %v23385_v19  ;;  %v13984_v24 = vpop.f32.mrb[225].mxu0 }
 0x962   :  { %v20404_v45 = vadd.f32 %v13984_v24, %v13983_v25  ;;  %v4539_v25 = vunpack.c.h.bf16 %v4520_v6  ;;  %v4538_v24 = vunpack.c.l.bf16 %v4520_v6 }
 0x964   :  { %4319 = vmatpush1.msra.mxu1 %v19216_v42  ;;  %v13986_v54 = vpop.f32.mrb[226].mxu0 }
 0x965   :  { %4351 = vmatmul.mubr.f32.vlgmr.msra.gmra.mrb[210].mxu1 %v4139_v1  ;;  %16806 = vmatprep.subr.bf16.mxu1 %v19091_v23  ;;  %v13987_v21 = vpop.f32.mrb[227].mxu0 }
 0x966   :  { %16808 = vmatpush3.bf16.msra.mxu1 %v19093_v30  ;;  %13123 = vmatprep.mubr.msk.f32.mxu1 %vm1034_vm6, %v4144_v39  ;;  %v20406_v41 = vadd.f32 %v13987_v21, %v13986_v54  ;;  %v4522_v54 = vld [vmem:[%s23334_s3 + $0x420] sm:$0xff] }
 0x967   :  { %16810 = vmatprep.subr.bf16.mxu1 %v19095_v12  ;;  %v4543_v21 = vunpack.c.h.bf16 %v4522_v54 }
 0x968   :  { %v13989_v57 = vpop.f32.mrb[228].mxu0 }
 0x969   :  { %4356 = vmatmul.mubr.f32.gmra.mrb[212].mxu1 %v4143_v9  ;;  %v13990_v1 = vpop.f32.mrb[229].mxu0 }
 0x96a   :  { %16812 = vmatpush3.bf16.msra.mxu1 %v19097_v27  ;;  %13124 = vmatprep.mubr.msk.f32.mxu1 %vm1034_vm6, %v4148_v61  ;;  %v20408_v39 = vadd.f32 %v13990_v1, %v13989_v57  ;;  %v4542_v57 = vunpack.c.l.bf16 %v4522_v54  ;;  %v4524_v1 = vld [vmem:[%s23334_s3 + $0x430] sm:$0xff] }
 0x96b   :  { %16814 = vmatprep.subr.bf16.mxu1 %v19099_v44 }
 0x96c   :  { %v13992_v0 = vpop.f32.mrb[230].mxu0 }
 0x96d   :  { %4361 = vmatmul.mubr.f32.gmra.mrb[214].mxu1 %v4147_v50  ;;  %v13993_v9 = vpop.f32.mrb[231].mxu0 }
 0x96e   :  { %16816 = vmatpush3.bf16.msra.mxu1 %v19101_v20  ;;  %13125 = vmatprep.mubr.msk.f32.mxu1 %vm1034_vm6, %v4152_v55  ;;  %v20410_v61 = vadd.f32 %v13993_v9, %v13992_v0  ;;  %v4547_v0 = vunpack.c.h.bf16 %v4524_v1  ;;  %v4546_v9 = vunpack.c.l.bf16 %v4524_v1 }
 0x96f   :  { %16818 = vmatprep.subr.bf16.mxu1 %v19104_v32 }
 0x970   :  { %v13995_v56 = vpop.f32.mrb[232].mxu0 }
 0x971   :  { %4366 = vmatmul.mubr.f32.gmra.mrb[216].mxu1 %v4151_v3  ;;  %v13996_v50 = vpop.f32.mrb[233].mxu0 }
 0x972   :  { %16820 = vmatpush3.bf16.msra.mxu1 %v19106_v33  ;;  %13126 = vmatprep.mubr.msk.f32.mxu1 %vm1034_vm6, %v4156_v29  ;;  %v20412_v55 = vadd.f32 %v13996_v50, %v13995_v56  ;;  %v4526_v56 = vld [vmem:[%s23334_s3 + $0x440] sm:$0xff] }
 0x973   :  { %16822 = vmatprep.subr.bf16.mxu1 %v19108_v47  ;;  %v4551_v50 = vunpack.c.h.bf16 %v4526_v56 }
 0x974   :  { %v13998_v15 = vpop.f32.mrb[234].mxu0 }
 0x975   :  { %4371 = vmatmul.mubr.f32.gmra.mrb[218].mxu1 %v4155_v7  ;;  %v13999_v3 = vpop.f32.mrb[235].mxu0 }
 0x976   :  { %16824 = vmatpush3.bf16.msra.mxu1 %v19110_v5  ;;  %13127 = vmatprep.mubr.msk.f32.mxu1 %vm1034_vm6, %v4160_v31  ;;  %v20414_v29 = vadd.f32 %v13999_v3, %v13998_v15  ;;  %v4550_v15 = vunpack.c.l.bf16 %v4526_v56  ;;  %v4528_v3 = vld [vmem:[%s23334_s3 + $0x450] sm:$0xff] }
 0x977   :  { %16826 = vmatprep.subr.bf16.mxu1 %v19112_v17 }
 0x978   :  { %v14001_v53 = vpop.f32.mrb[236].mxu0 }
 0x979   :  { %4376 = vmatmul.mubr.f32.gmra.mrb[220].mxu1 %v4159_v59  ;;  %v14002_v7 = vpop.f32.mrb[237].mxu0  ;;  %v4530_v59 = vunpack.c.l.bf16 %v4516_v34 }
 0x97a   :  { %16828 = vmatpush3.bf16.msra.mxu1 %v19114_v4  ;;  %13128 = vmatprep.mubr.msk.f32.mxu1 %vm1034_vm6, %v4164_v63  ;;  %v20416_v31 = vadd.f32 %v14002_v7, %v14001_v53  ;;  %v4531_v63 = vunpack.c.h.bf16 %v4516_v34  ;;  %v4555_v53 = vunpack.c.h.bf16 %v4528_v3  ;;  %v4554_v7 = vunpack.c.l.bf16 %v4528_v3 }
 0x97b   :  { %16830 = vmatprep.subr.bf16.mxu1 %v19116_v14 }
 0x97d   :  { %4381 = vmatmul.mubr.f32.gmra.mrb[222].mxu1 %v4163_v35  ;;  %v4518_v35 = vld [vmem:[%s23334_s3 + $0x400] sm:$0xff] }
 0x97e   :  { %16832 = vmatpush3.bf16.msra.mxu1 %v19118_v51  ;;  %4643 = vmatprep.mubr.f32.mxu1 %v4531_v63  ;;  %v4535_v2 = vunpack.c.h.bf16 %v4518_v35  ;;  %v4534_v52 = vunpack.c.l.bf16 %v4518_v35 }
 0x97f   :  { %16834 = vmatprep.subr.bf16.mxu1 %v19121_v26 }
 0x982   :  { %16836 = vmatpush3.bf16.msra.mxu1 %v19123_v58 }
 0x983   :  { %16861 = vmatprep.subr.bf16.mxu1 %v23384_v22 }
 0x985   :  { %4644 = vmatmul.mubr.f32.vlgmr.msra.gmra.mrb[224].mxu1 %v4530_v59 }
 0x986   :  { %4648 = vmatprep.mubr.f32.mxu1 %v4535_v2 }
 0x989   :  { %4649 = vmatmul.mubr.f32.gmra.mrb[226].mxu1 %v4534_v52 }
 0x98a   :  { %4653 = vmatprep.mubr.f32.mxu1 %v4539_v25 }
 0x98d   :  { %4654 = vmatmul.mubr.f32.gmra.mrb[228].mxu1 %v4538_v24 }
 0x98e   :  { %4658 = vmatprep.mubr.f32.mxu1 %v4543_v21 }
 0x991   :  { %4659 = vmatmul.mubr.f32.gmra.mrb[230].mxu1 %v4542_v57 }
 0x992   :  { %4663 = vmatprep.mubr.f32.mxu1 %v4547_v0 }
 0x995   :  { %4664 = vmatmul.mubr.f32.gmra.mrb[232].mxu1 %v4546_v9 }
 0x996   :  { %4668 = vmatprep.mubr.f32.mxu1 %v4551_v50 }
 0x999   :  { %4669 = vmatmul.mubr.f32.gmra.mrb[234].mxu1 %v4550_v15 }
 0x99a   :  { %4673 = vmatprep.mubr.f32.mxu1 %v4555_v53 }
 0x99d   :  { %4674 = vmatmul.mubr.f32.gmra.mrb[236].mxu1 %v4554_v7 }
 0x99e   :  { %15546 = vmatprep.mubr.msk.f32.mxu1 %vm17944_vm0, %v23385_v19 }
 0xa16   :  { %v4082_v34 = vpop.f32.mrb[196].mxu1 }
 0xa17   :  { %v20442_v59 = vadd.f32 %v4082_v34, %v20289_v13  ;;  %v15498_v63 = vpop.f32.mrb[197].mxu1 }
 0xa1a   :  { %v4087_v35 = vpop.f32.mrb[198].mxu1 }
 0xa1b   :  { %v20445_v2 = vadd.f32 %v4087_v35, %v20292_v8  ;;  %v15501_v52 = vpop.f32.mrb[199].mxu1 }
 0xa1e   :  { %v4092_v6 = vpop.f32.mrb[200].mxu1 }
 0xa1f   :  { %v20448_v25 = vadd.f32 %v4092_v6, %v20295_v37  ;;  %v15504_v24 = vpop.f32.mrb[201].mxu1 }
 0xa22   :  { %v4097_v54 = vpop.f32.mrb[202].mxu1 }
 0xa23   :  { %v20451_v21 = vadd.f32 %v4097_v54, %v20298_v40  ;;  %v15507_v57 = vpop.f32.mrb[203].mxu1 }
 0xa26   :  { %v4102_v1 = vpop.f32.mrb[204].mxu1 }
 0xa27   :  { %v20454_v13 = vadd.f32 %v4102_v1, %v20301_v62  ;;  %v15510_v0 = vpop.f32.mrb[205].mxu1 }
 0xa2a   :  { %v4107_v9 = vpop.f32.mrb[206].mxu1 }
 0xa2b   :  { %v20457_v8 = vadd.f32 %v4107_v9, %v20304_v28  ;;  %v15513_v56 = vpop.f32.mrb[207].mxu1  ;;  %v4519_v9 = vld [vmem:[%s23334_s3 + $0x408] sm:$0xff] }
 0xa2c   :  { %v4537_v56 = vunpack.c.h.bf16 %v4519_v9 }
 0xa2e   :  { %v4112_v50 = vpop.f32.mrb[208].mxu1 }
 0xa2f   :  { %v20460_v37 = vadd.f32 %v4112_v50, %v20307_v49  ;;  %v15516_v15 = vpop.f32.mrb[209].mxu1  ;;  %v4521_v50 = vld [vmem:[%s23334_s3 + $0x418] sm:$0xff] }
 0xa30   :  { %v4536_v15 = vunpack.c.l.bf16 %v4519_v9 }
 0xa38   :  { %v4352_v3 = vpop.f32.mrb[210].mxu1 }
 0xa39   :  { %v4353_v40 = vadd.f32 %v20404_v45, %v4352_v3  ;;  %v4354_v53 = vpop.f32.mrb[211].mxu1  ;;  %v4541_v3 = vunpack.c.h.bf16 %v4521_v50 }
 0xa3a   :  { %v4540_v53 = vunpack.c.l.bf16 %v4521_v50 }
 0xa3b   :  { %15522 = vmatmul.mubr.msk.f32.vlgmr.msra.gmra.mrb[238].mxu0 %vm568_vm5, %v4353_v40  ;;  %v4523_v40 = vld [vmem:[%s23334_s3 + $0x428] sm:$0xff] }
 0xa3c   :  { %16839 = vmatpush1.bf16.msra.mxu0 %v19125_v18  ;;  %v4357_v62 = vpop.f32.mrb[212].mxu1  ;;  %15524 = vmatprep.mubr.msk.f32.mxu0 %vm17944_vm0, %v23385_v19 }
 0xa3d   :  { %v4358_v28 = vadd.f32 %v20406_v41, %v4357_v62  ;;  %16840 = vmatprep.subr.bf16.mxu0 %v23384_v22  ;;  %v4359_v7 = vpop.f32.mrb[213].mxu1  ;;  %v4545_v62 = vunpack.c.h.bf16 %v4523_v40 }
 0xa3e   :  { %v4544_v7 = vunpack.c.l.bf16 %v4523_v40 }
 0xa3f   :  { %15525 = vmatmul.mubr.msk.f32.gmra.mrb[240].mxu0 %vm568_vm5, %v4358_v28  ;;  %v4525_v28 = vld [vmem:[%s23334_s3 + $0x438] sm:$0xff] }
 0xa40   :  { %16842 = vmatpush1.bf16.msra.mxu0 %v19127_v38  ;;  %v4362_v49 = vpop.f32.mrb[214].mxu1  ;;  %15527 = vmatprep.mubr.msk.f32.mxu0 %vm17944_vm0, %v23385_v19 }
 0xa41   :  { %v4363_v45 = vadd.f32 %v20408_v39, %v4362_v49  ;;  %16843 = vmatprep.subr.bf16.mxu0 %v23384_v22  ;;  %v4364_v34 = vpop.f32.mrb[215].mxu1  ;;  %v4549_v49 = vunpack.c.h.bf16 %v4525_v28 }
 0xa42   :  { %v4548_v34 = vunpack.c.l.bf16 %v4525_v28 }
 0xa43   :  { %15528 = vmatmul.mubr.msk.f32.gmra.mrb[242].mxu0 %vm568_vm5, %v4363_v45  ;;  %v4527_v45 = vld [vmem:[%s23334_s3 + $0x448] sm:$0xff] }
 0xa44   :  { %16845 = vmatpush1.bf16.msra.mxu0 %v19130_v10  ;;  %v4367_v41 = vpop.f32.mrb[216].mxu1  ;;  %15530 = vmatprep.mubr.msk.f32.mxu0 %vm17944_vm0, %v23385_v19 }
 0xa45   :  { %v4368_v63 = vadd.f32 %v20410_v61, %v4367_v41  ;;  %16846 = vmatprep.subr.bf16.mxu0 %v23384_v22  ;;  %v4369_v35 = vpop.f32.mrb[217].mxu1  ;;  %v4553_v41 = vunpack.c.h.bf16 %v4527_v45 }
 0xa46   :  { %v4552_v35 = vunpack.c.l.bf16 %v4527_v45 }
 0xa47   :  { %15531 = vmatmul.mubr.msk.f32.gmra.mrb[244].mxu0 %vm568_vm5, %v4368_v63  ;;  %v4529_v63 = vld [vmem:[%s23334_s3 + $0x458] sm:$0xff] }
 0xa48   :  { %16848 = vmatpush1.bf16.msra.mxu0 %v19132_v36  ;;  %v4372_v39 = vpop.f32.mrb[218].mxu1  ;;  %15533 = vmatprep.mubr.msk.f32.mxu0 %vm17944_vm0, %v23385_v19 }
 0xa49   :  { %v4373_v52 = vadd.f32 %v20412_v55, %v4372_v39  ;;  %16849 = vmatprep.subr.bf16.mxu0 %v23384_v22  ;;  %v4374_v6 = vpop.f32.mrb[219].mxu1  ;;  %v4517_v55 = vld [vmem:[%s23334_s3 + $0x3f8] sm:$0xff]  ;;  %v4557_v39 = vunpack.c.h.bf16 %v4529_v63 }
 0xa4a   :  { %v4533_v1 = vunpack.c.h.bf16 %v4517_v55  ;;  %v4779_v6 = vld [vmem:[%s23335_s4 + $0x90] sm:$0xff] }
 0xa4b   :  { %15534 = vmatmul.mubr.msk.f32.gmra.mrb[246].mxu0 %vm568_vm5, %v4373_v52  ;;  %v4556_v52 = vunpack.c.l.bf16 %v4529_v63  ;;  %v4909_v63 = vld [vmem:[%s23334_s3 + $0x460] sm:$0xff] }
 0xa4c   :  { %16851 = vmatpush1.bf16.msra.mxu0 %v19134_v11  ;;  %v4377_v61 = vpop.f32.mrb[220].mxu1  ;;  %15536 = vmatprep.mubr.msk.f32.mxu0 %vm17944_vm0, %v23385_v19 }
 0xa4d   :  { %v4378_v24 = vadd.f32 %v20414_v29, %v4377_v61  ;;  %16852 = vmatprep.subr.bf16.mxu0 %v23384_v22  ;;  %v4379_v54 = vpop.f32.mrb[221].mxu1  ;;  %v4780_v61 = vld [vmem:[%s23335_s4 + $0x98] sm:$0xff] }
 0xa4f   :  { %15537 = vmatmul.mubr.msk.f32.gmra.mrb[248].mxu0 %vm568_vm5, %v4378_v24  ;;  %v16862_v24 = vpack.c.bf16 %v4780_v61, %v4779_v6 }
 0xa50   :  { %16854 = vmatpush1.bf16.msra.mxu0 %v19136_v48  ;;  %v4382_v57 = vpop.f32.mrb[222].mxu1  ;;  %15539 = vmatprep.mubr.msk.f32.mxu0 %vm17944_vm0, %v23385_v19 }
 0xa51   :  { %v4383_v0 = vadd.f32 %v20416_v31, %v4382_v57  ;;  %16855 = vmatprep.subr.bf16.mxu0 %v23384_v22  ;;  %v4384_v29 = vpop.f32.mrb[223].mxu1  ;;  %v4532_v31 = vunpack.c.l.bf16 %v4517_v55  ;;  %16863 = vmatpush3.bf16.msra.mxu1 %v16862_v24  ;;  %v4913_v24 = vld [vmem:[%s23334_s3 + $0x480] sm:$0xff] }
 0xa52   :  { %16896 = vmatprep.subr.bf16.mxu1 %v23384_v22 }
 0xa53   :  { %15540 = vmatmul.mubr.msk.f32.gmra.mrb[250].mxu0 %vm568_vm5, %v4383_v0 }
 0xa54   :  { %16857 = vmatpush1.bf16.msra.mxu0 %v19139_v60  ;;  %13136 = vmatprep.mubr.msk.f32.mxu0 %vm1034_vm6, %v4533_v1 }
 0xa55   :  { %16858 = vmatprep.subr.bf16.mxu0 %v23384_v22 }
 0xa58   :  { %16860 = vmatpush1.bf16.msra.mxu0 %v19141_v16  ;;  %v14045_v54 = vpop.f32.mrb[224].mxu1 }
 0xa59   :  { %4711 = vmatprep.subr.mxu0 %v23385_v19  ;;  %v14046_v55 = vpop.f32.mrb[225].mxu1 }
 0xa5a   :  { %v20557_v57 = vadd.f32 %v14046_v55, %v14045_v54  ;;  %v4931_v54 = vunpack.c.l.bf16 %v4913_v24  ;;  %v4932_v55 = vunpack.c.h.bf16 %v4913_v24 }
 0xa5c   :  { %4712 = vmatpush1.msra.mxu0 %v19216_v42  ;;  %v14048_v1 = vpop.f32.mrb[226].mxu1 }
 0xa5d   :  { %4744 = vmatmul.mubr.f32.vlgmr.msra.gmra.mrb[252].mxu0 %v4532_v31  ;;  %16865 = vmatprep.subr.bf16.mxu0 %v19091_v23  ;;  %v14049_v0 = vpop.f32.mrb[227].mxu1 }
 0xa5e   :  { %16867 = vmatpush3.bf16.msra.mxu0 %v19093_v30  ;;  %13137 = vmatprep.mubr.msk.f32.mxu0 %vm1034_vm6, %v4537_v56  ;;  %v20559_v29 = vadd.f32 %v14049_v0, %v14048_v1  ;;  %v4915_v1 = vld [vmem:[%s23334_s3 + $0x490] sm:$0xff] }
 0xa5f   :  { %16869 = vmatprep.subr.bf16.mxu0 %v19095_v12  ;;  %v4935_v0 = vunpack.c.l.bf16 %v4915_v1 }
 0xa60   :  { %v14051_v9 = vpop.f32.mrb[228].mxu1 }
 0xa61   :  { %4749 = vmatmul.mubr.f32.gmra.mrb[254].mxu0 %v4536_v15  ;;  %v14052_v31 = vpop.f32.mrb[229].mxu1 }
 0xa62   :  { %16871 = vmatpush3.bf16.msra.mxu0 %v19097_v27  ;;  %13138 = vmatprep.mubr.msk.f32.mxu0 %vm1034_vm6, %v4541_v3  ;;  %v20561_v56 = vadd.f32 %v14052_v31, %v14051_v9  ;;  %v4936_v9 = vunpack.c.h.bf16 %v4915_v1  ;;  %v4917_v31 = vld [vmem:[%s23334_s3 + $0x4a0] sm:$0xff] }
 0xa63   :  { %16873 = vmatprep.subr.bf16.mxu0 %v19099_v44 }
 0xa64   :  { %v14054_v50 = vpop.f32.mrb[230].mxu1 }
 0xa65   :  { %4754 = vmatmul.mubr.f32.gmra.mrb[0].mxu0 %v4540_v53  ;;  %v14055_v15 = vpop.f32.mrb[231].mxu1 }
 0xa66   :  { %16875 = vmatpush3.bf16.msra.mxu0 %v19101_v20  ;;  %13139 = vmatprep.mubr.msk.f32.mxu0 %vm1034_vm6, %v4545_v62  ;;  %v20563_v3 = vadd.f32 %v14055_v15, %v14054_v50  ;;  %v4939_v50 = vunpack.c.l.bf16 %v4917_v31  ;;  %v4940_v15 = vunpack.c.h.bf16 %v4917_v31 }
 0xa67   :  { %16877 = vmatprep.subr.bf16.mxu0 %v19104_v32 }
 0xa68   :  { %v14057_v40 = vpop.f32.mrb[232].mxu1 }
 0xa69   :  { %4759 = vmatmul.mubr.f32.gmra.mrb[2].mxu0 %v4544_v7  ;;  %v14058_v53 = vpop.f32.mrb[233].mxu1 }
 0xa6a   :  { %16879 = vmatpush3.bf16.msra.mxu0 %v19106_v33  ;;  %13140 = vmatprep.mubr.msk.f32.mxu0 %vm1034_vm6, %v4549_v49  ;;  %v20565_v62 = vadd.f32 %v14058_v53, %v14057_v40  ;;  %v4919_v40 = vld [vmem:[%s23334_s3 + $0x4b0] sm:$0xff] }
 0xa6b   :  { %16881 = vmatprep.subr.bf16.mxu0 %v19108_v47  ;;  %v4943_v53 = vunpack.c.l.bf16 %v4919_v40 }
 0xa6c   :  { %v14060_v28 = vpop.f32.mrb[234].mxu1 }
 0xa6d   :  { %4764 = vmatmul.mubr.f32.gmra.mrb[4].mxu0 %v4548_v34  ;;  %v14061_v7 = vpop.f32.mrb[235].mxu1 }
 0xa6e   :  { %16883 = vmatpush3.bf16.msra.mxu0 %v19110_v5  ;;  %13141 = vmatprep.mubr.msk.f32.mxu0 %vm1034_vm6, %v4553_v41  ;;  %v20567_v49 = vadd.f32 %v14061_v7, %v14060_v28  ;;  %v4944_v28 = vunpack.c.h.bf16 %v4919_v40  ;;  %v4921_v7 = vld [vmem:[%s23334_s3 + $0x4c0] sm:$0xff] }
 0xa6f   :  { %16885 = vmatprep.subr.bf16.mxu0 %v19112_v17 }
 0xa70   :  { %v14063_v45 = vpop.f32.mrb[236].mxu1 }
 0xa71   :  { %4769 = vmatmul.mubr.f32.gmra.mrb[6].mxu0 %v4552_v35  ;;  %v14064_v34 = vpop.f32.mrb[237].mxu1  ;;  %v4923_v35 = vunpack.c.l.bf16 %v4909_v63 }
 0xa72   :  { %16887 = vmatpush3.bf16.msra.mxu0 %v19114_v4  ;;  %13142 = vmatprep.mubr.msk.f32.mxu0 %vm1034_vm6, %v4557_v39  ;;  %v20569_v41 = vadd.f32 %v14064_v34, %v14063_v45  ;;  %v4924_v39 = vunpack.c.h.bf16 %v4909_v63  ;;  %v4947_v45 = vunpack.c.l.bf16 %v4921_v7  ;;  %v4948_v34 = vunpack.c.h.bf16 %v4921_v7 }
 0xa73   :  { %16889 = vmatprep.subr.bf16.mxu0 %v19116_v14 }
 0xa75   :  { %4774 = vmatmul.mubr.f32.gmra.mrb[8].mxu0 %v4556_v52  ;;  %v4911_v52 = vld [vmem:[%s23334_s3 + $0x470] sm:$0xff] }
 0xa76   :  { %16891 = vmatpush3.bf16.msra.mxu0 %v19118_v51  ;;  %5036 = vmatprep.mubr.f32.mxu0 %v4924_v39  ;;  %v4928_v6 = vunpack.c.h.bf16 %v4911_v52  ;;  %v4927_v61 = vunpack.c.l.bf16 %v4911_v52 }
 0xa77   :  { %16893 = vmatprep.subr.bf16.mxu0 %v19121_v26 }
 0xa7a   :  { %16895 = vmatpush3.bf16.msra.mxu0 %v19123_v58 }
 0xa7b   :  { %16920 = vmatprep.subr.bf16.mxu0 %v23384_v22 }
 0xa7d   :  { %5037 = vmatmul.mubr.f32.vlgmr.msra.gmra.mrb[10].mxu0 %v4923_v35 }
 0xa7e   :  { %5041 = vmatprep.mubr.f32.mxu0 %v4928_v6 }
 0xa81   :  { %5042 = vmatmul.mubr.f32.gmra.mrb[12].mxu0 %v4927_v61 }
 0xa82   :  { %5046 = vmatprep.mubr.f32.mxu0 %v4932_v55 }
 0xa85   :  { %5047 = vmatmul.mubr.f32.gmra.mrb[14].mxu0 %v4931_v54 }
 0xa86   :  { %5051 = vmatprep.mubr.f32.mxu0 %v4936_v9 }
 0xa89   :  { %5052 = vmatmul.mubr.f32.gmra.mrb[16].mxu0 %v4935_v0 }
 0xa8a   :  { %5056 = vmatprep.mubr.f32.mxu0 %v4940_v15 }
 0xa8d   :  { %5057 = vmatmul.mubr.f32.gmra.mrb[18].mxu0 %v4939_v50 }
 0xa8e   :  { %5061 = vmatprep.mubr.f32.mxu0 %v4944_v28 }
 0xa91   :  { %5062 = vmatmul.mubr.f32.gmra.mrb[20].mxu0 %v4943_v53 }
 0xa92   :  { %5066 = vmatprep.mubr.f32.mxu0 %v4948_v34 }
 0xa95   :  { %5067 = vmatmul.mubr.f32.gmra.mrb[22].mxu0 %v4947_v45 }
 0xa96   :  { %15571 = vmatprep.mubr.msk.f32.mxu0 %vm17944_vm0, %v23385_v19 }
 0xb0e   :  { %v4475_v63 = vpop.f32.mrb[238].mxu0 }
 0xb0f   :  { %v20595_v35 = vadd.f32 %v4475_v63, %v20442_v59  ;;  %v15523_v39 = vpop.f32.mrb[239].mxu0 }
 0xb12   :  { %v4480_v52 = vpop.f32.mrb[240].mxu0 }
 0xb13   :  { %v20598_v6 = vadd.f32 %v4480_v52, %v20445_v2  ;;  %v15526_v61 = vpop.f32.mrb[241].mxu0 }
 0xb16   :  { %v4485_v24 = vpop.f32.mrb[242].mxu0 }
 0xb17   :  { %v20601_v54 = vadd.f32 %v4485_v24, %v20448_v25  ;;  %v15529_v55 = vpop.f32.mrb[243].mxu0 }
 0xb1a   :  { %v4490_v1 = vpop.f32.mrb[244].mxu0 }
 0xb1b   :  { %v20604_v0 = vadd.f32 %v4490_v1, %v20451_v21  ;;  %v15532_v9 = vpop.f32.mrb[245].mxu0 }
 0xb1e   :  { %v4495_v31 = vpop.f32.mrb[246].mxu0 }
 0xb1f   :  { %v20607_v59 = vadd.f32 %v4495_v31, %v20454_v13  ;;  %v15535_v50 = vpop.f32.mrb[247].mxu0 }
 0xb22   :  { %v4500_v15 = vpop.f32.mrb[248].mxu0 }
 0xb23   :  { %v20610_v2 = vadd.f32 %v4500_v15, %v20457_v8  ;;  %v15538_v40 = vpop.f32.mrb[249].mxu0  ;;  %v4912_v15 = vld [vmem:[%s23334_s3 + $0x478] sm:$0xff] }
 0xb24   :  { %v4930_v40 = vunpack.c.h.bf16 %v4912_v15 }
 0xb26   :  { %v4505_v53 = vpop.f32.mrb[250].mxu0 }
 0xb27   :  { %v20613_v25 = vadd.f32 %v4505_v53, %v20460_v37  ;;  %v15541_v28 = vpop.f32.mrb[251].mxu0  ;;  %v4914_v53 = vld [vmem:[%s23334_s3 + $0x488] sm:$0xff] }
 0xb28   :  { %v4929_v28 = vunpack.c.l.bf16 %v4912_v15 }
 0xb30   :  { %v4745_v7 = vpop.f32.mrb[252].mxu0 }
 0xb31   :  { %v4746_v21 = vadd.f32 %v20557_v57, %v4745_v7  ;;  %v4747_v45 = vpop.f32.mrb[253].mxu0  ;;  %v4934_v7 = vunpack.c.h.bf16 %v4914_v53 }
 0xb32   :  { %v4933_v45 = vunpack.c.l.bf16 %v4914_v53 }
 0xb33   :  { %15547 = vmatmul.mubr.msk.f32.vlgmr.msra.gmra.mrb[238].mxu1 %vm568_vm5, %v4746_v21  ;;  %v4916_v21 = vld [vmem:[%s23334_s3 + $0x498] sm:$0xff] }
 0xb34   :  { %16898 = vmatpush1.bf16.msra.mxu1 %v19125_v18  ;;  %v4750_v13 = vpop.f32.mrb[254].mxu0  ;;  %15549 = vmatprep.mubr.msk.f32.mxu1 %vm17944_vm0, %v23385_v19 }
 0xb35   :  { %v4751_v8 = vadd.f32 %v20559_v29, %v4750_v13  ;;  %16899 = vmatprep.subr.bf16.mxu1 %v23384_v22  ;;  %v4752_v34 = vpop.f32.mrb[255].mxu0  ;;  %v4938_v13 = vunpack.c.h.bf16 %v4916_v21 }
 0xb36   :  { %v4937_v34 = vunpack.c.l.bf16 %v4916_v21 }
 0xb37   :  { %15550 = vmatmul.mubr.msk.f32.gmra.mrb[240].mxu1 %vm568_vm5, %v4751_v8  ;;  %v4918_v8 = vld [vmem:[%s23334_s3 + $0x4a8] sm:$0xff] }
 0xb38   :  { %16901 = vmatpush1.bf16.msra.mxu1 %v19127_v38  ;;  %v4755_v37 = vpop.f32.mrb[0].mxu0  ;;  %15552 = vmatprep.mubr.msk.f32.mxu1 %vm17944_vm0, %v23385_v19 }
 0xb39   :  { %v4756_v57 = vadd.f32 %v20561_v56, %v4755_v37  ;;  %16902 = vmatprep.subr.bf16.mxu1 %v23384_v22  ;;  %v4757_v63 = vpop.f32.mrb[1].mxu0  ;;  %v4942_v37 = vunpack.c.h.bf16 %v4918_v8 }
 0xb3a   :  { %v4941_v63 = vunpack.c.l.bf16 %v4918_v8 }
 0xb3b   :  { %15553 = vmatmul.mubr.msk.f32.gmra.mrb[242].mxu1 %vm568_vm5, %v4756_v57  ;;  %v4920_v57 = vld [vmem:[%s23334_s3 + $0x4b8] sm:$0xff] }
 0xb3c   :  { %16904 = vmatpush1.bf16.msra.mxu1 %v19130_v10  ;;  %v4760_v29 = vpop.f32.mrb[2].mxu0  ;;  %15555 = vmatprep.mubr.msk.f32.mxu1 %vm17944_vm0, %v23385_v19 }
 0xb3d   :  { %v4761_v39 = vadd.f32 %v20563_v3, %v4760_v29  ;;  %16905 = vmatprep.subr.bf16.mxu1 %v23384_v22  ;;  %v4762_v52 = vpop.f32.mrb[3].mxu0  ;;  %v4946_v29 = vunpack.c.h.bf16 %v4920_v57 }
 0xb3e   :  { %v4945_v52 = vunpack.c.l.bf16 %v4920_v57 }
 0xb3f   :  { %15556 = vmatmul.mubr.msk.f32.gmra.mrb[244].mxu1 %vm568_vm5, %v4761_v39  ;;  %v4922_v39 = vld [vmem:[%s23334_s3 + $0x4c8] sm:$0xff] }
 0xb40   :  { %16907 = vmatpush1.bf16.msra.mxu1 %v19132_v36  ;;  %v4765_v56 = vpop.f32.mrb[4].mxu0  ;;  %15558 = vmatprep.mubr.msk.f32.mxu1 %vm17944_vm0, %v23385_v19 }
 0xb41   :  { %v4766_v61 = vadd.f32 %v20565_v62, %v4765_v56  ;;  %16908 = vmatprep.subr.bf16.mxu1 %v23384_v22  ;;  %v4767_v24 = vpop.f32.mrb[5].mxu0  ;;  %v4910_v62 = vld [vmem:[%s23334_s3 + $0x468] sm:$0xff]  ;;  %v4950_v56 = vunpack.c.h.bf16 %v4922_v39 }
 0xb42   :  { %v4926_v31 = vunpack.c.h.bf16 %v4910_v62  ;;  %v5172_v24 = vld [vmem:[%s23335_s4 + $0xa0] sm:$0xff] }
 0xb43   :  { %15559 = vmatmul.mubr.msk.f32.gmra.mrb[246].mxu1 %vm568_vm5, %v4766_v61  ;;  %v4949_v61 = vunpack.c.l.bf16 %v4922_v39  ;;  %v5302_v39 = vld [vmem:[%s23334_s3 + $0x4d0] sm:$0xff] }
 0xb44   :  { %16910 = vmatpush1.bf16.msra.mxu1 %v19134_v11  ;;  %v4770_v3 = vpop.f32.mrb[6].mxu0  ;;  %15561 = vmatprep.mubr.msk.f32.mxu1 %vm17944_vm0, %v23385_v19 }
 0xb45   :  { %v4771_v55 = vadd.f32 %v20567_v49, %v4770_v3  ;;  %16911 = vmatprep.subr.bf16.mxu1 %v23384_v22  ;;  %v4772_v1 = vpop.f32.mrb[7].mxu0  ;;  %v5173_v3 = vld [vmem:[%s23335_s4 + $0xa8] sm:$0xff] }
 0xb47   :  { %15562 = vmatmul.mubr.msk.f32.gmra.mrb[248].mxu1 %vm568_vm5, %v4771_v55  ;;  %v16921_v55 = vpack.c.bf16 %v5173_v3, %v5172_v24 }
 0xb48   :  { %16913 = vmatpush1.bf16.msra.mxu1 %v19136_v48  ;;  %v4775_v9 = vpop.f32.mrb[8].mxu0  ;;  %15564 = vmatprep.mubr.msk.f32.mxu1 %vm17944_vm0, %v23385_v19 }
 0xb49   :  { %v4776_v50 = vadd.f32 %v20569_v41, %v4775_v9  ;;  %16914 = vmatprep.subr.bf16.mxu1 %v23384_v22  ;;  %v4777_v49 = vpop.f32.mrb[9].mxu0  ;;  %v4925_v41 = vunpack.c.l.bf16 %v4910_v62  ;;  %16922 = vmatpush3.bf16.msra.mxu0 %v16921_v55  ;;  %v5306_v55 = vld [vmem:[%s23334_s3 + $0x4f0] sm:$0xff] }
 0xb4a   :  { %16955 = vmatprep.subr.bf16.mxu0 %v23384_v22 }
 0xb4b   :  { %15565 = vmatmul.mubr.msk.f32.gmra.mrb[250].mxu1 %vm568_vm5, %v4776_v50 }
 0xb4c   :  { %16916 = vmatpush1.bf16.msra.mxu1 %v19139_v60  ;;  %13150 = vmatprep.mubr.msk.f32.mxu1 %vm1034_vm6, %v4926_v31 }
 0xb4d   :  { %16917 = vmatprep.subr.bf16.mxu1 %v23384_v22 }
 0xb50   :  { %16919 = vmatpush1.bf16.msra.mxu1 %v19141_v16  ;;  %v14107_v1 = vpop.f32.mrb[10].mxu0 }
 0xb51   :  { %5104 = vmatprep.subr.mxu1 %v23385_v19  ;;  %v14108_v62 = vpop.f32.mrb[11].mxu0 }
 0xb52   :  { %v20710_v9 = vadd.f32 %v14108_v62, %v14107_v1  ;;  %v5324_v1 = vunpack.c.l.bf16 %v5306_v55  ;;  %v5325_v62 = vunpack.c.h.bf16 %v5306_v55 }
 0xb54   :  { %5105 = vmatpush1.msra.mxu1 %v19216_v42  ;;  %v14110_v31 = vpop.f32.mrb[12].mxu0 }
 0xb55   :  { %5137 = vmatmul.mubr.f32.vlgmr.msra.gmra.mrb[252].mxu1 %v4925_v41  ;;  %16924 = vmatprep.subr.bf16.mxu1 %v19091_v23  ;;  %v14111_v50 = vpop.f32.mrb[13].mxu0 }
 0xb56   :  { %16926 = vmatpush3.bf16.msra.mxu1 %v19093_v30  ;;  %13151 = vmatprep.mubr.msk.f32.mxu1 %vm1034_vm6, %v4930_v40  ;;  %v20712_v49 = vadd.f32 %v14111_v50, %v14110_v31  ;;  %v5308_v31 = vld [vmem:[%s23334_s3 + $0x500] sm:$0xff] }
 0xb57   :  { %16928 = vmatprep.subr.bf16.mxu1 %v19095_v12  ;;  %v5328_v50 = vunpack.c.l.bf16 %v5308_v31 }
 0xb58   :  { %v14113_v15 = vpop.f32.mrb[14].mxu0 }
 0xb59   :  { %5142 = vmatmul.mubr.f32.gmra.mrb[254].mxu1 %v4929_v28  ;;  %v14114_v41 = vpop.f32.mrb[15].mxu0 }
 0xb5a   :  { %16930 = vmatpush3.bf16.msra.mxu1 %v19097_v27  ;;  %13152 = vmatprep.mubr.msk.f32.mxu1 %vm1034_vm6, %v4934_v7  ;;  %v20714_v40 = vadd.f32 %v14114_v41, %v14113_v15  ;;  %v5329_v15 = vunpack.c.h.bf16 %v5308_v31  ;;  %v5310_v41 = vld [vmem:[%s23334_s3 + $0x510] sm:$0xff] }
 0xb5b   :  { %16932 = vmatprep.subr.bf16.mxu1 %v19099_v44 }
 0xb5c   :  { %v14116_v53 = vpop.f32.mrb[16].mxu0 }
 0xb5d   :  { %5147 = vmatmul.mubr.f32.gmra.mrb[0].mxu1 %v4933_v45  ;;  %v14117_v28 = vpop.f32.mrb[17].mxu0 }
 0xb5e   :  { %16934 = vmatpush3.bf16.msra.mxu1 %v19101_v20  ;;  %13153 = vmatprep.mubr.msk.f32.mxu1 %vm1034_vm6, %v4938_v13  ;;  %v20716_v7 = vadd.f32 %v14117_v28, %v14116_v53  ;;  %v5332_v53 = vunpack.c.l.bf16 %v5310_v41  ;;  %v5333_v28 = vunpack.c.h.bf16 %v5310_v41 }
 0xb5f   :  { %16936 = vmatprep.subr.bf16.mxu1 %v19104_v32 }
 0xb60   :  { %v14119_v21 = vpop.f32.mrb[18].mxu0 }
 0xb61   :  { %5152 = vmatmul.mubr.f32.gmra.mrb[2].mxu1 %v4937_v34  ;;  %v14120_v45 = vpop.f32.mrb[19].mxu0 }
 0xb62   :  { %16938 = vmatpush3.bf16.msra.mxu1 %v19106_v33  ;;  %13154 = vmatprep.mubr.msk.f32.mxu1 %vm1034_vm6, %v4942_v37  ;;  %v20718_v13 = vadd.f32 %v14120_v45, %v14119_v21  ;;  %v5312_v21 = vld [vmem:[%s23334_s3 + $0x520] sm:$0xff] }
 0xb63   :  { %16940 = vmatprep.subr.bf16.mxu1 %v19108_v47  ;;  %v5336_v45 = vunpack.c.l.bf16 %v5312_v21 }
 0xb64   :  { %v14122_v8 = vpop.f32.mrb[20].mxu0 }
 0xb65   :  { %5157 = vmatmul.mubr.f32.gmra.mrb[4].mxu1 %v4941_v63  ;;  %v14123_v34 = vpop.f32.mrb[21].mxu0 }
 0xb66   :  { %16942 = vmatpush3.bf16.msra.mxu1 %v19110_v5  ;;  %13155 = vmatprep.mubr.msk.f32.mxu1 %vm1034_vm6, %v4946_v29  ;;  %v20720_v37 = vadd.f32 %v14123_v34, %v14122_v8  ;;  %v5337_v8 = vunpack.c.h.bf16 %v5312_v21  ;;  %v5314_v34 = vld [vmem:[%s23334_s3 + $0x530] sm:$0xff] }
 0xb67   :  { %16944 = vmatprep.subr.bf16.mxu1 %v19112_v17 }
 0xb68   :  { %v14125_v57 = vpop.f32.mrb[22].mxu0 }
 0xb69   :  { %5162 = vmatmul.mubr.f32.gmra.mrb[6].mxu1 %v4945_v52  ;;  %v14126_v63 = vpop.f32.mrb[23].mxu0  ;;  %v5316_v52 = vunpack.c.l.bf16 %v5302_v39 }
 0xb6a   :  { %16946 = vmatpush3.bf16.msra.mxu1 %v19114_v4  ;;  %13156 = vmatprep.mubr.msk.f32.mxu1 %vm1034_vm6, %v4950_v56  ;;  %v20722_v29 = vadd.f32 %v14126_v63, %v14125_v57  ;;  %v5317_v56 = vunpack.c.h.bf16 %v5302_v39  ;;  %v5340_v57 = vunpack.c.l.bf16 %v5314_v34  ;;  %v5341_v63 = vunpack.c.h.bf16 %v5314_v34 }
 0xb6b   :  { %16948 = vmatprep.subr.bf16.mxu1 %v19116_v14 }
 0xb6d   :  { %5167 = vmatmul.mubr.f32.gmra.mrb[8].mxu1 %v4949_v61  ;;  %v5304_v61 = vld [vmem:[%s23334_s3 + $0x4e0] sm:$0xff] }
 0xb6e   :  { %16950 = vmatpush3.bf16.msra.mxu1 %v19118_v51  ;;  %5429 = vmatprep.mubr.f32.mxu1 %v5317_v56  ;;  %v5321_v24 = vunpack.c.h.bf16 %v5304_v61  ;;  %v5320_v3 = vunpack.c.l.bf16 %v5304_v61 }
 0xb6f   :  { %16952 = vmatprep.subr.bf16.mxu1 %v19121_v26 }
 0xb72   :  { %16954 = vmatpush3.bf16.msra.mxu1 %v19123_v58 }
 0xb73   :  { %16979 = vmatprep.subr.bf16.mxu1 %v23384_v22 }
 0xb75   :  { %5430 = vmatmul.mubr.f32.vlgmr.msra.gmra.mrb[10].mxu1 %v5316_v52 }
 0xb76   :  { %5434 = vmatprep.mubr.f32.mxu1 %v5321_v24 }
 0xb79   :  { %5435 = vmatmul.mubr.f32.gmra.mrb[12].mxu1 %v5320_v3 }
 0xb7a   :  { %5439 = vmatprep.mubr.f32.mxu1 %v5325_v62 }
 0xb7d   :  { %5440 = vmatmul.mubr.f32.gmra.mrb[14].mxu1 %v5324_v1 }
 0xb7e   :  { %5444 = vmatprep.mubr.f32.mxu1 %v5329_v15 }
 0xb81   :  { %5445 = vmatmul.mubr.f32.gmra.mrb[16].mxu1 %v5328_v50 }
 0xb82   :  { %5449 = vmatprep.mubr.f32.mxu1 %v5333_v28 }
 0xb85   :  { %5450 = vmatmul.mubr.f32.gmra.mrb[18].mxu1 %v5332_v53 }
 0xb86   :  { %5454 = vmatprep.mubr.f32.mxu1 %v5337_v8 }
 0xb89   :  { %5455 = vmatmul.mubr.f32.gmra.mrb[20].mxu1 %v5336_v45 }
 0xb8a   :  { %5459 = vmatprep.mubr.f32.mxu1 %v5341_v63 }
 0xb8d   :  { %5460 = vmatmul.mubr.f32.gmra.mrb[22].mxu1 %v5340_v57 }
 0xb8e   :  { %15596 = vmatprep.mubr.msk.f32.mxu1 %vm17944_vm0, %v23385_v19 }
 0xc06   :  { %v4868_v39 = vpop.f32.mrb[238].mxu1 }
 0xc07   :  { %v20748_v52 = vadd.f32 %v4868_v39, %v20595_v35  ;;  %v15548_v56 = vpop.f32.mrb[239].mxu1 }
 0xc0a   :  { %v4873_v61 = vpop.f32.mrb[240].mxu1 }
 0xc0b   :  { %v20751_v24 = vadd.f32 %v4873_v61, %v20598_v6  ;;  %v15551_v3 = vpop.f32.mrb[241].mxu1 }
 0xc0e   :  { %v4878_v55 = vpop.f32.mrb[242].mxu1 }
 0xc0f   :  { %v20754_v1 = vadd.f32 %v4878_v55, %v20601_v54  ;;  %v15554_v62 = vpop.f32.mrb[243].mxu1 }
 0xc12   :  { %v4883_v31 = vpop.f32.mrb[244].mxu1 }
 0xc13   :  { %v20757_v50 = vadd.f32 %v4883_v31, %v20604_v0  ;;  %v15557_v15 = vpop.f32.mrb[245].mxu1 }
 0xc16   :  { %v4888_v41 = vpop.f32.mrb[246].mxu1 }
 0xc17   :  { %v20760_v35 = vadd.f32 %v4888_v41, %v20607_v59  ;;  %v15560_v53 = vpop.f32.mrb[247].mxu1 }
 0xc1a   :  { %v4893_v28 = vpop.f32.mrb[248].mxu1 }
 0xc1b   :  { %v20763_v6 = vadd.f32 %v4893_v28, %v20610_v2  ;;  %v15563_v21 = vpop.f32.mrb[249].mxu1  ;;  %v5305_v28 = vld [vmem:[%s23334_s3 + $0x4e8] sm:$0xff] }
 0xc1c   :  { %v5323_v21 = vunpack.c.h.bf16 %v5305_v28 }
 0xc1e   :  { %v4898_v45 = vpop.f32.mrb[250].mxu1 }
 0xc1f   :  { %v20766_v54 = vadd.f32 %v4898_v45, %v20613_v25  ;;  %v15566_v8 = vpop.f32.mrb[251].mxu1  ;;  %v5307_v45 = vld [vmem:[%s23334_s3 + $0x4f8] sm:$0xff] }
 0xc20   :  { %v5322_v8 = vunpack.c.l.bf16 %v5305_v28 }
 0xc28   :  { %v5138_v34 = vpop.f32.mrb[252].mxu1 }
 0xc29   :  { %v5139_v0 = vadd.f32 %v20710_v9, %v5138_v34  ;;  %v5140_v57 = vpop.f32.mrb[253].mxu1  ;;  %v5327_v34 = vunpack.c.h.bf16 %v5307_v45 }
 0xc2a   :  { %v5326_v57 = vunpack.c.l.bf16 %v5307_v45 }
 0xc2b   :  { %15572 = vmatmul.mubr.msk.f32.vlgmr.msra.gmra.mrb[24].mxu0 %vm568_vm5, %v5139_v0  ;;  %v5309_v0 = vld [vmem:[%s23334_s3 + $0x508] sm:$0xff] }
 0xc2c   :  { %16957 = vmatpush1.bf16.msra.mxu0 %v19125_v18  ;;  %v5143_v59 = vpop.f32.mrb[254].mxu1  ;;  %15574 = vmatprep.mubr.msk.f32.mxu0 %vm17944_vm0, %v23385_v19 }
 0xc2d   :  { %v5144_v2 = vadd.f32 %v20712_v49, %v5143_v59  ;;  %16958 = vmatprep.subr.bf16.mxu0 %v23384_v22  ;;  %v5145_v63 = vpop.f32.mrb[255].mxu1  ;;  %v5331_v59 = vunpack.c.h.bf16 %v5309_v0 }
 0xc2e   :  { %v5330_v63 = vunpack.c.l.bf16 %v5309_v0 }
 0xc2f   :  { %15575 = vmatmul.mubr.msk.f32.gmra.mrb[26].mxu0 %vm568_vm5, %v5144_v2  ;;  %v5311_v2 = vld [vmem:[%s23334_s3 + $0x518] sm:$0xff] }
 0xc30   :  { %16960 = vmatpush1.bf16.msra.mxu0 %v19127_v38  ;;  %v5148_v25 = vpop.f32.mrb[0].mxu1  ;;  %15577 = vmatprep.mubr.msk.f32.mxu0 %vm17944_vm0, %v23385_v19 }
 0xc31   :  { %v5149_v9 = vadd.f32 %v20714_v40, %v5148_v25  ;;  %16961 = vmatprep.subr.bf16.mxu0 %v23384_v22  ;;  %v5150_v39 = vpop.f32.mrb[1].mxu1  ;;  %v5335_v25 = vunpack.c.h.bf16 %v5311_v2 }
 0xc32   :  { %v5334_v39 = vunpack.c.l.bf16 %v5311_v2 }
 0xc33   :  { %15578 = vmatmul.mubr.msk.f32.gmra.mrb[28].mxu0 %vm568_vm5, %v5149_v9  ;;  %v5313_v9 = vld [vmem:[%s23334_s3 + $0x528] sm:$0xff] }
 0xc34   :  { %16963 = vmatpush1.bf16.msra.mxu0 %v19130_v10  ;;  %v5153_v49 = vpop.f32.mrb[2].mxu1  ;;  %15580 = vmatprep.mubr.msk.f32.mxu0 %vm17944_vm0, %v23385_v19 }
 0xc35   :  { %v5154_v56 = vadd.f32 %v20716_v7, %v5153_v49  ;;  %16964 = vmatprep.subr.bf16.mxu0 %v23384_v22  ;;  %v5155_v61 = vpop.f32.mrb[3].mxu1  ;;  %v5339_v49 = vunpack.c.h.bf16 %v5313_v9 }
 0xc36   :  { %v5338_v61 = vunpack.c.l.bf16 %v5313_v9 }
 0xc37   :  { %15581 = vmatmul.mubr.msk.f32.gmra.mrb[30].mxu0 %vm568_vm5, %v5154_v56  ;;  %v5315_v56 = vld [vmem:[%s23334_s3 + $0x538] sm:$0xff] }
 0xc38   :  { %16966 = vmatpush1.bf16.msra.mxu0 %v19132_v36  ;;  %v5158_v40 = vpop.f32.mrb[4].mxu1  ;;  %15583 = vmatprep.mubr.msk.f32.mxu0 %vm17944_vm0, %v23385_v19 }
 0xc39   :  { %v5159_v3 = vadd.f32 %v20718_v13, %v5158_v40  ;;  %16967 = vmatprep.subr.bf16.mxu0 %v23384_v22  ;;  %v5160_v55 = vpop.f32.mrb[5].mxu1  ;;  %v5303_v13 = vld [vmem:[%s23334_s3 + $0x4d8] sm:$0xff]  ;;  %v5343_v40 = vunpack.c.h.bf16 %v5315_v56 }
 0xc3a   :  { %v5319_v41 = vunpack.c.h.bf16 %v5303_v13  ;;  %v5565_v55 = vld [vmem:[%s23335_s4 + $0xb0] sm:$0xff] }
 0xc3b   :  { %15584 = vmatmul.mubr.msk.f32.gmra.mrb[32].mxu0 %vm568_vm5, %v5159_v3  ;;  %v5342_v3 = vunpack.c.l.bf16 %v5315_v56  ;;  %v5695_v56 = vld [vmem:[%s23334_s3 + $0x540] sm:$0xff] }
 0xc3c   :  { %16969 = vmatpush1.bf16.msra.mxu0 %v19134_v11  ;;  %v5163_v7 = vpop.f32.mrb[6].mxu1  ;;  %15586 = vmatprep.mubr.msk.f32.mxu0 %vm17944_vm0, %v23385_v19 }
 0xc3d   :  { %v5164_v62 = vadd.f32 %v20720_v37, %v5163_v7  ;;  %16970 = vmatprep.subr.bf16.mxu0 %v23384_v22  ;;  %v5165_v31 = vpop.f32.mrb[7].mxu1  ;;  %v5566_v7 = vld [vmem:[%s23335_s4 + $0xb8] sm:$0xff] }
 0xc3f   :  { %15587 = vmatmul.mubr.msk.f32.gmra.mrb[34].mxu0 %vm568_vm5, %v5164_v62  ;;  %v16980_v62 = vpack.c.bf16 %v5566_v7, %v5565_v55 }
 0xc40   :  { %16972 = vmatpush1.bf16.msra.mxu0 %v19136_v48  ;;  %v5168_v15 = vpop.f32.mrb[8].mxu1  ;;  %15589 = vmatprep.mubr.msk.f32.mxu0 %vm17944_vm0, %v23385_v19 }
 0xc41   :  { %v5169_v53 = vadd.f32 %v20722_v29, %v5168_v15  ;;  %16973 = vmatprep.subr.bf16.mxu0 %v23384_v22  ;;  %v5170_v37 = vpop.f32.mrb[9].mxu1  ;;  %v5318_v29 = vunpack.c.l.bf16 %v5303_v13  ;;  %16981 = vmatpush3.bf16.msra.mxu1 %v16980_v62  ;;  %v5699_v62 = vld [vmem:[%s23334_s3 + $0x560] sm:$0xff] }
 0xc42   :  { %17014 = vmatprep.subr.bf16.mxu1 %v23384_v22 }
 0xc43   :  { %15590 = vmatmul.mubr.msk.f32.gmra.mrb[36].mxu0 %vm568_vm5, %v5169_v53 }
 0xc44   :  { %16975 = vmatpush1.bf16.msra.mxu0 %v19139_v60  ;;  %13164 = vmatprep.mubr.msk.f32.mxu0 %vm1034_vm6, %v5319_v41 }
 0xc45   :  { %16976 = vmatprep.subr.bf16.mxu0 %v23384_v22 }
 0xc48   :  { %16978 = vmatpush1.bf16.msra.mxu0 %v19141_v16  ;;  %v14169_v31 = vpop.f32.mrb[10].mxu1 }
 0xc49   :  { %5497 = vmatprep.subr.mxu0 %v23385_v19  ;;  %v14170_v13 = vpop.f32.mrb[11].mxu1 }
 0xc4a   :  { %v20863_v15 = vadd.f32 %v14170_v13, %v14169_v31  ;;  %v5717_v31 = vunpack.c.l.bf16 %v5699_v62  ;;  %v5718_v13 = vunpack.c.h.bf16 %v5699_v62 }
 0xc4c   :  { %5498 = vmatpush1.msra.mxu0 %v19216_v42  ;;  %v14172_v41 = vpop.f32.mrb[12].mxu1 }
 0xc4d   :  { %5530 = vmatmul.mubr.f32.vlgmr.msra.gmra.mrb[38].mxu0 %v5318_v29  ;;  %16983 = vmatprep.subr.bf16.mxu0 %v19091_v23  ;;  %v14173_v53 = vpop.f32.mrb[13].mxu1 }
 0xc4e   :  { %16985 = vmatpush3.bf16.msra.mxu0 %v19093_v30  ;;  %13165 = vmatprep.mubr.msk.f32.mxu0 %vm1034_vm6, %v5323_v21  ;;  %v20865_v37 = vadd.f32 %v14173_v53, %v14172_v41  ;;  %v5701_v41 = vld [vmem:[%s23334_s3 + $0x570] sm:$0xff] }
 0xc4f   :  { %16987 = vmatprep.subr.bf16.mxu0 %v19095_v12  ;;  %v5721_v53 = vunpack.c.l.bf16 %v5701_v41 }
 0xc50   :  { %v14175_v28 = vpop.f32.mrb[14].mxu1 }
 0xc51   :  { %5535 = vmatmul.mubr.f32.gmra.mrb[40].mxu0 %v5322_v8  ;;  %v14176_v29 = vpop.f32.mrb[15].mxu1 }
 0xc52   :  { %16989 = vmatpush3.bf16.msra.mxu0 %v19097_v27  ;;  %13166 = vmatprep.mubr.msk.f32.mxu0 %vm1034_vm6, %v5327_v34  ;;  %v20867_v21 = vadd.f32 %v14176_v29, %v14175_v28  ;;  %v5722_v28 = vunpack.c.h.bf16 %v5701_v41  ;;  %v5703_v29 = vld [vmem:[%s23334_s3 + $0x580] sm:$0xff] }
 0xc53   :  { %16991 = vmatprep.subr.bf16.mxu0 %v19099_v44 }
 0xc54   :  { %v14178_v45 = vpop.f32.mrb[16].mxu1 }
 0xc55   :  { %5540 = vmatmul.mubr.f32.gmra.mrb[42].mxu0 %v5326_v57  ;;  %v14179_v8 = vpop.f32.mrb[17].mxu1 }
 0xc56   :  { %16993 = vmatpush3.bf16.msra.mxu0 %v19101_v20  ;;  %13167 = vmatprep.mubr.msk.f32.mxu0 %vm1034_vm6, %v5331_v59  ;;  %v20869_v34 = vadd.f32 %v14179_v8, %v14178_v45  ;;  %v5725_v45 = vunpack.c.l.bf16 %v5703_v29  ;;  %v5726_v8 = vunpack.c.h.bf16 %v5703_v29 }
 0xc57   :  { %16995 = vmatprep.subr.bf16.mxu0 %v19104_v32 }
 0xc58   :  { %v14181_v0 = vpop.f32.mrb[18].mxu1 }
 0xc59   :  { %5545 = vmatmul.mubr.f32.gmra.mrb[44].mxu0 %v5330_v63  ;;  %v14182_v57 = vpop.f32.mrb[19].mxu1 }
 0xc5a   :  { %16997 = vmatpush3.bf16.msra.mxu0 %v19106_v33  ;;  %13168 = vmatprep.mubr.msk.f32.mxu0 %vm1034_vm6, %v5335_v25  ;;  %v20871_v59 = vadd.f32 %v14182_v57, %v14181_v0  ;;  %v5705_v0 = vld [vmem:[%s23334_s3 + $0x590] sm:$0xff] }
 0xc5b   :  { %16999 = vmatprep.subr.bf16.mxu0 %v19108_v47  ;;  %v5729_v57 = vunpack.c.l.bf16 %v5705_v0 }
 0xc5c   :  { %v14184_v2 = vpop.f32.mrb[20].mxu1 }
 0xc5d   :  { %5550 = vmatmul.mubr.f32.gmra.mrb[46].mxu0 %v5334_v39  ;;  %v14185_v63 = vpop.f32.mrb[21].mxu1 }
 0xc5e   :  { %17001 = vmatpush3.bf16.msra.mxu0 %v19110_v5  ;;  %13169 = vmatprep.mubr.msk.f32.mxu0 %vm1034_vm6, %v5339_v49  ;;  %v20873_v25 = vadd.f32 %v14185_v63, %v14184_v2  ;;  %v5730_v2 = vunpack.c.h.bf16 %v5705_v0  ;;  %v5707_v63 = vld [vmem:[%s23334_s3 + $0x5a0] sm:$0xff] }
 0xc5f   :  { %17003 = vmatprep.subr.bf16.mxu0 %v19112_v17 }
 0xc60   :  { %v14187_v9 = vpop.f32.mrb[22].mxu1 }
 0xc61   :  { %5555 = vmatmul.mubr.f32.gmra.mrb[48].mxu0 %v5338_v61  ;;  %v14188_v39 = vpop.f32.mrb[23].mxu1  ;;  %v5709_v61 = vunpack.c.l.bf16 %v5695_v56 }
 0xc62   :  { %17005 = vmatpush3.bf16.msra.mxu0 %v19114_v4  ;;  %13170 = vmatprep.mubr.msk.f32.mxu0 %vm1034_vm6, %v5343_v40  ;;  %v20875_v49 = vadd.f32 %v14188_v39, %v14187_v9  ;;  %v5710_v40 = vunpack.c.h.bf16 %v5695_v56  ;;  %v5733_v9 = vunpack.c.l.bf16 %v5707_v63  ;;  %v5734_v39 = vunpack.c.h.bf16 %v5707_v63 }
 0xc63   :  { %17007 = vmatprep.subr.bf16.mxu0 %v19116_v14 }
 0xc65   :  { %5560 = vmatmul.mubr.f32.gmra.mrb[50].mxu0 %v5342_v3  ;;  %v5697_v3 = vld [vmem:[%s23334_s3 + $0x550] sm:$0xff] }
 0xc66   :  { %17009 = vmatpush3.bf16.msra.mxu0 %v19118_v51  ;;  %5822 = vmatprep.mubr.f32.mxu0 %v5710_v40  ;;  %v5714_v55 = vunpack.c.h.bf16 %v5697_v3  ;;  %v5713_v7 = vunpack.c.l.bf16 %v5697_v3 }
 0xc67   :  { %17011 = vmatprep.subr.bf16.mxu0 %v19121_v26 }
 0xc6a   :  { %17013 = vmatpush3.bf16.msra.mxu0 %v19123_v58 }
 0xc6b   :  { %17038 = vmatprep.subr.bf16.mxu0 %v23384_v22 }
 0xc6d   :  { %5823 = vmatmul.mubr.f32.vlgmr.msra.gmra.mrb[52].mxu0 %v5709_v61 }
 0xc6e   :  { %5827 = vmatprep.mubr.f32.mxu0 %v5714_v55 }
 0xc71   :  { %5828 = vmatmul.mubr.f32.gmra.mrb[54].mxu0 %v5713_v7 }
 0xc72   :  { %5832 = vmatprep.mubr.f32.mxu0 %v5718_v13 }
 0xc75   :  { %5833 = vmatmul.mubr.f32.gmra.mrb[56].mxu0 %v5717_v31 }
 0xc76   :  { %5837 = vmatprep.mubr.f32.mxu0 %v5722_v28 }
 0xc79   :  { %5838 = vmatmul.mubr.f32.gmra.mrb[58].mxu0 %v5721_v53 }
 0xc7a   :  { %5842 = vmatprep.mubr.f32.mxu0 %v5726_v8 }
 0xc7d   :  { %5843 = vmatmul.mubr.f32.gmra.mrb[60].mxu0 %v5725_v45 }
 0xc7e   :  { %5847 = vmatprep.mubr.f32.mxu0 %v5730_v2 }
 0xc81   :  { %5848 = vmatmul.mubr.f32.gmra.mrb[62].mxu0 %v5729_v57 }
 0xc82   :  { %5852 = vmatprep.mubr.f32.mxu0 %v5734_v39 }
 0xc85   :  { %5853 = vmatmul.mubr.f32.gmra.mrb[64].mxu0 %v5733_v9 }
 0xc86   :  { %15621 = vmatprep.mubr.msk.f32.mxu0 %vm17944_vm0, %v23385_v19 }
 0xcfe   :  { %v5261_v56 = vpop.f32.mrb[24].mxu0 }
 0xcff   :  { %v20901_v61 = vadd.f32 %v5261_v56, %v20748_v52  ;;  %v15573_v40 = vpop.f32.mrb[25].mxu0 }
 0xd02   :  { %v5266_v3 = vpop.f32.mrb[26].mxu0 }
 0xd03   :  { %v20904_v55 = vadd.f32 %v5266_v3, %v20751_v24  ;;  %v15576_v7 = vpop.f32.mrb[27].mxu0 }
 0xd06   :  { %v5271_v62 = vpop.f32.mrb[28].mxu0 }
 0xd07   :  { %v20907_v31 = vadd.f32 %v5271_v62, %v20754_v1  ;;  %v15579_v13 = vpop.f32.mrb[29].mxu0 }
 0xd0a   :  { %v5276_v41 = vpop.f32.mrb[30].mxu0 }
 0xd0b   :  { %v20910_v53 = vadd.f32 %v5276_v41, %v20757_v50  ;;  %v15582_v28 = vpop.f32.mrb[31].mxu0 }
 0xd0e   :  { %v5281_v29 = vpop.f32.mrb[32].mxu0 }
 0xd0f   :  { %v20913_v52 = vadd.f32 %v5281_v29, %v20760_v35  ;;  %v15585_v45 = vpop.f32.mrb[33].mxu0 }
 0xd12   :  { %v5286_v8 = vpop.f32.mrb[34].mxu0 }
 0xd13   :  { %v20916_v24 = vadd.f32 %v5286_v8, %v20763_v6  ;;  %v15588_v0 = vpop.f32.mrb[35].mxu0  ;;  %v5698_v8 = vld [vmem:[%s23334_s3 + $0x558] sm:$0xff] }
 0xd14   :  { %v5716_v0 = vunpack.c.h.bf16 %v5698_v8 }
 0xd16   :  { %v5291_v57 = vpop.f32.mrb[36].mxu0 }
 0xd17   :  { %v20919_v1 = vadd.f32 %v5291_v57, %v20766_v54  ;;  %v15591_v2 = vpop.f32.mrb[37].mxu0  ;;  %v5700_v57 = vld [vmem:[%s23334_s3 + $0x568] sm:$0xff] }
 0xd18   :  { %v5715_v2 = vunpack.c.l.bf16 %v5698_v8 }
 0xd20   :  { %v5531_v63 = vpop.f32.mrb[38].mxu0 }
 0xd21   :  { %v5532_v50 = vadd.f32 %v20863_v15, %v5531_v63  ;;  %v5533_v9 = vpop.f32.mrb[39].mxu0  ;;  %v5720_v63 = vunpack.c.h.bf16 %v5700_v57 }
 0xd22   :  { %v5719_v9 = vunpack.c.l.bf16 %v5700_v57 }
 0xd23   :  { %15597 = vmatmul.mubr.msk.f32.vlgmr.msra.gmra.mrb[24].mxu1 %vm568_vm5, %v5532_v50  ;;  %v5702_v50 = vld [vmem:[%s23334_s3 + $0x578] sm:$0xff] }
 0xd24   :  { %17016 = vmatpush1.bf16.msra.mxu1 %v19125_v18  ;;  %v5536_v35 = vpop.f32.mrb[40].mxu0  ;;  %15599 = vmatprep.mubr.msk.f32.mxu1 %vm17944_vm0, %v23385_v19 }
 0xd25   :  { %v5537_v6 = vadd.f32 %v20865_v37, %v5536_v35  ;;  %17017 = vmatprep.subr.bf16.mxu1 %v23384_v22  ;;  %v5538_v39 = vpop.f32.mrb[41].mxu0  ;;  %v5724_v35 = vunpack.c.h.bf16 %v5702_v50 }
 0xd26   :  { %v5723_v39 = vunpack.c.l.bf16 %v5702_v50 }
 0xd27   :  { %15600 = vmatmul.mubr.msk.f32.gmra.mrb[26].mxu1 %vm568_vm5, %v5537_v6  ;;  %v5704_v6 = vld [vmem:[%s23334_s3 + $0x588] sm:$0xff] }
 0xd28   :  { %17019 = vmatpush1.bf16.msra.mxu1 %v19127_v38  ;;  %v5541_v54 = vpop.f32.mrb[42].mxu0  ;;  %15602 = vmatprep.mubr.msk.f32.mxu1 %vm17944_vm0, %v23385_v19 }
 0xd29   :  { %v5542_v15 = vadd.f32 %v20867_v21, %v5541_v54  ;;  %17020 = vmatprep.subr.bf16.mxu1 %v23384_v22  ;;  %v5543_v56 = vpop.f32.mrb[43].mxu0  ;;  %v5728_v54 = vunpack.c.h.bf16 %v5704_v6 }
 0xd2a   :  { %v5727_v56 = vunpack.c.l.bf16 %v5704_v6 }
 0xd2b   :  { %15603 = vmatmul.mubr.msk.f32.gmra.mrb[28].mxu1 %vm568_vm5, %v5542_v15  ;;  %v5706_v15 = vld [vmem:[%s23334_s3 + $0x598] sm:$0xff] }
 0xd2c   :  { %17022 = vmatpush1.bf16.msra.mxu1 %v19130_v10  ;;  %v5546_v37 = vpop.f32.mrb[44].mxu0  ;;  %15605 = vmatprep.mubr.msk.f32.mxu1 %vm17944_vm0, %v23385_v19 }
 0xd2d   :  { %v5547_v40 = vadd.f32 %v20869_v34, %v5546_v37  ;;  %17023 = vmatprep.subr.bf16.mxu1 %v23384_v22  ;;  %v5548_v3 = vpop.f32.mrb[45].mxu0  ;;  %v5732_v37 = vunpack.c.h.bf16 %v5706_v15 }
 0xd2e   :  { %v5731_v3 = vunpack.c.l.bf16 %v5706_v15 }
 0xd2f   :  { %15606 = vmatmul.mubr.msk.f32.gmra.mrb[30].mxu1 %vm568_vm5, %v5547_v40  ;;  %v5708_v40 = vld [vmem:[%s23334_s3 + $0x5a8] sm:$0xff] }
 0xd30   :  { %17025 = vmatpush1.bf16.msra.mxu1 %v19132_v36  ;;  %v5551_v21 = vpop.f32.mrb[46].mxu0  ;;  %15608 = vmatprep.mubr.msk.f32.mxu1 %vm17944_vm0, %v23385_v19 }
 0xd31   :  { %v5552_v7 = vadd.f32 %v20871_v59, %v5551_v21  ;;  %17026 = vmatprep.subr.bf16.mxu1 %v23384_v22  ;;  %v5553_v62 = vpop.f32.mrb[47].mxu0  ;;  %v5696_v59 = vld [vmem:[%s23334_s3 + $0x548] sm:$0xff]  ;;  %v5736_v21 = vunpack.c.h.bf16 %v5708_v40 }
 0xd32   :  { %v5712_v29 = vunpack.c.h.bf16 %v5696_v59  ;;  %v5958_v62 = vld [vmem:[%s23335_s4 + $0xc0] sm:$0xff] }
 0xd33   :  { %15609 = vmatmul.mubr.msk.f32.gmra.mrb[32].mxu1 %vm568_vm5, %v5552_v7  ;;  %v5735_v7 = vunpack.c.l.bf16 %v5708_v40  ;;  %v6088_v40 = vld [vmem:[%s23334_s3 + $0x5b0] sm:$0xff] }
 0xd34   :  { %17028 = vmatpush1.bf16.msra.mxu1 %v19134_v11  ;;  %v5556_v34 = vpop.f32.mrb[48].mxu0  ;;  %15611 = vmatprep.mubr.msk.f32.mxu1 %vm17944_vm0, %v23385_v19 }
 0xd35   :  { %v5557_v13 = vadd.f32 %v20873_v25, %v5556_v34  ;;  %17029 = vmatprep.subr.bf16.mxu1 %v23384_v22  ;;  %v5558_v41 = vpop.f32.mrb[49].mxu0  ;;  %v5959_v34 = vld [vmem:[%s23335_s4 + $0xc8] sm:$0xff] }
 0xd37   :  { %15612 = vmatmul.mubr.msk.f32.gmra.mrb[34].mxu1 %vm568_vm5, %v5557_v13  ;;  %v17039_v13 = vpack.c.bf16 %v5959_v34, %v5958_v62 }
 0xd38   :  { %17031 = vmatpush1.bf16.msra.mxu1 %v19136_v48  ;;  %v5561_v28 = vpop.f32.mrb[50].mxu0  ;;  %15614 = vmatprep.mubr.msk.f32.mxu1 %vm17944_vm0, %v23385_v19 }
 0xd39   :  { %v5562_v45 = vadd.f32 %v20875_v49, %v5561_v28  ;;  %17032 = vmatprep.subr.bf16.mxu1 %v23384_v22  ;;  %v5563_v25 = vpop.f32.mrb[51].mxu0  ;;  %v5711_v49 = vunpack.c.l.bf16 %v5696_v59  ;;  %17040 = vmatpush3.bf16.msra.mxu0 %v17039_v13  ;;  %v6092_v13 = vld [vmem:[%s23334_s3 + $0x5d0] sm:$0xff] }
 0xd3a   :  { %17073 = vmatprep.subr.bf16.mxu0 %v23384_v22 }
 0xd3b   :  { %15615 = vmatmul.mubr.msk.f32.gmra.mrb[36].mxu1 %vm568_vm5, %v5562_v45 }
 0xd3c   :  { %17034 = vmatpush1.bf16.msra.mxu1 %v19139_v60  ;;  %13178 = vmatprep.mubr.msk.f32.mxu1 %vm1034_vm6, %v5712_v29 }
 0xd3d   :  { %17035 = vmatprep.subr.bf16.mxu1 %v23384_v22 }
 0xd40   :  { %17037 = vmatpush1.bf16.msra.mxu1 %v19141_v16  ;;  %v14231_v41 = vpop.f32.mrb[52].mxu0 }
 0xd41   :  { %5890 = vmatprep.subr.mxu1 %v23385_v19  ;;  %v14232_v59 = vpop.f32.mrb[53].mxu0 }
 0xd42   :  { %v21016_v28 = vadd.f32 %v14232_v59, %v14231_v41  ;;  %v6110_v41 = vunpack.c.l.bf16 %v6092_v13  ;;  %v6111_v59 = vunpack.c.h.bf16 %v6092_v13 }
 0xd44   :  { %5891 = vmatpush1.msra.mxu1 %v19216_v42  ;;  %v14234_v29 = vpop.f32.mrb[54].mxu0 }
 0xd45   :  { %5923 = vmatmul.mubr.f32.vlgmr.msra.gmra.mrb[38].mxu1 %v5711_v49  ;;  %17042 = vmatprep.subr.bf16.mxu1 %v19091_v23  ;;  %v14235_v45 = vpop.f32.mrb[55].mxu0 }
 0xd46   :  { %17044 = vmatpush3.bf16.msra.mxu1 %v19093_v30  ;;  %13179 = vmatprep.mubr.msk.f32.mxu1 %vm1034_vm6, %v5716_v0  ;;  %v21018_v25 = vadd.f32 %v14235_v45, %v14234_v29  ;;  %v6094_v29 = vld [vmem:[%s23334_s3 + $0x5e0] sm:$0xff] }
 0xd47   :  { %17046 = vmatprep.subr.bf16.mxu1 %v19095_v12  ;;  %v6114_v45 = vunpack.c.l.bf16 %v6094_v29 }
 0xd48   :  { %v14237_v8 = vpop.f32.mrb[56].mxu0 }
 0xd49   :  { %5928 = vmatmul.mubr.f32.gmra.mrb[40].mxu1 %v5715_v2  ;;  %v14238_v49 = vpop.f32.mrb[57].mxu0 }
 0xd4a   :  { %17048 = vmatpush3.bf16.msra.mxu1 %v19097_v27  ;;  %13180 = vmatprep.mubr.msk.f32.mxu1 %vm1034_vm6, %v5720_v63  ;;  %v21020_v0 = vadd.f32 %v14238_v49, %v14237_v8  ;;  %v6115_v8 = vunpack.c.h.bf16 %v6094_v29  ;;  %v6096_v49 = vld [vmem:[%s23334_s3 + $0x5f0] sm:$0xff] }
 0xd4b   :  { %17050 = vmatprep.subr.bf16.mxu1 %v19099_v44 }
 0xd4c   :  { %v14240_v57 = vpop.f32.mrb[58].mxu0 }
 0xd4d   :  { %5933 = vmatmul.mubr.f32.gmra.mrb[42].mxu1 %v5719_v9  ;;  %v14241_v2 = vpop.f32.mrb[59].mxu0 }
 0xd4e   :  { %17052 = vmatpush3.bf16.msra.mxu1 %v19101_v20  ;;  %13181 = vmatprep.mubr.msk.f32.mxu1 %vm1034_vm6, %v5724_v35  ;;  %v21022_v63 = vadd.f32 %v14241_v2, %v14240_v57  ;;  %v6118_v57 = vunpack.c.l.bf16 %v6096_v49  ;;  %v6119_v2 = vunpack.c.h.bf16 %v6096_v49 }
 0xd4f   :  { %17054 = vmatprep.subr.bf16.mxu1 %v19104_v32 }
 0xd50   :  { %v14243_v50 = vpop.f32.mrb[60].mxu0 }
 0xd51   :  { %5938 = vmatmul.mubr.f32.gmra.mrb[44].mxu1 %v5723_v39  ;;  %v14244_v9 = vpop.f32.mrb[61].mxu0 }
 0xd52   :  { %17056 = vmatpush3.bf16.msra.mxu1 %v19106_v33  ;;  %13182 = vmatprep.mubr.msk.f32.mxu1 %vm1034_vm6, %v5728_v54  ;;  %v21024_v35 = vadd.f32 %v14244_v9, %v14243_v50  ;;  %v6098_v50 = vld [vmem:[%s23334_s3 + $0x600] sm:$0xff] }
 0xd53   :  { %17058 = vmatprep.subr.bf16.mxu1 %v19108_v47  ;;  %v6122_v9 = vunpack.c.l.bf16 %v6098_v50 }
 0xd54   :  { %v14246_v6 = vpop.f32.mrb[62].mxu0 }
 0xd55   :  { %5943 = vmatmul.mubr.f32.gmra.mrb[46].mxu1 %v5727_v56  ;;  %v14247_v39 = vpop.f32.mrb[63].mxu0 }
 0xd56   :  { %17060 = vmatpush3.bf16.msra.mxu1 %v19110_v5  ;;  %13183 = vmatprep.mubr.msk.f32.mxu1 %vm1034_vm6, %v5732_v37  ;;  %v21026_v54 = vadd.f32 %v14247_v39, %v14246_v6  ;;  %v6123_v6 = vunpack.c.h.bf16 %v6098_v50  ;;  %v6100_v39 = vld [vmem:[%s23334_s3 + $0x610] sm:$0xff] }
 0xd57   :  { %17062 = vmatprep.subr.bf16.mxu1 %v19112_v17 }
 0xd58   :  { %v14249_v15 = vpop.f32.mrb[64].mxu0 }
 0xd59   :  { %5948 = vmatmul.mubr.f32.gmra.mrb[48].mxu1 %v5731_v3  ;;  %v14250_v56 = vpop.f32.mrb[65].mxu0  ;;  %v6102_v3 = vunpack.c.l.bf16 %v6088_v40 }
 0xd5a   :  { %17064 = vmatpush3.bf16.msra.mxu1 %v19114_v4  ;;  %13184 = vmatprep.mubr.msk.f32.mxu1 %vm1034_vm6, %v5736_v21  ;;  %v21028_v37 = vadd.f32 %v14250_v56, %v14249_v15  ;;  %v6103_v21 = vunpack.c.h.bf16 %v6088_v40  ;;  %v6126_v15 = vunpack.c.l.bf16 %v6100_v39  ;;  %v6127_v56 = vunpack.c.h.bf16 %v6100_v39 }
 0xd5b   :  { %17066 = vmatprep.subr.bf16.mxu1 %v19116_v14 }
 0xd5d   :  { %5953 = vmatmul.mubr.f32.gmra.mrb[50].mxu1 %v5735_v7  ;;  %v6090_v7 = vld [vmem:[%s23334_s3 + $0x5c0] sm:$0xff] }
 0xd5e   :  { %17068 = vmatpush3.bf16.msra.mxu1 %v19118_v51  ;;  %6215 = vmatprep.mubr.f32.mxu1 %v6103_v21  ;;  %v6107_v62 = vunpack.c.h.bf16 %v6090_v7  ;;  %v6106_v34 = vunpack.c.l.bf16 %v6090_v7 }
 0xd5f   :  { %17070 = vmatprep.subr.bf16.mxu1 %v19121_v26 }
 0xd62   :  { %17072 = vmatpush3.bf16.msra.mxu1 %v19123_v58 }
 0xd63   :  { %17097 = vmatprep.subr.bf16.mxu1 %v23384_v22 }
 0xd65   :  { %6216 = vmatmul.mubr.f32.vlgmr.msra.gmra.mrb[52].mxu1 %v6102_v3 }
 0xd66   :  { %6220 = vmatprep.mubr.f32.mxu1 %v6107_v62 }
 0xd69   :  { %6221 = vmatmul.mubr.f32.gmra.mrb[54].mxu1 %v6106_v34 }
 0xd6a   :  { %6225 = vmatprep.mubr.f32.mxu1 %v6111_v59 }
 0xd6d   :  { %6226 = vmatmul.mubr.f32.gmra.mrb[56].mxu1 %v6110_v41 }
 0xd6e   :  { %6230 = vmatprep.mubr.f32.mxu1 %v6115_v8 }
 0xd71   :  { %6231 = vmatmul.mubr.f32.gmra.mrb[58].mxu1 %v6114_v45 }
 0xd72   :  { %6235 = vmatprep.mubr.f32.mxu1 %v6119_v2 }
 0xd75   :  { %6236 = vmatmul.mubr.f32.gmra.mrb[60].mxu1 %v6118_v57 }
 0xd76   :  { %6240 = vmatprep.mubr.f32.mxu1 %v6123_v6 }
 0xd79   :  { %6241 = vmatmul.mubr.f32.gmra.mrb[62].mxu1 %v6122_v9 }
 0xd7a   :  { %6245 = vmatprep.mubr.f32.mxu1 %v6127_v56 }
 0xd7d   :  { %6246 = vmatmul.mubr.f32.gmra.mrb[64].mxu1 %v6126_v15 }
 0xd7e   :  { %15646 = vmatprep.mubr.msk.f32.mxu1 %vm17944_vm0, %v23385_v19 }
 0xdf6   :  { %v5654_v40 = vpop.f32.mrb[24].mxu1 }
 0xdf7   :  { %v21054_v3 = vadd.f32 %v5654_v40, %v20901_v61  ;;  %v15598_v21 = vpop.f32.mrb[25].mxu1 }
 0xdfa   :  { %v5659_v7 = vpop.f32.mrb[26].mxu1 }
 0xdfb   :  { %v21057_v62 = vadd.f32 %v5659_v7, %v20904_v55  ;;  %v15601_v34 = vpop.f32.mrb[27].mxu1 }
 0xdfe   :  { %v5664_v13 = vpop.f32.mrb[28].mxu1 }
 0xdff   :  { %v21060_v41 = vadd.f32 %v5664_v13, %v20907_v31  ;;  %v15604_v59 = vpop.f32.mrb[29].mxu1 }
 0xe02   :  { %v5669_v29 = vpop.f32.mrb[30].mxu1 }
 0xe03   :  { %v21063_v45 = vadd.f32 %v5669_v29, %v20910_v53  ;;  %v15607_v8 = vpop.f32.mrb[31].mxu1 }
 0xe06   :  { %v5674_v49 = vpop.f32.mrb[32].mxu1 }
 0xe07   :  { %v21066_v61 = vadd.f32 %v5674_v49, %v20913_v52  ;;  %v15610_v57 = vpop.f32.mrb[33].mxu1 }
 0xe0a   :  { %v5679_v2 = vpop.f32.mrb[34].mxu1 }
 0xe0b   :  { %v21069_v55 = vadd.f32 %v5679_v2, %v20916_v24  ;;  %v15613_v50 = vpop.f32.mrb[35].mxu1  ;;  %v6091_v2 = vld [vmem:[%s23334_s3 + $0x5c8] sm:$0xff] }
 0xe0c   :  { %v6109_v50 = vunpack.c.h.bf16 %v6091_v2 }
 0xe0e   :  { %v5684_v9 = vpop.f32.mrb[36].mxu1 }
 0xe0f   :  { %v21072_v31 = vadd.f32 %v5684_v9, %v20919_v1  ;;  %v15616_v6 = vpop.f32.mrb[37].mxu1  ;;  %v6093_v9 = vld [vmem:[%s23334_s3 + $0x5d8] sm:$0xff] }
 0xe10   :  { %v6108_v6 = vunpack.c.l.bf16 %v6091_v2 }
 0xe18   :  { %v5924_v39 = vpop.f32.mrb[38].mxu1 }
 0xe19   :  { %v5925_v53 = vadd.f32 %v21016_v28, %v5924_v39  ;;  %v5926_v15 = vpop.f32.mrb[39].mxu1  ;;  %v6113_v39 = vunpack.c.h.bf16 %v6093_v9 }
 0xe1a   :  { %v6112_v15 = vunpack.c.l.bf16 %v6093_v9 }
 0xe1b   :  { %15622 = vmatmul.mubr.msk.f32.vlgmr.msra.gmra.mrb[66].mxu0 %vm568_vm5, %v5925_v53  ;;  %v6095_v53 = vld [vmem:[%s23334_s3 + $0x5e8] sm:$0xff] }
 0xe1c   :  { %17075 = vmatpush1.bf16.msra.mxu0 %v19125_v18  ;;  %v5929_v52 = vpop.f32.mrb[40].mxu1  ;;  %15624 = vmatprep.mubr.msk.f32.mxu0 %vm17944_vm0, %v23385_v19 }
 0xe1d   :  { %v5930_v24 = vadd.f32 %v21018_v25, %v5929_v52  ;;  %17076 = vmatprep.subr.bf16.mxu0 %v23384_v22  ;;  %v5931_v56 = vpop.f32.mrb[41].mxu1  ;;  %v6117_v52 = vunpack.c.h.bf16 %v6095_v53 }
 0xe1e   :  { %v6116_v56 = vunpack.c.l.bf16 %v6095_v53 }
 0xe1f   :  { %15625 = vmatmul.mubr.msk.f32.gmra.mrb[68].mxu0 %vm568_vm5, %v5930_v24  ;;  %v6097_v24 = vld [vmem:[%s23334_s3 + $0x5f8] sm:$0xff] }
 0xe20   :  { %17078 = vmatpush1.bf16.msra.mxu0 %v19127_v38  ;;  %v5934_v1 = vpop.f32.mrb[42].mxu1  ;;  %15627 = vmatprep.mubr.msk.f32.mxu0 %vm17944_vm0, %v23385_v19 }
 0xe21   :  { %v5935_v28 = vadd.f32 %v21020_v0, %v5934_v1  ;;  %17079 = vmatprep.subr.bf16.mxu0 %v23384_v22  ;;  %v5936_v40 = vpop.f32.mrb[43].mxu1  ;;  %v6121_v1 = vunpack.c.h.bf16 %v6097_v24 }
 0xe22   :  { %v6120_v40 = vunpack.c.l.bf16 %v6097_v24 }
 0xe23   :  { %15628 = vmatmul.mubr.msk.f32.gmra.mrb[70].mxu0 %vm568_vm5, %v5935_v28  ;;  %v6099_v28 = vld [vmem:[%s23334_s3 + $0x608] sm:$0xff] }
 0xe24   :  { %17081 = vmatpush1.bf16.msra.mxu0 %v19130_v10  ;;  %v5939_v25 = vpop.f32.mrb[44].mxu1  ;;  %15630 = vmatprep.mubr.msk.f32.mxu0 %vm17944_vm0, %v23385_v19 }
 0xe25   :  { %v5940_v21 = vadd.f32 %v21022_v63, %v5939_v25  ;;  %17082 = vmatprep.subr.bf16.mxu0 %v23384_v22  ;;  %v5941_v7 = vpop.f32.mrb[45].mxu1  ;;  %v6125_v25 = vunpack.c.h.bf16 %v6099_v28 }
 0xe26   :  { %v6124_v7 = vunpack.c.l.bf16 %v6099_v28 }
 0xe27   :  { %15631 = vmatmul.mubr.msk.f32.gmra.mrb[72].mxu0 %vm568_vm5, %v5940_v21  ;;  %v6101_v21 = vld [vmem:[%s23334_s3 + $0x618] sm:$0xff] }
 0xe28   :  { %17084 = vmatpush1.bf16.msra.mxu0 %v19132_v36  ;;  %v5944_v0 = vpop.f32.mrb[46].mxu1  ;;  %15633 = vmatprep.mubr.msk.f32.mxu0 %vm17944_vm0, %v23385_v19 }
 0xe29   :  { %v5945_v34 = vadd.f32 %v21024_v35, %v5944_v0  ;;  %17085 = vmatprep.subr.bf16.mxu0 %v23384_v22  ;;  %v5946_v13 = vpop.f32.mrb[47].mxu1  ;;  %v6089_v35 = vld [vmem:[%s23334_s3 + $0x5b8] sm:$0xff]  ;;  %v6129_v0 = vunpack.c.h.bf16 %v6101_v21 }
 0xe2a   :  { %v6105_v49 = vunpack.c.h.bf16 %v6089_v35  ;;  %v6351_v13 = vld [vmem:[%s23335_s4 + $0xd0] sm:$0xff] }
 0xe2b   :  { %15634 = vmatmul.mubr.msk.f32.gmra.mrb[74].mxu0 %vm568_vm5, %v5945_v34  ;;  %v6128_v34 = vunpack.c.l.bf16 %v6101_v21  ;;  %v6481_v21 = vld [vmem:[%s23334_s3 + $0x620] sm:$0xff] }
 0xe2c   :  { %17087 = vmatpush1.bf16.msra.mxu0 %v19134_v11  ;;  %v5949_v63 = vpop.f32.mrb[48].mxu1  ;;  %15636 = vmatprep.mubr.msk.f32.mxu0 %vm17944_vm0, %v23385_v19 }
 0xe2d   :  { %v5950_v59 = vadd.f32 %v21026_v54, %v5949_v63  ;;  %17088 = vmatprep.subr.bf16.mxu0 %v23384_v22  ;;  %v5951_v29 = vpop.f32.mrb[49].mxu1  ;;  %v6352_v63 = vld [vmem:[%s23335_s4 + $0xd8] sm:$0xff] }
 0xe2f   :  { %15637 = vmatmul.mubr.msk.f32.gmra.mrb[76].mxu0 %vm568_vm5, %v5950_v59  ;;  %v17098_v59 = vpack.c.bf16 %v6352_v63, %v6351_v13 }
 0xe30   :  { %17090 = vmatpush1.bf16.msra.mxu0 %v19136_v48  ;;  %v5954_v8 = vpop.f32.mrb[50].mxu1  ;;  %15639 = vmatprep.mubr.msk.f32.mxu0 %vm17944_vm0, %v23385_v19 }
 0xe31   :  { %v5955_v57 = vadd.f32 %v21028_v37, %v5954_v8  ;;  %17091 = vmatprep.subr.bf16.mxu0 %v23384_v22  ;;  %v5956_v54 = vpop.f32.mrb[51].mxu1  ;;  %v6104_v37 = vunpack.c.l.bf16 %v6089_v35  ;;  %17099 = vmatpush3.bf16.msra.mxu1 %v17098_v59  ;;  %v6485_v59 = vld [vmem:[%s23334_s3 + $0x640] sm:$0xff] }
 0xe32   :  { %17132 = vmatprep.subr.bf16.mxu1 %v23384_v22 }
 0xe33   :  { %15640 = vmatmul.mubr.msk.f32.gmra.mrb[78].mxu0 %vm568_vm5, %v5955_v57 }
 0xe34   :  { %17093 = vmatpush1.bf16.msra.mxu0 %v19139_v60  ;;  %13192 = vmatprep.mubr.msk.f32.mxu0 %vm1034_vm6, %v6105_v49 }
 0xe35   :  { %17094 = vmatprep.subr.bf16.mxu0 %v23384_v22 }
 0xe38   :  { %17096 = vmatpush1.bf16.msra.mxu0 %v19141_v16  ;;  %v14293_v29 = vpop.f32.mrb[52].mxu1 }
 0xe39   :  { %6283 = vmatprep.subr.mxu0 %v23385_v19  ;;  %v14294_v35 = vpop.f32.mrb[53].mxu1 }
 0xe3a   :  { %v21169_v8 = vadd.f32 %v14294_v35, %v14293_v29  ;;  %v6503_v29 = vunpack.c.l.bf16 %v6485_v59  ;;  %v6504_v35 = vunpack.c.h.bf16 %v6485_v59 }
 0xe3c   :  { %6284 = vmatpush1.msra.mxu0 %v19216_v42  ;;  %v14296_v49 = vpop.f32.mrb[54].mxu1 }
 0xe3d   :  { %6316 = vmatmul.mubr.f32.vlgmr.msra.gmra.mrb[80].mxu0 %v6104_v37  ;;  %17101 = vmatprep.subr.bf16.mxu0 %v19091_v23  ;;  %v14297_v57 = vpop.f32.mrb[55].mxu1 }
 0xe3e   :  { %17103 = vmatpush3.bf16.msra.mxu0 %v19093_v30  ;;  %13193 = vmatprep.mubr.msk.f32.mxu0 %vm1034_vm6, %v6109_v50  ;;  %v21171_v54 = vadd.f32 %v14297_v57, %v14296_v49  ;;  %v6487_v49 = vld [vmem:[%s23334_s3 + $0x650] sm:$0xff] }
 0xe3f   :  { %17105 = vmatprep.subr.bf16.mxu0 %v19095_v12  ;;  %v6507_v57 = vunpack.c.l.bf16 %v6487_v49 }
 0xe40   :  { %v14299_v2 = vpop.f32.mrb[56].mxu1 }
 0xe41   :  { %6321 = vmatmul.mubr.f32.gmra.mrb[82].mxu0 %v6108_v6  ;;  %v14300_v37 = vpop.f32.mrb[57].mxu1 }
 0xe42   :  { %17107 = vmatpush3.bf16.msra.mxu0 %v19097_v27  ;;  %13194 = vmatprep.mubr.msk.f32.mxu0 %vm1034_vm6, %v6113_v39  ;;  %v21173_v50 = vadd.f32 %v14300_v37, %v14299_v2  ;;  %v6508_v2 = vunpack.c.h.bf16 %v6487_v49  ;;  %v6489_v37 = vld [vmem:[%s23334_s3 + $0x660] sm:$0xff] }
 0xe43   :  { %17109 = vmatprep.subr.bf16.mxu0 %v19099_v44 }
 0xe44   :  { %v14302_v9 = vpop.f32.mrb[58].mxu1 }
 0xe45   :  { %6326 = vmatmul.mubr.f32.gmra.mrb[84].mxu0 %v6112_v15  ;;  %v14303_v6 = vpop.f32.mrb[59].mxu1 }
 0xe46   :  { %17111 = vmatpush3.bf16.msra.mxu0 %v19101_v20  ;;  %13195 = vmatprep.mubr.msk.f32.mxu0 %vm1034_vm6, %v6117_v52  ;;  %v21175_v39 = vadd.f32 %v14303_v6, %v14302_v9  ;;  %v6511_v9 = vunpack.c.l.bf16 %v6489_v37  ;;  %v6512_v6 = vunpack.c.h.bf16 %v6489_v37 }
 0xe47   :  { %17113 = vmatprep.subr.bf16.mxu0 %v19104_v32 }
 0xe48   :  { %v14305_v53 = vpop.f32.mrb[60].mxu1 }
 0xe49   :  { %6331 = vmatmul.mubr.f32.gmra.mrb[86].mxu0 %v6116_v56  ;;  %v14306_v15 = vpop.f32.mrb[61].mxu1 }
 0xe4a   :  { %17115 = vmatpush3.bf16.msra.mxu0 %v19106_v33  ;;  %13196 = vmatprep.mubr.msk.f32.mxu0 %vm1034_vm6, %v6121_v1  ;;  %v21177_v52 = vadd.f32 %v14306_v15, %v14305_v53  ;;  %v6491_v53 = vld [vmem:[%s23334_s3 + $0x670] sm:$0xff] }
 0xe4b   :  { %17117 = vmatprep.subr.bf16.mxu0 %v19108_v47  ;;  %v6515_v15 = vunpack.c.l.bf16 %v6491_v53 }
 0xe4c   :  { %v14308_v24 = vpop.f32.mrb[62].mxu1 }
 0xe4d   :  { %6336 = vmatmul.mubr.f32.gmra.mrb[88].mxu0 %v6120_v40  ;;  %v14309_v56 = vpop.f32.mrb[63].mxu1 }
 0xe4e   :  { %17119 = vmatpush3.bf16.msra.mxu0 %v19110_v5  ;;  %13197 = vmatprep.mubr.msk.f32.mxu0 %vm1034_vm6, %v6125_v25  ;;  %v21179_v1 = vadd.f32 %v14309_v56, %v14308_v24  ;;  %v6516_v24 = vunpack.c.h.bf16 %v6491_v53  ;;  %v6493_v56 = vld [vmem:[%s23334_s3 + $0x680] sm:$0xff] }
 0xe4f   :  { %17121 = vmatprep.subr.bf16.mxu0 %v19112_v17 }
 0xe50   :  { %v14311_v28 = vpop.f32.mrb[64].mxu1 }
 0xe51   :  { %6341 = vmatmul.mubr.f32.gmra.mrb[90].mxu0 %v6124_v7  ;;  %v14312_v40 = vpop.f32.mrb[65].mxu1  ;;  %v6495_v7 = vunpack.c.l.bf16 %v6481_v21 }
 0xe52   :  { %17123 = vmatpush3.bf16.msra.mxu0 %v19114_v4  ;;  %13198 = vmatprep.mubr.msk.f32.mxu0 %vm1034_vm6, %v6129_v0  ;;  %v21181_v25 = vadd.f32 %v14312_v40, %v14311_v28  ;;  %v6496_v0 = vunpack.c.h.bf16 %v6481_v21  ;;  %v6519_v28 = vunpack.c.l.bf16 %v6493_v56  ;;  %v6520_v40 = vunpack.c.h.bf16 %v6493_v56 }
 0xe53   :  { %17125 = vmatprep.subr.bf16.mxu0 %v19116_v14 }
 0xe55   :  { %6346 = vmatmul.mubr.f32.gmra.mrb[92].mxu0 %v6128_v34  ;;  %v6483_v34 = vld [vmem:[%s23334_s3 + $0x630] sm:$0xff] }
 0xe56   :  { %17127 = vmatpush3.bf16.msra.mxu0 %v19118_v51  ;;  %6608 = vmatprep.mubr.f32.mxu0 %v6496_v0  ;;  %v6500_v13 = vunpack.c.h.bf16 %v6483_v34  ;;  %v6499_v63 = vunpack.c.l.bf16 %v6483_v34 }
 0xe57   :  { %17129 = vmatprep.subr.bf16.mxu0 %v19121_v26 }
 0xe5a   :  { %17131 = vmatpush3.bf16.msra.mxu0 %v19123_v58 }
 0xe5b   :  { %17156 = vmatprep.subr.bf16.mxu0 %v23384_v22 }
 0xe5d   :  { %6609 = vmatmul.mubr.f32.vlgmr.msra.gmra.mrb[94].mxu0 %v6495_v7 }
 0xe5e   :  { %6613 = vmatprep.mubr.f32.mxu0 %v6500_v13 }
 0xe61   :  { %6614 = vmatmul.mubr.f32.gmra.mrb[96].mxu0 %v6499_v63 }
 0xe62   :  { %6618 = vmatprep.mubr.f32.mxu0 %v6504_v35 }
 0xe65   :  { %6619 = vmatmul.mubr.f32.gmra.mrb[98].mxu0 %v6503_v29 }
 0xe66   :  { %6623 = vmatprep.mubr.f32.mxu0 %v6508_v2 }
 0xe69   :  { %6624 = vmatmul.mubr.f32.gmra.mrb[100].mxu0 %v6507_v57 }
 0xe6a   :  { %6628 = vmatprep.mubr.f32.mxu0 %v6512_v6 }
 0xe6d   :  { %6629 = vmatmul.mubr.f32.gmra.mrb[102].mxu0 %v6511_v9 }
 0xe6e   :  { %6633 = vmatprep.mubr.f32.mxu0 %v6516_v24 }
 0xe71   :  { %6634 = vmatmul.mubr.f32.gmra.mrb[104].mxu0 %v6515_v15 }
 0xe72   :  { %6638 = vmatprep.mubr.f32.mxu0 %v6520_v40 }
 0xe75   :  { %6639 = vmatmul.mubr.f32.gmra.mrb[106].mxu0 %v6519_v28 }
 0xe76   :  { %15671 = vmatprep.mubr.msk.f32.mxu0 %vm17944_vm0, %v23385_v19 }
 0xeee   :  { %v6047_v21 = vpop.f32.mrb[66].mxu0 }
 0xeef   :  { %v21207_v7 = vadd.f32 %v6047_v21, %v21054_v3  ;;  %v15623_v0 = vpop.f32.mrb[67].mxu0 }
 0xef2   :  { %v6052_v34 = vpop.f32.mrb[68].mxu0 }
 0xef3   :  { %v21210_v13 = vadd.f32 %v6052_v34, %v21057_v62  ;;  %v15626_v63 = vpop.f32.mrb[69].mxu0 }
 0xef6   :  { %v6057_v59 = vpop.f32.mrb[70].mxu0 }
 0xef7   :  { %v21213_v29 = vadd.f32 %v6057_v59, %v21060_v41  ;;  %v15629_v35 = vpop.f32.mrb[71].mxu0 }
 0xefa   :  { %v6062_v49 = vpop.f32.mrb[72].mxu0 }
 0xefb   :  { %v21216_v57 = vadd.f32 %v6062_v49, %v21063_v45  ;;  %v15632_v2 = vpop.f32.mrb[73].mxu0 }
 0xefe   :  { %v6067_v37 = vpop.f32.mrb[74].mxu0 }
 0xeff   :  { %v21219_v3 = vadd.f32 %v6067_v37, %v21066_v61  ;;  %v15635_v9 = vpop.f32.mrb[75].mxu0 }
 0xf02   :  { %v6072_v6 = vpop.f32.mrb[76].mxu0 }
 0xf03   :  { %v21222_v62 = vadd.f32 %v6072_v6, %v21069_v55  ;;  %v15638_v53 = vpop.f32.mrb[77].mxu0  ;;  %v6484_v6 = vld [vmem:[%s23334_s3 + $0x638] sm:$0xff] }
 0xf04   :  { %v6502_v53 = vunpack.c.h.bf16 %v6484_v6 }
 0xf06   :  { %v6077_v15 = vpop.f32.mrb[78].mxu0 }
 0xf07   :  { %v15641_v24 = vpop.f32.mrb[79].mxu0  ;;  %v21225_v41 = vadd.f32 %v6077_v15, %v21072_v31  ;;  %v6486_v15 = vld [vmem:[%s23334_s3 + $0x648] sm:$0xff] }
 0xf08   :  { %v6501_v24 = vunpack.c.l.bf16 %v6484_v6 }
 0xf10   :  { %v6317_v56 = vpop.f32.mrb[80].mxu0 }
 0xf11   :  { %v6318_v45 = vadd.f32 %v21169_v8, %v6317_v56  ;;  %v6319_v28 = vpop.f32.mrb[81].mxu0  ;;  %v6506_v56 = vunpack.c.h.bf16 %v6486_v15 }
 0xf12   :  { %v6505_v28 = vunpack.c.l.bf16 %v6486_v15 }
 0xf13   :  { %15647 = vmatmul.mubr.msk.f32.vlgmr.msra.gmra.mrb[66].mxu1 %vm568_vm5, %v6318_v45  ;;  %v6488_v45 = vld [vmem:[%s23334_s3 + $0x658] sm:$0xff] }
 0xf14   :  { %17134 = vmatpush1.bf16.msra.mxu1 %v19125_v18  ;;  %v6322_v61 = vpop.f32.mrb[82].mxu0  ;;  %15649 = vmatprep.mubr.msk.f32.mxu1 %vm17944_vm0, %v23385_v19 }
 0xf15   :  { %v6323_v55 = vadd.f32 %v21171_v54, %v6322_v61  ;;  %17135 = vmatprep.subr.bf16.mxu1 %v23384_v22  ;;  %v6324_v40 = vpop.f32.mrb[83].mxu0  ;;  %v6510_v61 = vunpack.c.h.bf16 %v6488_v45 }
 0xf16   :  { %v6509_v40 = vunpack.c.l.bf16 %v6488_v45 }
 0xf17   :  { %15650 = vmatmul.mubr.msk.f32.gmra.mrb[68].mxu1 %vm568_vm5, %v6323_v55  ;;  %v6490_v55 = vld [vmem:[%s23334_s3 + $0x668] sm:$0xff] }
 0xf18   :  { %17137 = vmatpush1.bf16.msra.mxu1 %v19127_v38  ;;  %v6327_v31 = vpop.f32.mrb[84].mxu0  ;;  %15652 = vmatprep.mubr.msk.f32.mxu1 %vm17944_vm0, %v23385_v19 }
 0xf19   :  { %v6328_v8 = vadd.f32 %v21173_v50, %v6327_v31  ;;  %17138 = vmatprep.subr.bf16.mxu1 %v23384_v22  ;;  %v6329_v21 = vpop.f32.mrb[85].mxu0  ;;  %v6514_v31 = vunpack.c.h.bf16 %v6490_v55 }
 0xf1a   :  { %v6513_v21 = vunpack.c.l.bf16 %v6490_v55 }
 0xf1b   :  { %15653 = vmatmul.mubr.msk.f32.gmra.mrb[70].mxu1 %vm568_vm5, %v6328_v8  ;;  %v6492_v8 = vld [vmem:[%s23334_s3 + $0x678] sm:$0xff] }
 0xf1c   :  { %17140 = vmatpush1.bf16.msra.mxu1 %v19130_v10  ;;  %v6332_v54 = vpop.f32.mrb[86].mxu0  ;;  %15655 = vmatprep.mubr.msk.f32.mxu1 %vm17944_vm0, %v23385_v19 }
 0xf1d   :  { %v6333_v0 = vadd.f32 %v21175_v39, %v6332_v54  ;;  %17141 = vmatprep.subr.bf16.mxu1 %v23384_v22  ;;  %v6334_v34 = vpop.f32.mrb[87].mxu0  ;;  %v6518_v54 = vunpack.c.h.bf16 %v6492_v8 }
 0xf1e   :  { %v6517_v34 = vunpack.c.l.bf16 %v6492_v8 }
 0xf1f   :  { %15656 = vmatmul.mubr.msk.f32.gmra.mrb[72].mxu1 %vm568_vm5, %v6333_v0  ;;  %v6494_v0 = vld [vmem:[%s23334_s3 + $0x688] sm:$0xff] }
 0xf20   :  { %17143 = vmatpush1.bf16.msra.mxu1 %v19132_v36  ;;  %v6337_v50 = vpop.f32.mrb[88].mxu0  ;;  %15658 = vmatprep.mubr.msk.f32.mxu1 %vm17944_vm0, %v23385_v19 }
 0xf21   :  { %v6338_v63 = vadd.f32 %v21177_v52, %v6337_v50  ;;  %17144 = vmatprep.subr.bf16.mxu1 %v23384_v22  ;;  %v6339_v59 = vpop.f32.mrb[89].mxu0  ;;  %v6482_v52 = vld [vmem:[%s23334_s3 + $0x628] sm:$0xff]  ;;  %v6522_v50 = vunpack.c.h.bf16 %v6494_v0 }
 0xf22   :  { %v6498_v37 = vunpack.c.h.bf16 %v6482_v52  ;;  %v6744_v59 = vld [vmem:[%s23335_s4 + $0xe0] sm:$0xff] }
 0xf23   :  { %15659 = vmatmul.mubr.msk.f32.gmra.mrb[74].mxu1 %vm568_vm5, %v6338_v63  ;;  %v6521_v63 = vunpack.c.l.bf16 %v6494_v0  ;;  %v6874_v0 = vld [vmem:[%s23334_s3 + $0x690] sm:$0xff] }
 0xf24   :  { %17146 = vmatpush1.bf16.msra.mxu1 %v19134_v11  ;;  %v6342_v39 = vpop.f32.mrb[90].mxu0  ;;  %15661 = vmatprep.mubr.msk.f32.mxu1 %vm17944_vm0, %v23385_v19 }
 0xf25   :  { %v6343_v35 = vadd.f32 %v21179_v1, %v6342_v39  ;;  %17147 = vmatprep.subr.bf16.mxu1 %v23384_v22  ;;  %v6344_v49 = vpop.f32.mrb[91].mxu0  ;;  %v6745_v39 = vld [vmem:[%s23335_s4 + $0xe8] sm:$0xff] }
 0xf27   :  { %15662 = vmatmul.mubr.msk.f32.gmra.mrb[76].mxu1 %vm568_vm5, %v6343_v35  ;;  %v17157_v35 = vpack.c.bf16 %v6745_v39, %v6744_v59 }
 0xf28   :  { %17149 = vmatpush1.bf16.msra.mxu1 %v19136_v48  ;;  %v6347_v2 = vpop.f32.mrb[92].mxu0  ;;  %15664 = vmatprep.mubr.msk.f32.mxu1 %vm17944_vm0, %v23385_v19 }
 0xf29   :  { %v6348_v9 = vadd.f32 %v21181_v25, %v6347_v2  ;;  %17150 = vmatprep.subr.bf16.mxu1 %v23384_v22  ;;  %v6349_v1 = vpop.f32.mrb[93].mxu0  ;;  %v6497_v25 = vunpack.c.l.bf16 %v6482_v52  ;;  %17158 = vmatpush3.bf16.msra.mxu0 %v17157_v35  ;;  %v6878_v35 = vld [vmem:[%s23334_s3 + $0x6b0] sm:$0xff] }
 0xf2a   :  { %17191 = vmatprep.subr.bf16.mxu0 %v23384_v22 }
 0xf2b   :  { %15665 = vmatmul.mubr.msk.f32.gmra.mrb[78].mxu1 %vm568_vm5, %v6348_v9 }
 0xf2c   :  { %17152 = vmatpush1.bf16.msra.mxu1 %v19139_v60  ;;  %13206 = vmatprep.mubr.msk.f32.mxu1 %vm1034_vm6, %v6498_v37 }
 0xf2d   :  { %17153 = vmatprep.subr.bf16.mxu1 %v23384_v22 }
 0xf30   :  { %17155 = vmatpush1.bf16.msra.mxu1 %v19141_v16  ;;  %v14355_v49 = vpop.f32.mrb[94].mxu0 }
 0xf31   :  { %6676 = vmatprep.subr.mxu1 %v23385_v19  ;;  %v14356_v52 = vpop.f32.mrb[95].mxu0 }
 0xf32   :  { %v21322_v2 = vadd.f32 %v14356_v52, %v14355_v49  ;;  %v6896_v49 = vunpack.c.l.bf16 %v6878_v35  ;;  %v6897_v52 = vunpack.c.h.bf16 %v6878_v35 }
 0xf34   :  { %6677 = vmatpush1.msra.mxu1 %v19216_v42  ;;  %v14358_v37 = vpop.f32.mrb[96].mxu0 }
 0xf35   :  { %6709 = vmatmul.mubr.f32.vlgmr.msra.gmra.mrb[80].mxu1 %v6497_v25  ;;  %17160 = vmatprep.subr.bf16.mxu1 %v19091_v23  ;;  %v14359_v9 = vpop.f32.mrb[97].mxu0 }
 0xf36   :  { %17162 = vmatpush3.bf16.msra.mxu1 %v19093_v30  ;;  %13207 = vmatprep.mubr.msk.f32.mxu1 %vm1034_vm6, %v6502_v53  ;;  %v21324_v1 = vadd.f32 %v14359_v9, %v14358_v37  ;;  %v6880_v37 = vld [vmem:[%s23334_s3 + $0x6c0] sm:$0xff] }
 0xf37   :  { %17164 = vmatprep.subr.bf16.mxu1 %v19095_v12  ;;  %v6900_v9 = vunpack.c.l.bf16 %v6880_v37 }
 0xf38   :  { %v14361_v6 = vpop.f32.mrb[98].mxu0 }
 0xf39   :  { %6714 = vmatmul.mubr.f32.gmra.mrb[82].mxu1 %v6501_v24  ;;  %v14362_v25 = vpop.f32.mrb[99].mxu0 }
 0xf3a   :  { %17166 = vmatpush3.bf16.msra.mxu1 %v19097_v27  ;;  %13208 = vmatprep.mubr.msk.f32.mxu1 %vm1034_vm6, %v6506_v56  ;;  %v21326_v53 = vadd.f32 %v14362_v25, %v14361_v6  ;;  %v6901_v6 = vunpack.c.h.bf16 %v6880_v37  ;;  %v6882_v25 = vld [vmem:[%s23334_s3 + $0x6d0] sm:$0xff] }
 0xf3b   :  { %17168 = vmatprep.subr.bf16.mxu1 %v19099_v44 }
 0xf3c   :  { %v14364_v15 = vpop.f32.mrb[100].mxu0 }
 0xf3d   :  { %6719 = vmatmul.mubr.f32.gmra.mrb[84].mxu1 %v6505_v28  ;;  %v14365_v24 = vpop.f32.mrb[101].mxu0 }
 0xf3e   :  { %17170 = vmatpush3.bf16.msra.mxu1 %v19101_v20  ;;  %13209 = vmatprep.mubr.msk.f32.mxu1 %vm1034_vm6, %v6510_v61  ;;  %v21328_v56 = vadd.f32 %v14365_v24, %v14364_v15  ;;  %v6904_v15 = vunpack.c.l.bf16 %v6882_v25  ;;  %v6905_v24 = vunpack.c.h.bf16 %v6882_v25 }
 0xf3f   :  { %17172 = vmatprep.subr.bf16.mxu1 %v19104_v32 }
 0xf40   :  { %v14367_v45 = vpop.f32.mrb[102].mxu0 }
 0xf41   :  { %6724 = vmatmul.mubr.f32.gmra.mrb[86].mxu1 %v6509_v40  ;;  %v14368_v28 = vpop.f32.mrb[103].mxu0 }
 0xf42   :  { %17174 = vmatpush3.bf16.msra.mxu1 %v19106_v33  ;;  %13210 = vmatprep.mubr.msk.f32.mxu1 %vm1034_vm6, %v6514_v31  ;;  %v21330_v61 = vadd.f32 %v14368_v28, %v14367_v45  ;;  %v6884_v45 = vld [vmem:[%s23334_s3 + $0x6e0] sm:$0xff] }
 0xf43   :  { %17176 = vmatprep.subr.bf16.mxu1 %v19108_v47  ;;  %v6908_v28 = vunpack.c.l.bf16 %v6884_v45 }
 0xf44   :  { %v14370_v55 = vpop.f32.mrb[104].mxu0 }
 0xf45   :  { %6729 = vmatmul.mubr.f32.gmra.mrb[88].mxu1 %v6513_v21  ;;  %v14371_v40 = vpop.f32.mrb[105].mxu0 }
 0xf46   :  { %17178 = vmatpush3.bf16.msra.mxu1 %v19110_v5  ;;  %13211 = vmatprep.mubr.msk.f32.mxu1 %vm1034_vm6, %v6518_v54  ;;  %v21332_v31 = vadd.f32 %v14371_v40, %v14370_v55  ;;  %v6909_v55 = vunpack.c.h.bf16 %v6884_v45  ;;  %v6886_v40 = vld [vmem:[%s23334_s3 + $0x6f0] sm:$0xff] }
 0xf47   :  { %17180 = vmatprep.subr.bf16.mxu1 %v19112_v17 }
 0xf48   :  { %v14373_v8 = vpop.f32.mrb[106].mxu0 }
 0xf49   :  { %6734 = vmatmul.mubr.f32.gmra.mrb[90].mxu1 %v6517_v34  ;;  %v14374_v21 = vpop.f32.mrb[107].mxu0  ;;  %v6888_v34 = vunpack.c.l.bf16 %v6874_v0 }
 0xf4a   :  { %17182 = vmatpush3.bf16.msra.mxu1 %v19114_v4  ;;  %13212 = vmatprep.mubr.msk.f32.mxu1 %vm1034_vm6, %v6522_v50  ;;  %v21334_v54 = vadd.f32 %v14374_v21, %v14373_v8  ;;  %v6889_v50 = vunpack.c.h.bf16 %v6874_v0  ;;  %v6912_v8 = vunpack.c.l.bf16 %v6886_v40  ;;  %v6913_v21 = vunpack.c.h.bf16 %v6886_v40 }
 0xf4b   :  { %17184 = vmatprep.subr.bf16.mxu1 %v19116_v14 }
 0xf4d   :  { %6739 = vmatmul.mubr.f32.gmra.mrb[92].mxu1 %v6521_v63  ;;  %v6876_v63 = vld [vmem:[%s23334_s3 + $0x6a0] sm:$0xff] }
 0xf4e   :  { %17186 = vmatpush3.bf16.msra.mxu1 %v19118_v51  ;;  %7001 = vmatprep.mubr.f32.mxu1 %v6889_v50  ;;  %v6893_v59 = vunpack.c.h.bf16 %v6876_v63  ;;  %v6892_v39 = vunpack.c.l.bf16 %v6876_v63 }
 0xf4f   :  { %17188 = vmatprep.subr.bf16.mxu1 %v19121_v26 }
 0xf52   :  { %17190 = vmatpush3.bf16.msra.mxu1 %v19123_v58 }
 0xf53   :  { %17215 = vmatprep.subr.bf16.mxu1 %v23384_v22 }
 0xf55   :  { %7002 = vmatmul.mubr.f32.vlgmr.msra.gmra.mrb[94].mxu1 %v6888_v34 }
 0xf56   :  { %7006 = vmatprep.mubr.f32.mxu1 %v6893_v59 }
 0xf59   :  { %7007 = vmatmul.mubr.f32.gmra.mrb[96].mxu1 %v6892_v39 }
 0xf5a   :  { %7011 = vmatprep.mubr.f32.mxu1 %v6897_v52 }
 0xf5d   :  { %7012 = vmatmul.mubr.f32.gmra.mrb[98].mxu1 %v6896_v49 }
 0xf5e   :  { %7016 = vmatprep.mubr.f32.mxu1 %v6901_v6 }
 0xf61   :  { %7017 = vmatmul.mubr.f32.gmra.mrb[100].mxu1 %v6900_v9 }
 0xf62   :  { %7021 = vmatprep.mubr.f32.mxu1 %v6905_v24 }
 0xf65   :  { %7022 = vmatmul.mubr.f32.gmra.mrb[102].mxu1 %v6904_v15 }
 0xf66   :  { %7026 = vmatprep.mubr.f32.mxu1 %v6909_v55 }
 0xf69   :  { %7027 = vmatmul.mubr.f32.gmra.mrb[104].mxu1 %v6908_v28 }
 0xf6a   :  { %7031 = vmatprep.mubr.f32.mxu1 %v6913_v21 }
 0xf6d   :  { %7032 = vmatmul.mubr.f32.gmra.mrb[106].mxu1 %v6912_v8 }
 0xf6e   :  { %15696 = vmatprep.mubr.msk.f32.mxu1 %vm17944_vm0, %v23385_v19 }
 0xfe6   :  { %v6440_v0 = vpop.f32.mrb[66].mxu1 }
 0xfe7   :  { %v15648_v34 = vpop.f32.mrb[67].mxu1  ;;  %v21360_v50 = vadd.f32 %v6440_v0, %v21207_v7 }
 0xfea   :  { %v6445_v63 = vpop.f32.mrb[68].mxu1 }
 0xfeb   :  { %v15651_v59 = vpop.f32.mrb[69].mxu1  ;;  %v21363_v39 = vadd.f32 %v6445_v63, %v21210_v13 }
 0xfee   :  { %v6450_v35 = vpop.f32.mrb[70].mxu1 }
 0xfef   :  { %v15654_v49 = vpop.f32.mrb[71].mxu1  ;;  %v21366_v52 = vadd.f32 %v6450_v35, %v21213_v29 }
 0xff2   :  { %v6455_v37 = vpop.f32.mrb[72].mxu1 }
 0xff3   :  { %v15657_v9 = vpop.f32.mrb[73].mxu1  ;;  %v21369_v6 = vadd.f32 %v6455_v37, %v21216_v57 }
 0xff6   :  { %v6460_v25 = vpop.f32.mrb[74].mxu1 }
 0xff7   :  { %v15660_v15 = vpop.f32.mrb[75].mxu1  ;;  %v21372_v7 = vadd.f32 %v6460_v25, %v21219_v3 }
 0xffa   :  { %v6465_v24 = vpop.f32.mrb[76].mxu1 }
 0xffb   :  { %v15663_v45 = vpop.f32.mrb[77].mxu1  ;;  %v21375_v13 = vadd.f32 %v6465_v24, %v21222_v62  ;;  %v6877_v24 = vld [vmem:[%s23334_s3 + $0x6a8] sm:$0xff] }
 0xffc   :  { %v6895_v45 = vunpack.c.h.bf16 %v6877_v24 }
 0xffe   :  { %v6470_v28 = vpop.f32.mrb[78].mxu1 }
 0xfff   :  { %v21378_v55 = vadd.f32 %v6470_v28, %v21225_v41  ;;  %v15666_v29 = vpop.f32.mrb[79].mxu1  ;;  %v6879_v28 = vld [vmem:[%s23334_s3 + $0x6b8] sm:$0xff] }
0x1000   :  { %v6894_v29 = vunpack.c.l.bf16 %v6877_v24 }
0x1008   :  { %v6710_v40 = vpop.f32.mrb[80].mxu1 }
0x1009   :  { %v6711_v8 = vadd.f32 %v21322_v2, %v6710_v40  ;;  %v6712_v57 = vpop.f32.mrb[81].mxu1  ;;  %v6899_v40 = vunpack.c.h.bf16 %v6879_v28 }
0x100a   :  { %v6898_v57 = vunpack.c.l.bf16 %v6879_v28 }
0x100b   :  { %15672 = vmatmul.mubr.msk.f32.vlgmr.msra.gmra.mrb[108].mxu0 %vm568_vm5, %v6711_v8  ;;  %v6881_v8 = vld [vmem:[%s23334_s3 + $0x6c8] sm:$0xff] }
0x100c   :  { %17193 = vmatpush1.bf16.msra.mxu0 %v19125_v18  ;;  %v6715_v3 = vpop.f32.mrb[82].mxu1  ;;  %15674 = vmatprep.mubr.msk.f32.mxu0 %vm17944_vm0, %v23385_v19 }
0x100d   :  { %v6716_v62 = vadd.f32 %v21324_v1, %v6715_v3  ;;  %17194 = vmatprep.subr.bf16.mxu0 %v23384_v22  ;;  %v6717_v21 = vpop.f32.mrb[83].mxu1  ;;  %v6903_v3 = vunpack.c.h.bf16 %v6881_v8 }
0x100e   :  { %v6902_v21 = vunpack.c.l.bf16 %v6881_v8 }
0x100f   :  { %15675 = vmatmul.mubr.msk.f32.gmra.mrb[110].mxu0 %vm568_vm5, %v6716_v62  ;;  %v6883_v62 = vld [vmem:[%s23334_s3 + $0x6d8] sm:$0xff] }
0x1010   :  { %17196 = vmatpush1.bf16.msra.mxu0 %v19127_v38  ;;  %v6720_v41 = vpop.f32.mrb[84].mxu1  ;;  %15677 = vmatprep.mubr.msk.f32.mxu0 %vm17944_vm0, %v23385_v19 }
0x1011   :  { %v6721_v2 = vadd.f32 %v21326_v53, %v6720_v41  ;;  %17197 = vmatprep.subr.bf16.mxu0 %v23384_v22  ;;  %v6722_v0 = vpop.f32.mrb[85].mxu1  ;;  %v6907_v41 = vunpack.c.h.bf16 %v6883_v62 }
0x1012   :  { %v6906_v0 = vunpack.c.l.bf16 %v6883_v62 }
0x1013   :  { %15678 = vmatmul.mubr.msk.f32.gmra.mrb[112].mxu0 %vm568_vm5, %v6721_v2  ;;  %v6885_v2 = vld [vmem:[%s23334_s3 + $0x6e8] sm:$0xff] }
0x1014   :  { %17199 = vmatpush1.bf16.msra.mxu0 %v19130_v10  ;;  %v6725_v1 = vpop.f32.mrb[86].mxu1  ;;  %15680 = vmatprep.mubr.msk.f32.mxu0 %vm17944_vm0, %v23385_v19 }
0x1015   :  { %v6726_v34 = vadd.f32 %v21328_v56, %v6725_v1  ;;  %17200 = vmatprep.subr.bf16.mxu0 %v23384_v22  ;;  %v6727_v63 = vpop.f32.mrb[87].mxu1  ;;  %v6911_v1 = vunpack.c.h.bf16 %v6885_v2 }
0x1016   :  { %v6910_v63 = vunpack.c.l.bf16 %v6885_v2 }
0x1017   :  { %15681 = vmatmul.mubr.msk.f32.gmra.mrb[114].mxu0 %vm568_vm5, %v6726_v34  ;;  %v6887_v34 = vld [vmem:[%s23334_s3 + $0x6f8] sm:$0xff] }
0x1018   :  { %17202 = vmatpush1.bf16.msra.mxu0 %v19132_v36  ;;  %v6730_v53 = vpop.f32.mrb[88].mxu1  ;;  %15683 = vmatprep.mubr.msk.f32.mxu0 %vm17944_vm0, %v23385_v19 }
0x1019   :  { %v6731_v59 = vadd.f32 %v21330_v61, %v6730_v53  ;;  %17203 = vmatprep.subr.bf16.mxu0 %v23384_v22  ;;  %v6732_v35 = vpop.f32.mrb[89].mxu1  ;;  %v6875_v61 = vld [vmem:[%s23334_s3 + $0x698] sm:$0xff]  ;;  %v6915_v53 = vunpack.c.h.bf16 %v6887_v34 }
0x101a   :  { %v6891_v25 = vunpack.c.h.bf16 %v6875_v61  ;;  %v7137_v35 = vld [vmem:[%s23335_s4 + $0xf0] sm:$0xff] }
0x101b   :  { %15684 = vmatmul.mubr.msk.f32.gmra.mrb[116].mxu0 %vm568_vm5, %v6731_v59  ;;  %v6914_v59 = vunpack.c.l.bf16 %v6887_v34  ;;  %v7267_v34 = vld [vmem:[%s23334_s3 + $0x700] sm:$0xff] }
0x101c   :  { %17205 = vmatpush1.bf16.msra.mxu0 %v19134_v11  ;;  %v6735_v56 = vpop.f32.mrb[90].mxu1  ;;  %15686 = vmatprep.mubr.msk.f32.mxu0 %vm17944_vm0, %v23385_v19 }
0x101d   :  { %v6736_v49 = vadd.f32 %v21332_v31, %v6735_v56  ;;  %17206 = vmatprep.subr.bf16.mxu0 %v23384_v22  ;;  %v6737_v37 = vpop.f32.mrb[91].mxu1  ;;  %v7138_v56 = vld [vmem:[%s23335_s4 + $0xf8] sm:$0xff] }
0x101f   :  { %15687 = vmatmul.mubr.msk.f32.gmra.mrb[118].mxu0 %vm568_vm5, %v6736_v49  ;;  %v17216_v49 = vpack.c.bf16 %v7138_v56, %v7137_v35 }
0x1020   :  { %17208 = vmatpush1.bf16.msra.mxu0 %v19136_v48  ;;  %v6740_v9 = vpop.f32.mrb[92].mxu1  ;;  %15689 = vmatprep.mubr.msk.f32.mxu0 %vm17944_vm0, %v23385_v19 }
0x1021   :  { %v6741_v15 = vadd.f32 %v21334_v54, %v6740_v9  ;;  %17209 = vmatprep.subr.bf16.mxu0 %v23384_v22  ;;  %v6742_v31 = vpop.f32.mrb[93].mxu1  ;;  %v6890_v54 = vunpack.c.l.bf16 %v6875_v61  ;;  %17217 = vmatpush3.bf16.msra.mxu1 %v17216_v49  ;;  %v7271_v49 = vld [vmem:[%s23334_s3 + $0x720] sm:$0xff] }
0x1022   :  { %17250 = vmatprep.subr.bf16.mxu1 %v23384_v22 }
0x1023   :  { %15690 = vmatmul.mubr.msk.f32.gmra.mrb[120].mxu0 %vm568_vm5, %v6741_v15 }
0x1024   :  { %17211 = vmatpush1.bf16.msra.mxu0 %v19139_v60  ;;  %13220 = vmatprep.mubr.msk.f32.mxu0 %vm1034_vm6, %v6891_v25 }
0x1025   :  { %17212 = vmatprep.subr.bf16.mxu0 %v23384_v22 }
0x1028   :  { %17214 = vmatpush1.bf16.msra.mxu0 %v19141_v16  ;;  %v14417_v37 = vpop.f32.mrb[94].mxu1 }
0x1029   :  { %7069 = vmatprep.subr.mxu0 %v23385_v19  ;;  %v14418_v61 = vpop.f32.mrb[95].mxu1 }
0x102a   :  { %v21475_v9 = vadd.f32 %v14418_v61, %v14417_v37  ;;  %v7289_v37 = vunpack.c.l.bf16 %v7271_v49  ;;  %v7290_v61 = vunpack.c.h.bf16 %v7271_v49 }
0x102c   :  { %7070 = vmatpush1.msra.mxu0 %v19216_v42  ;;  %v14420_v25 = vpop.f32.mrb[96].mxu1 }
0x102d   :  { %7102 = vmatmul.mubr.f32.vlgmr.msra.gmra.mrb[122].mxu0 %v6890_v54  ;;  %17219 = vmatprep.subr.bf16.mxu0 %v19091_v23  ;;  %v14421_v15 = vpop.f32.mrb[97].mxu1 }
0x102e   :  { %17221 = vmatpush3.bf16.msra.mxu0 %v19093_v30  ;;  %13221 = vmatprep.mubr.msk.f32.mxu0 %vm1034_vm6, %v6895_v45  ;;  %v21477_v31 = vadd.f32 %v14421_v15, %v14420_v25  ;;  %v7273_v25 = vld [vmem:[%s23334_s3 + $0x730] sm:$0xff] }
0x102f   :  { %17223 = vmatprep.subr.bf16.mxu0 %v19095_v12  ;;  %v7293_v15 = vunpack.c.l.bf16 %v7273_v25 }
0x1030   :  { %v14423_v24 = vpop.f32.mrb[98].mxu1 }
0x1031   :  { %7107 = vmatmul.mubr.f32.gmra.mrb[124].mxu0 %v6894_v29  ;;  %v14424_v54 = vpop.f32.mrb[99].mxu1 }
0x1032   :  { %17225 = vmatpush3.bf16.msra.mxu0 %v19097_v27  ;;  %13222 = vmatprep.mubr.msk.f32.mxu0 %vm1034_vm6, %v6899_v40  ;;  %v21479_v45 = vadd.f32 %v14424_v54, %v14423_v24  ;;  %v7294_v24 = vunpack.c.h.bf16 %v7273_v25  ;;  %v7275_v54 = vld [vmem:[%s23334_s3 + $0x740] sm:$0xff] }
0x1033   :  { %17227 = vmatprep.subr.bf16.mxu0 %v19099_v44 }
0x1034   :  { %v14426_v28 = vpop.f32.mrb[100].mxu1 }
0x1035   :  { %7112 = vmatmul.mubr.f32.gmra.mrb[126].mxu0 %v6898_v57  ;;  %v14427_v29 = vpop.f32.mrb[101].mxu1 }
0x1036   :  { %17229 = vmatpush3.bf16.msra.mxu0 %v19101_v20  ;;  %13223 = vmatprep.mubr.msk.f32.mxu0 %vm1034_vm6, %v6903_v3  ;;  %v21481_v40 = vadd.f32 %v14427_v29, %v14426_v28  ;;  %v7297_v28 = vunpack.c.l.bf16 %v7275_v54  ;;  %v7298_v29 = vunpack.c.h.bf16 %v7275_v54 }
0x1037   :  { %17231 = vmatprep.subr.bf16.mxu0 %v19104_v32 }
0x1038   :  { %v14429_v8 = vpop.f32.mrb[102].mxu1 }
0x1039   :  { %7117 = vmatmul.mubr.f32.gmra.mrb[128].mxu0 %v6902_v21  ;;  %v14430_v57 = vpop.f32.mrb[103].mxu1 }
0x103a   :  { %17233 = vmatpush3.bf16.msra.mxu0 %v19106_v33  ;;  %13224 = vmatprep.mubr.msk.f32.mxu0 %vm1034_vm6, %v6907_v41  ;;  %v21483_v3 = vadd.f32 %v14430_v57, %v14429_v8  ;;  %v7277_v8 = vld [vmem:[%s23334_s3 + $0x750] sm:$0xff] }
0x103b   :  { %17235 = vmatprep.subr.bf16.mxu0 %v19108_v47  ;;  %v7301_v57 = vunpack.c.l.bf16 %v7277_v8 }
0x103c   :  { %v14432_v62 = vpop.f32.mrb[104].mxu1 }
0x103d   :  { %7122 = vmatmul.mubr.f32.gmra.mrb[130].mxu0 %v6906_v0  ;;  %v14433_v21 = vpop.f32.mrb[105].mxu1 }
0x103e   :  { %17237 = vmatpush3.bf16.msra.mxu0 %v19110_v5  ;;  %13225 = vmatprep.mubr.msk.f32.mxu0 %vm1034_vm6, %v6911_v1  ;;  %v21485_v41 = vadd.f32 %v14433_v21, %v14432_v62  ;;  %v7302_v62 = vunpack.c.h.bf16 %v7277_v8  ;;  %v7279_v21 = vld [vmem:[%s23334_s3 + $0x760] sm:$0xff] }
0x103f   :  { %17239 = vmatprep.subr.bf16.mxu0 %v19112_v17 }
0x1040   :  { %v14435_v2 = vpop.f32.mrb[106].mxu1 }
0x1041   :  { %7127 = vmatmul.mubr.f32.gmra.mrb[132].mxu0 %v6910_v63  ;;  %v14436_v0 = vpop.f32.mrb[107].mxu1  ;;  %v7281_v63 = vunpack.c.l.bf16 %v7267_v34 }
0x1042   :  { %17241 = vmatpush3.bf16.msra.mxu0 %v19114_v4  ;;  %13226 = vmatprep.mubr.msk.f32.mxu0 %vm1034_vm6, %v6915_v53  ;;  %v21487_v1 = vadd.f32 %v14436_v0, %v14435_v2  ;;  %v7282_v53 = vunpack.c.h.bf16 %v7267_v34  ;;  %v7305_v2 = vunpack.c.l.bf16 %v7279_v21  ;;  %v7306_v0 = vunpack.c.h.bf16 %v7279_v21 }
0x1043   :  { %17243 = vmatprep.subr.bf16.mxu0 %v19116_v14 }
0x1045   :  { %7132 = vmatmul.mubr.f32.gmra.mrb[134].mxu0 %v6914_v59  ;;  %v7269_v59 = vld [vmem:[%s23334_s3 + $0x710] sm:$0xff] }
0x1046   :  { %17245 = vmatpush3.bf16.msra.mxu0 %v19118_v51  ;;  %7394 = vmatprep.mubr.f32.mxu0 %v7282_v53  ;;  %v7286_v35 = vunpack.c.h.bf16 %v7269_v59  ;;  %v7285_v56 = vunpack.c.l.bf16 %v7269_v59 }
0x1047   :  { %17247 = vmatprep.subr.bf16.mxu0 %v19121_v26 }
0x104a   :  { %17249 = vmatpush3.bf16.msra.mxu0 %v19123_v58 }
0x104b   :  { %17274 = vmatprep.subr.bf16.mxu0 %v23384_v22 }
0x104d   :  { %7395 = vmatmul.mubr.f32.vlgmr.msra.gmra.mrb[136].mxu0 %v7281_v63 }
0x104e   :  { %7399 = vmatprep.mubr.f32.mxu0 %v7286_v35 }
0x1051   :  { %7400 = vmatmul.mubr.f32.gmra.mrb[138].mxu0 %v7285_v56 }
0x1052   :  { %7404 = vmatprep.mubr.f32.mxu0 %v7290_v61 }
0x1055   :  { %7405 = vmatmul.mubr.f32.gmra.mrb[140].mxu0 %v7289_v37 }
0x1056   :  { %7409 = vmatprep.mubr.f32.mxu0 %v7294_v24 }
0x1059   :  { %7410 = vmatmul.mubr.f32.gmra.mrb[142].mxu0 %v7293_v15 }
0x105a   :  { %7414 = vmatprep.mubr.f32.mxu0 %v7298_v29 }
0x105d   :  { %7415 = vmatmul.mubr.f32.gmra.mrb[144].mxu0 %v7297_v28 }
0x105e   :  { %7419 = vmatprep.mubr.f32.mxu0 %v7302_v62 }
0x1061   :  { %7420 = vmatmul.mubr.f32.gmra.mrb[146].mxu0 %v7301_v57 }
0x1062   :  { %7424 = vmatprep.mubr.f32.mxu0 %v7306_v0 }
0x1065   :  { %7425 = vmatmul.mubr.f32.gmra.mrb[148].mxu0 %v7305_v2 }
0x1066   :  { %15721 = vmatprep.mubr.msk.f32.mxu0 %vm17944_vm0, %v23385_v19 }
0x10de   :  { %v6833_v34 = vpop.f32.mrb[108].mxu0 }
0x10df   :  { %v21513_v63 = vadd.f32 %v6833_v34, %v21360_v50  ;;  %v15673_v53 = vpop.f32.mrb[109].mxu0 }
0x10e2   :  { %v6838_v59 = vpop.f32.mrb[110].mxu0 }
0x10e3   :  { %v21516_v35 = vadd.f32 %v6838_v59, %v21363_v39  ;;  %v15676_v56 = vpop.f32.mrb[111].mxu0 }
0x10e6   :  { %v6843_v49 = vpop.f32.mrb[112].mxu0 }
0x10e7   :  { %v21519_v37 = vadd.f32 %v6843_v49, %v21366_v52  ;;  %v15679_v61 = vpop.f32.mrb[113].mxu0 }
0x10ea   :  { %v6848_v25 = vpop.f32.mrb[114].mxu0 }
0x10eb   :  { %v21522_v15 = vadd.f32 %v6848_v25, %v21369_v6  ;;  %v15682_v24 = vpop.f32.mrb[115].mxu0 }
0x10ee   :  { %v6853_v54 = vpop.f32.mrb[116].mxu0 }
0x10ef   :  { %v21525_v50 = vadd.f32 %v6853_v54, %v21372_v7  ;;  %v15685_v28 = vpop.f32.mrb[117].mxu0 }
0x10f2   :  { %v6858_v29 = vpop.f32.mrb[118].mxu0 }
0x10f3   :  { %v21528_v39 = vadd.f32 %v6858_v29, %v21375_v13  ;;  %v15688_v8 = vpop.f32.mrb[119].mxu0  ;;  %v7270_v29 = vld [vmem:[%s23334_s3 + $0x718] sm:$0xff] }
0x10f4   :  { %v7288_v8 = vunpack.c.h.bf16 %v7270_v29 }
0x10f6   :  { %v6863_v57 = vpop.f32.mrb[120].mxu0 }
0x10f7   :  { %v21531_v52 = vadd.f32 %v6863_v57, %v21378_v55  ;;  %v15691_v62 = vpop.f32.mrb[121].mxu0  ;;  %v7272_v57 = vld [vmem:[%s23334_s3 + $0x728] sm:$0xff] }
0x10f8   :  { %v7287_v62 = vunpack.c.l.bf16 %v7270_v29 }
0x1100   :  { %v7103_v21 = vpop.f32.mrb[122].mxu0 }
0x1101   :  { %v7104_v6 = vadd.f32 %v21475_v9, %v7103_v21  ;;  %v7105_v2 = vpop.f32.mrb[123].mxu0  ;;  %v7292_v21 = vunpack.c.h.bf16 %v7272_v57 }
0x1102   :  { %v7291_v2 = vunpack.c.l.bf16 %v7272_v57 }
0x1103   :  { %15697 = vmatmul.mubr.msk.f32.vlgmr.msra.gmra.mrb[108].mxu1 %vm568_vm5, %v7104_v6  ;;  %v7274_v6 = vld [vmem:[%s23334_s3 + $0x738] sm:$0xff] }
0x1104   :  { %17252 = vmatpush1.bf16.msra.mxu1 %v19125_v18  ;;  %v7108_v7 = vpop.f32.mrb[124].mxu0  ;;  %15699 = vmatprep.mubr.msk.f32.mxu1 %vm17944_vm0, %v23385_v19 }
0x1105   :  { %v7109_v13 = vadd.f32 %v21477_v31, %v7108_v7  ;;  %17253 = vmatprep.subr.bf16.mxu1 %v23384_v22  ;;  %v7110_v0 = vpop.f32.mrb[125].mxu0  ;;  %v7296_v7 = vunpack.c.h.bf16 %v7274_v6 }
0x1106   :  { %v7295_v0 = vunpack.c.l.bf16 %v7274_v6 }
0x1107   :  { %15700 = vmatmul.mubr.msk.f32.gmra.mrb[110].mxu1 %vm568_vm5, %v7109_v13  ;;  %v7276_v13 = vld [vmem:[%s23334_s3 + $0x748] sm:$0xff] }
0x1108   :  { %17255 = vmatpush1.bf16.msra.mxu1 %v19127_v38  ;;  %v7113_v55 = vpop.f32.mrb[126].mxu0  ;;  %15702 = vmatprep.mubr.msk.f32.mxu1 %vm17944_vm0, %v23385_v19 }
0x1109   :  { %v7114_v9 = vadd.f32 %v21479_v45, %v7113_v55  ;;  %17256 = vmatprep.subr.bf16.mxu1 %v23384_v22  ;;  %v7115_v34 = vpop.f32.mrb[127].mxu0  ;;  %v7300_v55 = vunpack.c.h.bf16 %v7276_v13 }
0x110a   :  { %v7299_v34 = vunpack.c.l.bf16 %v7276_v13 }
0x110b   :  { %15703 = vmatmul.mubr.msk.f32.gmra.mrb[112].mxu1 %vm568_vm5, %v7114_v9  ;;  %v7278_v9 = vld [vmem:[%s23334_s3 + $0x758] sm:$0xff] }
0x110c   :  { %17258 = vmatpush1.bf16.msra.mxu1 %v19130_v10  ;;  %v7118_v31 = vpop.f32.mrb[128].mxu0  ;;  %15705 = vmatprep.mubr.msk.f32.mxu1 %vm17944_vm0, %v23385_v19 }
0x110d   :  { %v7119_v53 = vadd.f32 %v21481_v40, %v7118_v31  ;;  %17259 = vmatprep.subr.bf16.mxu1 %v23384_v22  ;;  %v7120_v59 = vpop.f32.mrb[129].mxu0  ;;  %v7304_v31 = vunpack.c.h.bf16 %v7278_v9 }
0x110e   :  { %v7303_v59 = vunpack.c.l.bf16 %v7278_v9 }
0x110f   :  { %15706 = vmatmul.mubr.msk.f32.gmra.mrb[114].mxu1 %vm568_vm5, %v7119_v53  ;;  %v7280_v53 = vld [vmem:[%s23334_s3 + $0x768] sm:$0xff] }
0x1110   :  { %17261 = vmatpush1.bf16.msra.mxu1 %v19132_v36  ;;  %v7123_v45 = vpop.f32.mrb[130].mxu0  ;;  %15708 = vmatprep.mubr.msk.f32.mxu1 %vm17944_vm0, %v23385_v19 }
0x1111   :  { %v7124_v56 = vadd.f32 %v21483_v3, %v7123_v45  ;;  %17262 = vmatprep.subr.bf16.mxu1 %v23384_v22  ;;  %v7125_v49 = vpop.f32.mrb[131].mxu0  ;;  %v7268_v3 = vld [vmem:[%s23334_s3 + $0x708] sm:$0xff]  ;;  %v7308_v45 = vunpack.c.h.bf16 %v7280_v53 }
0x1112   :  { %v7284_v54 = vunpack.c.h.bf16 %v7268_v3  ;;  %v7530_v49 = vld [vmem:[%s23335_s4 + $0x100] sm:$0xff] }
0x1113   :  { %15709 = vmatmul.mubr.msk.f32.gmra.mrb[116].mxu1 %vm568_vm5, %v7124_v56  ;;  %v7307_v56 = vunpack.c.l.bf16 %v7280_v53  ;;  %v7660_v53 = vld [vmem:[%s23334_s3 + $0x770] sm:$0xff] }
0x1114   :  { %17264 = vmatpush1.bf16.msra.mxu1 %v19134_v11  ;;  %v7128_v40 = vpop.f32.mrb[132].mxu0  ;;  %15711 = vmatprep.mubr.msk.f32.mxu1 %vm17944_vm0, %v23385_v19 }
0x1115   :  { %v7129_v61 = vadd.f32 %v21485_v41, %v7128_v40  ;;  %17265 = vmatprep.subr.bf16.mxu1 %v23384_v22  ;;  %v7130_v25 = vpop.f32.mrb[133].mxu0  ;;  %v7531_v40 = vld [vmem:[%s23335_s4 + $0x108] sm:$0xff] }
0x1117   :  { %15712 = vmatmul.mubr.msk.f32.gmra.mrb[118].mxu1 %vm568_vm5, %v7129_v61  ;;  %v17275_v61 = vpack.c.bf16 %v7531_v40, %v7530_v49 }
0x1118   :  { %17267 = vmatpush1.bf16.msra.mxu1 %v19136_v48  ;;  %v7133_v24 = vpop.f32.mrb[134].mxu0  ;;  %15714 = vmatprep.mubr.msk.f32.mxu1 %vm17944_vm0, %v23385_v19 }
0x1119   :  { %v7134_v28 = vadd.f32 %v21487_v1, %v7133_v24  ;;  %17268 = vmatprep.subr.bf16.mxu1 %v23384_v22  ;;  %v7135_v41 = vpop.f32.mrb[135].mxu0  ;;  %v7283_v1 = vunpack.c.l.bf16 %v7268_v3  ;;  %17276 = vmatpush3.bf16.msra.mxu0 %v17275_v61  ;;  %v7664_v61 = vld [vmem:[%s23334_s3 + $0x790] sm:$0xff] }
0x111a   :  { %17309 = vmatprep.subr.bf16.mxu0 %v23384_v22 }
0x111b   :  { %15715 = vmatmul.mubr.msk.f32.gmra.mrb[120].mxu1 %vm568_vm5, %v7134_v28 }
0x111c   :  { %17270 = vmatpush1.bf16.msra.mxu1 %v19139_v60  ;;  %13234 = vmatprep.mubr.msk.f32.mxu1 %vm1034_vm6, %v7284_v54 }
0x111d   :  { %17271 = vmatprep.subr.bf16.mxu1 %v23384_v22 }
0x1120   :  { %17273 = vmatpush1.bf16.msra.mxu1 %v19141_v16  ;;  %v14479_v25 = vpop.f32.mrb[136].mxu0 }
0x1121   :  { %7462 = vmatprep.subr.mxu1 %v23385_v19  ;;  %v14480_v3 = vpop.f32.mrb[137].mxu0 }
0x1122   :  { %v21628_v24 = vadd.f32 %v14480_v3, %v14479_v25  ;;  %v7682_v25 = vunpack.c.l.bf16 %v7664_v61  ;;  %v7683_v3 = vunpack.c.h.bf16 %v7664_v61 }
0x1124   :  { %7463 = vmatpush1.msra.mxu1 %v19216_v42  ;;  %v14482_v54 = vpop.f32.mrb[138].mxu0 }
0x1125   :  { %7495 = vmatmul.mubr.f32.vlgmr.msra.gmra.mrb[122].mxu1 %v7283_v1  ;;  %17278 = vmatprep.subr.bf16.mxu1 %v19091_v23  ;;  %v14483_v28 = vpop.f32.mrb[139].mxu0 }
0x1126   :  { %17280 = vmatpush3.bf16.msra.mxu1 %v19093_v30  ;;  %13235 = vmatprep.mubr.msk.f32.mxu1 %vm1034_vm6, %v7288_v8  ;;  %v21630_v41 = vadd.f32 %v14483_v28, %v14482_v54  ;;  %v7666_v54 = vld [vmem:[%s23334_s3 + $0x7a0] sm:$0xff] }
0x1127   :  { %17282 = vmatprep.subr.bf16.mxu1 %v19095_v12  ;;  %v7686_v28 = vunpack.c.l.bf16 %v7666_v54 }
0x1128   :  { %v14485_v29 = vpop.f32.mrb[140].mxu0 }
0x1129   :  { %7500 = vmatmul.mubr.f32.gmra.mrb[124].mxu1 %v7287_v62  ;;  %v14486_v1 = vpop.f32.mrb[141].mxu0 }
0x112a   :  { %17284 = vmatpush3.bf16.msra.mxu1 %v19097_v27  ;;  %13236 = vmatprep.mubr.msk.f32.mxu1 %vm1034_vm6, %v7292_v21  ;;  %v21632_v8 = vadd.f32 %v14486_v1, %v14485_v29  ;;  %v7687_v29 = vunpack.c.h.bf16 %v7666_v54  ;;  %v7668_v1 = vld [vmem:[%s23334_s3 + $0x7b0] sm:$0xff] }
0x112b   :  { %17286 = vmatprep.subr.bf16.mxu1 %v19099_v44 }
0x112c   :  { %v14488_v57 = vpop.f32.mrb[142].mxu0 }
0x112d   :  { %7505 = vmatmul.mubr.f32.gmra.mrb[126].mxu1 %v7291_v2  ;;  %v14489_v62 = vpop.f32.mrb[143].mxu0 }
0x112e   :  { %17288 = vmatpush3.bf16.msra.mxu1 %v19101_v20  ;;  %13237 = vmatprep.mubr.msk.f32.mxu1 %vm1034_vm6, %v7296_v7  ;;  %v21634_v21 = vadd.f32 %v14489_v62, %v14488_v57  ;;  %v7690_v57 = vunpack.c.l.bf16 %v7668_v1  ;;  %v7691_v62 = vunpack.c.h.bf16 %v7668_v1 }
0x112f   :  { %17290 = vmatprep.subr.bf16.mxu1 %v19104_v32 }
0x1130   :  { %v14491_v6 = vpop.f32.mrb[144].mxu0 }
0x1131   :  { %7510 = vmatmul.mubr.f32.gmra.mrb[128].mxu1 %v7295_v0  ;;  %v14492_v2 = vpop.f32.mrb[145].mxu0 }
0x1132   :  { %17292 = vmatpush3.bf16.msra.mxu1 %v19106_v33  ;;  %13238 = vmatprep.mubr.msk.f32.mxu1 %vm1034_vm6, %v7300_v55  ;;  %v21636_v7 = vadd.f32 %v14492_v2, %v14491_v6  ;;  %v7670_v6 = vld [vmem:[%s23334_s3 + $0x7c0] sm:$0xff] }
0x1133   :  { %17294 = vmatprep.subr.bf16.mxu1 %v19108_v47  ;;  %v7694_v2 = vunpack.c.l.bf16 %v7670_v6 }
0x1134   :  { %v14494_v13 = vpop.f32.mrb[146].mxu0 }
0x1135   :  { %7515 = vmatmul.mubr.f32.gmra.mrb[130].mxu1 %v7299_v34  ;;  %v14495_v0 = vpop.f32.mrb[147].mxu0 }
0x1136   :  { %17296 = vmatpush3.bf16.msra.mxu1 %v19110_v5  ;;  %13239 = vmatprep.mubr.msk.f32.mxu1 %vm1034_vm6, %v7304_v31  ;;  %v21638_v55 = vadd.f32 %v14495_v0, %v14494_v13  ;;  %v7695_v13 = vunpack.c.h.bf16 %v7670_v6  ;;  %v7672_v0 = vld [vmem:[%s23334_s3 + $0x7d0] sm:$0xff] }
0x1137   :  { %17298 = vmatprep.subr.bf16.mxu1 %v19112_v17 }
0x1138   :  { %v14497_v9 = vpop.f32.mrb[148].mxu0 }
0x1139   :  { %7520 = vmatmul.mubr.f32.gmra.mrb[132].mxu1 %v7303_v59  ;;  %v14498_v34 = vpop.f32.mrb[149].mxu0  ;;  %v7674_v59 = vunpack.c.l.bf16 %v7660_v53 }
0x113a   :  { %17300 = vmatpush3.bf16.msra.mxu1 %v19114_v4  ;;  %13240 = vmatprep.mubr.msk.f32.mxu1 %vm1034_vm6, %v7308_v45  ;;  %v21640_v31 = vadd.f32 %v14498_v34, %v14497_v9  ;;  %v7675_v45 = vunpack.c.h.bf16 %v7660_v53  ;;  %v7698_v9 = vunpack.c.l.bf16 %v7672_v0  ;;  %v7699_v34 = vunpack.c.h.bf16 %v7672_v0 }
0x113b   :  { %17302 = vmatprep.subr.bf16.mxu1 %v19116_v14 }
0x113d   :  { %7525 = vmatmul.mubr.f32.gmra.mrb[134].mxu1 %v7307_v56  ;;  %v7662_v56 = vld [vmem:[%s23334_s3 + $0x780] sm:$0xff] }
0x113e   :  { %17304 = vmatpush3.bf16.msra.mxu1 %v19118_v51  ;;  %7787 = vmatprep.mubr.f32.mxu1 %v7675_v45  ;;  %v7679_v49 = vunpack.c.h.bf16 %v7662_v56  ;;  %v7678_v40 = vunpack.c.l.bf16 %v7662_v56 }
0x113f   :  { %17306 = vmatprep.subr.bf16.mxu1 %v19121_v26 }
0x1142   :  { %17308 = vmatpush3.bf16.msra.mxu1 %v19123_v58 }
0x1143   :  { %17333 = vmatprep.subr.bf16.mxu1 %v23384_v22 }
0x1145   :  { %7788 = vmatmul.mubr.f32.vlgmr.msra.gmra.mrb[136].mxu1 %v7674_v59 }
0x1146   :  { %7792 = vmatprep.mubr.f32.mxu1 %v7679_v49 }
0x1149   :  { %7793 = vmatmul.mubr.f32.gmra.mrb[138].mxu1 %v7678_v40 }
0x114a   :  { %7797 = vmatprep.mubr.f32.mxu1 %v7683_v3 }
0x114d   :  { %7798 = vmatmul.mubr.f32.gmra.mrb[140].mxu1 %v7682_v25 }
0x114e   :  { %7802 = vmatprep.mubr.f32.mxu1 %v7687_v29 }
0x1151   :  { %7803 = vmatmul.mubr.f32.gmra.mrb[142].mxu1 %v7686_v28 }
0x1152   :  { %7807 = vmatprep.mubr.f32.mxu1 %v7691_v62 }
0x1155   :  { %7808 = vmatmul.mubr.f32.gmra.mrb[144].mxu1 %v7690_v57 }
0x1156   :  { %7812 = vmatprep.mubr.f32.mxu1 %v7695_v13 }
0x1159   :  { %7813 = vmatmul.mubr.f32.gmra.mrb[146].mxu1 %v7694_v2 }
0x115a   :  { %7817 = vmatprep.mubr.f32.mxu1 %v7699_v34 }
0x115d   :  { %7818 = vmatmul.mubr.f32.gmra.mrb[148].mxu1 %v7698_v9 }
0x115e   :  { %15746 = vmatprep.mubr.msk.f32.mxu1 %vm17944_vm0, %v23385_v19 }
0x11d6   :  { %v7226_v53 = vpop.f32.mrb[108].mxu1 }
0x11d7   :  { %v21666_v59 = vadd.f32 %v7226_v53, %v21513_v63  ;;  %v15698_v45 = vpop.f32.mrb[109].mxu1 }
0x11da   :  { %v7231_v56 = vpop.f32.mrb[110].mxu1 }
0x11db   :  { %v21669_v49 = vadd.f32 %v7231_v56, %v21516_v35  ;;  %v15701_v40 = vpop.f32.mrb[111].mxu1 }
0x11de   :  { %v7236_v61 = vpop.f32.mrb[112].mxu1 }
0x11df   :  { %v21672_v25 = vadd.f32 %v7236_v61, %v21519_v37  ;;  %v15704_v3 = vpop.f32.mrb[113].mxu1 }
0x11e2   :  { %v7241_v54 = vpop.f32.mrb[114].mxu1 }
0x11e3   :  { %v21675_v28 = vadd.f32 %v7241_v54, %v21522_v15  ;;  %v15707_v29 = vpop.f32.mrb[115].mxu1 }
0x11e6   :  { %v7246_v1 = vpop.f32.mrb[116].mxu1 }
0x11e7   :  { %v21678_v63 = vadd.f32 %v7246_v1, %v21525_v50  ;;  %v15710_v57 = vpop.f32.mrb[117].mxu1 }
0x11ea   :  { %v7251_v62 = vpop.f32.mrb[118].mxu1 }
0x11eb   :  { %v21681_v35 = vadd.f32 %v7251_v62, %v21528_v39  ;;  %v15713_v6 = vpop.f32.mrb[119].mxu1  ;;  %v7663_v62 = vld [vmem:[%s23334_s3 + $0x788] sm:$0xff] }
0x11ec   :  { %v7681_v6 = vunpack.c.h.bf16 %v7663_v62 }
0x11ee   :  { %v7256_v2 = vpop.f32.mrb[120].mxu1 }
0x11ef   :  { %v21684_v37 = vadd.f32 %v7256_v2, %v21531_v52  ;;  %v15716_v13 = vpop.f32.mrb[121].mxu1  ;;  %v7665_v2 = vld [vmem:[%s23334_s3 + $0x798] sm:$0xff] }
0x11f0   :  { %v7680_v13 = vunpack.c.l.bf16 %v7663_v62 }
0x11f8   :  { %v7496_v0 = vpop.f32.mrb[122].mxu1 }
0x11f9   :  { %v7497_v15 = vadd.f32 %v21628_v24, %v7496_v0  ;;  %v7498_v9 = vpop.f32.mrb[123].mxu1  ;;  %v7685_v0 = vunpack.c.h.bf16 %v7665_v2 }
0x11fa   :  { %v7684_v9 = vunpack.c.l.bf16 %v7665_v2 }
0x11fb   :  { %15722 = vmatmul.mubr.msk.f32.vlgmr.msra.gmra.mrb[150].mxu0 %vm568_vm5, %v7497_v15  ;;  %v7667_v15 = vld [vmem:[%s23334_s3 + $0x7a8] sm:$0xff] }
0x11fc   :  { %17311 = vmatpush1.bf16.msra.mxu0 %v19125_v18  ;;  %v7501_v50 = vpop.f32.mrb[124].mxu1  ;;  %15724 = vmatprep.mubr.msk.f32.mxu0 %vm17944_vm0, %v23385_v19 }
0x11fd   :  { %v7502_v39 = vadd.f32 %v21630_v41, %v7501_v50  ;;  %17312 = vmatprep.subr.bf16.mxu0 %v23384_v22  ;;  %v7503_v34 = vpop.f32.mrb[125].mxu1  ;;  %v7689_v50 = vunpack.c.h.bf16 %v7667_v15 }
0x11fe   :  { %v7688_v34 = vunpack.c.l.bf16 %v7667_v15 }
0x11ff   :  { %15725 = vmatmul.mubr.msk.f32.gmra.mrb[152].mxu0 %vm568_vm5, %v7502_v39  ;;  %v7669_v39 = vld [vmem:[%s23334_s3 + $0x7b8] sm:$0xff] }
0x1200   :  { %17314 = vmatpush1.bf16.msra.mxu0 %v19127_v38  ;;  %v7506_v52 = vpop.f32.mrb[126].mxu1  ;;  %15727 = vmatprep.mubr.msk.f32.mxu0 %vm17944_vm0, %v23385_v19 }
0x1201   :  { %v7507_v24 = vadd.f32 %v21632_v8, %v7506_v52  ;;  %17315 = vmatprep.subr.bf16.mxu0 %v23384_v22  ;;  %v7508_v53 = vpop.f32.mrb[127].mxu1  ;;  %v7693_v52 = vunpack.c.h.bf16 %v7669_v39 }
0x1202   :  { %v7692_v53 = vunpack.c.l.bf16 %v7669_v39 }
0x1203   :  { %15728 = vmatmul.mubr.msk.f32.gmra.mrb[154].mxu0 %vm568_vm5, %v7507_v24  ;;  %v7671_v24 = vld [vmem:[%s23334_s3 + $0x7c8] sm:$0xff] }
0x1204   :  { %17317 = vmatpush1.bf16.msra.mxu0 %v19130_v10  ;;  %v7511_v41 = vpop.f32.mrb[128].mxu1  ;;  %15730 = vmatprep.mubr.msk.f32.mxu0 %vm17944_vm0, %v23385_v19 }
0x1205   :  { %v7512_v45 = vadd.f32 %v21634_v21, %v7511_v41  ;;  %17318 = vmatprep.subr.bf16.mxu0 %v23384_v22  ;;  %v7513_v56 = vpop.f32.mrb[129].mxu1  ;;  %v7697_v41 = vunpack.c.h.bf16 %v7671_v24 }
0x1206   :  { %v7696_v56 = vunpack.c.l.bf16 %v7671_v24 }
0x1207   :  { %15731 = vmatmul.mubr.msk.f32.gmra.mrb[156].mxu0 %vm568_vm5, %v7512_v45  ;;  %v7673_v45 = vld [vmem:[%s23334_s3 + $0x7d8] sm:$0xff] }
0x1208   :  { %17320 = vmatpush1.bf16.msra.mxu0 %v19132_v36  ;;  %v7516_v8 = vpop.f32.mrb[130].mxu1  ;;  %15733 = vmatprep.mubr.msk.f32.mxu0 %vm17944_vm0, %v23385_v19 }
0x1209   :  { %v7517_v40 = vadd.f32 %v21636_v7, %v7516_v8  ;;  %17321 = vmatprep.subr.bf16.mxu0 %v23384_v22  ;;  %v7518_v61 = vpop.f32.mrb[131].mxu1  ;;  %v7661_v7 = vld [vmem:[%s23334_s3 + $0x778] sm:$0xff]  ;;  %v7701_v8 = vunpack.c.h.bf16 %v7673_v45 }
0x120a   :  { %v7677_v1 = vunpack.c.h.bf16 %v7661_v7  ;;  %v7923_v61 = vld [vmem:[%s23335_s4 + $0x110] sm:$0xff] }
0x120b   :  { %15734 = vmatmul.mubr.msk.f32.gmra.mrb[158].mxu0 %vm568_vm5, %v7517_v40  ;;  %v7700_v40 = vunpack.c.l.bf16 %v7673_v45  ;;  %v8053_v45 = vld [vmem:[%s23334_s3 + $0x7e0] sm:$0xff] }
0x120c   :  { %17323 = vmatpush1.bf16.msra.mxu0 %v19134_v11  ;;  %v7521_v21 = vpop.f32.mrb[132].mxu1  ;;  %15736 = vmatprep.mubr.msk.f32.mxu0 %vm17944_vm0, %v23385_v19 }
0x120d   :  { %v7522_v3 = vadd.f32 %v21638_v55, %v7521_v21  ;;  %17324 = vmatprep.subr.bf16.mxu0 %v23384_v22  ;;  %v7523_v54 = vpop.f32.mrb[133].mxu1  ;;  %v7924_v21 = vld [vmem:[%s23335_s4 + $0x118] sm:$0xff] }
0x120f   :  { %15737 = vmatmul.mubr.msk.f32.gmra.mrb[160].mxu0 %vm568_vm5, %v7522_v3  ;;  %v17334_v3 = vpack.c.bf16 %v7924_v21, %v7923_v61 }
0x1210   :  { %17326 = vmatpush1.bf16.msra.mxu0 %v19136_v48  ;;  %v7526_v29 = vpop.f32.mrb[134].mxu1  ;;  %15739 = vmatprep.mubr.msk.f32.mxu0 %vm17944_vm0, %v23385_v19 }
0x1211   :  { %v7527_v57 = vadd.f32 %v21640_v31, %v7526_v29  ;;  %17327 = vmatprep.subr.bf16.mxu0 %v23384_v22  ;;  %v7528_v55 = vpop.f32.mrb[135].mxu1  ;;  %v7676_v31 = vunpack.c.l.bf16 %v7661_v7  ;;  %17335 = vmatpush3.bf16.msra.mxu1 %v17334_v3  ;;  %v8057_v3 = vld [vmem:[%s23334_s3 + $0x800] sm:$0xff] }
0x1212   :  { %17368 = vmatprep.subr.bf16.mxu1 %v23384_v22 }
0x1213   :  { %15740 = vmatmul.mubr.msk.f32.gmra.mrb[162].mxu0 %vm568_vm5, %v7527_v57 }
0x1214   :  { %17329 = vmatpush1.bf16.msra.mxu0 %v19139_v60  ;;  %13248 = vmatprep.mubr.msk.f32.mxu0 %vm1034_vm6, %v7677_v1 }
0x1215   :  { %17330 = vmatprep.subr.bf16.mxu0 %v23384_v22 }
0x1218   :  { %17332 = vmatpush1.bf16.msra.mxu0 %v19141_v16  ;;  %v14541_v54 = vpop.f32.mrb[136].mxu1 }
0x1219   :  { %7855 = vmatprep.subr.mxu0 %v23385_v19  ;;  %v14542_v7 = vpop.f32.mrb[137].mxu1 }
0x121a   :  { %v21781_v29 = vadd.f32 %v14542_v7, %v14541_v54  ;;  %v8075_v54 = vunpack.c.l.bf16 %v8057_v3  ;;  %v8076_v7 = vunpack.c.h.bf16 %v8057_v3 }
0x121c   :  { %7856 = vmatpush1.msra.mxu0 %v19216_v42  ;;  %v14544_v1 = vpop.f32.mrb[138].mxu1 }
0x121d   :  { %7888 = vmatmul.mubr.f32.vlgmr.msra.gmra.mrb[164].mxu0 %v7676_v31  ;;  %17337 = vmatprep.subr.bf16.mxu0 %v19091_v23  ;;  %v14545_v57 = vpop.f32.mrb[139].mxu1 }
0x121e   :  { %17339 = vmatpush3.bf16.msra.mxu0 %v19093_v30  ;;  %13249 = vmatprep.mubr.msk.f32.mxu0 %vm1034_vm6, %v7681_v6  ;;  %v21783_v55 = vadd.f32 %v14545_v57, %v14544_v1  ;;  %v8059_v1 = vld [vmem:[%s23334_s3 + $0x810] sm:$0xff] }
0x121f   :  { %17341 = vmatprep.subr.bf16.mxu0 %v19095_v12  ;;  %v8079_v57 = vunpack.c.l.bf16 %v8059_v1 }
0x1220   :  { %v14547_v62 = vpop.f32.mrb[140].mxu1 }
0x1221   :  { %7893 = vmatmul.mubr.f32.gmra.mrb[166].mxu0 %v7680_v13  ;;  %v14548_v31 = vpop.f32.mrb[141].mxu1 }
0x1222   :  { %17343 = vmatpush3.bf16.msra.mxu0 %v19097_v27  ;;  %13250 = vmatprep.mubr.msk.f32.mxu0 %vm1034_vm6, %v7685_v0  ;;  %v21785_v6 = vadd.f32 %v14548_v31, %v14547_v62  ;;  %v8080_v62 = vunpack.c.h.bf16 %v8059_v1  ;;  %v8061_v31 = vld [vmem:[%s23334_s3 + $0x820] sm:$0xff] }
0x1223   :  { %17345 = vmatprep.subr.bf16.mxu0 %v19099_v44 }
0x1224   :  { %v14550_v2 = vpop.f32.mrb[142].mxu1 }
0x1225   :  { %7898 = vmatmul.mubr.f32.gmra.mrb[168].mxu0 %v7684_v9  ;;  %v14551_v13 = vpop.f32.mrb[143].mxu1 }
0x1226   :  { %17347 = vmatpush3.bf16.msra.mxu0 %v19101_v20  ;;  %13251 = vmatprep.mubr.msk.f32.mxu0 %vm1034_vm6, %v7689_v50  ;;  %v21787_v0 = vadd.f32 %v14551_v13, %v14550_v2  ;;  %v8083_v2 = vunpack.c.l.bf16 %v8061_v31  ;;  %v8084_v13 = vunpack.c.h.bf16 %v8061_v31 }
0x1227   :  { %17349 = vmatprep.subr.bf16.mxu0 %v19104_v32 }
0x1228   :  { %v14553_v15 = vpop.f32.mrb[144].mxu1 }
0x1229   :  { %7903 = vmatmul.mubr.f32.gmra.mrb[170].mxu0 %v7688_v34  ;;  %v14554_v9 = vpop.f32.mrb[145].mxu1 }
0x122a   :  { %17351 = vmatpush3.bf16.msra.mxu0 %v19106_v33  ;;  %13252 = vmatprep.mubr.msk.f32.mxu0 %vm1034_vm6, %v7693_v52  ;;  %v21789_v50 = vadd.f32 %v14554_v9, %v14553_v15  ;;  %v8063_v15 = vld [vmem:[%s23334_s3 + $0x830] sm:$0xff] }
0x122b   :  { %17353 = vmatprep.subr.bf16.mxu0 %v19108_v47  ;;  %v8087_v9 = vunpack.c.l.bf16 %v8063_v15 }
0x122c   :  { %v14556_v39 = vpop.f32.mrb[146].mxu1 }
0x122d   :  { %7908 = vmatmul.mubr.f32.gmra.mrb[172].mxu0 %v7692_v53  ;;  %v14557_v34 = vpop.f32.mrb[147].mxu1 }
0x122e   :  { %17355 = vmatpush3.bf16.msra.mxu0 %v19110_v5  ;;  %13253 = vmatprep.mubr.msk.f32.mxu0 %vm1034_vm6, %v7697_v41  ;;  %v21791_v52 = vadd.f32 %v14557_v34, %v14556_v39  ;;  %v8088_v39 = vunpack.c.h.bf16 %v8063_v15  ;;  %v8065_v34 = vld [vmem:[%s23334_s3 + $0x840] sm:$0xff] }
0x122f   :  { %17357 = vmatprep.subr.bf16.mxu0 %v19112_v17 }
0x1230   :  { %v14559_v24 = vpop.f32.mrb[148].mxu1 }
0x1231   :  { %7913 = vmatmul.mubr.f32.gmra.mrb[174].mxu0 %v7696_v56  ;;  %v14560_v53 = vpop.f32.mrb[149].mxu1  ;;  %v8067_v56 = vunpack.c.l.bf16 %v8053_v45 }
0x1232   :  { %17359 = vmatpush3.bf16.msra.mxu0 %v19114_v4  ;;  %13254 = vmatprep.mubr.msk.f32.mxu0 %vm1034_vm6, %v7701_v8  ;;  %v21793_v41 = vadd.f32 %v14560_v53, %v14559_v24  ;;  %v8068_v8 = vunpack.c.h.bf16 %v8053_v45  ;;  %v8091_v24 = vunpack.c.l.bf16 %v8065_v34  ;;  %v8092_v53 = vunpack.c.h.bf16 %v8065_v34 }
0x1233   :  { %17361 = vmatprep.subr.bf16.mxu0 %v19116_v14 }
0x1235   :  { %7918 = vmatmul.mubr.f32.gmra.mrb[176].mxu0 %v7700_v40  ;;  %v8055_v40 = vld [vmem:[%s23334_s3 + $0x7f0] sm:$0xff] }
0x1236   :  { %17363 = vmatpush3.bf16.msra.mxu0 %v19118_v51  ;;  %8180 = vmatprep.mubr.f32.mxu0 %v8068_v8  ;;  %v8072_v61 = vunpack.c.h.bf16 %v8055_v40  ;;  %v8071_v21 = vunpack.c.l.bf16 %v8055_v40 }
0x1237   :  { %17365 = vmatprep.subr.bf16.mxu0 %v19121_v26 }
0x123a   :  { %17367 = vmatpush3.bf16.msra.mxu0 %v19123_v58 }
0x123b   :  { %17392 = vmatprep.subr.bf16.mxu0 %v23384_v22 }
0x123d   :  { %8181 = vmatmul.mubr.f32.vlgmr.msra.gmra.mrb[178].mxu0 %v8067_v56 }
0x123e   :  { %8185 = vmatprep.mubr.f32.mxu0 %v8072_v61 }
0x1241   :  { %8186 = vmatmul.mubr.f32.gmra.mrb[180].mxu0 %v8071_v21 }
0x1242   :  { %8190 = vmatprep.mubr.f32.mxu0 %v8076_v7 }
0x1245   :  { %8191 = vmatmul.mubr.f32.gmra.mrb[182].mxu0 %v8075_v54 }
0x1246   :  { %8195 = vmatprep.mubr.f32.mxu0 %v8080_v62 }
0x1249   :  { %8196 = vmatmul.mubr.f32.gmra.mrb[184].mxu0 %v8079_v57 }
0x124a   :  { %8200 = vmatprep.mubr.f32.mxu0 %v8084_v13 }
0x124d   :  { %8201 = vmatmul.mubr.f32.gmra.mrb[186].mxu0 %v8083_v2 }
0x124e   :  { %8205 = vmatprep.mubr.f32.mxu0 %v8088_v39 }
0x1251   :  { %8206 = vmatmul.mubr.f32.gmra.mrb[188].mxu0 %v8087_v9 }
0x1252   :  { %8210 = vmatprep.mubr.f32.mxu0 %v8092_v53 }
0x1255   :  { %8211 = vmatmul.mubr.f32.gmra.mrb[190].mxu0 %v8091_v24 }
0x1256   :  { %15771 = vmatprep.mubr.msk.f32.mxu0 %vm17944_vm0, %v23385_v19 }
0x12ce   :  { %v7619_v45 = vpop.f32.mrb[150].mxu0 }
0x12cf   :  { %v21819_v56 = vadd.f32 %v7619_v45, %v21666_v59  ;;  %v15723_v8 = vpop.f32.mrb[151].mxu0 }
0x12d2   :  { %v7624_v40 = vpop.f32.mrb[152].mxu0 }
0x12d3   :  { %v21822_v61 = vadd.f32 %v7624_v40, %v21669_v49  ;;  %v15726_v21 = vpop.f32.mrb[153].mxu0 }
0x12d6   :  { %v7629_v3 = vpop.f32.mrb[154].mxu0 }
0x12d7   :  { %v21825_v54 = vadd.f32 %v7629_v3, %v21672_v25  ;;  %v15729_v7 = vpop.f32.mrb[155].mxu0 }
0x12da   :  { %v7634_v1 = vpop.f32.mrb[156].mxu0 }
0x12db   :  { %v21828_v57 = vadd.f32 %v7634_v1, %v21675_v28  ;;  %v15732_v62 = vpop.f32.mrb[157].mxu0 }
0x12de   :  { %v7639_v31 = vpop.f32.mrb[158].mxu0 }
0x12df   :  { %v21831_v59 = vadd.f32 %v7639_v31, %v21678_v63  ;;  %v15735_v2 = vpop.f32.mrb[159].mxu0 }
0x12e2   :  { %v7644_v13 = vpop.f32.mrb[160].mxu0 }
0x12e3   :  { %v21834_v49 = vadd.f32 %v7644_v13, %v21681_v35  ;;  %v15738_v15 = vpop.f32.mrb[161].mxu0  ;;  %v8056_v13 = vld [vmem:[%s23334_s3 + $0x7f8] sm:$0xff] }
0x12e4   :  { %v8074_v15 = vunpack.c.h.bf16 %v8056_v13 }
0x12e6   :  { %v7649_v9 = vpop.f32.mrb[162].mxu0 }
0x12e7   :  { %v21837_v25 = vadd.f32 %v7649_v9, %v21684_v37  ;;  %v15741_v39 = vpop.f32.mrb[163].mxu0  ;;  %v8058_v9 = vld [vmem:[%s23334_s3 + $0x808] sm:$0xff] }
0x12e8   :  { %v8073_v39 = vunpack.c.l.bf16 %v8056_v13 }
0x12f0   :  { %v7889_v34 = vpop.f32.mrb[164].mxu0 }
0x12f1   :  { %v7890_v28 = vadd.f32 %v21781_v29, %v7889_v34  ;;  %v7891_v24 = vpop.f32.mrb[165].mxu0  ;;  %v8078_v34 = vunpack.c.h.bf16 %v8058_v9 }
0x12f2   :  { %v8077_v24 = vunpack.c.l.bf16 %v8058_v9 }
0x12f3   :  { %15747 = vmatmul.mubr.msk.f32.vlgmr.msra.gmra.mrb[150].mxu1 %vm568_vm5, %v7890_v28  ;;  %v8060_v28 = vld [vmem:[%s23334_s3 + $0x818] sm:$0xff] }
0x12f4   :  { %17370 = vmatpush1.bf16.msra.mxu1 %v19125_v18  ;;  %v7894_v63 = vpop.f32.mrb[166].mxu0  ;;  %15749 = vmatprep.mubr.msk.f32.mxu1 %vm17944_vm0, %v23385_v19 }
0x12f5   :  { %v7895_v35 = vadd.f32 %v21783_v55, %v7894_v63  ;;  %17371 = vmatprep.subr.bf16.mxu1 %v23384_v22  ;;  %v7896_v53 = vpop.f32.mrb[167].mxu0  ;;  %v8082_v63 = vunpack.c.h.bf16 %v8060_v28 }
0x12f6   :  { %v8081_v53 = vunpack.c.l.bf16 %v8060_v28 }
0x12f7   :  { %15750 = vmatmul.mubr.msk.f32.gmra.mrb[152].mxu1 %vm568_vm5, %v7895_v35  ;;  %v8062_v35 = vld [vmem:[%s23334_s3 + $0x828] sm:$0xff] }
0x12f8   :  { %17373 = vmatpush1.bf16.msra.mxu1 %v19127_v38  ;;  %v7899_v37 = vpop.f32.mrb[168].mxu0  ;;  %15752 = vmatprep.mubr.msk.f32.mxu1 %vm17944_vm0, %v23385_v19 }
0x12f9   :  { %v7900_v29 = vadd.f32 %v21785_v6, %v7899_v37  ;;  %17374 = vmatprep.subr.bf16.mxu1 %v23384_v22  ;;  %v7901_v45 = vpop.f32.mrb[169].mxu0  ;;  %v8086_v37 = vunpack.c.h.bf16 %v8062_v35 }
0x12fa   :  { %v8085_v45 = vunpack.c.l.bf16 %v8062_v35 }
0x12fb   :  { %15753 = vmatmul.mubr.msk.f32.gmra.mrb[154].mxu1 %vm568_vm5, %v7900_v29  ;;  %v8064_v29 = vld [vmem:[%s23334_s3 + $0x838] sm:$0xff] }
0x12fc   :  { %17376 = vmatpush1.bf16.msra.mxu1 %v19130_v10  ;;  %v7904_v55 = vpop.f32.mrb[170].mxu0  ;;  %15755 = vmatprep.mubr.msk.f32.mxu1 %vm17944_vm0, %v23385_v19 }
0x12fd   :  { %v7905_v8 = vadd.f32 %v21787_v0, %v7904_v55  ;;  %17377 = vmatprep.subr.bf16.mxu1 %v23384_v22  ;;  %v7906_v40 = vpop.f32.mrb[171].mxu0  ;;  %v8090_v55 = vunpack.c.h.bf16 %v8064_v29 }
0x12fe   :  { %v8089_v40 = vunpack.c.l.bf16 %v8064_v29 }
0x12ff   :  { %15756 = vmatmul.mubr.msk.f32.gmra.mrb[156].mxu1 %vm568_vm5, %v7905_v8  ;;  %v8066_v8 = vld [vmem:[%s23334_s3 + $0x848] sm:$0xff] }
0x1300   :  { %17379 = vmatpush1.bf16.msra.mxu1 %v19132_v36  ;;  %v7909_v6 = vpop.f32.mrb[172].mxu0  ;;  %15758 = vmatprep.mubr.msk.f32.mxu1 %vm17944_vm0, %v23385_v19 }
0x1301   :  { %v7910_v21 = vadd.f32 %v21789_v50, %v7909_v6  ;;  %17380 = vmatprep.subr.bf16.mxu1 %v23384_v22  ;;  %v7911_v3 = vpop.f32.mrb[173].mxu0  ;;  %v8054_v50 = vld [vmem:[%s23334_s3 + $0x7e8] sm:$0xff]  ;;  %v8094_v6 = vunpack.c.h.bf16 %v8066_v8 }
0x1302   :  { %v8070_v31 = vunpack.c.h.bf16 %v8054_v50  ;;  %v8316_v3 = vld [vmem:[%s23335_s4 + $0x120] sm:$0xff] }
0x1303   :  { %15759 = vmatmul.mubr.msk.f32.gmra.mrb[158].mxu1 %vm568_vm5, %v7910_v21  ;;  %v8093_v21 = vunpack.c.l.bf16 %v8066_v8  ;;  %v8446_v8 = vld [vmem:[%s23334_s3 + $0x850] sm:$0xff] }
0x1304   :  { %17382 = vmatpush1.bf16.msra.mxu1 %v19134_v11  ;;  %v7914_v0 = vpop.f32.mrb[174].mxu0  ;;  %15761 = vmatprep.mubr.msk.f32.mxu1 %vm17944_vm0, %v23385_v19 }
0x1305   :  { %v7915_v7 = vadd.f32 %v21791_v52, %v7914_v0  ;;  %17383 = vmatprep.subr.bf16.mxu1 %v23384_v22  ;;  %v7916_v1 = vpop.f32.mrb[175].mxu0  ;;  %v8317_v0 = vld [vmem:[%s23335_s4 + $0x128] sm:$0xff] }
0x1307   :  { %15762 = vmatmul.mubr.msk.f32.gmra.mrb[160].mxu1 %vm568_vm5, %v7915_v7  ;;  %v17393_v7 = vpack.c.bf16 %v8317_v0, %v8316_v3 }
0x1308   :  { %17385 = vmatpush1.bf16.msra.mxu1 %v19136_v48  ;;  %v7919_v62 = vpop.f32.mrb[176].mxu0  ;;  %15764 = vmatprep.mubr.msk.f32.mxu1 %vm17944_vm0, %v23385_v19 }
0x1309   :  { %v7920_v2 = vadd.f32 %v21793_v41, %v7919_v62  ;;  %17386 = vmatprep.subr.bf16.mxu1 %v23384_v22  ;;  %v7921_v52 = vpop.f32.mrb[177].mxu0  ;;  %v8069_v41 = vunpack.c.l.bf16 %v8054_v50  ;;  %17394 = vmatpush3.bf16.msra.mxu0 %v17393_v7  ;;  %v8450_v7 = vld [vmem:[%s23334_s3 + $0x870] sm:$0xff] }
0x130a   :  { %17427 = vmatprep.subr.bf16.mxu0 %v23384_v22 }
0x130b   :  { %15765 = vmatmul.mubr.msk.f32.gmra.mrb[162].mxu1 %vm568_vm5, %v7920_v2 }
0x130c   :  { %17388 = vmatpush1.bf16.msra.mxu1 %v19139_v60  ;;  %13262 = vmatprep.mubr.msk.f32.mxu1 %vm1034_vm6, %v8070_v31 }
0x130d   :  { %17389 = vmatprep.subr.bf16.mxu1 %v23384_v22 }
0x1310   :  { %17391 = vmatpush1.bf16.msra.mxu1 %v19141_v16  ;;  %v14603_v1 = vpop.f32.mrb[178].mxu0 }
0x1311   :  { %8248 = vmatprep.subr.mxu1 %v23385_v19  ;;  %v14604_v50 = vpop.f32.mrb[179].mxu0 }
0x1312   :  { %v21934_v62 = vadd.f32 %v14604_v50, %v14603_v1  ;;  %v8468_v1 = vunpack.c.l.bf16 %v8450_v7  ;;  %v8469_v50 = vunpack.c.h.bf16 %v8450_v7 }
0x1314   :  { %8249 = vmatpush1.msra.mxu1 %v19216_v42  ;;  %v14606_v31 = vpop.f32.mrb[180].mxu0 }
0x1315   :  { %8281 = vmatmul.mubr.f32.vlgmr.msra.gmra.mrb[164].mxu1 %v8069_v41  ;;  %17396 = vmatprep.subr.bf16.mxu1 %v19091_v23  ;;  %v14607_v2 = vpop.f32.mrb[181].mxu0 }
0x1316   :  { %17398 = vmatpush3.bf16.msra.mxu1 %v19093_v30  ;;  %13263 = vmatprep.mubr.msk.f32.mxu1 %vm1034_vm6, %v8074_v15  ;;  %v21936_v52 = vadd.f32 %v14607_v2, %v14606_v31  ;;  %v8452_v31 = vld [vmem:[%s23334_s3 + $0x880] sm:$0xff] }
0x1317   :  { %17400 = vmatprep.subr.bf16.mxu1 %v19095_v12  ;;  %v8472_v2 = vunpack.c.l.bf16 %v8452_v31 }
0x1318   :  { %v14609_v13 = vpop.f32.mrb[182].mxu0 }
0x1319   :  { %8286 = vmatmul.mubr.f32.gmra.mrb[166].mxu1 %v8073_v39  ;;  %v14610_v41 = vpop.f32.mrb[183].mxu0 }
0x131a   :  { %17402 = vmatpush3.bf16.msra.mxu1 %v19097_v27  ;;  %13264 = vmatprep.mubr.msk.f32.mxu1 %vm1034_vm6, %v8078_v34  ;;  %v21938_v15 = vadd.f32 %v14610_v41, %v14609_v13  ;;  %v8473_v13 = vunpack.c.h.bf16 %v8452_v31  ;;  %v8454_v41 = vld [vmem:[%s23334_s3 + $0x890] sm:$0xff] }
0x131b   :  { %17404 = vmatprep.subr.bf16.mxu1 %v19099_v44 }
0x131c   :  { %v14612_v9 = vpop.f32.mrb[184].mxu0 }
0x131d   :  { %8291 = vmatmul.mubr.f32.gmra.mrb[168].mxu1 %v8077_v24  ;;  %v14613_v39 = vpop.f32.mrb[185].mxu0 }
0x131e   :  { %17406 = vmatpush3.bf16.msra.mxu1 %v19101_v20  ;;  %13265 = vmatprep.mubr.msk.f32.mxu1 %vm1034_vm6, %v8082_v63  ;;  %v21940_v34 = vadd.f32 %v14613_v39, %v14612_v9  ;;  %v8476_v9 = vunpack.c.l.bf16 %v8454_v41  ;;  %v8477_v39 = vunpack.c.h.bf16 %v8454_v41 }
0x131f   :  { %17408 = vmatprep.subr.bf16.mxu1 %v19104_v32 }
0x1320   :  { %v14615_v28 = vpop.f32.mrb[186].mxu0 }
0x1321   :  { %8296 = vmatmul.mubr.f32.gmra.mrb[170].mxu1 %v8081_v53  ;;  %v14616_v24 = vpop.f32.mrb[187].mxu0 }
0x1322   :  { %17410 = vmatpush3.bf16.msra.mxu1 %v19106_v33  ;;  %13266 = vmatprep.mubr.msk.f32.mxu1 %vm1034_vm6, %v8086_v37  ;;  %v21942_v63 = vadd.f32 %v14616_v24, %v14615_v28  ;;  %v8456_v28 = vld [vmem:[%s23334_s3 + $0x8a0] sm:$0xff] }
0x1323   :  { %17412 = vmatprep.subr.bf16.mxu1 %v19108_v47  ;;  %v8480_v24 = vunpack.c.l.bf16 %v8456_v28 }
0x1324   :  { %v14618_v35 = vpop.f32.mrb[188].mxu0 }
0x1325   :  { %8301 = vmatmul.mubr.f32.gmra.mrb[172].mxu1 %v8085_v45  ;;  %v14619_v53 = vpop.f32.mrb[189].mxu0 }
0x1326   :  { %17414 = vmatpush3.bf16.msra.mxu1 %v19110_v5  ;;  %13267 = vmatprep.mubr.msk.f32.mxu1 %vm1034_vm6, %v8090_v55  ;;  %v21944_v37 = vadd.f32 %v14619_v53, %v14618_v35  ;;  %v8481_v35 = vunpack.c.h.bf16 %v8456_v28  ;;  %v8458_v53 = vld [vmem:[%s23334_s3 + $0x8b0] sm:$0xff] }
0x1327   :  { %17416 = vmatprep.subr.bf16.mxu1 %v19112_v17 }
0x1328   :  { %v14621_v29 = vpop.f32.mrb[190].mxu0 }
0x1329   :  { %8306 = vmatmul.mubr.f32.gmra.mrb[174].mxu1 %v8089_v40  ;;  %v14622_v45 = vpop.f32.mrb[191].mxu0  ;;  %v8460_v40 = vunpack.c.l.bf16 %v8446_v8 }
0x132a   :  { %17418 = vmatpush3.bf16.msra.mxu1 %v19114_v4  ;;  %13268 = vmatprep.mubr.msk.f32.mxu1 %vm1034_vm6, %v8094_v6  ;;  %v21946_v55 = vadd.f32 %v14622_v45, %v14621_v29  ;;  %v8461_v6 = vunpack.c.h.bf16 %v8446_v8  ;;  %v8484_v29 = vunpack.c.l.bf16 %v8458_v53  ;;  %v8485_v45 = vunpack.c.h.bf16 %v8458_v53 }
0x132b   :  { %17420 = vmatprep.subr.bf16.mxu1 %v19116_v14 }
0x132d   :  { %8311 = vmatmul.mubr.f32.gmra.mrb[176].mxu1 %v8093_v21  ;;  %v8448_v21 = vld [vmem:[%s23334_s3 + $0x860] sm:$0xff] }
0x132e   :  { %17422 = vmatpush3.bf16.msra.mxu1 %v19118_v51  ;;  %8573 = vmatprep.mubr.f32.mxu1 %v8461_v6  ;;  %v8465_v3 = vunpack.c.h.bf16 %v8448_v21  ;;  %v8464_v0 = vunpack.c.l.bf16 %v8448_v21 }
0x132f   :  { %17424 = vmatprep.subr.bf16.mxu1 %v19121_v26 }
0x1332   :  { %17426 = vmatpush3.bf16.msra.mxu1 %v19123_v58 }
0x1333   :  { %17451 = vmatprep.subr.bf16.mxu1 %v23384_v22 }
0x1335   :  { %8574 = vmatmul.mubr.f32.vlgmr.msra.gmra.mrb[178].mxu1 %v8460_v40 }
0x1336   :  { %8578 = vmatprep.mubr.f32.mxu1 %v8465_v3 }
0x1339   :  { %8579 = vmatmul.mubr.f32.gmra.mrb[180].mxu1 %v8464_v0 }
0x133a   :  { %8583 = vmatprep.mubr.f32.mxu1 %v8469_v50 }
0x133d   :  { %8584 = vmatmul.mubr.f32.gmra.mrb[182].mxu1 %v8468_v1 }
0x133e   :  { %8588 = vmatprep.mubr.f32.mxu1 %v8473_v13 }
0x1341   :  { %8589 = vmatmul.mubr.f32.gmra.mrb[184].mxu1 %v8472_v2 }
0x1342   :  { %8593 = vmatprep.mubr.f32.mxu1 %v8477_v39 }
0x1345   :  { %8594 = vmatmul.mubr.f32.gmra.mrb[186].mxu1 %v8476_v9 }
0x1346   :  { %8598 = vmatprep.mubr.f32.mxu1 %v8481_v35 }
0x1349   :  { %8599 = vmatmul.mubr.f32.gmra.mrb[188].mxu1 %v8480_v24 }
0x134a   :  { %8603 = vmatprep.mubr.f32.mxu1 %v8485_v45 }
0x134d   :  { %8604 = vmatmul.mubr.f32.gmra.mrb[190].mxu1 %v8484_v29 }
0x134e   :  { %15796 = vmatprep.mubr.msk.f32.mxu1 %vm17944_vm0, %v23385_v19 }
0x13c6   :  { %v8012_v8 = vpop.f32.mrb[150].mxu1 }
0x13c7   :  { %v21972_v40 = vadd.f32 %v8012_v8, %v21819_v56  ;;  %v15748_v6 = vpop.f32.mrb[151].mxu1 }
0x13ca   :  { %v8017_v21 = vpop.f32.mrb[152].mxu1 }
0x13cb   :  { %v21975_v3 = vadd.f32 %v8017_v21, %v21822_v61  ;;  %v15751_v0 = vpop.f32.mrb[153].mxu1 }
0x13ce   :  { %v8022_v7 = vpop.f32.mrb[154].mxu1 }
0x13cf   :  { %v21978_v1 = vadd.f32 %v8022_v7, %v21825_v54  ;;  %v15754_v50 = vpop.f32.mrb[155].mxu1 }
0x13d2   :  { %v8027_v31 = vpop.f32.mrb[156].mxu1 }
0x13d3   :  { %v21981_v2 = vadd.f32 %v8027_v31, %v21828_v57  ;;  %v15757_v13 = vpop.f32.mrb[157].mxu1 }
0x13d6   :  { %v8032_v41 = vpop.f32.mrb[158].mxu1 }
0x13d7   :  { %v21984_v56 = vadd.f32 %v8032_v41, %v21831_v59  ;;  %v15760_v9 = vpop.f32.mrb[159].mxu1 }
0x13da   :  { %v8037_v39 = vpop.f32.mrb[160].mxu1 }
0x13db   :  { %v21987_v61 = vadd.f32 %v8037_v39, %v21834_v49  ;;  %v15763_v28 = vpop.f32.mrb[161].mxu1  ;;  %v8449_v39 = vld [vmem:[%s23334_s3 + $0x868] sm:$0xff] }
0x13dc   :  { %v8467_v28 = vunpack.c.h.bf16 %v8449_v39 }
0x13de   :  { %v8042_v24 = vpop.f32.mrb[162].mxu1 }
0x13df   :  { %v21990_v54 = vadd.f32 %v8042_v24, %v21837_v25  ;;  %v15766_v35 = vpop.f32.mrb[163].mxu1  ;;  %v8451_v24 = vld [vmem:[%s23334_s3 + $0x878] sm:$0xff] }
0x13e0   :  { %v8466_v35 = vunpack.c.l.bf16 %v8449_v39 }
0x13e8   :  { %v8282_v53 = vpop.f32.mrb[164].mxu1 }
0x13e9   :  { %v8283_v57 = vadd.f32 %v21934_v62, %v8282_v53  ;;  %v8284_v29 = vpop.f32.mrb[165].mxu1  ;;  %v8471_v53 = vunpack.c.h.bf16 %v8451_v24 }
0x13ea   :  { %v8470_v29 = vunpack.c.l.bf16 %v8451_v24 }
0x13eb   :  { %15772 = vmatmul.mubr.msk.f32.vlgmr.msra.gmra.mrb[192].mxu0 %vm568_vm5, %v8283_v57  ;;  %v8453_v57 = vld [vmem:[%s23334_s3 + $0x888] sm:$0xff] }
0x13ec   :  { %17429 = vmatpush1.bf16.msra.mxu0 %v19125_v18  ;;  %v8287_v59 = vpop.f32.mrb[166].mxu1  ;;  %15774 = vmatprep.mubr.msk.f32.mxu0 %vm17944_vm0, %v23385_v19 }
0x13ed   :  { %v8288_v49 = vadd.f32 %v21936_v52, %v8287_v59  ;;  %17430 = vmatprep.subr.bf16.mxu0 %v23384_v22  ;;  %v8289_v45 = vpop.f32.mrb[167].mxu1  ;;  %v8475_v59 = vunpack.c.h.bf16 %v8453_v57 }
0x13ee   :  { %v8474_v45 = vunpack.c.l.bf16 %v8453_v57 }
0x13ef   :  { %15775 = vmatmul.mubr.msk.f32.gmra.mrb[194].mxu0 %vm568_vm5, %v8288_v49  ;;  %v8455_v49 = vld [vmem:[%s23334_s3 + $0x898] sm:$0xff] }
0x13f0   :  { %17432 = vmatpush1.bf16.msra.mxu0 %v19127_v38  ;;  %v8292_v25 = vpop.f32.mrb[168].mxu1  ;;  %15777 = vmatprep.mubr.msk.f32.mxu0 %vm17944_vm0, %v23385_v19 }
0x13f1   :  { %v8293_v62 = vadd.f32 %v21938_v15, %v8292_v25  ;;  %17433 = vmatprep.subr.bf16.mxu0 %v23384_v22  ;;  %v8294_v8 = vpop.f32.mrb[169].mxu1  ;;  %v8479_v25 = vunpack.c.h.bf16 %v8455_v49 }
0x13f2   :  { %v8478_v8 = vunpack.c.l.bf16 %v8455_v49 }
0x13f3   :  { %15778 = vmatmul.mubr.msk.f32.gmra.mrb[196].mxu0 %vm568_vm5, %v8293_v62  ;;  %v8457_v62 = vld [vmem:[%s23334_s3 + $0x8a8] sm:$0xff] }
0x13f4   :  { %17435 = vmatpush1.bf16.msra.mxu0 %v19130_v10  ;;  %v8297_v52 = vpop.f32.mrb[170].mxu1  ;;  %15780 = vmatprep.mubr.msk.f32.mxu0 %vm17944_vm0, %v23385_v19 }
0x13f5   :  { %v8298_v6 = vadd.f32 %v21940_v34, %v8297_v52  ;;  %17436 = vmatprep.subr.bf16.mxu0 %v23384_v22  ;;  %v8299_v21 = vpop.f32.mrb[171].mxu1  ;;  %v8483_v52 = vunpack.c.h.bf16 %v8457_v62 }
0x13f6   :  { %v8482_v21 = vunpack.c.l.bf16 %v8457_v62 }
0x13f7   :  { %15781 = vmatmul.mubr.msk.f32.gmra.mrb[198].mxu0 %vm568_vm5, %v8298_v6  ;;  %v8459_v6 = vld [vmem:[%s23334_s3 + $0x8b8] sm:$0xff] }
0x13f8   :  { %17438 = vmatpush1.bf16.msra.mxu0 %v19132_v36  ;;  %v8302_v15 = vpop.f32.mrb[172].mxu1  ;;  %15783 = vmatprep.mubr.msk.f32.mxu0 %vm17944_vm0, %v23385_v19 }
0x13f9   :  { %v8303_v0 = vadd.f32 %v21942_v63, %v8302_v15  ;;  %17439 = vmatprep.subr.bf16.mxu0 %v23384_v22  ;;  %v8304_v7 = vpop.f32.mrb[173].mxu1  ;;  %v8447_v63 = vld [vmem:[%s23334_s3 + $0x858] sm:$0xff]  ;;  %v8487_v15 = vunpack.c.h.bf16 %v8459_v6 }
0x13fa   :  { %v8463_v41 = vunpack.c.h.bf16 %v8447_v63  ;;  %v8709_v7 = vld [vmem:[%s23335_s4 + $0x130] sm:$0xff] }
0x13fb   :  { %15784 = vmatmul.mubr.msk.f32.gmra.mrb[200].mxu0 %vm568_vm5, %v8303_v0  ;;  %v8486_v0 = vunpack.c.l.bf16 %v8459_v6  ;;  %v8839_v6 = vld [vmem:[%s23334_s3 + $0x8c0] sm:$0xff] }
0x13fc   :  { %17441 = vmatpush1.bf16.msra.mxu0 %v19134_v11  ;;  %v8307_v34 = vpop.f32.mrb[174].mxu1  ;;  %15786 = vmatprep.mubr.msk.f32.mxu0 %vm17944_vm0, %v23385_v19 }
0x13fd   :  { %v8308_v50 = vadd.f32 %v21944_v37, %v8307_v34  ;;  %17442 = vmatprep.subr.bf16.mxu0 %v23384_v22  ;;  %v8309_v31 = vpop.f32.mrb[175].mxu1  ;;  %v8710_v34 = vld [vmem:[%s23335_s4 + $0x138] sm:$0xff] }
0x13ff   :  { %15787 = vmatmul.mubr.msk.f32.gmra.mrb[202].mxu0 %vm568_vm5, %v8308_v50  ;;  %v17452_v50 = vpack.c.bf16 %v8710_v34, %v8709_v7 }
0x1400   :  { %17444 = vmatpush1.bf16.msra.mxu0 %v19136_v48  ;;  %v8312_v13 = vpop.f32.mrb[176].mxu1  ;;  %15789 = vmatprep.mubr.msk.f32.mxu0 %vm17944_vm0, %v23385_v19 }
0x1401   :  { %v8313_v9 = vadd.f32 %v21946_v55, %v8312_v13  ;;  %17445 = vmatprep.subr.bf16.mxu0 %v23384_v22  ;;  %v8314_v37 = vpop.f32.mrb[177].mxu1  ;;  %v8462_v55 = vunpack.c.l.bf16 %v8447_v63  ;;  %17453 = vmatpush3.bf16.msra.mxu1 %v17452_v50  ;;  %v8843_v50 = vld [vmem:[%s23334_s3 + $0x8e0] sm:$0xff] }
0x1402   :  { %17486 = vmatprep.subr.bf16.mxu1 %v23384_v22 }
0x1403   :  { %15790 = vmatmul.mubr.msk.f32.gmra.mrb[204].mxu0 %vm568_vm5, %v8313_v9 }
0x1404   :  { %17447 = vmatpush1.bf16.msra.mxu0 %v19139_v60  ;;  %13276 = vmatprep.mubr.msk.f32.mxu0 %vm1034_vm6, %v8463_v41 }
0x1405   :  { %17448 = vmatprep.subr.bf16.mxu0 %v23384_v22 }
0x1408   :  { %17450 = vmatpush1.bf16.msra.mxu0 %v19141_v16  ;;  %v14665_v31 = vpop.f32.mrb[178].mxu1 }
0x1409   :  { %8641 = vmatprep.subr.mxu0 %v23385_v19  ;;  %v14666_v63 = vpop.f32.mrb[179].mxu1 }
0x140a   :  { %v22087_v13 = vadd.f32 %v14666_v63, %v14665_v31  ;;  %v8861_v31 = vunpack.c.l.bf16 %v8843_v50  ;;  %v8862_v63 = vunpack.c.h.bf16 %v8843_v50 }
0x140c   :  { %8642 = vmatpush1.msra.mxu0 %v19216_v42  ;;  %v14668_v41 = vpop.f32.mrb[180].mxu1 }
0x140d   :  { %8674 = vmatmul.mubr.f32.vlgmr.msra.gmra.mrb[206].mxu0 %v8462_v55  ;;  %17455 = vmatprep.subr.bf16.mxu0 %v19091_v23  ;;  %v14669_v9 = vpop.f32.mrb[181].mxu1 }
0x140e   :  { %17457 = vmatpush3.bf16.msra.mxu0 %v19093_v30  ;;  %13277 = vmatprep.mubr.msk.f32.mxu0 %vm1034_vm6, %v8467_v28  ;;  %v22089_v37 = vadd.f32 %v14669_v9, %v14668_v41  ;;  %v8845_v41 = vld [vmem:[%s23334_s3 + $0x8f0] sm:$0xff] }
0x140f   :  { %17459 = vmatprep.subr.bf16.mxu0 %v19095_v12  ;;  %v8865_v9 = vunpack.c.l.bf16 %v8845_v41 }
0x1410   :  { %v14671_v39 = vpop.f32.mrb[182].mxu1 }
0x1411   :  { %8679 = vmatmul.mubr.f32.gmra.mrb[208].mxu0 %v8466_v35  ;;  %v14672_v55 = vpop.f32.mrb[183].mxu1 }
0x1412   :  { %17461 = vmatpush3.bf16.msra.mxu0 %v19097_v27  ;;  %13278 = vmatprep.mubr.msk.f32.mxu0 %vm1034_vm6, %v8471_v53  ;;  %v22091_v28 = vadd.f32 %v14672_v55, %v14671_v39  ;;  %v8866_v39 = vunpack.c.h.bf16 %v8845_v41  ;;  %v8847_v55 = vld [vmem:[%s23334_s3 + $0x900] sm:$0xff] }
0x1413   :  { %17463 = vmatprep.subr.bf16.mxu0 %v19099_v44 }
0x1414   :  { %v14674_v24 = vpop.f32.mrb[184].mxu1 }
0x1415   :  { %8684 = vmatmul.mubr.f32.gmra.mrb[210].mxu0 %v8470_v29  ;;  %v14675_v35 = vpop.f32.mrb[185].mxu1 }
0x1416   :  { %17465 = vmatpush3.bf16.msra.mxu0 %v19101_v20  ;;  %13279 = vmatprep.mubr.msk.f32.mxu0 %vm1034_vm6, %v8475_v59  ;;  %v22093_v53 = vadd.f32 %v14675_v35, %v14674_v24  ;;  %v8869_v24 = vunpack.c.l.bf16 %v8847_v55  ;;  %v8870_v35 = vunpack.c.h.bf16 %v8847_v55 }
0x1417   :  { %17467 = vmatprep.subr.bf16.mxu0 %v19104_v32 }
0x1418   :  { %v14677_v57 = vpop.f32.mrb[186].mxu1 }
0x1419   :  { %8689 = vmatmul.mubr.f32.gmra.mrb[212].mxu0 %v8474_v45  ;;  %v14678_v29 = vpop.f32.mrb[187].mxu1 }
0x141a   :  { %17469 = vmatpush3.bf16.msra.mxu0 %v19106_v33  ;;  %13280 = vmatprep.mubr.msk.f32.mxu0 %vm1034_vm6, %v8479_v25  ;;  %v22095_v59 = vadd.f32 %v14678_v29, %v14677_v57  ;;  %v8849_v57 = vld [vmem:[%s23334_s3 + $0x910] sm:$0xff] }
0x141b   :  { %17471 = vmatprep.subr.bf16.mxu0 %v19108_v47  ;;  %v8873_v29 = vunpack.c.l.bf16 %v8849_v57 }
0x141c   :  { %v14680_v49 = vpop.f32.mrb[188].mxu1 }
0x141d   :  { %8694 = vmatmul.mubr.f32.gmra.mrb[214].mxu0 %v8478_v8  ;;  %v14681_v45 = vpop.f32.mrb[189].mxu1 }
0x141e   :  { %17473 = vmatpush3.bf16.msra.mxu0 %v19110_v5  ;;  %13281 = vmatprep.mubr.msk.f32.mxu0 %vm1034_vm6, %v8483_v52  ;;  %v22097_v25 = vadd.f32 %v14681_v45, %v14680_v49  ;;  %v8874_v49 = vunpack.c.h.bf16 %v8849_v57  ;;  %v8851_v45 = vld [vmem:[%s23334_s3 + $0x920] sm:$0xff] }
0x141f   :  { %17475 = vmatprep.subr.bf16.mxu0 %v19112_v17 }
0x1420   :  { %v14683_v62 = vpop.f32.mrb[190].mxu1 }
0x1421   :  { %8699 = vmatmul.mubr.f32.gmra.mrb[216].mxu0 %v8482_v21  ;;  %v14684_v8 = vpop.f32.mrb[191].mxu1  ;;  %v8853_v21 = vunpack.c.l.bf16 %v8839_v6 }
0x1422   :  { %17477 = vmatpush3.bf16.msra.mxu0 %v19114_v4  ;;  %13282 = vmatprep.mubr.msk.f32.mxu0 %vm1034_vm6, %v8487_v15  ;;  %v22099_v52 = vadd.f32 %v14684_v8, %v14683_v62  ;;  %v8854_v15 = vunpack.c.h.bf16 %v8839_v6  ;;  %v8877_v62 = vunpack.c.l.bf16 %v8851_v45  ;;  %v8878_v8 = vunpack.c.h.bf16 %v8851_v45 }
0x1423   :  { %17479 = vmatprep.subr.bf16.mxu0 %v19116_v14 }
0x1425   :  { %8704 = vmatmul.mubr.f32.gmra.mrb[218].mxu0 %v8486_v0  ;;  %v8841_v0 = vld [vmem:[%s23334_s3 + $0x8d0] sm:$0xff] }
0x1426   :  { %17481 = vmatpush3.bf16.msra.mxu0 %v19118_v51  ;;  %8966 = vmatprep.mubr.f32.mxu0 %v8854_v15  ;;  %v8858_v7 = vunpack.c.h.bf16 %v8841_v0  ;;  %v8857_v34 = vunpack.c.l.bf16 %v8841_v0 }
0x1427   :  { %17483 = vmatprep.subr.bf16.mxu0 %v19121_v26 }
0x142a   :  { %17485 = vmatpush3.bf16.msra.mxu0 %v19123_v58 }
0x142b   :  { %17510 = vmatprep.subr.bf16.mxu0 %v23384_v22 }
0x142d   :  { %8967 = vmatmul.mubr.f32.vlgmr.msra.gmra.mrb[220].mxu0 %v8853_v21 }
0x142e   :  { %8971 = vmatprep.mubr.f32.mxu0 %v8858_v7 }
0x1431   :  { %8972 = vmatmul.mubr.f32.gmra.mrb[222].mxu0 %v8857_v34 }
0x1432   :  { %8976 = vmatprep.mubr.f32.mxu0 %v8862_v63 }
0x1435   :  { %8977 = vmatmul.mubr.f32.gmra.mrb[224].mxu0 %v8861_v31 }
0x1436   :  { %8981 = vmatprep.mubr.f32.mxu0 %v8866_v39 }
0x1439   :  { %8982 = vmatmul.mubr.f32.gmra.mrb[226].mxu0 %v8865_v9 }
0x143a   :  { %8986 = vmatprep.mubr.f32.mxu0 %v8870_v35 }
0x143d   :  { %8987 = vmatmul.mubr.f32.gmra.mrb[228].mxu0 %v8869_v24 }
0x143e   :  { %8991 = vmatprep.mubr.f32.mxu0 %v8874_v49 }
0x1441   :  { %8992 = vmatmul.mubr.f32.gmra.mrb[230].mxu0 %v8873_v29 }
0x1442   :  { %8996 = vmatprep.mubr.f32.mxu0 %v8878_v8 }
0x1445   :  { %8997 = vmatmul.mubr.f32.gmra.mrb[232].mxu0 %v8877_v62 }
0x1446   :  { %15821 = vmatprep.mubr.msk.f32.mxu0 %vm17944_vm0, %v23385_v19 }
0x14be   :  { %v8405_v6 = vpop.f32.mrb[192].mxu0 }
0x14bf   :  { %v22125_v21 = vadd.f32 %v8405_v6, %v21972_v40  ;;  %v15773_v15 = vpop.f32.mrb[193].mxu0 }
0x14c2   :  { %v8410_v0 = vpop.f32.mrb[194].mxu0 }
0x14c3   :  { %v22128_v7 = vadd.f32 %v8410_v0, %v21975_v3  ;;  %v15776_v34 = vpop.f32.mrb[195].mxu0 }
0x14c6   :  { %v8415_v50 = vpop.f32.mrb[196].mxu0 }
0x14c7   :  { %v22131_v31 = vadd.f32 %v8415_v50, %v21978_v1  ;;  %v15779_v63 = vpop.f32.mrb[197].mxu0 }
0x14ca   :  { %v8420_v41 = vpop.f32.mrb[198].mxu0 }
0x14cb   :  { %v22134_v9 = vadd.f32 %v8420_v41, %v21981_v2  ;;  %v15782_v39 = vpop.f32.mrb[199].mxu0 }
0x14ce   :  { %v8425_v55 = vpop.f32.mrb[200].mxu0 }
0x14cf   :  { %v22137_v40 = vadd.f32 %v8425_v55, %v21984_v56  ;;  %v15785_v24 = vpop.f32.mrb[201].mxu0 }
0x14d2   :  { %v8430_v35 = vpop.f32.mrb[202].mxu0 }
0x14d3   :  { %v22140_v3 = vadd.f32 %v8430_v35, %v21987_v61  ;;  %v15788_v57 = vpop.f32.mrb[203].mxu0  ;;  %v8842_v35 = vld [vmem:[%s23334_s3 + $0x8d8] sm:$0xff] }
0x14d4   :  { %v8860_v57 = vunpack.c.h.bf16 %v8842_v35 }
0x14d6   :  { %v8435_v29 = vpop.f32.mrb[204].mxu0 }
0x14d7   :  { %v22143_v1 = vadd.f32 %v8435_v29, %v21990_v54  ;;  %v15791_v49 = vpop.f32.mrb[205].mxu0  ;;  %v8844_v29 = vld [vmem:[%s23334_s3 + $0x8e8] sm:$0xff] }
0x14d8   :  { %v8859_v49 = vunpack.c.l.bf16 %v8842_v35 }
0x14e0   :  { %v8675_v45 = vpop.f32.mrb[206].mxu0 }
0x14e1   :  { %v8676_v2 = vadd.f32 %v22087_v13, %v8675_v45  ;;  %v8677_v62 = vpop.f32.mrb[207].mxu0  ;;  %v8864_v45 = vunpack.c.h.bf16 %v8844_v29 }
0x14e2   :  { %v8863_v62 = vunpack.c.l.bf16 %v8844_v29 }
0x14e3   :  { %15797 = vmatmul.mubr.msk.f32.vlgmr.msra.gmra.mrb[192].mxu1 %vm568_vm5, %v8676_v2  ;;  %v8846_v2 = vld [vmem:[%s23334_s3 + $0x8f8] sm:$0xff] }
0x14e4   :  { %17488 = vmatpush1.bf16.msra.mxu1 %v19125_v18  ;;  %v8680_v56 = vpop.f32.mrb[208].mxu0  ;;  %15799 = vmatprep.mubr.msk.f32.mxu1 %vm17944_vm0, %v23385_v19 }
0x14e5   :  { %v8681_v61 = vadd.f32 %v22089_v37, %v8680_v56  ;;  %17489 = vmatprep.subr.bf16.mxu1 %v23384_v22  ;;  %v8682_v8 = vpop.f32.mrb[209].mxu0  ;;  %v8868_v56 = vunpack.c.h.bf16 %v8846_v2 }
0x14e6   :  { %v8867_v8 = vunpack.c.l.bf16 %v8846_v2 }
0x14e7   :  { %15800 = vmatmul.mubr.msk.f32.gmra.mrb[194].mxu1 %vm568_vm5, %v8681_v61  ;;  %v8848_v61 = vld [vmem:[%s23334_s3 + $0x908] sm:$0xff] }
0x14e8   :  { %17491 = vmatpush1.bf16.msra.mxu1 %v19127_v38  ;;  %v8685_v54 = vpop.f32.mrb[210].mxu0  ;;  %15802 = vmatprep.mubr.msk.f32.mxu1 %vm17944_vm0, %v23385_v19 }
0x14e9   :  { %v8686_v13 = vadd.f32 %v22091_v28, %v8685_v54  ;;  %17492 = vmatprep.subr.bf16.mxu1 %v23384_v22  ;;  %v8687_v6 = vpop.f32.mrb[211].mxu0  ;;  %v8872_v54 = vunpack.c.h.bf16 %v8848_v61 }
0x14ea   :  { %v8871_v6 = vunpack.c.l.bf16 %v8848_v61 }
0x14eb   :  { %15803 = vmatmul.mubr.msk.f32.gmra.mrb[196].mxu1 %vm568_vm5, %v8686_v13  ;;  %v8850_v13 = vld [vmem:[%s23334_s3 + $0x918] sm:$0xff] }
0x14ec   :  { %17494 = vmatpush1.bf16.msra.mxu1 %v19130_v10  ;;  %v8690_v37 = vpop.f32.mrb[212].mxu0  ;;  %15805 = vmatprep.mubr.msk.f32.mxu1 %vm17944_vm0, %v23385_v19 }
0x14ed   :  { %v8691_v15 = vadd.f32 %v22093_v53, %v8690_v37  ;;  %17495 = vmatprep.subr.bf16.mxu1 %v23384_v22  ;;  %v8692_v0 = vpop.f32.mrb[213].mxu0  ;;  %v8876_v37 = vunpack.c.h.bf16 %v8850_v13 }
0x14ee   :  { %v8875_v0 = vunpack.c.l.bf16 %v8850_v13 }
0x14ef   :  { %15806 = vmatmul.mubr.msk.f32.gmra.mrb[198].mxu1 %vm568_vm5, %v8691_v15  ;;  %v8852_v15 = vld [vmem:[%s23334_s3 + $0x928] sm:$0xff] }
0x14f0   :  { %17497 = vmatpush1.bf16.msra.mxu1 %v19132_v36  ;;  %v8695_v28 = vpop.f32.mrb[214].mxu0  ;;  %15808 = vmatprep.mubr.msk.f32.mxu1 %vm17944_vm0, %v23385_v19 }
0x14f1   :  { %v8696_v34 = vadd.f32 %v22095_v59, %v8695_v28  ;;  %17498 = vmatprep.subr.bf16.mxu1 %v23384_v22  ;;  %v8697_v50 = vpop.f32.mrb[215].mxu0  ;;  %v8840_v59 = vld [vmem:[%s23334_s3 + $0x8c8] sm:$0xff]  ;;  %v8880_v28 = vunpack.c.h.bf16 %v8852_v15 }
0x14f2   :  { %v8856_v55 = vunpack.c.h.bf16 %v8840_v59  ;;  %v9102_v50 = vld [vmem:[%s23335_s4 + $0x140] sm:$0xff] }
0x14f3   :  { %15809 = vmatmul.mubr.msk.f32.gmra.mrb[200].mxu1 %vm568_vm5, %v8696_v34  ;;  %v8879_v34 = vunpack.c.l.bf16 %v8852_v15  ;;  %v9232_v15 = vld [vmem:[%s23334_s3 + $0x930] sm:$0xff] }
0x14f4   :  { %17500 = vmatpush1.bf16.msra.mxu1 %v19134_v11  ;;  %v8700_v53 = vpop.f32.mrb[216].mxu0  ;;  %15811 = vmatprep.mubr.msk.f32.mxu1 %vm17944_vm0, %v23385_v19 }
0x14f5   :  { %v8701_v63 = vadd.f32 %v22097_v25, %v8700_v53  ;;  %17501 = vmatprep.subr.bf16.mxu1 %v23384_v22  ;;  %v8702_v41 = vpop.f32.mrb[217].mxu0  ;;  %v9103_v53 = vld [vmem:[%s23335_s4 + $0x148] sm:$0xff] }
0x14f7   :  { %15812 = vmatmul.mubr.msk.f32.gmra.mrb[202].mxu1 %vm568_vm5, %v8701_v63  ;;  %v17511_v63 = vpack.c.bf16 %v9103_v53, %v9102_v50 }
0x14f8   :  { %17503 = vmatpush1.bf16.msra.mxu1 %v19136_v48  ;;  %v8705_v39 = vpop.f32.mrb[218].mxu0  ;;  %15814 = vmatprep.mubr.msk.f32.mxu1 %vm17944_vm0, %v23385_v19 }
0x14f9   :  { %v8706_v24 = vadd.f32 %v22099_v52, %v8705_v39  ;;  %17504 = vmatprep.subr.bf16.mxu1 %v23384_v22  ;;  %v8707_v25 = vpop.f32.mrb[219].mxu0  ;;  %v8855_v52 = vunpack.c.l.bf16 %v8840_v59  ;;  %17512 = vmatpush3.bf16.msra.mxu0 %v17511_v63  ;;  %v9236_v63 = vld [vmem:[%s23334_s3 + $0x950] sm:$0xff] }
0x14fa   :  { %17545 = vmatprep.subr.bf16.mxu0 %v23384_v22 }
0x14fb   :  { %15815 = vmatmul.mubr.msk.f32.gmra.mrb[204].mxu1 %vm568_vm5, %v8706_v24 }
0x14fc   :  { %17506 = vmatpush1.bf16.msra.mxu1 %v19139_v60  ;;  %13290 = vmatprep.mubr.msk.f32.mxu1 %vm1034_vm6, %v8856_v55 }
0x14fd   :  { %17507 = vmatprep.subr.bf16.mxu1 %v23384_v22 }
0x1500   :  { %17509 = vmatpush1.bf16.msra.mxu1 %v19141_v16  ;;  %v14727_v41 = vpop.f32.mrb[220].mxu0 }
0x1501   :  { %9034 = vmatprep.subr.mxu1 %v23385_v19  ;;  %v14728_v59 = vpop.f32.mrb[221].mxu0 }
0x1502   :  { %v22240_v39 = vadd.f32 %v14728_v59, %v14727_v41  ;;  %v9254_v41 = vunpack.c.l.bf16 %v9236_v63  ;;  %v9255_v59 = vunpack.c.h.bf16 %v9236_v63 }
0x1504   :  { %9035 = vmatpush1.msra.mxu1 %v19216_v42  ;;  %v14730_v55 = vpop.f32.mrb[222].mxu0 }
0x1505   :  { %9067 = vmatmul.mubr.f32.vlgmr.msra.gmra.mrb[206].mxu1 %v8855_v52  ;;  %17514 = vmatprep.subr.bf16.mxu1 %v19091_v23  ;;  %v14731_v24 = vpop.f32.mrb[223].mxu0 }
0x1506   :  { %17516 = vmatpush3.bf16.msra.mxu1 %v19093_v30  ;;  %13291 = vmatprep.mubr.msk.f32.mxu1 %vm1034_vm6, %v8860_v57  ;;  %v22242_v25 = vadd.f32 %v14731_v24, %v14730_v55  ;;  %v9238_v55 = vld [vmem:[%s23334_s3 + $0x960] sm:$0xff] }
0x1507   :  { %17518 = vmatprep.subr.bf16.mxu1 %v19095_v12  ;;  %v9258_v24 = vunpack.c.l.bf16 %v9238_v55 }
0x1508   :  { %v14733_v35 = vpop.f32.mrb[224].mxu0 }
0x1509   :  { %9072 = vmatmul.mubr.f32.gmra.mrb[208].mxu1 %v8859_v49  ;;  %v14734_v52 = vpop.f32.mrb[225].mxu0 }
0x150a   :  { %17520 = vmatpush3.bf16.msra.mxu1 %v19097_v27  ;;  %13292 = vmatprep.mubr.msk.f32.mxu1 %vm1034_vm6, %v8864_v45  ;;  %v22244_v57 = vadd.f32 %v14734_v52, %v14733_v35  ;;  %v9259_v35 = vunpack.c.h.bf16 %v9238_v55  ;;  %v9240_v52 = vld [vmem:[%s23334_s3 + $0x970] sm:$0xff] }
0x150b   :  { %17522 = vmatprep.subr.bf16.mxu1 %v19099_v44 }
0x150c   :  { %v14736_v29 = vpop.f32.mrb[226].mxu0 }
0x150d   :  { %9077 = vmatmul.mubr.f32.gmra.mrb[210].mxu1 %v8863_v62  ;;  %v14737_v49 = vpop.f32.mrb[227].mxu0 }
0x150e   :  { %17524 = vmatpush3.bf16.msra.mxu1 %v19101_v20  ;;  %13293 = vmatprep.mubr.msk.f32.mxu1 %vm1034_vm6, %v8868_v56  ;;  %v22246_v45 = vadd.f32 %v14737_v49, %v14736_v29  ;;  %v9262_v29 = vunpack.c.l.bf16 %v9240_v52  ;;  %v9263_v49 = vunpack.c.h.bf16 %v9240_v52 }
0x150f   :  { %17526 = vmatprep.subr.bf16.mxu1 %v19104_v32 }
0x1510   :  { %v14739_v2 = vpop.f32.mrb[228].mxu0 }
0x1511   :  { %9082 = vmatmul.mubr.f32.gmra.mrb[212].mxu1 %v8867_v8  ;;  %v14740_v62 = vpop.f32.mrb[229].mxu0 }
0x1512   :  { %17528 = vmatpush3.bf16.msra.mxu1 %v19106_v33  ;;  %13294 = vmatprep.mubr.msk.f32.mxu1 %vm1034_vm6, %v8872_v54  ;;  %v22248_v56 = vadd.f32 %v14740_v62, %v14739_v2  ;;  %v9242_v2 = vld [vmem:[%s23334_s3 + $0x980] sm:$0xff] }
0x1513   :  { %17530 = vmatprep.subr.bf16.mxu1 %v19108_v47  ;;  %v9266_v62 = vunpack.c.l.bf16 %v9242_v2 }
0x1514   :  { %v14742_v61 = vpop.f32.mrb[230].mxu0 }
0x1515   :  { %9087 = vmatmul.mubr.f32.gmra.mrb[214].mxu1 %v8871_v6  ;;  %v14743_v8 = vpop.f32.mrb[231].mxu0 }
0x1516   :  { %17532 = vmatpush3.bf16.msra.mxu1 %v19110_v5  ;;  %13295 = vmatprep.mubr.msk.f32.mxu1 %vm1034_vm6, %v8876_v37  ;;  %v22250_v54 = vadd.f32 %v14743_v8, %v14742_v61  ;;  %v9267_v61 = vunpack.c.h.bf16 %v9242_v2  ;;  %v9244_v8 = vld [vmem:[%s23334_s3 + $0x990] sm:$0xff] }
0x1517   :  { %17534 = vmatprep.subr.bf16.mxu1 %v19112_v17 }
0x1518   :  { %v14745_v13 = vpop.f32.mrb[232].mxu0 }
0x1519   :  { %9092 = vmatmul.mubr.f32.gmra.mrb[216].mxu1 %v8875_v0  ;;  %v14746_v6 = vpop.f32.mrb[233].mxu0  ;;  %v9246_v0 = vunpack.c.l.bf16 %v9232_v15 }
0x151a   :  { %17536 = vmatpush3.bf16.msra.mxu1 %v19114_v4  ;;  %13296 = vmatprep.mubr.msk.f32.mxu1 %vm1034_vm6, %v8880_v28  ;;  %v22252_v37 = vadd.f32 %v14746_v6, %v14745_v13  ;;  %v9247_v28 = vunpack.c.h.bf16 %v9232_v15  ;;  %v9270_v13 = vunpack.c.l.bf16 %v9244_v8  ;;  %v9271_v6 = vunpack.c.h.bf16 %v9244_v8 }
0x151b   :  { %17538 = vmatprep.subr.bf16.mxu1 %v19116_v14 }
0x151d   :  { %9097 = vmatmul.mubr.f32.gmra.mrb[218].mxu1 %v8879_v34  ;;  %v9234_v34 = vld [vmem:[%s23334_s3 + $0x940] sm:$0xff] }
0x151e   :  { %17540 = vmatpush3.bf16.msra.mxu1 %v19118_v51  ;;  %9359 = vmatprep.mubr.f32.mxu1 %v9247_v28  ;;  %v9251_v50 = vunpack.c.h.bf16 %v9234_v34  ;;  %v9250_v53 = vunpack.c.l.bf16 %v9234_v34 }
0x151f   :  { %17542 = vmatprep.subr.bf16.mxu1 %v19121_v26 }
0x1522   :  { %17544 = vmatpush3.bf16.msra.mxu1 %v19123_v58 }
0x1523   :  { %17569 = vmatprep.subr.bf16.mxu1 %v23384_v22 }
0x1525   :  { %9360 = vmatmul.mubr.f32.vlgmr.msra.gmra.mrb[220].mxu1 %v9246_v0 }
0x1526   :  { %9364 = vmatprep.mubr.f32.mxu1 %v9251_v50 }
0x1529   :  { %9365 = vmatmul.mubr.f32.gmra.mrb[222].mxu1 %v9250_v53 }
0x152a   :  { %9369 = vmatprep.mubr.f32.mxu1 %v9255_v59 }
0x152d   :  { %9370 = vmatmul.mubr.f32.gmra.mrb[224].mxu1 %v9254_v41 }
0x152e   :  { %9374 = vmatprep.mubr.f32.mxu1 %v9259_v35 }
0x1531   :  { %9375 = vmatmul.mubr.f32.gmra.mrb[226].mxu1 %v9258_v24 }
0x1532   :  { %9379 = vmatprep.mubr.f32.mxu1 %v9263_v49 }
0x1535   :  { %9380 = vmatmul.mubr.f32.gmra.mrb[228].mxu1 %v9262_v29 }
0x1536   :  { %9384 = vmatprep.mubr.f32.mxu1 %v9267_v61 }
0x1539   :  { %9385 = vmatmul.mubr.f32.gmra.mrb[230].mxu1 %v9266_v62 }
0x153a   :  { %9389 = vmatprep.mubr.f32.mxu1 %v9271_v6 }
0x153d   :  { %9390 = vmatmul.mubr.f32.gmra.mrb[232].mxu1 %v9270_v13 }
0x153e   :  { %15846 = vmatprep.mubr.msk.f32.mxu1 %vm17944_vm0, %v23385_v19 }
0x15b6   :  { %v8798_v15 = vpop.f32.mrb[192].mxu1 }
0x15b7   :  { %v22278_v0 = vadd.f32 %v8798_v15, %v22125_v21  ;;  %v15798_v28 = vpop.f32.mrb[193].mxu1 }
0x15ba   :  { %v8803_v34 = vpop.f32.mrb[194].mxu1 }
0x15bb   :  { %v22281_v50 = vadd.f32 %v8803_v34, %v22128_v7  ;;  %v15801_v53 = vpop.f32.mrb[195].mxu1 }
0x15be   :  { %v8808_v63 = vpop.f32.mrb[196].mxu1 }
0x15bf   :  { %v22284_v41 = vadd.f32 %v8808_v63, %v22131_v31  ;;  %v15804_v59 = vpop.f32.mrb[197].mxu1 }
0x15c2   :  { %v8813_v55 = vpop.f32.mrb[198].mxu1 }
0x15c3   :  { %v22287_v24 = vadd.f32 %v8813_v55, %v22134_v9  ;;  %v15807_v35 = vpop.f32.mrb[199].mxu1 }
0x15c6   :  { %v8818_v52 = vpop.f32.mrb[200].mxu1 }
0x15c7   :  { %v22290_v21 = vadd.f32 %v8818_v52, %v22137_v40  ;;  %v15810_v29 = vpop.f32.mrb[201].mxu1 }
0x15ca   :  { %v8823_v49 = vpop.f32.mrb[202].mxu1 }
0x15cb   :  { %v22293_v7 = vadd.f32 %v8823_v49, %v22140_v3  ;;  %v15813_v2 = vpop.f32.mrb[203].mxu1  ;;  %v9235_v49 = vld [vmem:[%s23334_s3 + $0x948] sm:$0xff] }
0x15cc   :  { %v9253_v2 = vunpack.c.h.bf16 %v9235_v49 }
0x15ce   :  { %v8828_v62 = vpop.f32.mrb[204].mxu1 }
0x15cf   :  { %v22296_v31 = vadd.f32 %v8828_v62, %v22143_v1  ;;  %v15816_v61 = vpop.f32.mrb[205].mxu1  ;;  %v9237_v62 = vld [vmem:[%s23334_s3 + $0x958] sm:$0xff] }
0x15d0   :  { %v9252_v61 = vunpack.c.l.bf16 %v9235_v49 }
0x15d8   :  { %v9068_v8 = vpop.f32.mrb[206].mxu1 }
0x15d9   :  { %v9069_v9 = vadd.f32 %v22240_v39, %v9068_v8  ;;  %v9070_v13 = vpop.f32.mrb[207].mxu1  ;;  %v9257_v8 = vunpack.c.h.bf16 %v9237_v62 }
0x15da   :  { %v9256_v13 = vunpack.c.l.bf16 %v9237_v62 }
0x15db   :  { %15822 = vmatmul.mubr.msk.f32.vlgmr.msra.gmra.mrb[234].mxu0 %vm568_vm5, %v9069_v9  ;;  %v9239_v9 = vld [vmem:[%s23334_s3 + $0x968] sm:$0xff] }
0x15dc   :  { %17547 = vmatpush1.bf16.msra.mxu0 %v19125_v18  ;;  %v9073_v40 = vpop.f32.mrb[208].mxu1  ;;  %15824 = vmatprep.mubr.msk.f32.mxu0 %vm17944_vm0, %v23385_v19 }
0x15dd   :  { %v9074_v3 = vadd.f32 %v22242_v25, %v9073_v40  ;;  %17548 = vmatprep.subr.bf16.mxu0 %v23384_v22  ;;  %v9075_v6 = vpop.f32.mrb[209].mxu1  ;;  %v9261_v40 = vunpack.c.h.bf16 %v9239_v9 }
0x15de   :  { %v9260_v6 = vunpack.c.l.bf16 %v9239_v9 }
0x15df   :  { %15825 = vmatmul.mubr.msk.f32.gmra.mrb[236].mxu0 %vm568_vm5, %v9074_v3  ;;  %v9241_v3 = vld [vmem:[%s23334_s3 + $0x978] sm:$0xff] }
0x15e0   :  { %17550 = vmatpush1.bf16.msra.mxu0 %v19127_v38  ;;  %v9078_v1 = vpop.f32.mrb[210].mxu1  ;;  %15827 = vmatprep.mubr.msk.f32.mxu0 %vm17944_vm0, %v23385_v19 }
0x15e1   :  { %v9079_v39 = vadd.f32 %v22244_v57, %v9078_v1  ;;  %17551 = vmatprep.subr.bf16.mxu0 %v23384_v22  ;;  %v9080_v15 = vpop.f32.mrb[211].mxu1  ;;  %v9265_v1 = vunpack.c.h.bf16 %v9241_v3 }
0x15e2   :  { %v9264_v15 = vunpack.c.l.bf16 %v9241_v3 }
0x15e3   :  { %15828 = vmatmul.mubr.msk.f32.gmra.mrb[238].mxu0 %vm568_vm5, %v9079_v39  ;;  %v9243_v39 = vld [vmem:[%s23334_s3 + $0x988] sm:$0xff] }
0x15e4   :  { %17553 = vmatpush1.bf16.msra.mxu0 %v19130_v10  ;;  %v9083_v25 = vpop.f32.mrb[212].mxu1  ;;  %15830 = vmatprep.mubr.msk.f32.mxu0 %vm17944_vm0, %v23385_v19 }
0x15e5   :  { %v9084_v28 = vadd.f32 %v22246_v45, %v9083_v25  ;;  %17554 = vmatprep.subr.bf16.mxu0 %v23384_v22  ;;  %v9085_v34 = vpop.f32.mrb[213].mxu1  ;;  %v9269_v25 = vunpack.c.h.bf16 %v9243_v39 }
0x15e6   :  { %v9268_v34 = vunpack.c.l.bf16 %v9243_v39 }
0x15e7   :  { %15831 = vmatmul.mubr.msk.f32.gmra.mrb[240].mxu0 %vm568_vm5, %v9084_v28  ;;  %v9245_v28 = vld [vmem:[%s23334_s3 + $0x998] sm:$0xff] }
0x15e8   :  { %17556 = vmatpush1.bf16.msra.mxu0 %v19132_v36  ;;  %v9088_v57 = vpop.f32.mrb[214].mxu1  ;;  %15833 = vmatprep.mubr.msk.f32.mxu0 %vm17944_vm0, %v23385_v19 }
0x15e9   :  { %v9089_v53 = vadd.f32 %v22248_v56, %v9088_v57  ;;  %17557 = vmatprep.subr.bf16.mxu0 %v23384_v22  ;;  %v9090_v63 = vpop.f32.mrb[215].mxu1  ;;  %v9233_v56 = vld [vmem:[%s23334_s3 + $0x938] sm:$0xff]  ;;  %v9273_v57 = vunpack.c.h.bf16 %v9245_v28 }
0x15ea   :  { %v9249_v52 = vunpack.c.h.bf16 %v9233_v56  ;;  %v9495_v63 = vld [vmem:[%s23335_s4 + $0x150] sm:$0xff] }
0x15eb   :  { %15834 = vmatmul.mubr.msk.f32.gmra.mrb[242].mxu0 %vm568_vm5, %v9089_v53  ;;  %v9272_v53 = vunpack.c.l.bf16 %v9245_v28  ;;  %v9625_v28 = vld [vmem:[%s23334_s3 + $0x9a0] sm:$0xff] }
0x15ec   :  { %17559 = vmatpush1.bf16.msra.mxu0 %v19134_v11  ;;  %v9093_v45 = vpop.f32.mrb[216].mxu1  ;;  %15836 = vmatprep.mubr.msk.f32.mxu0 %vm17944_vm0, %v23385_v19 }
0x15ed   :  { %v9094_v59 = vadd.f32 %v22250_v54, %v9093_v45  ;;  %17560 = vmatprep.subr.bf16.mxu0 %v23384_v22  ;;  %v9095_v55 = vpop.f32.mrb[217].mxu1  ;;  %v9496_v45 = vld [vmem:[%s23335_s4 + $0x158] sm:$0xff] }
0x15ef   :  { %15837 = vmatmul.mubr.msk.f32.gmra.mrb[244].mxu0 %vm568_vm5, %v9094_v59  ;;  %v17570_v59 = vpack.c.bf16 %v9496_v45, %v9495_v63 }
0x15f0   :  { %17562 = vmatpush1.bf16.msra.mxu0 %v19136_v48  ;;  %v9098_v35 = vpop.f32.mrb[218].mxu1  ;;  %15839 = vmatprep.mubr.msk.f32.mxu0 %vm17944_vm0, %v23385_v19 }
0x15f1   :  { %v9099_v29 = vadd.f32 %v22252_v37, %v9098_v35  ;;  %17563 = vmatprep.subr.bf16.mxu0 %v23384_v22  ;;  %v9100_v54 = vpop.f32.mrb[219].mxu1  ;;  %v9248_v37 = vunpack.c.l.bf16 %v9233_v56  ;;  %17571 = vmatpush3.bf16.msra.mxu1 %v17570_v59  ;;  %v9629_v59 = vld [vmem:[%s23334_s3 + $0x9c0] sm:$0xff] }
0x15f2   :  { %17604 = vmatprep.subr.bf16.mxu1 %v23384_v22 }
0x15f3   :  { %15840 = vmatmul.mubr.msk.f32.gmra.mrb[246].mxu0 %vm568_vm5, %v9099_v29 }
0x15f4   :  { %17565 = vmatpush1.bf16.msra.mxu0 %v19139_v60  ;;  %13304 = vmatprep.mubr.msk.f32.mxu0 %vm1034_vm6, %v9249_v52 }
0x15f5   :  { %17566 = vmatprep.subr.bf16.mxu0 %v23384_v22 }
0x15f8   :  { %17568 = vmatpush1.bf16.msra.mxu0 %v19141_v16  ;;  %v14789_v55 = vpop.f32.mrb[220].mxu1 }
0x15f9   :  { %9427 = vmatprep.subr.mxu0 %v23385_v19  ;;  %v14790_v56 = vpop.f32.mrb[221].mxu1 }
0x15fa   :  { %v22393_v35 = vadd.f32 %v14790_v56, %v14789_v55  ;;  %v9647_v55 = vunpack.c.l.bf16 %v9629_v59  ;;  %v9648_v56 = vunpack.c.h.bf16 %v9629_v59 }
0x15fc   :  { %9428 = vmatpush1.msra.mxu0 %v19216_v42  ;;  %v14792_v52 = vpop.f32.mrb[222].mxu1 }
0x15fd   :  { %9460 = vmatmul.mubr.f32.vlgmr.msra.gmra.mrb[248].mxu0 %v9248_v37  ;;  %17573 = vmatprep.subr.bf16.mxu0 %v19091_v23  ;;  %v14793_v29 = vpop.f32.mrb[223].mxu1 }
0x15fe   :  { %17575 = vmatpush3.bf16.msra.mxu0 %v19093_v30  ;;  %13305 = vmatprep.mubr.msk.f32.mxu0 %vm1034_vm6, %v9253_v2  ;;  %v22395_v54 = vadd.f32 %v14793_v29, %v14792_v52  ;;  %v9631_v52 = vld [vmem:[%s23334_s3 + $0x9d0] sm:$0xff] }
0x15ff   :  { %17577 = vmatprep.subr.bf16.mxu0 %v19095_v12  ;;  %v9651_v29 = vunpack.c.l.bf16 %v9631_v52 }
0x1600   :  { %v14795_v49 = vpop.f32.mrb[224].mxu1 }
0x1601   :  { %9465 = vmatmul.mubr.f32.gmra.mrb[250].mxu0 %v9252_v61  ;;  %v14796_v37 = vpop.f32.mrb[225].mxu1 }
0x1602   :  { %17579 = vmatpush3.bf16.msra.mxu0 %v19097_v27  ;;  %13306 = vmatprep.mubr.msk.f32.mxu0 %vm1034_vm6, %v9257_v8  ;;  %v22397_v2 = vadd.f32 %v14796_v37, %v14795_v49  ;;  %v9652_v49 = vunpack.c.h.bf16 %v9631_v52  ;;  %v9633_v37 = vld [vmem:[%s23334_s3 + $0x9e0] sm:$0xff] }
0x1603   :  { %17581 = vmatprep.subr.bf16.mxu0 %v19099_v44 }
0x1604   :  { %v14798_v62 = vpop.f32.mrb[226].mxu1 }
0x1605   :  { %9470 = vmatmul.mubr.f32.gmra.mrb[252].mxu0 %v9256_v13  ;;  %v14799_v61 = vpop.f32.mrb[227].mxu1 }
0x1606   :  { %17583 = vmatpush3.bf16.msra.mxu0 %v19101_v20  ;;  %13307 = vmatprep.mubr.msk.f32.mxu0 %vm1034_vm6, %v9261_v40  ;;  %v22399_v8 = vadd.f32 %v14799_v61, %v14798_v62  ;;  %v9655_v62 = vunpack.c.l.bf16 %v9633_v37  ;;  %v9656_v61 = vunpack.c.h.bf16 %v9633_v37 }
0x1607   :  { %17585 = vmatprep.subr.bf16.mxu0 %v19104_v32 }
0x1608   :  { %v14801_v9 = vpop.f32.mrb[228].mxu1 }
0x1609   :  { %9475 = vmatmul.mubr.f32.gmra.mrb[254].mxu0 %v9260_v6  ;;  %v14802_v13 = vpop.f32.mrb[229].mxu1 }
0x160a   :  { %17587 = vmatpush3.bf16.msra.mxu0 %v19106_v33  ;;  %13308 = vmatprep.mubr.msk.f32.mxu0 %vm1034_vm6, %v9265_v1  ;;  %v22401_v40 = vadd.f32 %v14802_v13, %v14801_v9  ;;  %v9635_v9 = vld [vmem:[%s23334_s3 + $0x9f0] sm:$0xff] }
0x160b   :  { %17589 = vmatprep.subr.bf16.mxu0 %v19108_v47  ;;  %v9659_v13 = vunpack.c.l.bf16 %v9635_v9 }
0x160c   :  { %v14804_v3 = vpop.f32.mrb[230].mxu1 }
0x160d   :  { %9480 = vmatmul.mubr.f32.gmra.mrb[0].mxu0 %v9264_v15  ;;  %v14805_v6 = vpop.f32.mrb[231].mxu1 }
0x160e   :  { %17591 = vmatpush3.bf16.msra.mxu0 %v19110_v5  ;;  %13309 = vmatprep.mubr.msk.f32.mxu0 %vm1034_vm6, %v9269_v25  ;;  %v22403_v1 = vadd.f32 %v14805_v6, %v14804_v3  ;;  %v9660_v3 = vunpack.c.h.bf16 %v9635_v9  ;;  %v9637_v6 = vld [vmem:[%s23334_s3 + $0xa00] sm:$0xff] }
0x160f   :  { %17593 = vmatprep.subr.bf16.mxu0 %v19112_v17 }
0x1610   :  { %v14807_v39 = vpop.f32.mrb[232].mxu1 }
0x1611   :  { %9485 = vmatmul.mubr.f32.gmra.mrb[2].mxu0 %v9268_v34  ;;  %v14808_v15 = vpop.f32.mrb[233].mxu1  ;;  %v9639_v34 = vunpack.c.l.bf16 %v9625_v28 }
0x1612   :  { %17595 = vmatpush3.bf16.msra.mxu0 %v19114_v4  ;;  %13310 = vmatprep.mubr.msk.f32.mxu0 %vm1034_vm6, %v9273_v57  ;;  %v22405_v25 = vadd.f32 %v14808_v15, %v14807_v39  ;;  %v9640_v57 = vunpack.c.h.bf16 %v9625_v28  ;;  %v9663_v39 = vunpack.c.l.bf16 %v9637_v6  ;;  %v9664_v15 = vunpack.c.h.bf16 %v9637_v6 }
0x1613   :  { %17597 = vmatprep.subr.bf16.mxu0 %v19116_v14 }
0x1615   :  { %9490 = vmatmul.mubr.f32.gmra.mrb[4].mxu0 %v9272_v53  ;;  %v9627_v53 = vld [vmem:[%s23334_s3 + $0x9b0] sm:$0xff] }
0x1616   :  { %17599 = vmatpush3.bf16.msra.mxu0 %v19118_v51  ;;  %9752 = vmatprep.mubr.f32.mxu0 %v9640_v57  ;;  %v9644_v63 = vunpack.c.h.bf16 %v9627_v53  ;;  %v9643_v45 = vunpack.c.l.bf16 %v9627_v53 }
0x1617   :  { %17601 = vmatprep.subr.bf16.mxu0 %v19121_v26 }
0x161a   :  { %17603 = vmatpush3.bf16.msra.mxu0 %v19123_v58 }
0x161b   :  { %17628 = vmatprep.subr.bf16.mxu0 %v23384_v22 }
0x161d   :  { %9753 = vmatmul.mubr.f32.vlgmr.msra.gmra.mrb[6].mxu0 %v9639_v34 }
0x161e   :  { %9757 = vmatprep.mubr.f32.mxu0 %v9644_v63 }
0x1621   :  { %9758 = vmatmul.mubr.f32.gmra.mrb[8].mxu0 %v9643_v45 }
0x1622   :  { %9762 = vmatprep.mubr.f32.mxu0 %v9648_v56 }
0x1625   :  { %9763 = vmatmul.mubr.f32.gmra.mrb[10].mxu0 %v9647_v55 }
0x1626   :  { %9767 = vmatprep.mubr.f32.mxu0 %v9652_v49 }
0x1629   :  { %9768 = vmatmul.mubr.f32.gmra.mrb[12].mxu0 %v9651_v29 }
0x162a   :  { %9772 = vmatprep.mubr.f32.mxu0 %v9656_v61 }
0x162d   :  { %9773 = vmatmul.mubr.f32.gmra.mrb[14].mxu0 %v9655_v62 }
0x162e   :  { %9777 = vmatprep.mubr.f32.mxu0 %v9660_v3 }
0x1631   :  { %9778 = vmatmul.mubr.f32.gmra.mrb[16].mxu0 %v9659_v13 }
0x1632   :  { %9782 = vmatprep.mubr.f32.mxu0 %v9664_v15 }
0x1635   :  { %9783 = vmatmul.mubr.f32.gmra.mrb[18].mxu0 %v9663_v39 }
0x1636   :  { %15871 = vmatprep.mubr.msk.f32.mxu0 %vm17944_vm0, %v23385_v19 }
0x16ae   :  { %v9191_v28 = vpop.f32.mrb[234].mxu0 }
0x16af   :  { %v22431_v34 = vadd.f32 %v9191_v28, %v22278_v0  ;;  %v15823_v57 = vpop.f32.mrb[235].mxu0 }
0x16b2   :  { %v9196_v53 = vpop.f32.mrb[236].mxu0 }
0x16b3   :  { %v22434_v63 = vadd.f32 %v9196_v53, %v22281_v50  ;;  %v15826_v45 = vpop.f32.mrb[237].mxu0 }
0x16b6   :  { %v9201_v59 = vpop.f32.mrb[238].mxu0 }
0x16b7   :  { %v22437_v55 = vadd.f32 %v9201_v59, %v22284_v41  ;;  %v15829_v56 = vpop.f32.mrb[239].mxu0 }
0x16ba   :  { %v9206_v52 = vpop.f32.mrb[240].mxu0 }
0x16bb   :  { %v22440_v29 = vadd.f32 %v9206_v52, %v22287_v24  ;;  %v15832_v49 = vpop.f32.mrb[241].mxu0 }
0x16be   :  { %v9211_v37 = vpop.f32.mrb[242].mxu0 }
0x16bf   :  { %v22443_v0 = vadd.f32 %v9211_v37, %v22290_v21  ;;  %v15835_v62 = vpop.f32.mrb[243].mxu0 }
0x16c2   :  { %v9216_v61 = vpop.f32.mrb[244].mxu0 }
0x16c3   :  { %v22446_v50 = vadd.f32 %v9216_v61, %v22293_v7  ;;  %v15838_v9 = vpop.f32.mrb[245].mxu0  ;;  %v9628_v61 = vld [vmem:[%s23334_s3 + $0x9b8] sm:$0xff] }
0x16c4   :  { %v9646_v9 = vunpack.c.h.bf16 %v9628_v61 }
0x16c6   :  { %v9221_v13 = vpop.f32.mrb[246].mxu0 }
0x16c7   :  { %v22449_v41 = vadd.f32 %v9221_v13, %v22296_v31  ;;  %v15841_v3 = vpop.f32.mrb[247].mxu0  ;;  %v9630_v13 = vld [vmem:[%s23334_s3 + $0x9c8] sm:$0xff] }
0x16c8   :  { %v9645_v3 = vunpack.c.l.bf16 %v9628_v61 }
0x16d0   :  { %v9461_v6 = vpop.f32.mrb[248].mxu0 }
0x16d1   :  { %v9462_v24 = vadd.f32 %v22393_v35, %v9461_v6  ;;  %v9463_v39 = vpop.f32.mrb[249].mxu0  ;;  %v9650_v6 = vunpack.c.h.bf16 %v9630_v13 }
0x16d2   :  { %v9649_v39 = vunpack.c.l.bf16 %v9630_v13 }
0x16d3   :  { %15847 = vmatmul.mubr.msk.f32.vlgmr.msra.gmra.mrb[234].mxu1 %vm568_vm5, %v9462_v24  ;;  %v9632_v24 = vld [vmem:[%s23334_s3 + $0x9d8] sm:$0xff] }
0x16d4   :  { %17606 = vmatpush1.bf16.msra.mxu1 %v19125_v18  ;;  %v9466_v21 = vpop.f32.mrb[250].mxu0  ;;  %15849 = vmatprep.mubr.msk.f32.mxu1 %vm17944_vm0, %v23385_v19 }
0x16d5   :  { %v9467_v7 = vadd.f32 %v22395_v54, %v9466_v21  ;;  %17607 = vmatprep.subr.bf16.mxu1 %v23384_v22  ;;  %v9468_v15 = vpop.f32.mrb[251].mxu0  ;;  %v9654_v21 = vunpack.c.h.bf16 %v9632_v24 }
0x16d6   :  { %v9653_v15 = vunpack.c.l.bf16 %v9632_v24 }
0x16d7   :  { %15850 = vmatmul.mubr.msk.f32.gmra.mrb[236].mxu1 %vm568_vm5, %v9467_v7  ;;  %v9634_v7 = vld [vmem:[%s23334_s3 + $0x9e8] sm:$0xff] }
0x16d8   :  { %17609 = vmatpush1.bf16.msra.mxu1 %v19127_v38  ;;  %v9471_v31 = vpop.f32.mrb[252].mxu0  ;;  %15852 = vmatprep.mubr.msk.f32.mxu1 %vm17944_vm0, %v23385_v19 }
0x16d9   :  { %v9472_v35 = vadd.f32 %v22397_v2, %v9471_v31  ;;  %17610 = vmatprep.subr.bf16.mxu1 %v23384_v22  ;;  %v9473_v28 = vpop.f32.mrb[253].mxu0  ;;  %v9658_v31 = vunpack.c.h.bf16 %v9634_v7 }
0x16da   :  { %v9657_v28 = vunpack.c.l.bf16 %v9634_v7 }
0x16db   :  { %15853 = vmatmul.mubr.msk.f32.gmra.mrb[238].mxu1 %vm568_vm5, %v9472_v35  ;;  %v9636_v35 = vld [vmem:[%s23334_s3 + $0x9f8] sm:$0xff] }
0x16dc   :  { %17612 = vmatpush1.bf16.msra.mxu1 %v19130_v10  ;;  %v9476_v54 = vpop.f32.mrb[254].mxu0  ;;  %15855 = vmatprep.mubr.msk.f32.mxu1 %vm17944_vm0, %v23385_v19 }
0x16dd   :  { %v9477_v57 = vadd.f32 %v22399_v8, %v9476_v54  ;;  %17613 = vmatprep.subr.bf16.mxu1 %v23384_v22  ;;  %v9478_v53 = vpop.f32.mrb[255].mxu0  ;;  %v9662_v54 = vunpack.c.h.bf16 %v9636_v35 }
0x16de   :  { %v9661_v53 = vunpack.c.l.bf16 %v9636_v35 }
0x16df   :  { %15856 = vmatmul.mubr.msk.f32.gmra.mrb[240].mxu1 %vm568_vm5, %v9477_v57  ;;  %v9638_v57 = vld [vmem:[%s23334_s3 + $0xa08] sm:$0xff] }
0x16e0   :  { %17615 = vmatpush1.bf16.msra.mxu1 %v19132_v36  ;;  %v9481_v2 = vpop.f32.mrb[0].mxu0  ;;  %15858 = vmatprep.mubr.msk.f32.mxu1 %vm17944_vm0, %v23385_v19 }
0x16e1   :  { %v9482_v45 = vadd.f32 %v22401_v40, %v9481_v2  ;;  %17616 = vmatprep.subr.bf16.mxu1 %v23384_v22  ;;  %v9483_v59 = vpop.f32.mrb[1].mxu0  ;;  %v9626_v40 = vld [vmem:[%s23334_s3 + $0x9a8] sm:$0xff]  ;;  %v9666_v2 = vunpack.c.h.bf16 %v9638_v57 }
0x16e2   :  { %v9642_v37 = vunpack.c.h.bf16 %v9626_v40  ;;  %v9888_v59 = vld [vmem:[%s23335_s4 + $0x160] sm:$0xff] }
0x16e3   :  { %15859 = vmatmul.mubr.msk.f32.gmra.mrb[242].mxu1 %vm568_vm5, %v9482_v45  ;;  %v9665_v45 = vunpack.c.l.bf16 %v9638_v57  ;;  %v10018_v57 = vld [vmem:[%s23334_s3 + $0xa10] sm:$0xff] }
0x16e4   :  { %17618 = vmatpush1.bf16.msra.mxu1 %v19134_v11  ;;  %v9486_v8 = vpop.f32.mrb[2].mxu0  ;;  %15861 = vmatprep.mubr.msk.f32.mxu1 %vm17944_vm0, %v23385_v19 }
0x16e5   :  { %v9487_v56 = vadd.f32 %v22403_v1, %v9486_v8  ;;  %17619 = vmatprep.subr.bf16.mxu1 %v23384_v22  ;;  %v9488_v52 = vpop.f32.mrb[3].mxu0  ;;  %v9889_v8 = vld [vmem:[%s23335_s4 + $0x168] sm:$0xff] }
0x16e7   :  { %15862 = vmatmul.mubr.msk.f32.gmra.mrb[244].mxu1 %vm568_vm5, %v9487_v56  ;;  %v17629_v56 = vpack.c.bf16 %v9889_v8, %v9888_v59 }
0x16e8   :  { %17621 = vmatpush1.bf16.msra.mxu1 %v19136_v48  ;;  %v9491_v49 = vpop.f32.mrb[4].mxu0  ;;  %15864 = vmatprep.mubr.msk.f32.mxu1 %vm17944_vm0, %v23385_v19 }
0x16e9   :  { %v9492_v62 = vadd.f32 %v22405_v25, %v9491_v49  ;;  %17622 = vmatprep.subr.bf16.mxu1 %v23384_v22  ;;  %v9493_v1 = vpop.f32.mrb[5].mxu0  ;;  %v9641_v25 = vunpack.c.l.bf16 %v9626_v40  ;;  %17630 = vmatpush3.bf16.msra.mxu0 %v17629_v56  ;;  %v10022_v56 = vld [vmem:[%s23334_s3 + $0xa30] sm:$0xff] }
0x16ea   :  { %17663 = vmatprep.subr.bf16.mxu0 %v23384_v22 }
0x16eb   :  { %15865 = vmatmul.mubr.msk.f32.gmra.mrb[246].mxu1 %vm568_vm5, %v9492_v62 }
0x16ec   :  { %17624 = vmatpush1.bf16.msra.mxu1 %v19139_v60  ;;  %13318 = vmatprep.mubr.msk.f32.mxu1 %vm1034_vm6, %v9642_v37 }
0x16ed   :  { %17625 = vmatprep.subr.bf16.mxu1 %v23384_v22 }
0x16f0   :  { %17627 = vmatpush1.bf16.msra.mxu1 %v19141_v16  ;;  %v14851_v52 = vpop.f32.mrb[6].mxu0 }
0x16f1   :  { %9820 = vmatprep.subr.mxu1 %v23385_v19  ;;  %v14852_v40 = vpop.f32.mrb[7].mxu0 }
0x16f2   :  { %v22546_v49 = vadd.f32 %v14852_v40, %v14851_v52  ;;  %v10040_v52 = vunpack.c.l.bf16 %v10022_v56  ;;  %v10041_v40 = vunpack.c.h.bf16 %v10022_v56 }
0x16f4   :  { %9821 = vmatpush1.msra.mxu1 %v19216_v42  ;;  %v14854_v37 = vpop.f32.mrb[8].mxu0 }
0x16f5   :  { %9853 = vmatmul.mubr.f32.vlgmr.msra.gmra.mrb[248].mxu1 %v9641_v25  ;;  %17632 = vmatprep.subr.bf16.mxu1 %v19091_v23  ;;  %v14855_v62 = vpop.f32.mrb[9].mxu0 }
0x16f6   :  { %17634 = vmatpush3.bf16.msra.mxu1 %v19093_v30  ;;  %13319 = vmatprep.mubr.msk.f32.mxu1 %vm1034_vm6, %v9646_v9  ;;  %v22548_v1 = vadd.f32 %v14855_v62, %v14854_v37  ;;  %v10024_v37 = vld [vmem:[%s23334_s3 + $0xa40] sm:$0xff] }
0x16f7   :  { %17636 = vmatprep.subr.bf16.mxu1 %v19095_v12  ;;  %v10044_v62 = vunpack.c.l.bf16 %v10024_v37 }
0x16f8   :  { %v14857_v61 = vpop.f32.mrb[10].mxu0 }
0x16f9   :  { %9858 = vmatmul.mubr.f32.gmra.mrb[250].mxu1 %v9645_v3  ;;  %v14858_v25 = vpop.f32.mrb[11].mxu0 }
0x16fa   :  { %17638 = vmatpush3.bf16.msra.mxu1 %v19097_v27  ;;  %13320 = vmatprep.mubr.msk.f32.mxu1 %vm1034_vm6, %v9650_v6  ;;  %v22550_v9 = vadd.f32 %v14858_v25, %v14857_v61  ;;  %v10045_v61 = vunpack.c.h.bf16 %v10024_v37  ;;  %v10026_v25 = vld [vmem:[%s23334_s3 + $0xa50] sm:$0xff] }
0x16fb   :  { %17640 = vmatprep.subr.bf16.mxu1 %v19099_v44 }
0x16fc   :  { %v14860_v13 = vpop.f32.mrb[12].mxu0 }
0x16fd   :  { %9863 = vmatmul.mubr.f32.gmra.mrb[252].mxu1 %v9649_v39  ;;  %v14861_v3 = vpop.f32.mrb[13].mxu0 }
0x16fe   :  { %17642 = vmatpush3.bf16.msra.mxu1 %v19101_v20  ;;  %13321 = vmatprep.mubr.msk.f32.mxu1 %vm1034_vm6, %v9654_v21  ;;  %v22552_v6 = vadd.f32 %v14861_v3, %v14860_v13  ;;  %v10048_v13 = vunpack.c.l.bf16 %v10026_v25  ;;  %v10049_v3 = vunpack.c.h.bf16 %v10026_v25 }
0x16ff   :  { %17644 = vmatprep.subr.bf16.mxu1 %v19104_v32 }
0x1700   :  { %v14863_v24 = vpop.f32.mrb[14].mxu0 }
0x1701   :  { %9868 = vmatmul.mubr.f32.gmra.mrb[254].mxu1 %v9653_v15  ;;  %v14864_v39 = vpop.f32.mrb[15].mxu0 }
0x1702   :  { %17646 = vmatpush3.bf16.msra.mxu1 %v19106_v33  ;;  %13322 = vmatprep.mubr.msk.f32.mxu1 %vm1034_vm6, %v9658_v31  ;;  %v22554_v21 = vadd.f32 %v14864_v39, %v14863_v24  ;;  %v10028_v24 = vld [vmem:[%s23334_s3 + $0xa60] sm:$0xff] }
0x1703   :  { %17648 = vmatprep.subr.bf16.mxu1 %v19108_v47  ;;  %v10052_v39 = vunpack.c.l.bf16 %v10028_v24 }
0x1704   :  { %v14866_v7 = vpop.f32.mrb[16].mxu0 }
0x1705   :  { %9873 = vmatmul.mubr.f32.gmra.mrb[0].mxu1 %v9657_v28  ;;  %v14867_v15 = vpop.f32.mrb[17].mxu0 }
0x1706   :  { %17650 = vmatpush3.bf16.msra.mxu1 %v19110_v5  ;;  %13323 = vmatprep.mubr.msk.f32.mxu1 %vm1034_vm6, %v9662_v54  ;;  %v22556_v31 = vadd.f32 %v14867_v15, %v14866_v7  ;;  %v10053_v7 = vunpack.c.h.bf16 %v10028_v24  ;;  %v10030_v15 = vld [vmem:[%s23334_s3 + $0xa70] sm:$0xff] }
0x1707   :  { %17652 = vmatprep.subr.bf16.mxu1 %v19112_v17 }
0x1708   :  { %v14869_v35 = vpop.f32.mrb[18].mxu0 }
0x1709   :  { %9878 = vmatmul.mubr.f32.gmra.mrb[2].mxu1 %v9661_v53  ;;  %v14870_v28 = vpop.f32.mrb[19].mxu0  ;;  %v10032_v53 = vunpack.c.l.bf16 %v10018_v57 }
0x170a   :  { %17654 = vmatpush3.bf16.msra.mxu1 %v19114_v4  ;;  %13324 = vmatprep.mubr.msk.f32.mxu1 %vm1034_vm6, %v9666_v2  ;;  %v22558_v54 = vadd.f32 %v14870_v28, %v14869_v35  ;;  %v10033_v2 = vunpack.c.h.bf16 %v10018_v57  ;;  %v10056_v35 = vunpack.c.l.bf16 %v10030_v15  ;;  %v10057_v28 = vunpack.c.h.bf16 %v10030_v15 }
0x170b   :  { %17656 = vmatprep.subr.bf16.mxu1 %v19116_v14 }
0x170d   :  { %9883 = vmatmul.mubr.f32.gmra.mrb[4].mxu1 %v9665_v45  ;;  %v10020_v45 = vld [vmem:[%s23334_s3 + $0xa20] sm:$0xff] }
0x170e   :  { %17658 = vmatpush3.bf16.msra.mxu1 %v19118_v51  ;;  %10145 = vmatprep.mubr.f32.mxu1 %v10033_v2  ;;  %v10037_v59 = vunpack.c.h.bf16 %v10020_v45  ;;  %v10036_v8 = vunpack.c.l.bf16 %v10020_v45 }
0x170f   :  { %17660 = vmatprep.subr.bf16.mxu1 %v19121_v26 }
0x1712   :  { %17662 = vmatpush3.bf16.msra.mxu1 %v19123_v58 }
0x1713   :  { %17687 = vmatprep.subr.bf16.mxu1 %v23384_v22 }
0x1715   :  { %10146 = vmatmul.mubr.f32.vlgmr.msra.gmra.mrb[6].mxu1 %v10032_v53 }
0x1716   :  { %10150 = vmatprep.mubr.f32.mxu1 %v10037_v59 }
0x1719   :  { %10151 = vmatmul.mubr.f32.gmra.mrb[8].mxu1 %v10036_v8 }
0x171a   :  { %10155 = vmatprep.mubr.f32.mxu1 %v10041_v40 }
0x171d   :  { %10156 = vmatmul.mubr.f32.gmra.mrb[10].mxu1 %v10040_v52 }
0x171e   :  { %10160 = vmatprep.mubr.f32.mxu1 %v10045_v61 }
0x1721   :  { %10161 = vmatmul.mubr.f32.gmra.mrb[12].mxu1 %v10044_v62 }
0x1722   :  { %10165 = vmatprep.mubr.f32.mxu1 %v10049_v3 }
0x1725   :  { %10166 = vmatmul.mubr.f32.gmra.mrb[14].mxu1 %v10048_v13 }
0x1726   :  { %10170 = vmatprep.mubr.f32.mxu1 %v10053_v7 }
0x1729   :  { %10171 = vmatmul.mubr.f32.gmra.mrb[16].mxu1 %v10052_v39 }
0x172a   :  { %10175 = vmatprep.mubr.f32.mxu1 %v10057_v28 }
0x172d   :  { %10176 = vmatmul.mubr.f32.gmra.mrb[18].mxu1 %v10056_v35 }
0x172e   :  { %15896 = vmatprep.mubr.msk.f32.mxu1 %vm17944_vm0, %v23385_v19 }
0x17a6   :  { %v9584_v57 = vpop.f32.mrb[234].mxu1 }
0x17a7   :  { %v22584_v53 = vadd.f32 %v9584_v57, %v22431_v34  ;;  %v15848_v2 = vpop.f32.mrb[235].mxu1 }
0x17aa   :  { %v9589_v45 = vpop.f32.mrb[236].mxu1 }
0x17ab   :  { %v22587_v59 = vadd.f32 %v9589_v45, %v22434_v63  ;;  %v15851_v8 = vpop.f32.mrb[237].mxu1 }
0x17ae   :  { %v9594_v56 = vpop.f32.mrb[238].mxu1 }
0x17af   :  { %v22590_v52 = vadd.f32 %v9594_v56, %v22437_v55  ;;  %v15854_v40 = vpop.f32.mrb[239].mxu1 }
0x17b2   :  { %v9599_v37 = vpop.f32.mrb[240].mxu1 }
0x17b3   :  { %v22593_v62 = vadd.f32 %v9599_v37, %v22440_v29  ;;  %v15857_v61 = vpop.f32.mrb[241].mxu1 }
0x17b6   :  { %v9604_v25 = vpop.f32.mrb[242].mxu1 }
0x17b7   :  { %v22596_v34 = vadd.f32 %v9604_v25, %v22443_v0  ;;  %v15860_v13 = vpop.f32.mrb[243].mxu1 }
0x17ba   :  { %v9609_v3 = vpop.f32.mrb[244].mxu1 }
0x17bb   :  { %v22599_v63 = vadd.f32 %v9609_v3, %v22446_v50  ;;  %v15863_v24 = vpop.f32.mrb[245].mxu1  ;;  %v10021_v3 = vld [vmem:[%s23334_s3 + $0xa28] sm:$0xff] }
0x17bc   :  { %v10039_v24 = vunpack.c.h.bf16 %v10021_v3 }
0x17be   :  { %v9614_v39 = vpop.f32.mrb[246].mxu1 }
0x17bf   :  { %v22602_v55 = vadd.f32 %v9614_v39, %v22449_v41  ;;  %v15866_v7 = vpop.f32.mrb[247].mxu1  ;;  %v10023_v39 = vld [vmem:[%s23334_s3 + $0xa38] sm:$0xff] }
0x17c0   :  { %v10038_v7 = vunpack.c.l.bf16 %v10021_v3 }
0x17c8   :  { %v9854_v15 = vpop.f32.mrb[248].mxu1 }
0x17c9   :  { %v9855_v29 = vadd.f32 %v22546_v49, %v9854_v15  ;;  %v9856_v35 = vpop.f32.mrb[249].mxu1  ;;  %v10043_v15 = vunpack.c.h.bf16 %v10023_v39 }
0x17ca   :  { %v10042_v35 = vunpack.c.l.bf16 %v10023_v39 }
0x17cb   :  { %15872 = vmatmul.mubr.msk.f32.vlgmr.msra.gmra.mrb[20].mxu0 %vm568_vm5, %v9855_v29  ;;  %v10025_v29 = vld [vmem:[%s23334_s3 + $0xa48] sm:$0xff] }
0x17cc   :  { %17665 = vmatpush1.bf16.msra.mxu0 %v19125_v18  ;;  %v9859_v0 = vpop.f32.mrb[250].mxu1  ;;  %15874 = vmatprep.mubr.msk.f32.mxu0 %vm17944_vm0, %v23385_v19 }
0x17cd   :  { %v9860_v50 = vadd.f32 %v22548_v1, %v9859_v0  ;;  %17666 = vmatprep.subr.bf16.mxu0 %v23384_v22  ;;  %v9861_v28 = vpop.f32.mrb[251].mxu1  ;;  %v10047_v0 = vunpack.c.h.bf16 %v10025_v29 }
0x17cf   :  { %15875 = vmatmul.mubr.msk.f32.gmra.mrb[22].mxu0 %vm568_vm5, %v9860_v50 }
0x17d0   :  { %17668 = vmatpush1.bf16.msra.mxu0 %v19127_v38  ;;  %v9864_v41 = vpop.f32.mrb[252].mxu1  ;;  %15877 = vmatprep.mubr.msk.f32.mxu0 %vm17944_vm0, %v23385_v19 }
0x17d1   :  { %v9865_v49 = vadd.f32 %v22550_v9, %v9864_v41  ;;  %17669 = vmatprep.subr.bf16.mxu0 %v23384_v22  ;;  %v9866_v57 = vpop.f32.mrb[253].mxu1 }
0x17d3   :  { %15878 = vmatmul.mubr.msk.f32.gmra.mrb[24].mxu0 %vm568_vm5, %v9865_v49 }
0x17d4   :  { %17671 = vmatpush1.bf16.msra.mxu0 %v19130_v10  ;;  %v9869_v1 = vpop.f32.mrb[254].mxu1  ;;  %15880 = vmatprep.mubr.msk.f32.mxu0 %vm17944_vm0, %v23385_v19 }
0x17d5   :  { %v9870_v2 = vadd.f32 %v22552_v6, %v9869_v1  ;;  %17672 = vmatprep.subr.bf16.mxu0 %v23384_v22  ;;  %v9871_v45 = vpop.f32.mrb[255].mxu1 }
0x17d7   :  { %15881 = vmatmul.mubr.msk.f32.gmra.mrb[26].mxu0 %vm568_vm5, %v9870_v2 }
0x17d8   :  { %17674 = vmatpush1.bf16.msra.mxu0 %v19132_v36  ;;  %v9874_v9 = vpop.f32.mrb[0].mxu1  ;;  %15883 = vmatprep.mubr.msk.f32.mxu0 %vm17944_vm0, %v23385_v19 }
0x17d9   :  { %v9875_v8 = vadd.f32 %v22554_v21, %v9874_v9  ;;  %17675 = vmatprep.subr.bf16.mxu0 %v23384_v22  ;;  %v9876_v56 = vpop.f32.mrb[1].mxu1  ;;  %v10019_v21 = vld [vmem:[%s23334_s3 + $0xa18] sm:$0xff] }
0x17da   :  { %v10035_v25 = vunpack.c.h.bf16 %v10019_v21 }
0x17db   :  { %15884 = vmatmul.mubr.msk.f32.gmra.mrb[28].mxu0 %vm568_vm5, %v9875_v8 }
0x17dc   :  { %17677 = vmatpush1.bf16.msra.mxu0 %v19134_v11  ;;  %v9879_v6 = vpop.f32.mrb[2].mxu1  ;;  %15886 = vmatprep.mubr.msk.f32.mxu0 %vm17944_vm0, %v23385_v19 }
0x17dd   :  { %v9880_v40 = vadd.f32 %v22556_v31, %v9879_v6  ;;  %17678 = vmatprep.subr.bf16.mxu0 %v23384_v22  ;;  %v9881_v37 = vpop.f32.mrb[3].mxu1 }
0x17df   :  { %15887 = vmatmul.mubr.msk.f32.gmra.mrb[30].mxu0 %vm568_vm5, %v9880_v40 }
0x17e0   :  { %17680 = vmatpush1.bf16.msra.mxu0 %v19136_v48  ;;  %v9884_v61 = vpop.f32.mrb[4].mxu1  ;;  %15889 = vmatprep.mubr.msk.f32.mxu0 %vm17944_vm0, %v23385_v19 }
0x17e1   :  { %v9885_v13 = vadd.f32 %v22558_v54, %v9884_v61  ;;  %17681 = vmatprep.subr.bf16.mxu0 %v23384_v22  ;;  %v9886_v31 = vpop.f32.mrb[5].mxu1  ;;  %v10034_v54 = vunpack.c.l.bf16 %v10019_v21 }
0x17e2   :  { %v10411_v31 = vld [vmem:[%s23334_s3 + $0xa80] sm:$0xff] }
0x17e3   :  { %15890 = vmatmul.mubr.msk.f32.gmra.mrb[32].mxu0 %vm568_vm5, %v9885_v13  ;;  %v10425_v3 = vunpack.c.l.bf16 %v10411_v31 }
0x17e4   :  { %17683 = vmatpush1.bf16.msra.mxu0 %v19139_v60  ;;  %13332 = vmatprep.mubr.msk.f32.mxu0 %vm1034_vm6, %v10035_v25 }
0x17e5   :  { %17684 = vmatprep.subr.bf16.mxu0 %v23384_v22 }
0x17e8   :  { %17686 = vmatpush1.bf16.msra.mxu0 %v19141_v16 }
0x17e9   :  { %10213 = vmatprep.subr.mxu0 %v23385_v19 }
0x17ec   :  { %10214 = vmatpush1.msra.mxu0 %v19216_v42 }
0x17ed   :  { %10246 = vmatmul.mubr.f32.vlgmr.msra.gmra.mrb[34].mxu0 %v10034_v54  ;;  %17691 = vmatprep.subr.bf16.mxu0 %v19091_v23  ;;  %v10027_v23 = vld [vmem:[%s23334_s3 + $0xa58] sm:$0xff]  ;;  %v10426_v54 = vunpack.c.h.bf16 %v10411_v31 }
0x17ee   :  { %17693 = vmatpush3.bf16.msra.mxu0 %v19093_v30  ;;  %13333 = vmatprep.mubr.msk.f32.mxu0 %vm1034_vm6, %v10039_v24  ;;  %v10046_v30 = vunpack.c.l.bf16 %v10025_v29  ;;  %v10050_v50 = vunpack.c.l.bf16 %v10027_v23  ;;  %v10413_v24 = vld [vmem:[%s23334_s3 + $0xa90] sm:$0xff] }
0x17ef   :  { %17695 = vmatprep.subr.bf16.mxu0 %v19095_v12  ;;  %v10051_v12 = vunpack.c.h.bf16 %v10027_v23  ;;  %v10429_v39 = vunpack.c.l.bf16 %v10413_v24 }
0x17f1   :  { %10251 = vmatmul.mubr.f32.gmra.mrb[36].mxu0 %v10038_v7  ;;  %v10430_v7 = vunpack.c.h.bf16 %v10413_v24 }
0x17f2   :  { %17697 = vmatpush3.bf16.msra.mxu0 %v19097_v27  ;;  %13334 = vmatprep.mubr.msk.f32.mxu0 %vm1034_vm6, %v10043_v15  ;;  %v10029_v27 = vld [vmem:[%s23334_s3 + $0xa68] sm:$0xff]  ;;  %v10415_v15 = vld [vmem:[%s23334_s3 + $0xaa0] sm:$0xff] }
0x17f3   :  { %17699 = vmatprep.subr.bf16.mxu0 %v19099_v44  ;;  %v10055_v44 = vunpack.c.h.bf16 %v10029_v27  ;;  %v10054_v28 = vunpack.c.l.bf16 %v10029_v27  ;;  %v10433_v29 = vunpack.c.l.bf16 %v10415_v15 }
0x17f5   :  { %10256 = vmatmul.mubr.f32.gmra.mrb[38].mxu0 %v10042_v35  ;;  %v10434_v35 = vunpack.c.h.bf16 %v10415_v15 }
0x17f6   :  { %17701 = vmatpush3.bf16.msra.mxu0 %v19101_v20  ;;  %13335 = vmatprep.mubr.msk.f32.mxu0 %vm1034_vm6, %v10047_v0  ;;  %v10031_v20 = vld [vmem:[%s23334_s3 + $0xa78] sm:$0xff]  ;;  %v10417_v0 = vld [vmem:[%s23334_s3 + $0xab0] sm:$0xff] }
0x17f7   :  { %17703 = vmatprep.subr.bf16.mxu0 %v19104_v32  ;;  %v10059_v32 = vunpack.c.h.bf16 %v10031_v20  ;;  %v10437_v23 = vunpack.c.l.bf16 %v10417_v0 }
0x17f9   :  { %10261 = vmatmul.mubr.f32.gmra.mrb[40].mxu0 %v10046_v30  ;;  %v10438_v30 = vunpack.c.h.bf16 %v10417_v0 }
0x17fa   :  { %17705 = vmatpush3.bf16.msra.mxu0 %v19106_v33  ;;  %13336 = vmatprep.mubr.msk.f32.mxu0 %vm1034_vm6, %v10051_v12  ;;  %v10058_v33 = vunpack.c.l.bf16 %v10031_v20  ;;  %v10419_v12 = vld [vmem:[%s23334_s3 + $0xac0] sm:$0xff] }
0x17fb   :  { %17707 = vmatprep.subr.bf16.mxu0 %v19108_v47  ;;  %v10281_v47 = vld [vmem:[%s23335_s4 + $0x170] sm:$0xff]  ;;  %v10441_v27 = vunpack.c.l.bf16 %v10419_v12 }
0x17fd   :  { %10266 = vmatmul.mubr.f32.gmra.mrb[42].mxu0 %v10050_v50  ;;  %v10442_v50 = vunpack.c.h.bf16 %v10419_v12 }
0x17fe   :  { %17709 = vmatpush3.bf16.msra.mxu0 %v19110_v5  ;;  %13337 = vmatprep.mubr.msk.f32.mxu0 %vm1034_vm6, %v10055_v44  ;;  %v10282_v5 = vld [vmem:[%s23335_s4 + $0x178] sm:$0xff]  ;;  %v10421_v44 = vld [vmem:[%s23334_s3 + $0xad0] sm:$0xff] }
0x17ff   :  { %17711 = vmatprep.subr.bf16.mxu0 %v19112_v17  ;;  %v17688_v17 = vpack.c.bf16 %v10282_v5, %v10281_v47  ;;  %v10445_v20 = vunpack.c.l.bf16 %v10421_v44 }
0x1801   :  { %10271 = vmatmul.mubr.f32.gmra.mrb[44].mxu0 %v10054_v28  ;;  %17689 = vmatpush3.bf16.msra.mxu1 %v17688_v17  ;;  %v10446_v28 = vunpack.c.h.bf16 %v10421_v44 }
0x1802   :  { %17713 = vmatpush3.bf16.msra.mxu0 %v19114_v4  ;;  %13338 = vmatprep.mubr.msk.f32.mxu0 %vm1034_vm6, %v10059_v32  ;;  %v14913_v4 = vpop.f32.mrb[6].mxu1  ;;  %v10423_v32 = vld [vmem:[%s23334_s3 + $0xae0] sm:$0xff] }
0x1803   :  { %17715 = vmatprep.subr.bf16.mxu0 %v19116_v14  ;;  %17722 = vmatprep.subr.bf16.mxu1 %v23384_v22  ;;  %v14914_v14 = vpop.f32.mrb[7].mxu1  ;;  %v10450_v47 = vunpack.c.h.bf16 %v10423_v32 }
0x1805   :  { %10276 = vmatmul.mubr.f32.gmra.mrb[46].mxu0 %v10058_v33  ;;  %v10449_v33 = vunpack.c.l.bf16 %v10423_v32 }
0x1806   :  { %17717 = vmatpush3.bf16.msra.mxu0 %v19118_v51  ;;  %v22699_v51 = vadd.f32 %v14914_v14, %v14913_v4  ;;  %10538 = vmatprep.mubr.f32.mxu0 %v10426_v54 }
0x1807   :  { %17719 = vmatprep.subr.bf16.mxu0 %v19121_v26  ;;  %v14916_v26 = vpop.f32.mrb[8].mxu1 }
0x180a   :  { %17721 = vmatpush3.bf16.msra.mxu0 %v19123_v58  ;;  %v14917_v58 = vpop.f32.mrb[9].mxu1 }
0x180b   :  { %17746 = vmatprep.subr.bf16.mxu0 %v23384_v22  ;;  %v22701_v41 = vadd.f32 %v14917_v58, %v14916_v26  ;;  %v14919_v49 = vpop.f32.mrb[10].mxu1 }
0x180c   :  { %v14920_v57 = vpop.f32.mrb[11].mxu1 }
0x180d   :  { %v22703_v1 = vadd.f32 %v14920_v57, %v14919_v49  ;;  %v14922_v2 = vpop.f32.mrb[12].mxu1  ;;  %10539 = vmatmul.mubr.f32.vlgmr.msra.gmra.mrb[48].mxu0 %v10425_v3 }
0x180e   :  { %v14923_v45 = vpop.f32.mrb[13].mxu1  ;;  %10543 = vmatprep.mubr.f32.mxu0 %v10430_v7 }
0x180f   :  { %v22705_v9 = vadd.f32 %v14923_v45, %v14922_v2  ;;  %v14925_v8 = vpop.f32.mrb[14].mxu1 }
0x1810   :  { %v14926_v56 = vpop.f32.mrb[15].mxu1 }
0x1811   :  { %v22707_v6 = vadd.f32 %v14926_v56, %v14925_v8  ;;  %v14928_v40 = vpop.f32.mrb[16].mxu1  ;;  %10544 = vmatmul.mubr.f32.gmra.mrb[50].mxu0 %v10429_v39 }
0x1812   :  { %v14929_v37 = vpop.f32.mrb[17].mxu1  ;;  %10548 = vmatprep.mubr.f32.mxu0 %v10434_v35 }
0x1813   :  { %v22709_v21 = vadd.f32 %v14929_v37, %v14928_v40  ;;  %v14931_v61 = vpop.f32.mrb[18].mxu1 }
0x1814   :  { %v14932_v25 = vpop.f32.mrb[19].mxu1 }
0x1815   :  { %v22711_v13 = vadd.f32 %v14932_v25, %v14931_v61  ;;  %10549 = vmatmul.mubr.f32.gmra.mrb[52].mxu0 %v10433_v29 }
0x1816   :  { %10553 = vmatprep.mubr.f32.mxu0 %v10438_v30  ;;  %v10416_v30 = vld [vmem:[%s23334_s3 + $0xaa8] sm:$0xff] }
0x1817   :  { %v10436_v12 = vunpack.c.h.bf16 %v10416_v30 }
0x1819   :  { %10554 = vmatmul.mubr.f32.gmra.mrb[54].mxu0 %v10437_v23 }
0x181a   :  { %10558 = vmatprep.mubr.f32.mxu0 %v10442_v50 }
0x181d   :  { %10559 = vmatmul.mubr.f32.gmra.mrb[56].mxu0 %v10441_v27  ;;  %v10435_v27 = vunpack.c.l.bf16 %v10416_v30 }
0x181e   :  { %10563 = vmatprep.mubr.f32.mxu0 %v10446_v28  ;;  %v10422_v28 = vld [vmem:[%s23334_s3 + $0xad8] sm:$0xff] }
0x1821   :  { %10564 = vmatmul.mubr.f32.gmra.mrb[58].mxu0 %v10445_v20 }
0x1822   :  { %10568 = vmatprep.mubr.f32.mxu0 %v10450_v47  ;;  %v10424_v47 = vld [vmem:[%s23334_s3 + $0xae8] sm:$0xff] }
0x1825   :  { %10569 = vmatmul.mubr.f32.gmra.mrb[60].mxu0 %v10449_v33  ;;  %v10448_v33 = vunpack.c.h.bf16 %v10422_v28 }
0x1826   :  { %15921 = vmatprep.mubr.msk.f32.mxu0 %vm17944_vm0, %v23385_v19 }
0x189e   :  { %v9977_v5 = vpop.f32.mrb[20].mxu0 }
0x189f   :  { %v22737_v17 = vadd.f32 %v9977_v5, %v22584_v53  ;;  %v15873_v4 = vpop.f32.mrb[21].mxu0  ;;  %v10447_v5 = vunpack.c.l.bf16 %v10422_v28 }
0x18a0   :  { %v10452_v4 = vunpack.c.h.bf16 %v10424_v47 }
0x18a2   :  { %v9982_v14 = vpop.f32.mrb[22].mxu0 }
0x18a3   :  { %v22740_v26 = vadd.f32 %v9982_v14, %v22587_v59  ;;  %v15876_v58 = vpop.f32.mrb[23].mxu0  ;;  %v10451_v14 = vunpack.c.l.bf16 %v10424_v47 }
0x18a4   :  { %v10674_v58 = vld [vmem:[%s23335_s4 + $0x180] sm:$0xff] }
0x18a6   :  { %v9987_v49 = vpop.f32.mrb[24].mxu0 }
0x18a7   :  { %v22743_v57 = vadd.f32 %v9987_v49, %v22590_v52  ;;  %v15879_v2 = vpop.f32.mrb[25].mxu0  ;;  %v10675_v49 = vld [vmem:[%s23335_s4 + $0x188] sm:$0xff] }
0x18a8   :  { %v17747_v2 = vpack.c.bf16 %v10675_v49, %v10674_v58 }
0x18aa   :  { %v9992_v45 = vpop.f32.mrb[26].mxu0  ;;  %17748 = vmatpush3.bf16.msra.mxu0 %v17747_v2 }
0x18ab   :  { %v22746_v8 = vadd.f32 %v9992_v45, %v22593_v62  ;;  %v15882_v56 = vpop.f32.mrb[27].mxu0  ;;  %17767 = vmatprep.subr.bf16.mxu0 %v23384_v22 }
0x18ae   :  { %v9997_v40 = vpop.f32.mrb[28].mxu0 }
0x18af   :  { %v22749_v53 = vadd.f32 %v9997_v40, %v22596_v34  ;;  %v15885_v37 = vpop.f32.mrb[29].mxu0 }
0x18b2   :  { %v10002_v61 = vpop.f32.mrb[30].mxu0 }
0x18b3   :  { %v22752_v59 = vadd.f32 %v10002_v61, %v22599_v63  ;;  %v15888_v25 = vpop.f32.mrb[31].mxu0 }
0x18b6   :  { %v10007_v31 = vpop.f32.mrb[32].mxu0 }
0x18b7   :  { %v22755_v52 = vadd.f32 %v10007_v31, %v22602_v55  ;;  %v15891_v3 = vpop.f32.mrb[33].mxu0 }
0x18c0   :  { %v10247_v54 = vpop.f32.mrb[34].mxu0 }
0x18c1   :  { %v10248_v62 = vadd.f32 %v22699_v51, %v10247_v54  ;;  %v10249_v24 = vpop.f32.mrb[35].mxu0 }
0x18c3   :  { %15897 = vmatmul.mubr.msk.f32.vlgmr.msra.gmra.mrb[20].mxu1 %vm568_vm5, %v10248_v62 }
0x18c4   :  { %17724 = vmatpush1.bf16.msra.mxu1 %v19125_v18  ;;  %v10252_v34 = vpop.f32.mrb[36].mxu0  ;;  %15899 = vmatprep.mubr.msk.f32.mxu1 %vm17944_vm0, %v23385_v19 }
0x18c5   :  { %v10253_v63 = vadd.f32 %v22701_v41, %v10252_v34  ;;  %17725 = vmatprep.subr.bf16.mxu1 %v23384_v22  ;;  %v10254_v39 = vpop.f32.mrb[37].mxu0 }
0x18c7   :  { %15900 = vmatmul.mubr.msk.f32.gmra.mrb[22].mxu1 %vm568_vm5, %v10253_v63 }
0x18c8   :  { %17727 = vmatpush1.bf16.msra.mxu1 %v19127_v38  ;;  %v10257_v55 = vpop.f32.mrb[38].mxu0  ;;  %15902 = vmatprep.mubr.msk.f32.mxu1 %vm17944_vm0, %v23385_v19 }
0x18c9   :  { %v10258_v51 = vadd.f32 %v22703_v1, %v10257_v55  ;;  %17728 = vmatprep.subr.bf16.mxu1 %v23384_v22  ;;  %v10259_v18 = vpop.f32.mrb[39].mxu0 }
0x18cb   :  { %15903 = vmatmul.mubr.msk.f32.gmra.mrb[24].mxu1 %vm568_vm5, %v10258_v51 }
0x18cc   :  { %17730 = vmatpush1.bf16.msra.mxu1 %v19130_v10  ;;  %v10262_v41 = vpop.f32.mrb[40].mxu0  ;;  %15905 = vmatprep.mubr.msk.f32.mxu1 %vm17944_vm0, %v23385_v19 }
0x18cd   :  { %v10263_v7 = vadd.f32 %v22705_v9, %v10262_v41  ;;  %17731 = vmatprep.subr.bf16.mxu1 %v23384_v22  ;;  %v10264_v38 = vpop.f32.mrb[41].mxu0 }
0x18cf   :  { %15906 = vmatmul.mubr.msk.f32.gmra.mrb[26].mxu1 %vm568_vm5, %v10263_v7 }
0x18d0   :  { %17733 = vmatpush1.bf16.msra.mxu1 %v19132_v36  ;;  %v10267_v1 = vpop.f32.mrb[42].mxu0  ;;  %15908 = vmatprep.mubr.msk.f32.mxu1 %vm17944_vm0, %v23385_v19 }
0x18d1   :  { %v10268_v15 = vadd.f32 %v22707_v6, %v10267_v1  ;;  %17734 = vmatprep.subr.bf16.mxu1 %v23384_v22  ;;  %v10269_v10 = vpop.f32.mrb[43].mxu0  ;;  %v10412_v6 = vld [vmem:[%s23334_s3 + $0xa88] sm:$0xff] }
0x18d3   :  { %15909 = vmatmul.mubr.msk.f32.gmra.mrb[28].mxu1 %vm568_vm5, %v10268_v15 }
0x18d4   :  { %17736 = vmatpush1.bf16.msra.mxu1 %v19134_v11  ;;  %v10272_v9 = vpop.f32.mrb[44].mxu0  ;;  %15911 = vmatprep.mubr.msk.f32.mxu1 %vm17944_vm0, %v23385_v19  ;;  %v10428_v11 = vunpack.c.h.bf16 %v10412_v6 }
0x18d5   :  { %v10273_v29 = vadd.f32 %v22709_v21, %v10272_v9  ;;  %17737 = vmatprep.subr.bf16.mxu1 %v23384_v22  ;;  %v10274_v36 = vpop.f32.mrb[45].mxu0 }
0x18d7   :  { %15912 = vmatmul.mubr.msk.f32.gmra.mrb[30].mxu1 %vm568_vm5, %v10273_v29 }
0x18d8   :  { %17739 = vmatpush1.bf16.msra.mxu1 %v19136_v48  ;;  %v10277_v35 = vpop.f32.mrb[46].mxu0  ;;  %15914 = vmatprep.mubr.msk.f32.mxu1 %vm17944_vm0, %v23385_v19  ;;  %v10414_v48 = vld [vmem:[%s23334_s3 + $0xa98] sm:$0xff] }
0x18d9   :  { %v10278_v0 = vadd.f32 %v22711_v13, %v10277_v35  ;;  %17740 = vmatprep.subr.bf16.mxu1 %v23384_v22  ;;  %v10279_v21 = vpop.f32.mrb[47].mxu0  ;;  %v10427_v13 = vunpack.c.l.bf16 %v10412_v6  ;;  %v10432_v23 = vunpack.c.h.bf16 %v10414_v48 }
0x18db   :  { %15915 = vmatmul.mubr.msk.f32.gmra.mrb[32].mxu1 %vm568_vm5, %v10278_v0 }
0x18dc   :  { %17742 = vmatpush1.bf16.msra.mxu1 %v19139_v60  ;;  %13346 = vmatprep.mubr.msk.f32.mxu1 %vm1034_vm6, %v10428_v11  ;;  %v10431_v60 = vunpack.c.l.bf16 %v10414_v48 }
0x18dd   :  { %17743 = vmatprep.subr.bf16.mxu1 %v23384_v22 }
0x18e0   :  { %17745 = vmatpush1.bf16.msra.mxu1 %v19141_v16  ;;  %v10418_v16 = vld [vmem:[%s23334_s3 + $0xab8] sm:$0xff]  ;;  %v14975_v45 = vpop.f32.mrb[48].mxu0 }
0x18e1   :  { %10606 = vmatprep.subr.mxu1 %v23385_v19  ;;  %v10440_v50 = vunpack.c.h.bf16 %v10418_v16  ;;  %v10439_v44 = vunpack.c.l.bf16 %v10418_v16  ;;  %v14976_v56 = vpop.f32.mrb[49].mxu0 }
0x18e2   :  { %v14977_v40 = vadd.f32 %v14976_v56, %v14975_v45 }
0x18e4   :  { %10607 = vmatpush1.msra.mxu1 %v19216_v42  ;;  %v10420_v42 = vld [vmem:[%s23334_s3 + $0xac8] sm:$0xff]  ;;  %v14978_v37 = vpop.f32.mrb[50].mxu0  ;;  %s17947_s3 = smov [#allocation2]  }
0x18e5   :  { %10639 = vmatmul.mubr.f32.vlgmr.msra.gmra.mrb[34].mxu1 %v10427_v13  ;;  %17749 = vmatprep.subr.bf16.mxu1 %v23384_v22  ;;  %v10444_v20 = vunpack.c.h.bf16 %v10420_v42  ;;  %v10443_v32 = vunpack.c.l.bf16 %v10420_v42  ;;  %v14979_v61 = vpop.f32.mrb[51].mxu0  ;;  %s12952_s4 = sshll.u32 %s17947_s3, 4  ;;  %s12953_s4 = int_to_ptr.vmem [resolvable:$true] %s12952_s4 }
0x18e6   :  { %13347 = vmatprep.mubr.msk.f32.mxu1 %vm1034_vm6, %v10432_v23  ;;  %v14980_v25 = vadd.f32 %v14979_v61, %v14978_v37  ;;  %v11064_v37 = vld [vmem:[%s23338_s7 + $0x20] sm:$0xff]  ;;  %v11065_v61 = vld [vmem:[%s23338_s7 + $0x28] sm:$0xff]  ;;  %s17919_s27 = scalar_lea.vmem %s12953_s4, 32  ;;  %p17924_p1 = scmp.lt.s32.totalorder %s12953_s4, %s12953_s4 }
0x18e7   :  { %p17920_p0 = scmp.ne.s32.totalorder %s12953_s4, %s17919_s27  ;;  %p17925_p2 = scmp.lt.s32.totalorder %s17919_s27, %s17919_s27 }
0x18e8   :  { %v14981_v31 = vpop.f32.mrb[52].mxu0 }
0x18e9   :  { %10644 = vmatmul.mubr.f32.gmra.mrb[36].mxu1 %v10431_v60  ;;  %v14982_v3 = vpop.f32.mrb[53].mxu0  ;;  %p17926_p3 = por %p17925_p2, %p17924_p1 }
0x18ea   :  { %13348 = vmatprep.mubr.msk.f32.mxu1 %vm1034_vm6, %v10436_v12  ;;  %v14983_v54 = vadd.f32 %v14982_v3, %v14981_v31  ;;  %v22890_v31 = vld [vmem:[%s23336_s5] sm:$0x7] }
0x18eb   :  { %v23386_v3 = vld [vmem:[#allocation5_spill] sm:$0xff]  ;;  %p17927_p4 = pnand %p17926_p3, %p17920_p0 }
0x18ec   :  { %v14984_v62 = vpop.f32.mrb[54].mxu0 }
0x18ed   :  { %10649 = vmatmul.mubr.f32.gmra.mrb[38].mxu1 %v10435_v27  ;;  %v14985_v24 = vpop.f32.mrb[55].mxu0 }
0x18ee   :  { %13349 = vmatprep.mubr.msk.f32.mxu1 %vm1034_vm6, %v10440_v50  ;;  %v14986_v34 = vadd.f32 %v14985_v24, %v14984_v62 }
0x18f0   :  { %v14987_v63 = vpop.f32.mrb[56].mxu0 }
0x18f1   :  { %10654 = vmatmul.mubr.f32.gmra.mrb[40].mxu1 %v10439_v44  ;;  %v14988_v39 = vpop.f32.mrb[57].mxu0 }
0x18f2   :  { %13350 = vmatprep.mubr.msk.f32.mxu1 %vm1034_vm6, %v10444_v20  ;;  %v14989_v55 = vadd.f32 %v14988_v39, %v14987_v63 }
0x18f4   :  { %v14990_v51 = vpop.f32.mrb[58].mxu0 }
0x18f5   :  { %10659 = vmatmul.mubr.f32.gmra.mrb[42].mxu1 %v10443_v32  ;;  %v14991_v18 = vpop.f32.mrb[59].mxu0 }
0x18f6   :  { %13351 = vmatprep.mubr.msk.f32.mxu1 %vm1034_vm6, %v10448_v33  ;;  %v14992_v41 = vadd.f32 %v14991_v18, %v14990_v51 }
0x18f8   :  { %v14993_v7 = vpop.f32.mrb[60].mxu0 }
0x18f9   :  { %10664 = vmatmul.mubr.f32.gmra.mrb[44].mxu1 %v10447_v5  ;;  %v14994_v38 = vpop.f32.mrb[61].mxu0 }
0x18fa   :  { %13352 = vmatprep.mubr.msk.f32.mxu1 %vm1034_vm6, %v10452_v4  ;;  %v14995_v1 = vadd.f32 %v14994_v38, %v14993_v7 }
0x18fd   :  { %10669 = vmatmul.mubr.f32.gmra.mrb[46].mxu1 %v10451_v14 }
0x18fe   :  { %15956 = vmatprep.mubr.msk.f32.mxu1 %vm17944_vm0, %v23385_v19 }
0x1996   :  { %v10370_v15 = vpop.f32.mrb[20].mxu1 }
0x1997   :  { %v22839_v10 = vadd.f32 %v10370_v15, %v22737_v17  ;;  %v15898_v9 = vpop.f32.mrb[21].mxu1 }
0x199a   :  { %v10375_v29 = vpop.f32.mrb[22].mxu1 }
0x199b   :  { %v22842_v36 = vadd.f32 %v10375_v29, %v22740_v26  ;;  %v15901_v6 = vpop.f32.mrb[23].mxu1 }
0x199e   :  { %v10380_v35 = vpop.f32.mrb[24].mxu1 }
0x199f   :  { %v22845_v11 = vadd.f32 %v10380_v35, %v22743_v57  ;;  %v15904_v0 = vpop.f32.mrb[25].mxu1 }
0x19a2   :  { %v10385_v21 = vpop.f32.mrb[26].mxu1 }
0x19a3   :  { %v22848_v48 = vadd.f32 %v10385_v21, %v22746_v8  ;;  %v15907_v13 = vpop.f32.mrb[27].mxu1 }
0x19a6   :  { %v10390_v23 = vpop.f32.mrb[28].mxu1 }
0x19a7   :  { %v22851_v17 = vadd.f32 %v10390_v23, %v22749_v53  ;;  %v15910_v30 = vpop.f32.mrb[29].mxu1 }
0x19aa   :  { %v10395_v60 = vpop.f32.mrb[30].mxu1 }
0x19ab   :  { %v22854_v26 = vadd.f32 %v10395_v60, %v22752_v59  ;;  %v15913_v12 = vpop.f32.mrb[31].mxu1 }
0x19ae   :  { %v10400_v16 = vpop.f32.mrb[32].mxu1 }
0x19af   :  { %v22857_v57 = vadd.f32 %v10400_v16, %v22755_v52  ;;  %v15916_v27 = vpop.f32.mrb[33].mxu1 }
0x19b8   :  { %v10640_v50 = vpop.f32.mrb[34].mxu1 }
0x19b9   :  { %v10641_v42 = vadd.f32 %v14977_v40, %v10640_v50  ;;  %v10642_v8 = vpop.f32.mrb[35].mxu1 }
0x19bb   :  { %15922 = vmatmul.mubr.msk.f32.vlgmr.msra.gmra.mrb[62].mxu0 %vm568_vm5, %v10641_v42 }
0x19bc   :  { %v10645_v44 = vpop.f32.mrb[36].mxu1  ;;  %15924 = vmatprep.mubr.msk.f32.mxu0 %vm17944_vm0, %v23385_v19 }
0x19bd   :  { %v10646_v53 = vadd.f32 %v14980_v25, %v10645_v44  ;;  %v10647_v20 = vpop.f32.mrb[37].mxu1  ;;  %v17768_v25 = vpack.c.bf16 %v11065_v61, %v11064_v37 }
0x19bf   :  { %15925 = vmatmul.mubr.msk.f32.gmra.mrb[64].mxu0 %vm568_vm5, %v10646_v53 }
0x19c0   :  { %v10650_v59 = vpop.f32.mrb[38].mxu1  ;;  %15927 = vmatprep.mubr.msk.f32.mxu0 %vm17944_vm0, %v23385_v19  ;;  %17769 = vmatpush3.bf16.msra.mxu0 %v17768_v25 }
0x19c1   :  { %v10651_v52 = vadd.f32 %v14983_v54, %v10650_v59  ;;  %v10652_v28 = vpop.f32.mrb[39].mxu1  ;;  %17770 = vmatprep.subr.bf16.mxu0 %v23384_v22  ;;  %v10808_v54 = vrot.slane %v22890_v31, %v23386_v3 }
0x19c3   :  { %15928 = vmatmul.mubr.msk.f32.gmra.mrb[66].mxu0 %vm568_vm5, %v10651_v52 }
0x19c4   :  { %v10655_v32 = vpop.f32.mrb[40].mxu1  ;;  %15930 = vmatprep.mubr.msk.f32.mxu0 %vm17944_vm0, %v23385_v19 }
0x19c5   :  { %v10656_v33 = vadd.f32 %v14986_v34, %v10655_v32  ;;  %v10657_v47 = vpop.f32.mrb[41].mxu1 }
0x19c7   :  { %15931 = vmatmul.mubr.msk.f32.gmra.mrb[68].mxu0 %vm568_vm5, %v10656_v33 }
0x19c8   :  { %v10660_v5 = vpop.f32.mrb[42].mxu1  ;;  %15933 = vmatprep.mubr.msk.f32.mxu0 %vm17944_vm0, %v23385_v19 }
0x19c9   :  { %v10661_v4 = vadd.f32 %v14989_v55, %v10660_v5  ;;  %v10662_v14 = vpop.f32.mrb[43].mxu1 }
0x19cb   :  { %15934 = vmatmul.mubr.msk.f32.gmra.mrb[70].mxu0 %vm568_vm5, %v10661_v4 }
0x19cc   :  { %v10665_v58 = vpop.f32.mrb[44].mxu1  ;;  %15936 = vmatprep.mubr.msk.f32.mxu0 %vm17944_vm0, %v23385_v19 }
0x19cd   :  { %v10666_v49 = vadd.f32 %v14992_v41, %v10665_v58  ;;  %v10667_v2 = vpop.f32.mrb[45].mxu1 }
0x19cf   :  { %15937 = vmatmul.mubr.msk.f32.gmra.mrb[72].mxu0 %vm568_vm5, %v10666_v49 }
0x19d0   :  { %v10670_v45 = vpop.f32.mrb[46].mxu1  ;;  %15939 = vmatprep.mubr.msk.f32.mxu0 %vm17944_vm0, %v23385_v19 }
0x19d1   :  { %v10671_v56 = vadd.f32 %v14995_v1, %v10670_v45  ;;  %v10672_v40 = vpop.f32.mrb[47].mxu1 }
0x19d3   :  { %15940 = vmatmul.mubr.msk.f32.gmra.mrb[74].mxu0 %vm568_vm5, %v10671_v56 }
0x19d4   :  { %15984 = vmatprep.mubr.msk.f32.mxu0 %vm17944_vm0, %v23385_v19 }
0x1a8e   :  { %v10763_v62 = vpop.f32.mrb[62].mxu0 }
0x1a8f   :  { %v10797_v24 = vadd.f32 %v10763_v62, %v22839_v10  ;;  %v15923_v34 = vpop.f32.mrb[63].mxu0 }
0x1a91   :  { %v22895_v63 = vadd.f32 %v10808_v54, %v10797_v24 }
0x1a92   :  { %v10768_v39 = vpop.f32.mrb[64].mxu0 }
0x1a93   :  { %v10798_v55 = vadd.f32 %v10768_v39, %v22842_v36  ;;  %v15926_v51 = vpop.f32.mrb[65].mxu0  ;;  %v10837_v18 = vmul.f32 %v22895_v63, %v22895_v63  ;;  %v10817_v38 = vsel %vm10816_vm7, %v22895_v63, 0.0 }
0x1a95   :  { %v22900_v41 = vadd.f32 %v10808_v54, %v10798_v55  ;;  %v10844_v36 = vsel %vm10816_vm7, %v10837_v18, 0.0 }
0x1a96   :  { %v10773_v7 = vpop.f32.mrb[66].mxu0 }
0x1a97   :  { %v10818_v1 = vsel %vm10816_vm7, %v22900_v41, 0.0  ;;  %v10838_v15 = vmul.f32 %v22900_v41, %v22900_v41  ;;  %v10799_v10 = vadd.f32 %v10773_v7, %v22845_v11  ;;  %v15929_v9 = vpop.f32.mrb[67].mxu0 }
0x1a98   :  { %v10819_v29 = vadd.f32 %v10818_v1, %v10817_v38 }
0x1a99   :  { %v10845_v6 = vsel %vm10816_vm7, %v10838_v15, 0.0  ;;  %v22911_v35 = vadd.f32 %v10808_v54, %v10799_v10 }
0x1a9a   :  { %v10846_v0 = vadd.f32 %v10845_v6, %v10844_v36  ;;  %v10778_v21 = vpop.f32.mrb[68].mxu0 }
0x1a9b   :  { %v10820_v13 = vsel %vm10816_vm7, %v22911_v35, 0.0  ;;  %v10839_v23 = vmul.f32 %v22911_v35, %v22911_v35  ;;  %v10800_v30 = vadd.f32 %v10778_v21, %v22848_v48  ;;  %v15932_v60 = vpop.f32.mrb[69].mxu0 }
0x1a9c   :  { %v10821_v11 = vadd.f32 %v10820_v13, %v10819_v29 }
0x1a9d   :  { %v10847_v12 = vsel %vm10816_vm7, %v10839_v23, 0.0  ;;  %v22919_v16 = vadd.f32 %v10808_v54, %v10800_v30 }
0x1a9e   :  { %v10848_v27 = vadd.f32 %v10847_v12, %v10846_v0  ;;  %v10783_v50 = vpop.f32.mrb[70].mxu0 }
0x1a9f   :  { %v10822_v42 = vsel %vm10816_vm7, %v22919_v16, 0.0  ;;  %v10840_v8 = vmul.f32 %v22919_v16, %v22919_v16  ;;  %v10801_v44 = vadd.f32 %v10783_v50, %v22851_v17  ;;  %v15935_v53 = vpop.f32.mrb[71].mxu0 }
0x1aa0   :  { %v10823_v20 = vadd.f32 %v10822_v42, %v10821_v11 }
0x1aa1   :  { %v10849_v48 = vsel %vm10816_vm7, %v10840_v8, 0.0  ;;  %v10813_v59 = vadd.f32 %v10808_v54, %v10801_v44 }
0x1aa2   :  { %v10850_v52 = vadd.f32 %v10849_v48, %v10848_v27  ;;  %v10788_v28 = vpop.f32.mrb[72].mxu0 }
0x1aa3   :  { %v10824_v32 = vsel %vm10816_vm7, %v10813_v59, 0.0  ;;  %v10841_v33 = vmul.f32 %v10813_v59, %v10813_v59  ;;  %v10802_v47 = vadd.f32 %v10788_v28, %v22854_v26  ;;  %v15938_v5 = vpop.f32.mrb[73].mxu0 }
0x1aa4   :  { %v10825_v4 = vadd.f32 %v10824_v32, %v10823_v20 }
0x1aa5   :  { %v10851_v14 = vsel %vm10816_vm7, %v10841_v33, 0.0  ;;  %v10814_v58 = vadd.f32 %v10808_v54, %v10802_v47 }
0x1aa6   :  { %v10852_v49 = vadd.f32 %v10851_v14, %v10850_v52  ;;  %v10793_v2 = vpop.f32.mrb[74].mxu0 }
0x1aa7   :  { %v10826_v17 = vsel %vm10816_vm7, %v10814_v58, 0.0  ;;  %v10842_v45 = vmul.f32 %v10814_v58, %v10814_v58  ;;  %v10803_v56 = vadd.f32 %v10793_v2, %v22857_v57  ;;  %v15941_v40 = vpop.f32.mrb[75].mxu0 }
0x1aa8   :  { %v10827_v37 = vadd.f32 %v10826_v17, %v10825_v4 }
0x1aa9   :  { %v10853_v61 = vsel %vm10816_vm7, %v10842_v45, 0.0  ;;  %v10815_v25 = vadd.f32 %v10808_v54, %v10803_v56 }
0x1aaa   :  { %v10854_v62 = vadd.f32 %v10853_v61, %v10852_v49  ;;  %v10985_v61 = vld [vmem:[%s23338_s7] sm:$0xff] }
0x1aab   :  { %v10829_v26 = vsel %vm10828_vm8, %v10815_v25, 0.0  ;;  %v10843_v24 = vmul.f32 %v10815_v25, %v10815_v25 }
0x1aac   :  { %v10830_v34 = vadd.f32 %v10829_v26, %v10827_v37 }
0x1aad   :  { %v10855_v39 = vsel %vm10828_vm8, %v10843_v24, 0.0  ;;  %v10987_v24 = vld [vmem:[%s23338_s7 + $0x10] sm:$0xff] }
0x1aae   :  { %v10831_v55 = vrot.slane %v10830_v34, 4  ;;  %v10856_v51 = vadd.f32 %v10855_v39, %v10854_v62 }
0x1ab0   :  { %v10832_v18 = vadd.f32 %v10831_v55, %v10830_v34  ;;  %v10857_v7 = vrot.slane %v10856_v51, 4  ;;  %v10988_v34 = vld [vmem:[%s23338_s7 + $0x18] sm:$0xff]  ;;  %v11066_v55 = vld [vmem:[%s23338_s7 + $0x30] sm:$0xff] }
0x1ab1   :  { %v17777_v39 = vpack.c.bf16 %v10988_v34, %v10987_v24  ;;  %v11751_v24 = vld [vmem:[%s23338_s7 + $0xb8] sm:$0xff] }
0x1ab2   :  { %v10833_v38 = vrot.slane %v10832_v18, 2  ;;  %v10858_v1 = vadd.f32 %v10857_v7, %v10856_v51  ;;  %v11067_v51 = vld [vmem:[%s23338_s7 + $0x38] sm:$0xff] }
0x1ab4   :  { %v10834_v15 = vadd.f32 %v10833_v38, %v10832_v18  ;;  %v10859_v10 = vrot.slane %v10858_v1, 2  ;;  %v17771_v18 = vpack.c.bf16 %v11067_v51, %v11066_v55 }
0x1ab6   :  { %v10835_v57 = vrot.slane %v10834_v15, 1  ;;  %v10860_v9 = vadd.f32 %v10859_v10, %v10858_v1  ;;  %17772 = vmatpush3.bf16.msra.mxu0 %v17771_v18  ;;  %v11214_v10 = vld [vmem:[%s23337_s6 + $0x8] sm:$0xff]  }
0x1ab7   :  { %17779 = vmatprep.subr.bf16.mxu0 %v23384_v22 }
0x1ab8   :  { %v10836_v29 = vadd.f32 %v10835_v57, %v10834_v15  ;;  %v10861_v36 = vrot.slane %v10860_v9, 1  ;;  %v11215_v57 = vunpack.c.l.bf16 %v11214_v10 }
0x1aba   :  { %v10862_v6 = vadd.f32 %v10861_v36, %v10860_v9  ;;  %v10863_v0 = vmul.f32 0.02, %v10836_v29  ;;  %v11289_v9 = vld [vmem:[%s23338_s7 + $0x40] sm:$0xff]  ;;  %v11290_v29 = vld [vmem:[%s23338_s7 + $0x48] sm:$0xff]  ;;  %v11291_v36 = vld [vmem:[%s23338_s7 + $0x50] sm:$0xff] }
0x1abc   :  { %v10864_v54 = vmul.f32 0.02, %v10862_v6  ;;  %v10865_v21 = vmul.f32 %v10863_v0, %v10863_v0  ;;  %v17789_v6 = vpack.c.bf16 %v11290_v29, %v11289_v9  ;;  %v11904_v29 = vld [vmem:[%s23338_s7 + $0xd8] sm:$0xff] }
0x1abe   :  { %v10866_v13 = vsub.f32 %v10864_v54, %v10865_v21 }
0x1ac0   :  { %v10867_v23 = vmax.f32 %v10866_v13, 0.0 }
0x1ac2   :  { %v10868_v30 = vadd.f32 1e-05, %v10867_v23 }
0x1ac4   :  { %17915 = vrsqrt.f32 %v10868_v30 }
0x1ace   :  { %v17916_v60 = vpop.eup %17915 }
0x1acf   :  { %v10870_v11 = vmul.f32 %v17916_v60, %v22890_v31 }
0x1ad1   :  { %v10871_v12 = vmul.f32 %v10870_v11, %v10863_v0  ;;  %v10879_v27 = vrot.slane %v10870_v11, %v18837_v43  ;;  %v11292_v0 = vld [vmem:[%s23338_s7 + $0x58] sm:$0xff] }
0x1ad2   :  { %v17792_v54 = vpack.c.bf16 %v11292_v0, %v11291_v36 }
0x1ad3   :  { %v10873_v50 = vrot.slane %v10871_v12, 7  ;;  %v10886_v42 = vmul.f32 %v10879_v27, %v10815_v25  ;;  %v10880_v8 = vmul.f32 %v10879_v27, %v22895_v63  ;;  %v10881_v44 = vmul.f32 %v10879_v27, %v22900_v41  ;;  %v10986_v25 = vld [vmem:[%s23338_s7 + $0x8] sm:$0xff] }
0x1ad4   :  { %v10882_v53 = vmul.f32 %v10879_v27, %v22911_v35  ;;  %v10883_v20 = vmul.f32 %v10879_v27, %v22919_v16  ;;  %v10884_v48 = vmul.f32 %v10879_v27, %v10813_v59  ;;  %v10885_v52 = vmul.f32 %v10879_v27, %v10814_v58  ;;  %v10905_v58 = vld [vmem:[%s23337_s6] sm:$0xff]  }
0x1ad5   :  { %v10875_v28 = vsub.f32 %v22890_v31, %v10873_v50  ;;  %v10906_v40 = vunpack.c.l.bf16 %v10905_v58  ;;  %v10990_v62 = vunpack.c.h.bf16 %v10905_v58  ;;  %v17774_v26 = vpack.c.bf16 %v10986_v25, %v10985_v61  ;;  %v11442_v50 = vld [vmem:[%s23338_s7 + $0x60] sm:$0xff]  ;;  %v11749_v25 = vld [vmem:[%s23338_s7 + $0xa8] sm:$0xff] }
0x1ad6   :  { %v11368_v27 = vunpack.c.h.bf16 %v11214_v10  ;;  %v11748_v61 = vld [vmem:[%s23338_s7 + $0xa0] sm:$0xff]  ;;  %v11902_v10 = vld [vmem:[%s23338_s7 + $0xc8] sm:$0xff] }
0x1ad7   :  { %v10890_v32 = vrot.slane %v10875_v28, %v18842_v46 }
0x1ad9   :  { %v10897_v33 = vadd.f32 %v10890_v32, %v10886_v42  ;;  %v10891_v47 = vadd.f32 %v10890_v32, %v10880_v8  ;;  %v10892_v5 = vadd.f32 %v10890_v32, %v10881_v44  ;;  %v10893_v4 = vadd.f32 %v10890_v32, %v10882_v53  ;;  %v11443_v42 = vld [vmem:[%s23338_s7 + $0x68] sm:$0xff]  ;;  %v11444_v8 = vld [vmem:[%s23338_s7 + $0x70] sm:$0xff]  ;;  %v11445_v53 = vld [vmem:[%s23338_s7 + $0x78] sm:$0xff] }
0x1ada   :  { %v10894_v14 = vadd.f32 %v10890_v32, %v10883_v20  ;;  %v10895_v49 = vadd.f32 %v10890_v32, %v10884_v48  ;;  %v10896_v2 = vadd.f32 %v10890_v32, %v10885_v52  ;;  %v17804_v44 = vpack.c.bf16 %v11443_v42, %v11442_v50 }
0x1adb   :  { %v10898_v63 = vmax.f32 %v10891_v47, 0.0  ;;  %v10899_v17 = vmax.f32 %v10892_v5, 0.0  ;;  %v10900_v41 = vmax.f32 %v10893_v4, 0.0  ;;  %v22956_v37 = vmax.f32 %v10897_v33, 0.0  ;;  %v11520_v47 = vld [vmem:[%s23337_s6 + $0x10] sm:$0xff]   ;;  %v11595_v4 = vld [vmem:[%s23338_s7 + $0x80] sm:$0xff] }
0x1adc   :  { %v10901_v45 = vmax.f32 %v10894_v14, 0.0  ;;  %v10902_v35 = vmax.f32 %v10895_v49, 0.0  ;;  %v10903_v56 = vmax.f32 %v10896_v2, 0.0  ;;  %v17807_v20 = vpack.c.bf16 %v11445_v53, %v11444_v8  ;;  %v11596_v14 = vld [vmem:[%s23338_s7 + $0x88] sm:$0xff]  ;;  %v11597_v49 = vld [vmem:[%s23338_s7 + $0x90] sm:$0xff] }
0x1add   :  { %v22941_v16 = vpack.c.bf16 %v10899_v17, %v10898_v63  ;;  %v11521_v5 = vunpack.c.l.bf16 %v11520_v47  ;;  %v17819_v2 = vpack.c.bf16 %v11596_v14, %v11595_v4  ;;  %v11598_v63 = vld [vmem:[%s23338_s7 + $0x98] sm:$0xff] }
0x1ade   :  { %v22943_v59 = vpack.c.bf16 %v10901_v45, %v10900_v41  ;;  %v22945_v31 = vpack.c.bf16 %v10903_v56, %v10902_v35  ;;  %v17822_v17 = vpack.c.bf16 %v11598_v63, %v11597_v49  ;;  %v12482_v49 = vld [vmem:[%s23341_s10 + $0x20] sm:$0xff] }
0x1adf   :  { %17751 = vmatpush3.bf16.msra.mxu1 %v22941_v16 }
0x1ae0   :  { %17752 = vmatprep.subr.bf16.mxu1 %v23384_v22 }
0x1ae3   :  { %17754 = vmatpush3.bf16.msra.mxu1 %v22943_v59 }
0x1ae4   :  { %17755 = vmatprep.subr.bf16.mxu1 %v23384_v22 }
0x1ae7   :  { %17757 = vmatpush3.bf16.msra.mxu1 %v22945_v31 }
0x1ae8   :  { %15954 = vmatprep.subr.mxu1 %v23385_v19 }
0x1aeb   :  { %15955 = vmatpush3.msk.msra.mxu1 %vm10911_vm9, %v22956_v37 }
0x1aec   :  { %17758 = vmatprep.subr.bf16.mxu1 %v23384_v22  ;;  %15957 = vmatmul.mubr.msk.f32.vlgmr.msra.gmra.mrb[48].mxu1 %vm10907_vm10, %v10906_v40  ;;  %v11674_v40 = vunpack.c.h.bf16 %v11520_v47 }
0x1aed   :  { %17760 = vmatpush3.bf16.msra.mxu1 %v22941_v16  ;;  %15973 = vmatprep.mubr.msk.f32.mxu1 %vm17944_vm0, %v23385_v19 }
0x1aee   :  { %17761 = vmatprep.subr.bf16.mxu1 %v23384_v22 }
0x1af1   :  { %17763 = vmatpush3.bf16.msra.mxu1 %v22943_v59 }
0x1af2   :  { %17764 = vmatprep.subr.bf16.mxu1 %v23384_v22 }
0x1af5   :  { %17766 = vmatpush3.bf16.msra.mxu1 %v22945_v31 }
0x1af6   :  { %15971 = vmatprep.subr.mxu1 %v23385_v19 }
0x1af9   :  { %15972 = vmatpush3.msk.msra.mxu1 %vm10911_vm9, %v22956_v37 }
0x1afa   :  { %15974 = vmatmul.mubr.msk.f32.vlgmr.msra.gmra.mrb[50].mxu1 %vm10907_vm10, %v10990_v62  ;;  %17773 = vmatprep.subr.bf16.mxu1 %v23384_v22  ;;  %v11750_v62 = vld [vmem:[%s23338_s7 + $0xb0] sm:$0xff] }
0x1afb   :  { %17775 = vmatpush3.bf16.msra.mxu1 %v17774_v26  ;;  %15995 = vmatprep.mubr.msk.f32.mxu1 %vm17944_vm0, %v23385_v19  ;;  %v17834_v26 = vpack.c.bf16 %v11749_v25, %v11748_v61  ;;  %v17837_v34 = vpack.c.bf16 %v11751_v24, %v11750_v62 }
0x1afc   :  { %17776 = vmatprep.subr.bf16.mxu1 %v23384_v22 }
0x1aff   :  { %17778 = vmatpush3.bf16.msra.mxu1 %v17777_v39 }
0x1b00   :  { %17788 = vmatprep.subr.bf16.mxu1 %v23384_v22 }
0x1bbf   :  { %v10981_v7 = vpop.f32.mrb[48].mxu1 }
0x1bc0   :  { %v15958_v38 = vpop.f32.mrb[49].mxu1  ;;  %15996 = vmatmul.mubr.msk.f32.vlgmr.msra.gmra.mrb[52].mxu1 %vm10816_vm7, %v10981_v7 }
0x1bc1   :  { %16023 = vmatprep.mubr.msk.f32.mxu1 %vm17944_vm0, %v23385_v19  ;;  %17790 = vmatpush3.bf16.msra.mxu1 %v17789_v6  ;;  %v11826_v38 = vld [vmem:[%s23337_s6 + $0x18] sm:$0xff]  }
0x1bc2   :  { %17791 = vmatprep.subr.bf16.mxu1 %v23384_v22 }
0x1bc5   :  { %17793 = vmatpush3.bf16.msra.mxu1 %v17792_v54 }
0x1bc6   :  { %17794 = vmatprep.subr.bf16.mxu1 %v23384_v22 }
0x1bcd   :  { %v11060_v1 = vpop.f32.mrb[50].mxu1 }
0x1bce   :  { %15985 = vmatmul.mubr.msk.f32.vlgmr.msra.gmra.mrb[76].mxu0 %vm10816_vm7, %v11060_v1  ;;  %v15975_v15 = vpop.f32.mrb[51].mxu1  ;;  %v11827_v1 = vunpack.c.l.bf16 %v11826_v38 }
0x1bcf   :  { %17781 = vmatpush3.bf16.msra.mxu0 %v22941_v16  ;;  %16012 = vmatprep.mubr.msk.f32.mxu0 %vm17944_vm0, %v23385_v19  ;;  %v11901_v15 = vld [vmem:[%s23338_s7 + $0xc0] sm:$0xff] }
0x1bd0   :  { %17782 = vmatprep.subr.bf16.mxu0 %v23384_v22  ;;  %v17849_v9 = vpack.c.bf16 %v11902_v10, %v11901_v15 }
0x1bd3   :  { %17784 = vmatpush3.bf16.msra.mxu0 %v22943_v59 }
0x1bd4   :  { %17785 = vmatprep.subr.bf16.mxu0 %v23384_v22 }
0x1bd7   :  { %17787 = vmatpush3.bf16.msra.mxu0 %v22945_v31 }
0x1bd8   :  { %16010 = vmatprep.subr.mxu0 %v23385_v19 }
0x1bdb   :  { %16011 = vmatpush3.msk.msra.mxu0 %vm10911_vm9, %v22956_v37 }
0x1bdc   :  { %16013 = vmatmul.mubr.msk.f32.vlgmr.msra.gmra.mrb[78].mxu0 %vm10907_vm10, %v11215_v57  ;;  %17803 = vmatprep.subr.bf16.mxu0 %v23384_v22  ;;  %v11903_v57 = vld [vmem:[%s23338_s7 + $0xd0] sm:$0xff] }
0x1bdd   :  { %16051 = vmatprep.mubr.msk.f32.mxu0 %vm17944_vm0, %v23385_v19  ;;  %17805 = vmatpush3.bf16.msra.mxu0 %v17804_v44  ;;  %v17852_v36 = vpack.c.bf16 %v11904_v29, %v11903_v57 }
0x1bde   :  { %17806 = vmatprep.subr.bf16.mxu0 %v23384_v22 }
0x1be1   :  { %17808 = vmatpush3.bf16.msra.mxu0 %v17807_v20 }
0x1be2   :  { %17809 = vmatprep.subr.bf16.mxu0 %v23384_v22 }
0x1c93   :  { %v11210_v21 = vpop.f32.mrb[52].mxu1 }
0x1c94   :  { %v15997_v13 = vpop.f32.mrb[53].mxu1 }
0x1ca1   :  { %v11137_v23 = vpop.f32.mrb[76].mxu0 }
0x1ca2   :  { %v11211_v30 = vadd.f32 %v11210_v21, %v11137_v23  ;;  %v15986_v60 = vpop.f32.mrb[77].mxu0  ;;  %v11980_v23 = vunpack.c.h.bf16 %v11826_v38 }
0x1ca3   :  { %v12055_v60 = vld [vmem:[%s23338_s7 + $0xe8] sm:$0xff] }
0x1caf   :  { %v11285_v11 = vpop.f32.mrb[78].mxu0 }
0x1cb0   :  { %16024 = vmatmul.mubr.msk.f32.vlgmr.msra.gmra.mrb[54].mxu1 %vm10816_vm7, %v11285_v11  ;;  %v16014_v12 = vpop.f32.mrb[79].mxu0  ;;  %v12056_v11 = vld [vmem:[%s23338_s7 + $0xf0] sm:$0xff] }
0x1cb1   :  { %17796 = vmatpush3.bf16.msra.mxu1 %v22941_v16  ;;  %16040 = vmatprep.mubr.msk.f32.mxu1 %vm17944_vm0, %v23385_v19 }
0x1cb2   :  { %17797 = vmatprep.subr.bf16.mxu1 %v23384_v22 }
0x1cb5   :  { %17799 = vmatpush3.bf16.msra.mxu1 %v22943_v59 }
0x1cb6   :  { %17800 = vmatprep.subr.bf16.mxu1 %v23384_v22 }
0x1cb9   :  { %17802 = vmatpush3.bf16.msra.mxu1 %v22945_v31 }
0x1cba   :  { %16038 = vmatprep.subr.mxu1 %v23385_v19 }
0x1cbd   :  { %16039 = vmatpush3.msk.msra.mxu1 %vm10911_vm9, %v22956_v37 }
0x1cbe   :  { %16041 = vmatmul.mubr.msk.f32.vlgmr.msra.gmra.mrb[56].mxu1 %vm10907_vm10, %v11368_v27  ;;  %17818 = vmatprep.subr.bf16.mxu1 %v23384_v22  ;;  %v12057_v27 = vld [vmem:[%s23338_s7 + $0xf8] sm:$0xff] }
0x1cbf   :  { %16079 = vmatprep.mubr.msk.f32.mxu1 %vm17944_vm0, %v23385_v19  ;;  %17820 = vmatpush3.bf16.msra.mxu1 %v17819_v2  ;;  %v17867_v50 = vpack.c.bf16 %v12057_v27, %v12056_v11  ;;  %v12483_v2 = vld [vmem:[%s23341_s10 + $0x28] sm:$0xff]  ;;  %v12330_v27 = vld [vmem:[%s23340_s9] sm:$0xff] }
0x1cc0   :  { %17821 = vmatprep.subr.bf16.mxu1 %v23384_v22  ;;  %v17885_v63 = vpack.c.bf16 %v12483_v2, %v12482_v49  ;;  %v12858_v49 = vld [vmem:[%s23341_s10 + $0x60] sm:$0xff] }
0x1cc3   :  { %17823 = vmatpush3.bf16.msra.mxu1 %v17822_v17  ;;  %v12285_v17 = vld [vmem:[%s23339_s8] sm:$0x7] }
0x1cc4   :  { %17824 = vmatprep.subr.bf16.mxu1 %v23384_v22 }
0x1d83   :  { %v11362_v48 = vpop.f32.mrb[54].mxu1 }
0x1d84   :  { %v11366_v52 = vadd.f32 %v11362_v48, %v11211_v30  ;;  %v16025_v28 = vpop.f32.mrb[55].mxu1  ;;  %v12054_v30 = vld [vmem:[%s23338_s7 + $0xe0] sm:$0xff] }
0x1d85   :  { %v17864_v12 = vpack.c.bf16 %v12055_v60, %v12054_v30  ;;  %v12132_v48 = vld [vmem:[%s23337_s6 + $0x20] sm:$0xf]  ;;  %v12210_v28 = vld [vmem:[%s23338_s7 + $0x118] sm:$0xff] }
0x1d91   :  { %v11438_v32 = vpop.f32.mrb[56].mxu1 }
0x1d92   :  { %16052 = vmatmul.mubr.msk.f32.vlgmr.msra.gmra.mrb[80].mxu0 %vm10816_vm7, %v11438_v32  ;;  %v16042_v33 = vpop.f32.mrb[57].mxu1 }
0x1d93   :  { %17811 = vmatpush3.bf16.msra.mxu0 %v22941_v16  ;;  %16068 = vmatprep.mubr.msk.f32.mxu0 %vm17944_vm0, %v23385_v19 }
0x1d94   :  { %17812 = vmatprep.subr.bf16.mxu0 %v23384_v22 }
0x1d97   :  { %17814 = vmatpush3.bf16.msra.mxu0 %v22943_v59 }
0x1d98   :  { %17815 = vmatprep.subr.bf16.mxu0 %v23384_v22 }
0x1d9b   :  { %17817 = vmatpush3.bf16.msra.mxu0 %v22945_v31 }
0x1d9c   :  { %16066 = vmatprep.subr.mxu0 %v23385_v19 }
0x1d9f   :  { %16067 = vmatpush3.msk.msra.mxu0 %vm10911_vm9, %v22956_v37 }
0x1da0   :  { %16069 = vmatmul.mubr.msk.f32.vlgmr.msra.gmra.mrb[82].mxu0 %vm10907_vm10, %v11521_v5  ;;  %17833 = vmatprep.subr.bf16.mxu0 %v23384_v22 }
0x1da1   :  { %16107 = vmatprep.mubr.msk.f32.mxu0 %vm17944_vm0, %v23385_v19  ;;  %17835 = vmatpush3.bf16.msra.mxu0 %v17834_v26 }
0x1da2   :  { %17836 = vmatprep.subr.bf16.mxu0 %v23384_v22 }
0x1da5   :  { %17838 = vmatpush3.bf16.msra.mxu0 %v17837_v34 }
0x1da6   :  { %17839 = vmatprep.subr.bf16.mxu0 %v23384_v22 }
0x1e65   :  { %v11515_v41 = vpop.f32.mrb[80].mxu0 }
0x1e66   :  { %v11519_v45 = vadd.f32 %v11515_v41, %v11366_v52  ;;  %v16053_v35 = vpop.f32.mrb[81].mxu0  ;;  %v12133_v52 = vunpack.c.l.bf16 %v12132_v48  ;;  %v12289_v41 = vrot.slane %v12285_v17, %v23386_v3  ;;  %v12485_v48 = vld [vmem:[%s23341_s10 + $0x38] sm:$0xff] }
0x1e73   :  { %v11591_v56 = vpop.f32.mrb[82].mxu0 }
0x1e74   :  { %16080 = vmatmul.mubr.msk.f32.vlgmr.msra.gmra.mrb[58].mxu1 %vm10816_vm7, %v11591_v56  ;;  %v16070_v58 = vpop.f32.mrb[83].mxu0 }
0x1e75   :  { %17826 = vmatpush3.bf16.msra.mxu1 %v22941_v16  ;;  %16096 = vmatprep.mubr.msk.f32.mxu1 %vm17944_vm0, %v23385_v19 }
0x1e76   :  { %17827 = vmatprep.subr.bf16.mxu1 %v23384_v22 }
0x1e79   :  { %17829 = vmatpush3.bf16.msra.mxu1 %v22943_v59 }
0x1e7a   :  { %17830 = vmatprep.subr.bf16.mxu1 %v23384_v22 }
0x1e7d   :  { %17832 = vmatpush3.bf16.msra.mxu1 %v22945_v31 }
0x1e7e   :  { %16094 = vmatprep.subr.mxu1 %v23385_v19 }
0x1e81   :  { %16095 = vmatpush3.msk.msra.mxu1 %vm10911_vm9, %v22956_v37 }
0x1e82   :  { %16097 = vmatmul.mubr.msk.f32.vlgmr.msra.gmra.mrb[60].mxu1 %vm10907_vm10, %v11674_v40  ;;  %17848 = vmatprep.subr.bf16.mxu1 %v23384_v22 }
0x1e83   :  { %16135 = vmatprep.mubr.msk.f32.mxu1 %vm17944_vm0, %v23385_v19  ;;  %17850 = vmatpush3.bf16.msra.mxu1 %v17849_v9 }
0x1e84   :  { %17851 = vmatprep.subr.bf16.mxu1 %v23384_v22 }
0x1e87   :  { %17853 = vmatpush3.bf16.msra.mxu1 %v17852_v36 }
0x1e88   :  { %17854 = vmatprep.subr.bf16.mxu1 %v23384_v22 }
0x1f47   :  { %v11668_v39 = vpop.f32.mrb[58].mxu1 }
0x1f48   :  { %v11672_v55 = vadd.f32 %v11668_v39, %v11519_v45  ;;  %v16081_v51 = vpop.f32.mrb[59].mxu1 }
0x1f55   :  { %v11744_v18 = vpop.f32.mrb[60].mxu1 }
0x1f56   :  { %16108 = vmatmul.mubr.msk.f32.vlgmr.msra.gmra.mrb[84].mxu0 %vm10816_vm7, %v11744_v18  ;;  %v16098_v7 = vpop.f32.mrb[61].mxu1 }
0x1f57   :  { %17841 = vmatpush3.bf16.msra.mxu0 %v22941_v16  ;;  %16124 = vmatprep.mubr.msk.f32.mxu0 %vm17944_vm0, %v23385_v19 }
0x1f58   :  { %17842 = vmatprep.subr.bf16.mxu0 %v23384_v22 }
0x1f5b   :  { %17844 = vmatpush3.bf16.msra.mxu0 %v22943_v59 }
0x1f5c   :  { %17845 = vmatprep.subr.bf16.mxu0 %v23384_v22 }
0x1f5f   :  { %17847 = vmatpush3.bf16.msra.mxu0 %v22945_v31 }
0x1f60   :  { %16122 = vmatprep.subr.mxu0 %v23385_v19 }
0x1f63   :  { %16123 = vmatpush3.msk.msra.mxu0 %vm10911_vm9, %v22956_v37 }
0x1f64   :  { %16125 = vmatmul.mubr.msk.f32.vlgmr.msra.gmra.mrb[86].mxu0 %vm10907_vm10, %v11827_v1  ;;  %17863 = vmatprep.subr.bf16.mxu0 %v23384_v22 }
0x1f65   :  { %16163 = vmatprep.mubr.msk.f32.mxu0 %vm17944_vm0, %v23385_v19  ;;  %17865 = vmatpush3.bf16.msra.mxu0 %v17864_v12 }
0x1f66   :  { %17866 = vmatprep.subr.bf16.mxu0 %v23384_v22 }
0x1f69   :  { %17868 = vmatpush3.bf16.msra.mxu0 %v17867_v50  ;;  %v12404_v50 = vld [vmem:[%s23341_s10] sm:$0xff] }
0x1f6a   :  { %17869 = vmatprep.subr.bf16.mxu0 %v23384_v22 }
0x2029   :  { %v11821_v6 = vpop.f32.mrb[84].mxu0 }
0x202a   :  { %v11825_v0 = vadd.f32 %v11821_v6, %v11672_v55  ;;  %v16109_v54 = vpop.f32.mrb[85].mxu0 }
0x2037   :  { %v11897_v21 = vpop.f32.mrb[86].mxu0 }
0x2038   :  { %16136 = vmatmul.mubr.msk.f32.vlgmr.msra.gmra.mrb[62].mxu1 %vm10816_vm7, %v11897_v21  ;;  %v16126_v13 = vpop.f32.mrb[87].mxu0 }
0x2039   :  { %17856 = vmatpush3.bf16.msra.mxu1 %v22941_v16  ;;  %16152 = vmatprep.mubr.msk.f32.mxu1 %vm17944_vm0, %v23385_v19 }
0x203a   :  { %17857 = vmatprep.subr.bf16.mxu1 %v23384_v22 }
0x203d   :  { %17859 = vmatpush3.bf16.msra.mxu1 %v22943_v59 }
0x203e   :  { %17860 = vmatprep.subr.bf16.mxu1 %v23384_v22 }
0x2041   :  { %17862 = vmatpush3.bf16.msra.mxu1 %v22945_v31 }
0x2042   :  { %16150 = vmatprep.subr.mxu1 %v23385_v19 }
0x2045   :  { %16151 = vmatpush3.msk.msra.mxu1 %vm10911_vm9, %v22956_v37 }
0x2046   :  { %16153 = vmatmul.mubr.msk.f32.vlgmr.msra.gmra.mrb[64].mxu1 %vm10907_vm10, %v11980_v23  ;;  %17878 = vmatprep.subr.bf16.mxu1 %v23384_v22 }
0x2047   :  { %16191 = vmatprep.mubr.msk.f32.mxu1 %vm17944_vm0, %v23385_v19 }
0x210b   :  { %v11974_v42 = vpop.f32.mrb[62].mxu1 }
0x210c   :  { %v11978_v8 = vadd.f32 %v11974_v42, %v11825_v0  ;;  %v16137_v44 = vpop.f32.mrb[63].mxu1  ;;  %v12405_v42 = vld [vmem:[%s23341_s10 + $0x8] sm:$0xff] }
0x210d   :  { %v12407_v44 = vld [vmem:[%s23341_s10 + $0x18] sm:$0xff] }
0x2119   :  { %v12050_v53 = vpop.f32.mrb[64].mxu1 }
0x211a   :  { %16164 = vmatmul.mubr.msk.f32.vlgmr.msra.gmra.mrb[88].mxu0 %vm10816_vm7, %v12050_v53  ;;  %v16154_v20 = vpop.f32.mrb[65].mxu1 }
0x211b   :  { %17871 = vmatpush3.bf16.msra.mxu0 %v22941_v16  ;;  %16180 = vmatprep.mubr.msk.f32.mxu0 %vm17944_vm0, %v23385_v19  ;;  %v12207_v16 = vld [vmem:[%s23338_s7 + $0x100] sm:$0xff]  ;;  %v12484_v20 = vld [vmem:[%s23341_s10 + $0x30] sm:$0xff] }
0x211c   :  { %17872 = vmatprep.subr.bf16.mxu0 %v23384_v22 }
0x211f   :  { %17874 = vmatpush3.bf16.msra.mxu0 %v22943_v59  ;;  %v12208_v59 = vld [vmem:[%s23338_s7 + $0x108] sm:$0xff] }
0x2120   :  { %17875 = vmatprep.subr.bf16.mxu0 %v23384_v22 }
0x2123   :  { %17877 = vmatpush3.bf16.msra.mxu0 %v22945_v31  ;;  %v12209_v31 = vld [vmem:[%s23338_s7 + $0x110] sm:$0xff] }
0x2124   :  { %16178 = vmatprep.subr.mxu0 %v23385_v19  ;;  %v17882_v32 = vpack.c.bf16 %v12210_v28, %v12209_v31  ;;  %v12707_v31 = vld [vmem:[%s23341_s10 + $0x48] sm:$0xff]  ;;  %v12632_v28 = vld [vmem:[%s23340_s9 + $0x10] sm:$0xff] }
0x2127   :  { %16179 = vmatpush3.msk.msra.mxu0 %vm10911_vm9, %v22956_v37  ;;  %v17879_v37 = vpack.c.bf16 %v12208_v59, %v12207_v16  ;;  %v12706_v59 = vld [vmem:[%s23341_s10 + $0x40] sm:$0xff] }
0x2128   :  { %16181 = vmatmul.mubr.msk.f32.vlgmr.msra.gmra.mrb[90].mxu0 %vm10907_vm10, %v12133_v52  ;;  %17884 = vmatprep.subr.bf16.mxu0 %v23384_v22  ;;  %v17888_v52 = vpack.c.bf16 %v12485_v48, %v12484_v20 }
0x2129   :  { %16212 = vmatprep.mubr.msk.f32.mxu0 %vm17944_vm0, %v23385_v19  ;;  %17880 = vmatpush3.bf16.msra.mxu1 %v17879_v37 }
0x212a   :  { %17881 = vmatprep.subr.bf16.mxu1 %v23384_v22  ;;  %17886 = vmatpush3.bf16.msra.mxu0 %v17885_v63  ;;  %v12859_v63 = vld [vmem:[%s23341_s10 + $0x68] sm:$0xff] }
0x212b   :  { %17887 = vmatprep.subr.bf16.mxu0 %v23384_v22 }
0x212d   :  { %17883 = vmatpush3.bf16.msra.mxu1 %v17882_v32  ;;  %v17897_v32 = vpack.c.bf16 %v12707_v31, %v12706_v59 }
0x212e   :  { %16194 = vmatprep.subr.mxu1 %v23385_v19  ;;  %17889 = vmatpush3.bf16.msra.mxu0 %v17888_v52 }
0x212f   :  { %16242 = vmatprep.subr.mxu0 %v23385_v19 }
0x21ed   :  { %v12127_v33 = vpop.f32.mrb[88].mxu0 }
0x21ee   :  { %v12131_v47 = vadd.f32 %v12127_v33, %v11978_v8  ;;  %v16165_v5 = vpop.f32.mrb[89].mxu0  ;;  %v12406_v8 = vld [vmem:[%s23341_s10 + $0x10] sm:$0xff] }
0x21ef   :  { %v17894_v53 = vpack.c.bf16 %v12407_v44, %v12406_v8  ;;  %v12784_v5 = vld [vmem:[%s23340_s9 + $0x18] sm:$0xff] }
0x21fb   :  { %v12203_v4 = vpop.f32.mrb[90].mxu0 }
0x21fc   :  { %16192 = vmatmul.mubr.msk.f32.vlgmr.msra.gmra.mrb[66].mxu1 %vm10816_vm7, %v12203_v4  ;;  %v16182_v14 = vpop.f32.mrb[91].mxu0  ;;  %v12708_v4 = vld [vmem:[%s23341_s10 + $0x50] sm:$0xff] }
0x21fd   :  { %16196 = vmatprep.mubr.msk.f32.mxu1 %vm17944_vm0, %v23385_v19  ;;  %v12709_v14 = vld [vmem:[%s23341_s10 + $0x58] sm:$0xff] }
0x21fe   :  { %v17900_v2 = vpack.c.bf16 %v12709_v14, %v12708_v4 }
0x22cf   :  { %v12280_v45 = vpop.f32.mrb[66].mxu1 }
0x22d0   :  { %v12284_v35 = vadd.f32 %v12280_v45, %v12131_v47  ;;  %v16193_v56 = vpop.f32.mrb[67].mxu1 }
0x22d2   :  { %v12290_v58 = vadd.f32 %v12289_v41, %v12284_v35  ;;  %v12861_v41 = vld [vmem:[%s23341_s10 + $0x78] sm:$0xff] }
0x22d4   :  { %v12291_v40 = vsel %vm10816_vm7, %v12290_v58, 0.0  ;;  %v12298_v61 = vmul.f32 %v12290_v58, %v12290_v58 }
0x22d5   :  { %v12292_v25 = vrot.slane %v12291_v40, 4 }
0x22d6   :  { %v12299_v62 = vsel %vm10816_vm7, %v12298_v61, 0.0 }
0x22d7   :  { %v12293_v26 = vadd.f32 %v12292_v25, %v12291_v40  ;;  %v12300_v24 = vrot.slane %v12299_v62, 4 }
0x22d9   :  { %v12294_v34 = vrot.slane %v12293_v26, 2  ;;  %v12301_v39 = vadd.f32 %v12300_v24, %v12299_v62 }
0x22db   :  { %v12295_v55 = vadd.f32 %v12294_v34, %v12293_v26  ;;  %v12302_v51 = vrot.slane %v12301_v39, 2 }
0x22dd   :  { %v12296_v18 = vrot.slane %v12295_v55, 1  ;;  %v12303_v7 = vadd.f32 %v12302_v51, %v12301_v39 }
0x22df   :  { %v12297_v38 = vadd.f32 %v12296_v18, %v12295_v55  ;;  %v12304_v3 = vrot.slane %v12303_v7, 1 }
0x22e1   :  { %v12305_v1 = vadd.f32 %v12304_v3, %v12303_v7  ;;  %v12306_v15 = vmul.f32 0.125, %v12297_v38 }
0x22e3   :  { %v12307_v10 = vmul.f32 0.125, %v12305_v1  ;;  %v12308_v57 = vmul.f32 %v12306_v15, %v12306_v15 }
0x22e5   :  { %v12309_v9 = vsub.f32 %v12307_v10, %v12308_v57 }
0x22e7   :  { %v12310_v29 = vmax.f32 %v12309_v9, 0.0 }
0x22e9   :  { %v12311_v36 = vadd.f32 1e-05, %v12310_v29 }
0x22eb   :  { %17917 = vrsqrt.f32 %v12311_v36 }
0x22f5   :  { %v17918_v6 = vpop.eup %17917 }
0x22f6   :  { %v12313_v0 = vmul.f32 %v17918_v6, %v12285_v17 }
0x22f8   :  { %v12314_v54 = vmul.f32 %v12313_v0, %v12306_v15  ;;  %v12322_v13 = vrot.slane %v12313_v0, %v18837_v43  ;;  %v12408_v43 = vld [vmem:[%s23340_s9 + $0x8] sm:$0xff] }
0x22fa   :  { %v12316_v21 = vrot.slane %v12314_v54, 7  ;;  %v12323_v30 = vmul.f32 %v12322_v13, %v12290_v58 }
0x22fc   :  { %v12318_v23 = vsub.f32 %v12285_v17, %v12316_v21  ;;  %v17903_v17 = vpack.c.bf16 %v12859_v63, %v12858_v49 }
0x22fe   :  { %v12327_v60 = vrot.slane %v12318_v23, %v18842_v46  ;;  %v17891_v46 = vpack.c.bf16 %v12405_v42, %v12404_v50 }
0x2300   :  { %v12328_v11 = vadd.f32 %v12327_v60, %v12323_v30 }
0x2302   :  { %v12329_v12 = vmax.f32 %v12328_v11, 0.0 }
0x2304   :  { %16195 = vmatpush3.msra.mxu1 %v12329_v12 }
0x2305   :  { %16197 = vmatmul.mubr.msk.f32.vlgmr.msra.gmra.mrb[68].mxu1 %vm1034_vm6, %v12330_v27  ;;  %16199 = vmatprep.subr.mxu1 %v23385_v19 }
0x2306   :  { %16200 = vmatpush3.msra.mxu1 %v12329_v12  ;;  %16201 = vmatprep.mubr.msk.f32.mxu1 %vm17944_vm0, %v23385_v19 }
0x2307   :  { %17890 = vmatprep.subr.bf16.mxu1 %v23384_v22 }
0x2309   :  { %16202 = vmatmul.mubr.msk.f32.vlgmr.msra.gmra.mrb[70].mxu1 %vm1034_vm6, %v12408_v43 }
0x230a   :  { %17892 = vmatpush3.bf16.msra.mxu1 %v17891_v46  ;;  %16223 = vmatprep.mubr.msk.f32.mxu1 %vm17944_vm0, %v23385_v19 }
0x230b   :  { %17893 = vmatprep.subr.bf16.mxu1 %v23384_v22 }
0x230e   :  { %17895 = vmatpush3.bf16.msra.mxu1 %v17894_v53 }
0x230f   :  { %16226 = vmatprep.subr.mxu1 %v23385_v19 }
0x23d8   :  { %v12400_v16 = vpop.f32.mrb[68].mxu1 }
0x23d9   :  { %16224 = vmatmul.mubr.msk.f32.vlgmr.msra.gmra.mrb[72].mxu1 %vm10816_vm7, %v12400_v16  ;;  %v16198_v37 = vpop.f32.mrb[69].mxu1 }
0x23da   :  { %16227 = vmatpush3.msra.mxu1 %v12329_v12  ;;  %16228 = vmatprep.mubr.msk.f32.mxu1 %vm17944_vm0, %v23385_v19 }
0x23db   :  { %17896 = vmatprep.subr.bf16.mxu1 %v23384_v22 }
0x23dc   :  { %v12478_v33 = vpop.f32.mrb[70].mxu1 }
0x23dd   :  { %16213 = vmatmul.mubr.msk.f32.vlgmr.msra.gmra.mrb[92].mxu0 %vm10816_vm7, %v12478_v33  ;;  %16229 = vmatmul.mubr.msk.f32.vlgmr.msra.gmra.mrb[74].mxu1 %vm1034_vm6, %v12632_v28  ;;  %v16203_v47 = vpop.f32.mrb[71].mxu1 }
0x23de   :  { %16243 = vmatpush3.msra.mxu0 %v12329_v12  ;;  %16244 = vmatprep.mubr.msk.f32.mxu0 %vm17944_vm0, %v23385_v19 }
0x23df   :  { %17898 = vmatpush3.bf16.msra.mxu1 %v17897_v32  ;;  %17902 = vmatprep.subr.bf16.mxu0 %v23384_v22 }
0x23e0   :  { %17899 = vmatprep.subr.bf16.mxu1 %v23384_v22  ;;  %16239 = vmatprep.mubr.msk.f32.mxu1 %vm17944_vm0, %v23385_v19 }
0x23e1   :  { %16245 = vmatmul.mubr.msk.f32.vlgmr.msra.gmra.mrb[94].mxu0 %vm1034_vm6, %v12784_v5 }
0x23e2   :  { %16255 = vmatprep.mubr.msk.f32.mxu0 %vm17944_vm0, %v23385_v19  ;;  %17904 = vmatpush3.bf16.msra.mxu0 %v17903_v17  ;;  %v12860_v19 = vld [vmem:[%s23341_s10 + $0x70] sm:$0xff] }
0x23e3   :  { %17901 = vmatpush3.bf16.msra.mxu1 %v17900_v2  ;;  %17905 = vmatprep.subr.bf16.mxu0 %v23384_v22  ;;  %v17906_v45 = vpack.c.bf16 %v12861_v41, %v12860_v19  ;;  %v13395_v22 = vld [vmem:[%s23342_s11] ss:$0 sm:$0xff] }
0x23e6   :  { %17907 = vmatpush3.bf16.msra.mxu0 %v17906_v45 }
0x24ac   :  { %v12628_v35 = vpop.f32.mrb[72].mxu1 }
0x24ad   :  { %v16225_v56 = vpop.f32.mrb[73].mxu1 }
0x24b0   :  { %v12702_v58 = vpop.f32.mrb[74].mxu1  ;;  %v12555_v40 = vpop.f32.mrb[92].mxu0 }
0x24b1   :  { %16240 = vmatmul.mubr.msk.f32.vlgmr.msra.gmra.mrb[76].mxu1 %vm10816_vm7, %v12702_v58  ;;  %v12629_v61 = vadd.f32 %v12628_v35, %v12555_v40  ;;  %v16214_v25 = vpop.f32.mrb[93].mxu0  ;;  %v16230_v62 = vpop.f32.mrb[75].mxu1 }
0x24b4   :  { %v12854_v26 = vpop.f32.mrb[94].mxu0 }
0x24b5   :  { %16256 = vmatmul.mubr.msk.f32.vlgmr.msra.gmra.mrb[96].mxu0 %vm10816_vm7, %v12854_v26  ;;  %v16246_v24 = vpop.f32.mrb[95].mxu0 }
0x2584   :  { %v12779_v34 = vpop.f32.mrb[76].mxu1 }
0x2585   :  { %v12783_v39 = vadd.f32 %v12779_v34, %v12629_v61  ;;  %v16241_v55 = vpop.f32.mrb[77].mxu1 }
0x2588   :  { %v12931_v51 = vpop.f32.mrb[96].mxu0 }
0x2589   :  { %v12935_v18 = vadd.f32 %v12931_v51, %v12783_v39  ;;  %v16257_v7 = vpop.f32.mrb[97].mxu0 }
0x258b   :  { %v12943_v38 = vadd.f32 %v13395_v22, %v12935_v18 }
0x258d   :  { %12945 = vst.msk [vmem:[#allocation2] sm:$0x3] %vm12944_vm11, %v12943_v38 }
0x258e   :  { %17930 = shalt.err (!%p17927_p4)
}
0x258f   :  { %s17931_s30 = scalar_lea.hbm %s23343_s12, 32 }
0x2590   :  { %p17932_p5 = scmp.ne.s32.totalorder %s23343_s12, %s17931_s30  ;;  %p17935_p6 = scmp.lt.u32.totalorder %s17931_s30, %s23343_s12 }
0x2592   :  { %p17937_p7 = pnand %p17935_p6, %p17932_p5 }
0x2594   :  { %17940 = shalt.err (!%p17937_p7)
}
0x2595   :  { %12955 = dma.vmem_to_hbm [thread:$0]  %s12953_s4, 32, %s23343_s12, [#allocation3]  }
0x2596   :  { %17941 = dma.done.wait [#allocation3], 32  }
0x2597   :  { %17942 = vsyncadd [#allocation3], 4294967264 }
0x2598   :  { %12959 = vsyncpa [#allocation3], 1 }

</bundles_post_ra>
